<compile_context>
chip_gen: v7x
topology: tpu7x:2x2x1
jax: 0.10.0
libtpu: 0.0.40
codegen_flags: <defaults>
</compile_context>

<pallas_src>
import functools
import numpy as np
import jax
import jax.numpy as jnp
from jax.experimental import pallas as pl
from jax.experimental.pallas import tpu as pltpu

# ----------------------------- hyper-parameters ------------------------------
B, TMAX, LMAX = 2, 8, 8
IDIM, ODIM = 32, 8
DUNITS = 32                # decoder LSTM units (dlayers = 2)
PRENET_UNITS = 16          # prenet_layers = 2
ATT_DIM = 16
POSTNET_LAYERS = 5
POSTNET_CHANS = 16
POSTNET_FILTS = 5
PPAD = (POSTNET_FILTS - 1) // 2
ZONEOUT = 0.1
BN_EPS = 1e-5
BN_SCALE = float(1.0 / np.sqrt(1.0 + BN_EPS))   # eval-mode BatchNorm (0 mean, 1 var)


# ====================== fused decoder + postnet kernel =======================
def fused_decoder_kernel(ys_prev_ref, hs_ref, mask_ref,
                         wenc_ref, wdec_ref, v_ref,
                         wp0_ref, wp1_ref, wih0p_ref, b0_ref,
                         wih0a_ref, whh0_ref,
                         wih1_ref, whh1_ref, b1_ref,
                         woz_ref, woc_ref, bout_ref,
                         post0_ref, post1_ref, post2_ref, post3_ref, post4_ref,
                         dec_ref, after_ref,
                         xpad0_ref, xpad_ref,
                         *, zoneout, lmax):
    f32 = jnp.float32
    hs = hs_ref[...]                                  # (B, T, I)
    Bk, Tk, Ik = hs.shape
    A = wenc_ref.shape[1]
    H = whh0_ref.shape[0]
    mask = mask_ref[...] > 0                          # (B, T)
    v = v_ref[...]                                    # (1, A)

    # ------------------- loop-invariant hoists (done once) -------------------
    # encoder projection for the additive attention
    enc_proj = jnp.dot(hs.reshape(Bk * Tk, Ik), wenc_ref[...],
                       preferred_element_type=f32).reshape(Bk, Tk, A)

    # prenet for all steps at once (teacher forcing: prev_out[t] = ys[:, t-1])
    pre = jnp.maximum(jnp.dot(ys_prev_ref[...], wp0_ref[...],
                              preferred_element_type=f32), 0.0)
    pre = jnp.maximum(jnp.dot(pre, wp1_ref[...],
                              preferred_element_type=f32), 0.0)
    # fold the prenet's LSTM-0 gate contribution and b0 in as well
    pre_gate = (jnp.dot(pre, wih0p_ref[...], preferred_element_type=f32)
                + b0_ref[...])                        # (L*B, 4H)

    wih0a = wih0a_ref[...]
    whh0 = whh0_ref[...]
    wih1 = wih1_ref[...]
    whh1 = whh1_ref[...]
    b1 = b1_ref[...]
    wdec = wdec_ref[...]
    woz = woz_ref[...]
    woc = woc_ref[...]
    bout = bout_ref[...]

    def lstm_zoneout(gates, z, c):
        i = jax.nn.sigmoid(gates[:, 0:H])
        f = jax.nn.sigmoid(gates[:, H:2 * H])
        g = jnp.tanh(gates[:, 2 * H:3 * H])
        o = jax.nn.sigmoid(gates[:, 3 * H:4 * H])
        c_cell = f * c + i * g
        h_cell = o * jnp.tanh(c_cell)
        # eval-mode ZoneOutCell: prob*old + (1-prob)*new, applied to (h, c)
        return (zoneout * z + (1.0 - zoneout) * h_cell,
                zoneout * c + (1.0 - zoneout) * c_cell)

    z0 = jnp.zeros((Bk, H), f32)
    c0 = jnp.zeros((Bk, H), f32)
    z1 = jnp.zeros((Bk, H), f32)
    c1 = jnp.zeros((Bk, H), f32)

    # ------------------ serial recurrence, fully unrolled ---------------------
    for t in range(lmax):
        # content-based additive attention (enc projection hoisted)
        dec_proj = jnp.dot(z0, wdec, preferred_element_type=f32)        # (B, A)
        e = jnp.tanh(enc_proj + dec_proj[:, None, :])                   # (B, T, A)
        e = jnp.sum(e * v, axis=2)                                      # (B, T)
        e = jnp.where(mask, e, f32(-1e30))
        m = jnp.max(e, axis=1, keepdims=True)
        p = jnp.exp(e - m)
        att_w = p / jnp.sum(p, axis=1, keepdims=True)                   # (B, T)
        att_c = jnp.sum(att_w[:, :, None] * hs, axis=1)                 # (B, I)

        # LSTM 0 (prenet + bias contribution precomputed in pre_gate)
        gates0 = (jnp.dot(att_c, wih0a, preferred_element_type=f32)
                  + jnp.dot(z0, whh0, preferred_element_type=f32)
                  + pre_gate[t * Bk:(t + 1) * Bk, :])
        z0, c0 = lstm_zoneout(gates0, z0, c0)

        # LSTM 1
        gates1 = (jnp.dot(z0, wih1, preferred_element_type=f32)
                  + jnp.dot(z1, whh1, preferred_element_type=f32) + b1)
        z1, c1 = lstm_zoneout(gates1, z1, c1)

        # fused feat_out / prob_out: one (B, ODIM+1) store per step
        out_t = (jnp.dot(z1, woz, preferred_element_type=f32)
                 + jnp.dot(att_c, woc, preferred_element_type=f32) + bout)
        dec_ref[t, :, :] = out_t

    # ---------------- postnet (5 x Conv1d + BN(eval) + tanh) + residual ------
    dec_all = dec_ref[...]                            # (L, B, ODIM+1)
    odim = after_ref.shape[2]
    before_tm = dec_all[:, :, 0:odim]                 # (L, B, ODIM)

    xpad0_ref[...] = jnp.zeros_like(xpad0_ref)
    xpad_ref[...] = jnp.zeros_like(xpad_ref)
    xpad0_ref[PPAD:PPAD + lmax, :, :] = before_tm

    post_refs = (post0_ref, post1_ref, post2_ref, post3_ref, post4_ref)
    cur_ref = xpad0_ref
    y = None
    for l in range(POSTNET_LAYERS):
        w = post_refs[l][...]                         # (K, Cin, Cout)
        K, Cin, Cout = w.shape
        acc = jnp.zeros((lmax * Bk, Cout), f32)
        for k in range(K):
            xk = cur_ref[k:k + lmax, :, :]            # (L, B, Cin), leading-axis slice
            acc = acc + jnp.dot(xk.reshape(lmax * Bk, Cin), w[k],
                                preferred_element_type=f32)
        y = acc * BN_SCALE                            # eval-mode BatchNorm1d
        if l < POSTNET_LAYERS - 1:
            y = jnp.tanh(y)
            xpad_ref[PPAD:PPAD + lmax, :, :] = y.reshape(lmax, Bk, Cout)
            cur_ref = xpad_ref

    after_ref[...] = before_tm + y.reshape(lmax, Bk, odim)


# ================================ full forward ===============================
def decoder_forward(hs, hlens, ys, p):
    """Pallas implementation of Decoder.forward.

    Returns (after_outs (B,L,odim), before_outs (B,L,odim), logits (B,L))."""
    Bx, T, I = hs.shape
    L = ys.shape[1]
    hmask = (jnp.arange(T)[None, :] < hlens[:, None]).astype(jnp.float32)

    # teacher forcing: prev_out at step t is ys[:, t-1, :] (zeros at t=0),
    # flattened time-major so the prenet runs as one batched matmul in-kernel.
    ys_tm = jnp.transpose(ys, (1, 0, 2)).astype(jnp.float32)           # (L, B, odim)
    ys_prev = jnp.concatenate(
        [jnp.zeros((1, Bx, ODIM), jnp.float32), ys_tm[:-1]], axis=0
    ).reshape(L * Bx, ODIM)

    # fuse feat_out / prob_out weights along the output columns (ODIM + 1)
    woz = jnp.concatenate([p["wfz"], p["wqz"]], axis=1)                # (H, ODIM+1)
    woc = jnp.concatenate([p["wfc"], p["wqc"]], axis=1)                # (I, ODIM+1)
    bout = jnp.concatenate([jnp.zeros((1, ODIM), jnp.float32), p["bq"]], axis=1)

    kernel = functools.partial(fused_decoder_kernel, zoneout=ZONEOUT, lmax=L)
    dec, after_tm = pl.pallas_call(
        kernel,
        out_shape=(jax.ShapeDtypeStruct((L, Bx, ODIM + 1), jnp.float32),
                   jax.ShapeDtypeStruct((L, Bx, ODIM), jnp.float32)),
        scratch_shapes=[
            pltpu.VMEM((L + 2 * PPAD, Bx, ODIM), jnp.float32),          # padded layer-0 input
            pltpu.VMEM((L + 2 * PPAD, Bx, POSTNET_CHANS), jnp.float32), # padded hidden act
        ],
    )(ys_prev, hs, hmask,
      p["wenc"], p["wdec"], p["v"],
      p["wp0"], p["wp1"], p["wih0p"], p["b0"],
      p["wih0a"], p["whh0"],
      p["wih1"], p["whh1"], p["b1"],
      woz, woc, bout,
      p["post"][0], p["post"][1], p["post"][2], p["post"][3], p["post"][4])

    before = jnp.transpose(dec[:, :, :ODIM], (1, 0, 2))                # (B, L, odim)
    logits = jnp.transpose(dec[:, :, ODIM], (1, 0))                    # (B, L)
    after = jnp.transpose(after_tm, (1, 0, 2))                         # (B, L, odim)
    return after, before, logits


# ============================ pure-JAX reference =============================
def reference_forward(hs, hlens, ys, p):
    Bx, T, I = hs.shape
    L = ys.shape[1]
    H = DUNITS
    hmask = (jnp.arange(T)[None, :] < hlens[:, None]).astype(jnp.float32)
    z0 = jnp.zeros((Bx, H)); c0 = jnp.zeros((Bx, H))
    z1 = jnp.zeros((Bx, H)); c1 = jnp.zeros((Bx, H))
    prev_out = jnp.zeros((Bx, ODIM))
    befores, logits = [], []

    def lstm(x_parts, wihs, z, c, whh, b):
        gates = sum(x @ w for x, w in zip(x_parts, wihs)) + z @ whh + b
        i = jax.nn.sigmoid(gates[:, :H]); f = jax.nn.sigmoid(gates[:, H:2 * H])
        g = jnp.tanh(gates[:, 2 * H:3 * H]); o = jax.nn.sigmoid(gates[:, 3 * H:])
        cn = f * c + i * g
        hn = o * jnp.tanh(cn)
        return ZONEOUT * z + (1 - ZONEOUT) * hn, ZONEOUT * c + (1 - ZONEOUT) * cn

    for t in range(L):
        enc = jnp.einsum("bti,ia->bta", hs, p["wenc"])
        dec = z0 @ p["wdec"]
        e = jnp.sum(jnp.tanh(enc + dec[:, None, :]) * p["v"], axis=2)
        e = jnp.where(hmask > 0, e, -1e30)
        m = jnp.max(e, axis=1, keepdims=True)
        pe = jnp.exp(e - m)
        aw = pe / jnp.sum(pe, axis=1, keepdims=True)
        att_c = jnp.einsum("bt,bti->bi", aw, hs)
        pre = jax.nn.relu(prev_out @ p["wp0"])
        pre = jax.nn.relu(pre @ p["wp1"])
        z0, c0 = lstm([att_c, pre], [p["wih0a"], p["wih0p"]], z0, c0, p["whh0"], p["b0"])
        z1, c1 = lstm([z0], [p["wih1"]], z1, c1, p["whh1"], p["b1"])
        befores.append(z1 @ p["wfz"] + att_c @ p["wfc"])
        logits.append(z1 @ p["wqz"] + att_c @ p["wqc"] + p["bq"])
        prev_out = ys[:, t, :]

    before = jnp.stack(befores, axis=1)                 # (B, L, odim)
    logit = jnp.concatenate(logits, axis=1)             # (B, L)
    x = before
    for l in range(POSTNET_LAYERS):
        w = p["post"][l]
        K = w.shape[0]; pad = (K - 1) // 2
        xp = jnp.pad(x, ((0, 0), (pad, pad), (0, 0)))
        Lx = x.shape[1]
        y = sum(jnp.einsum("blc,cd->bld", xp[:, k:k + Lx, :], w[k]) for k in range(K))
        y = y * BN_SCALE
        if l < POSTNET_LAYERS - 1:
            y = jnp.tanh(y)
        x = y
    return before + x, before, logit


# ============================== parameter setup ==============================
def make_params(key):
    def nrm(k, shape, scale):
        return (jax.random.normal(k, shape, jnp.float32) * scale)

    keys = jax.random.split(key, 24)
    p = {
        # synthetic content-based attention
        "wenc": nrm(keys[0], (IDIM, ATT_DIM), 0.2),
        "wdec": nrm(keys[1], (DUNITS, ATT_DIM), 0.2),
        "v":    nrm(keys[2], (1, ATT_DIM), 0.2),
        # prenet (Linear no-bias + ReLU) x2
        "wp0": nrm(keys[3], (ODIM, PRENET_UNITS), 0.3),
        "wp1": nrm(keys[4], (PRENET_UNITS, PRENET_UNITS), 0.3),
        # LSTMCell 0: input = cat([att_c (idim), prenet (prenet_units)])
        "wih0a": nrm(keys[5], (IDIM, 4 * DUNITS), 0.15),
        "wih0p": nrm(keys[6], (PRENET_UNITS, 4 * DUNITS), 0.15),
        "whh0":  nrm(keys[7], (DUNITS, 4 * DUNITS), 0.15),
        "b0":    nrm(keys[8], (1, 4 * DUNITS), 0.1),
        # LSTMCell 1
        "wih1": nrm(keys[9], (DUNITS, 4 * DUNITS), 0.15),
        "whh1": nrm(keys[10], (DUNITS, 4 * DUNITS), 0.15),
        "b1":   nrm(keys[11], (1, 4 * DUNITS), 0.1),
        # feat_out / prob_out on zcs = cat([z1 (dunits), att_c (idim)])
        "wfz": nrm(keys[12], (DUNITS, ODIM), 0.2),
        "wfc": nrm(keys[13], (IDIM, ODIM), 0.2),
        "wqz": nrm(keys[14], (DUNITS, 1), 0.2),
        "wqc": nrm(keys[15], (IDIM, 1), 0.2),
        "bq":  nrm(keys[16], (1, 1), 0.1),
    }
    # postnet: 5 Conv1d layers (K, Cin, Cout), channels odim->16->16->16->16->odim
    chans = [ODIM] + [POSTNET_CHANS] * (POSTNET_LAYERS - 1) + [ODIM]
    post = []
    for l in range(POSTNET_LAYERS):
        post.append(nrm(keys[17 + l], (POSTNET_FILTS, chans[l], chans[l + 1]), 0.1))
    p["post"] = post
    return p


# ==================================== main ===================================
if __name__ == "__main__":
    key = jax.random.PRNGKey(0)
    k_hs, k_ys, k_par = jax.random.split(key, 3)
    hs = jax.random.normal(k_hs, (B, TMAX, IDIM), jnp.float32)
    ys = jax.random.normal(k_ys, (B, LMAX, ODIM), jnp.float32) * 0.5
    hlens = jnp.array([TMAX, TMAX - 2], dtype=jnp.int32)
    params = make_params(k_par)

    after, before, logits = decoder_forward(hs, hlens, ys, params)
    jax.block_until_ready((after, before, logits))

    after_r, before_r, logits_r = reference_forward(hs, hlens, ys, params)

    assert after.shape == (B, LMAX, ODIM)
    assert before.shape == (B, LMAX, ODIM)
    assert logits.shape == (B, LMAX)
    assert bool(jnp.allclose(before, before_r, atol=5e-3, rtol=5e-3))
    assert bool(jnp.allclose(after, after_r, atol=5e-3, rtol=5e-3))
    assert bool(jnp.allclose(logits, logits_r, atol=5e-3, rtol=5e-3))

    print("KERNEL_OK")
</pallas_src>

<mosaic_0001>
module attributes {stable_mosaic.version = 11 : i64} {
  func.func @fused_decoder_kernel(%arg0: memref<16x8xf32, #tpu.memory_space<vmem>>, %arg1: memref<2x8x32xf32, #tpu.memory_space<vmem>>, %arg2: memref<2x8xf32, #tpu.memory_space<vmem>>, %arg3: memref<32x16xf32, #tpu.memory_space<vmem>>, %arg4: memref<32x16xf32, #tpu.memory_space<vmem>>, %arg5: memref<1x16xf32, #tpu.memory_space<vmem>>, %arg6: memref<8x16xf32, #tpu.memory_space<vmem>>, %arg7: memref<16x16xf32, #tpu.memory_space<vmem>>, %arg8: memref<16x128xf32, #tpu.memory_space<vmem>>, %arg9: memref<1x128xf32, #tpu.memory_space<vmem>>, %arg10: memref<32x128xf32, #tpu.memory_space<vmem>>, %arg11: memref<32x128xf32, #tpu.memory_space<vmem>>, %arg12: memref<32x128xf32, #tpu.memory_space<vmem>>, %arg13: memref<32x128xf32, #tpu.memory_space<vmem>>, %arg14: memref<1x128xf32, #tpu.memory_space<vmem>>, %arg15: memref<32x9xf32, #tpu.memory_space<vmem>>, %arg16: memref<32x9xf32, #tpu.memory_space<vmem>>, %arg17: memref<1x9xf32, #tpu.memory_space<vmem>>, %arg18: memref<5x8x16xf32, #tpu.memory_space<vmem>>, %arg19: memref<5x16x16xf32, #tpu.memory_space<vmem>>, %arg20: memref<5x16x16xf32, #tpu.memory_space<vmem>>, %arg21: memref<5x16x16xf32, #tpu.memory_space<vmem>>, %arg22: memref<5x16x8xf32, #tpu.memory_space<vmem>>, %arg23: memref<8x2x9xf32, #tpu.memory_space<vmem>>, %arg24: memref<8x2x8xf32, #tpu.memory_space<vmem>>, %arg25: memref<12x2x8xf32, #tpu.memory_space<vmem>>, %arg26: memref<12x2x16xf32, #tpu.memory_space<vmem>>) attributes {dimension_semantics = [], scalar_prefetch = 0 : i64, scratch_operands = 2 : i64, tpu.core_type = #tpu.core_type<tc>} {
    %c0 = arith.constant 0 : index
    %c0_0 = arith.constant 0 : index
    %c0_1 = arith.constant 0 : index
    %0 = vector.load %arg1[%c0, %c0_0, %c0_1] : memref<2x8x32xf32, #tpu.memory_space<vmem>>, vector<2x8x32xf32>
    %c0_2 = arith.constant 0 : index
    %c0_3 = arith.constant 0 : index
    %1 = vector.load %arg2[%c0_2, %c0_3] : memref<2x8xf32, #tpu.memory_space<vmem>>, vector<2x8xf32>
    %cst = arith.constant 0.000000e+00 : f32
    %2 = vector.broadcast %cst : f32 to vector<2x8xf32>
    %3 = arith.cmpf ogt, %1, %2 : vector<2x8xf32>
    %c0_4 = arith.constant 0 : index
    %c0_5 = arith.constant 0 : index
    %4 = vector.load %arg5[%c0_4, %c0_5] : memref<1x16xf32, #tpu.memory_space<vmem>>, vector<1x16xf32>
    %5 = vector.shape_cast %0 : vector<2x8x32xf32> to vector<16x32xf32>
    %c0_6 = arith.constant 0 : index
    %c0_7 = arith.constant 0 : index
    %6 = vector.load %arg3[%c0_6, %c0_7] : memref<32x16xf32, #tpu.memory_space<vmem>>, vector<32x16xf32>
    %cst_8 = arith.constant dense<0.000000e+00> : vector<16x16xf32>
    %7 = tpu.matmul %5, %6, %cst_8 {dimension_numbers = #tpu.dot_dimension_numbers<[1], [0], [0], [1], [0, 0, 1, 1], [], []>} : vector<16x32xf32>, vector<32x16xf32>, vector<16x16xf32> -> vector<16x16xf32>
    %8 = vector.shape_cast %7 : vector<16x16xf32> to vector<2x8x16xf32>
    %c0_9 = arith.constant 0 : index
    %c0_10 = arith.constant 0 : index
    %9 = vector.load %arg0[%c0_9, %c0_10] : memref<16x8xf32, #tpu.memory_space<vmem>>, vector<16x8xf32>
    %c0_11 = arith.constant 0 : index
    %c0_12 = arith.constant 0 : index
    %10 = vector.load %arg6[%c0_11, %c0_12] : memref<8x16xf32, #tpu.memory_space<vmem>>, vector<8x16xf32>
    %cst_13 = arith.constant dense<0.000000e+00> : vector<16x16xf32>
    %11 = tpu.matmul %9, %10, %cst_13 {dimension_numbers = #tpu.dot_dimension_numbers<[1], [0], [0], [1], [0, 0, 1, 1], [], []>} : vector<16x8xf32>, vector<8x16xf32>, vector<16x16xf32> -> vector<16x16xf32>
    %cst_14 = arith.constant 0.000000e+00 : f32
    %12 = vector.broadcast %cst_14 : f32 to vector<16x16xf32>
    %13 = arith.maximumf %11, %12 : vector<16x16xf32>
    %c0_15 = arith.constant 0 : index
    %c0_16 = arith.constant 0 : index
    %14 = vector.load %arg7[%c0_15, %c0_16] : memref<16x16xf32, #tpu.memory_space<vmem>>, vector<16x16xf32>
    %cst_17 = arith.constant dense<0.000000e+00> : vector<16x16xf32>
    %15 = tpu.matmul %13, %14, %cst_17 {dimension_numbers = #tpu.dot_dimension_numbers<[1], [0], [0], [1], [0, 0, 1, 1], [], []>} : vector<16x16xf32>, vector<16x16xf32>, vector<16x16xf32> -> vector<16x16xf32>
    %cst_18 = arith.constant 0.000000e+00 : f32
    %16 = vector.broadcast %cst_18 : f32 to vector<16x16xf32>
    %17 = arith.maximumf %15, %16 : vector<16x16xf32>
    %c0_19 = arith.constant 0 : index
    %c0_20 = arith.constant 0 : index
    %18 = vector.load %arg8[%c0_19, %c0_20] : memref<16x128xf32, #tpu.memory_space<vmem>>, vector<16x128xf32>
    %cst_21 = arith.constant dense<0.000000e+00> : vector<16x128xf32>
    %19 = tpu.matmul %17, %18, %cst_21 {dimension_numbers = #tpu.dot_dimension_numbers<[1], [0], [0], [1], [0, 0, 1, 1], [], []>} : vector<16x16xf32>, vector<16x128xf32>, vector<16x128xf32> -> vector<16x128xf32>
    %c0_22 = arith.constant 0 : index
    %c0_23 = arith.constant 0 : index
    %20 = vector.load %arg9[%c0_22, %c0_23] : memref<1x128xf32, #tpu.memory_space<vmem>>, vector<1x128xf32>
    %21 = vector.broadcast %20 : vector<1x128xf32> to vector<16x128xf32>
    %22 = arith.addf %19, %21 : vector<16x128xf32>
    %c0_24 = arith.constant 0 : index
    %c0_25 = arith.constant 0 : index
    %23 = vector.load %arg10[%c0_24, %c0_25] : memref<32x128xf32, #tpu.memory_space<vmem>>, vector<32x128xf32>
    %c0_26 = arith.constant 0 : index
    %c0_27 = arith.constant 0 : index
    %24 = vector.load %arg11[%c0_26, %c0_27] : memref<32x128xf32, #tpu.memory_space<vmem>>, vector<32x128xf32>
    %c0_28 = arith.constant 0 : index
    %c0_29 = arith.constant 0 : index
    %25 = vector.load %arg12[%c0_28, %c0_29] : memref<32x128xf32, #tpu.memory_space<vmem>>, vector<32x128xf32>
    %c0_30 = arith.constant 0 : index
    %c0_31 = arith.constant 0 : index
    %26 = vector.load %arg13[%c0_30, %c0_31] : memref<32x128xf32, #tpu.memory_space<vmem>>, vector<32x128xf32>
    %c0_32 = arith.constant 0 : index
    %c0_33 = arith.constant 0 : index
    %27 = vector.load %arg14[%c0_32, %c0_33] : memref<1x128xf32, #tpu.memory_space<vmem>>, vector<1x128xf32>
    %c0_34 = arith.constant 0 : index
    %c0_35 = arith.constant 0 : index
    %28 = vector.load %arg4[%c0_34, %c0_35] : memref<32x16xf32, #tpu.memory_space<vmem>>, vector<32x16xf32>
    %c0_36 = arith.constant 0 : index
    %c0_37 = arith.constant 0 : index
    %29 = vector.load %arg15[%c0_36, %c0_37] : memref<32x9xf32, #tpu.memory_space<vmem>>, vector<32x9xf32>
    %c0_38 = arith.constant 0 : index
    %c0_39 = arith.constant 0 : index
    %30 = vector.load %arg16[%c0_38, %c0_39] : memref<32x9xf32, #tpu.memory_space<vmem>>, vector<32x9xf32>
    %c0_40 = arith.constant 0 : index
    %c0_41 = arith.constant 0 : index
    %31 = vector.load %arg17[%c0_40, %c0_41] : memref<1x9xf32, #tpu.memory_space<vmem>>, vector<1x9xf32>
    %cst_42 = arith.constant 0.000000e+00 : f32
    %32 = vector.broadcast %cst_42 : f32 to vector<2x32xf32>
    %cst_43 = arith.constant 0.000000e+00 : f32
    %33 = vector.broadcast %cst_43 : f32 to vector<2x32xf32>
    %cst_44 = arith.constant 0.000000e+00 : f32
    %34 = vector.broadcast %cst_44 : f32 to vector<2x32xf32>
    %cst_45 = arith.constant 0.000000e+00 : f32
    %35 = vector.broadcast %cst_45 : f32 to vector<2x32xf32>
    %cst_46 = arith.constant dense<0.000000e+00> : vector<2x16xf32>
    %36 = tpu.matmul %32, %28, %cst_46 {dimension_numbers = #tpu.dot_dimension_numbers<[1], [0], [0], [1], [0, 0, 1, 1], [], []>} : vector<2x32xf32>, vector<32x16xf32>, vector<2x16xf32> -> vector<2x16xf32>
    %37 = vector.shape_cast %36 : vector<2x16xf32> to vector<2x1x16xf32>
    %38 = vector.broadcast %37 : vector<2x1x16xf32> to vector<2x8x16xf32>
    %39 = arith.addf %8, %38 : vector<2x8x16xf32>
    %40 = math.tanh %39 : vector<2x8x16xf32>
    %41 = vector.shape_cast %4 : vector<1x16xf32> to vector<1x1x16xf32>
    %42 = vector.broadcast %41 : vector<1x1x16xf32> to vector<2x8x16xf32>
    %43 = arith.mulf %40, %42 : vector<2x8x16xf32>
    %cst_47 = arith.constant dense<0.000000e+00> : vector<2x8xf32>
    %44 = vector.multi_reduction <add>, %43, %cst_47 [2] : vector<2x8x16xf32> to vector<2x8xf32>
    %cst_48 = arith.constant -1.000000e+30 : f32
    %45 = vector.broadcast %cst_48 : f32 to vector<2x8xf32>
    %46 = arith.select %3, %44, %45 : vector<2x8xi1>, vector<2x8xf32>
    %cst_49 = arith.constant dense<0xFF800000> : vector<2xf32>
    %47 = vector.multi_reduction <maximumf>, %46, %cst_49 [1] : vector<2x8xf32> to vector<2xf32>
    %48 = vector.shape_cast %47 : vector<2xf32> to vector<2x1xf32>
    %49 = vector.broadcast %48 : vector<2x1xf32> to vector<2x8xf32>
    %50 = arith.subf %46, %49 : vector<2x8xf32>
    %51 = math.exp %50 : vector<2x8xf32>
    %cst_50 = arith.constant dense<0.000000e+00> : vector<2xf32>
    %52 = vector.multi_reduction <add>, %51, %cst_50 [1] : vector<2x8xf32> to vector<2xf32>
    %53 = vector.shape_cast %52 : vector<2xf32> to vector<2x1xf32>
    %54 = vector.broadcast %53 : vector<2x1xf32> to vector<2x8xf32>
    %55 = arith.divf %51, %54 : vector<2x8xf32>
    %56 = vector.shape_cast %55 : vector<2x8xf32> to vector<2x8x1xf32>
    %57 = vector.broadcast %56 : vector<2x8x1xf32> to vector<2x8x32xf32>
    %58 = arith.mulf %57, %0 : vector<2x8x32xf32>
    %cst_51 = arith.constant dense<0.000000e+00> : vector<2x32xf32>
    %59 = vector.multi_reduction <add>, %58, %cst_51 [1] : vector<2x8x32xf32> to vector<2x32xf32>
    %cst_52 = arith.constant dense<0.000000e+00> : vector<2x128xf32>
    %60 = tpu.matmul %59, %23, %cst_52 {dimension_numbers = #tpu.dot_dimension_numbers<[1], [0], [0], [1], [0, 0, 1, 1], [], []>} : vector<2x32xf32>, vector<32x128xf32>, vector<2x128xf32> -> vector<2x128xf32>
    %cst_53 = arith.constant dense<0.000000e+00> : vector<2x128xf32>
    %61 = tpu.matmul %32, %24, %cst_53 {dimension_numbers = #tpu.dot_dimension_numbers<[1], [0], [0], [1], [0, 0, 1, 1], [], []>} : vector<2x32xf32>, vector<32x128xf32>, vector<2x128xf32> -> vector<2x128xf32>
    %62 = arith.addf %60, %61 : vector<2x128xf32>
    %63 = vector.extract_strided_slice %22 {offsets = [0, 0], sizes = [2, 128], strides = [1, 1]} : vector<16x128xf32> to vector<2x128xf32>
    %64 = arith.addf %62, %63 : vector<2x128xf32>
    %65 = vector.extract_strided_slice %64 {offsets = [0, 0], sizes = [2, 32], strides = [1, 1]} : vector<2x128xf32> to vector<2x32xf32>
    %66 = arith.negf %65 : vector<2x32xf32>
    %67 = math.exp %66 : vector<2x32xf32>
    %cst_54 = arith.constant 1.000000e+00 : f32
    %68 = vector.broadcast %cst_54 : f32 to vector<2x32xf32>
    %69 = arith.addf %68, %67 : vector<2x32xf32>
    %70 = arith.divf %68, %69 : vector<2x32xf32>
    %71 = vector.extract_strided_slice %64 {offsets = [0, 32], sizes = [2, 32], strides = [1, 1]} : vector<2x128xf32> to vector<2x32xf32>
    %72 = arith.negf %71 : vector<2x32xf32>
    %73 = math.exp %72 : vector<2x32xf32>
    %cst_55 = arith.constant 1.000000e+00 : f32
    %74 = vector.broadcast %cst_55 : f32 to vector<2x32xf32>
    %75 = arith.addf %74, %73 : vector<2x32xf32>
    %76 = arith.divf %74, %75 : vector<2x32xf32>
    %77 = vector.extract_strided_slice %64 {offsets = [0, 64], sizes = [2, 32], strides = [1, 1]} : vector<2x128xf32> to vector<2x32xf32>
    %78 = math.tanh %77 : vector<2x32xf32>
    %79 = vector.extract_strided_slice %64 {offsets = [0, 96], sizes = [2, 32], strides = [1, 1]} : vector<2x128xf32> to vector<2x32xf32>
    %80 = arith.negf %79 : vector<2x32xf32>
    %81 = math.exp %80 : vector<2x32xf32>
    %cst_56 = arith.constant 1.000000e+00 : f32
    %82 = vector.broadcast %cst_56 : f32 to vector<2x32xf32>
    %83 = arith.addf %82, %81 : vector<2x32xf32>
    %84 = arith.divf %82, %83 : vector<2x32xf32>
    %85 = arith.mulf %76, %33 : vector<2x32xf32>
    %86 = arith.mulf %70, %78 : vector<2x32xf32>
    %87 = arith.addf %85, %86 : vector<2x32xf32>
    %88 = math.tanh %87 : vector<2x32xf32>
    %89 = arith.mulf %84, %88 : vector<2x32xf32>
    %cst_57 = arith.constant 1.000000e-01 : f32
    %90 = vector.broadcast %cst_57 : f32 to vector<2x32xf32>
    %91 = arith.mulf %90, %32 : vector<2x32xf32>
    %cst_58 = arith.constant 0.899999976 : f32
    %92 = vector.broadcast %cst_58 : f32 to vector<2x32xf32>
    %93 = arith.mulf %92, %89 : vector<2x32xf32>
    %94 = arith.addf %91, %93 : vector<2x32xf32>
    %cst_59 = arith.constant 1.000000e-01 : f32
    %95 = vector.broadcast %cst_59 : f32 to vector<2x32xf32>
    %96 = arith.mulf %95, %33 : vector<2x32xf32>
    %cst_60 = arith.constant 0.899999976 : f32
    %97 = vector.broadcast %cst_60 : f32 to vector<2x32xf32>
    %98 = arith.mulf %97, %87 : vector<2x32xf32>
    %99 = arith.addf %96, %98 : vector<2x32xf32>
    %cst_61 = arith.constant dense<0.000000e+00> : vector<2x128xf32>
    %100 = tpu.matmul %94, %25, %cst_61 {dimension_numbers = #tpu.dot_dimension_numbers<[1], [0], [0], [1], [0, 0, 1, 1], [], []>} : vector<2x32xf32>, vector<32x128xf32>, vector<2x128xf32> -> vector<2x128xf32>
    %cst_62 = arith.constant dense<0.000000e+00> : vector<2x128xf32>
    %101 = tpu.matmul %34, %26, %cst_62 {dimension_numbers = #tpu.dot_dimension_numbers<[1], [0], [0], [1], [0, 0, 1, 1], [], []>} : vector<2x32xf32>, vector<32x128xf32>, vector<2x128xf32> -> vector<2x128xf32>
    %102 = arith.addf %100, %101 : vector<2x128xf32>
    %103 = vector.broadcast %27 : vector<1x128xf32> to vector<2x128xf32>
    %104 = arith.addf %102, %103 : vector<2x128xf32>
    %105 = vector.extract_strided_slice %104 {offsets = [0, 0], sizes = [2, 32], strides = [1, 1]} : vector<2x128xf32> to vector<2x32xf32>
    %106 = arith.negf %105 : vector<2x32xf32>
    %107 = math.exp %106 : vector<2x32xf32>
    %cst_63 = arith.constant 1.000000e+00 : f32
    %108 = vector.broadcast %cst_63 : f32 to vector<2x32xf32>
    %109 = arith.addf %108, %107 : vector<2x32xf32>
    %110 = arith.divf %108, %109 : vector<2x32xf32>
    %111 = vector.extract_strided_slice %104 {offsets = [0, 32], sizes = [2, 32], strides = [1, 1]} : vector<2x128xf32> to vector<2x32xf32>
    %112 = arith.negf %111 : vector<2x32xf32>
    %113 = math.exp %112 : vector<2x32xf32>
    %cst_64 = arith.constant 1.000000e+00 : f32
    %114 = vector.broadcast %cst_64 : f32 to vector<2x32xf32>
    %115 = arith.addf %114, %113 : vector<2x32xf32>
    %116 = arith.divf %114, %115 : vector<2x32xf32>
    %117 = vector.extract_strided_slice %104 {offsets = [0, 64], sizes = [2, 32], strides = [1, 1]} : vector<2x128xf32> to vector<2x32xf32>
    %118 = math.tanh %117 : vector<2x32xf32>
    %119 = vector.extract_strided_slice %104 {offsets = [0, 96], sizes = [2, 32], strides = [1, 1]} : vector<2x128xf32> to vector<2x32xf32>
    %120 = arith.negf %119 : vector<2x32xf32>
    %121 = math.exp %120 : vector<2x32xf32>
    %cst_65 = arith.constant 1.000000e+00 : f32
    %122 = vector.broadcast %cst_65 : f32 to vector<2x32xf32>
    %123 = arith.addf %122, %121 : vector<2x32xf32>
    %124 = arith.divf %122, %123 : vector<2x32xf32>
    %125 = arith.mulf %116, %35 : vector<2x32xf32>
    %126 = arith.mulf %110, %118 : vector<2x32xf32>
    %127 = arith.addf %125, %126 : vector<2x32xf32>
    %128 = math.tanh %127 : vector<2x32xf32>
    %129 = arith.mulf %124, %128 : vector<2x32xf32>
    %cst_66 = arith.constant 1.000000e-01 : f32
    %130 = vector.broadcast %cst_66 : f32 to vector<2x32xf32>
    %131 = arith.mulf %130, %34 : vector<2x32xf32>
    %cst_67 = arith.constant 0.899999976 : f32
    %132 = vector.broadcast %cst_67 : f32 to vector<2x32xf32>
    %133 = arith.mulf %132, %129 : vector<2x32xf32>
    %134 = arith.addf %131, %133 : vector<2x32xf32>
    %cst_68 = arith.constant 1.000000e-01 : f32
    %135 = vector.broadcast %cst_68 : f32 to vector<2x32xf32>
    %136 = arith.mulf %135, %35 : vector<2x32xf32>
    %cst_69 = arith.constant 0.899999976 : f32
    %137 = vector.broadcast %cst_69 : f32 to vector<2x32xf32>
    %138 = arith.mulf %137, %127 : vector<2x32xf32>
    %139 = arith.addf %136, %138 : vector<2x32xf32>
    %cst_70 = arith.constant dense<0.000000e+00> : vector<2x9xf32>
    %140 = tpu.matmul %134, %29, %cst_70 {dimension_numbers = #tpu.dot_dimension_numbers<[1], [0], [0], [1], [0, 0, 1, 1], [], []>} : vector<2x32xf32>, vector<32x9xf32>, vector<2x9xf32> -> vector<2x9xf32>
    %cst_71 = arith.constant dense<0.000000e+00> : vector<2x9xf32>
    %141 = tpu.matmul %59, %30, %cst_71 {dimension_numbers = #tpu.dot_dimension_numbers<[1], [0], [0], [1], [0, 0, 1, 1], [], []>} : vector<2x32xf32>, vector<32x9xf32>, vector<2x9xf32> -> vector<2x9xf32>
    %142 = arith.addf %140, %141 : vector<2x9xf32>
    %143 = vector.broadcast %31 : vector<1x9xf32> to vector<2x9xf32>
    %144 = arith.addf %142, %143 : vector<2x9xf32>
    %c0_72 = arith.constant 0 : index
    %c0_73 = arith.constant 0 : index
    %c0_74 = arith.constant 0 : index
    %145 = vector.load %arg23[%c0_72, %c0_73, %c0_74] : memref<8x2x9xf32, #tpu.memory_space<vmem>>, vector<1x2x9xf32>
    %146 = vector.shape_cast %145 : vector<1x2x9xf32> to vector<2x9xf32>
    %147 = vector.shape_cast %144 : vector<2x9xf32> to vector<1x2x9xf32>
    tpu.vector_store %arg23[%c0_72, %c0_73, %c0_74], %147 {strides = array<i32>} : memref<8x2x9xf32, #tpu.memory_space<vmem>>, vector<1x2x9xf32>,
    %cst_75 = arith.constant dense<0.000000e+00> : vector<2x16xf32>
    %148 = tpu.matmul %94, %28, %cst_75 {dimension_numbers = #tpu.dot_dimension_numbers<[1], [0], [0], [1], [0, 0, 1, 1], [], []>} : vector<2x32xf32>, vector<32x16xf32>, vector<2x16xf32> -> vector<2x16xf32>
    %149 = vector.shape_cast %148 : vector<2x16xf32> to vector<2x1x16xf32>
    %150 = vector.broadcast %149 : vector<2x1x16xf32> to vector<2x8x16xf32>
    %151 = arith.addf %8, %150 : vector<2x8x16xf32>
    %152 = math.tanh %151 : vector<2x8x16xf32>
    %153 = vector.shape_cast %4 : vector<1x16xf32> to vector<1x1x16xf32>
    %154 = vector.broadcast %153 : vector<1x1x16xf32> to vector<2x8x16xf32>
    %155 = arith.mulf %152, %154 : vector<2x8x16xf32>
    %cst_76 = arith.constant dense<0.000000e+00> : vector<2x8xf32>
    %156 = vector.multi_reduction <add>, %155, %cst_76 [2] : vector<2x8x16xf32> to vector<2x8xf32>
    %cst_77 = arith.constant -1.000000e+30 : f32
    %157 = vector.broadcast %cst_77 : f32 to vector<2x8xf32>
    %158 = arith.select %3, %156, %157 : vector<2x8xi1>, vector<2x8xf32>
    %cst_78 = arith.constant dense<0xFF800000> : vector<2xf32>
    %159 = vector.multi_reduction <maximumf>, %158, %cst_78 [1] : vector<2x8xf32> to vector<2xf32>
    %160 = vector.shape_cast %159 : vector<2xf32> to vector<2x1xf32>
    %161 = vector.broadcast %160 : vector<2x1xf32> to vector<2x8xf32>
    %162 = arith.subf %158, %161 : vector<2x8xf32>
    %163 = math.exp %162 : vector<2x8xf32>
    %cst_79 = arith.constant dense<0.000000e+00> : vector<2xf32>
    %164 = vector.multi_reduction <add>, %163, %cst_79 [1] : vector<2x8xf32> to vector<2xf32>
    %165 = vector.shape_cast %164 : vector<2xf32> to vector<2x1xf32>
    %166 = vector.broadcast %165 : vector<2x1xf32> to vector<2x8xf32>
    %167 = arith.divf %163, %166 : vector<2x8xf32>
    %168 = vector.shape_cast %167 : vector<2x8xf32> to vector<2x8x1xf32>
    %169 = vector.broadcast %168 : vector<2x8x1xf32> to vector<2x8x32xf32>
    %170 = arith.mulf %169, %0 : vector<2x8x32xf32>
    %cst_80 = arith.constant dense<0.000000e+00> : vector<2x32xf32>
    %171 = vector.multi_reduction <add>, %170, %cst_80 [1] : vector<2x8x32xf32> to vector<2x32xf32>
    %cst_81 = arith.constant dense<0.000000e+00> : vector<2x128xf32>
    %172 = tpu.matmul %171, %23, %cst_81 {dimension_numbers = #tpu.dot_dimension_numbers<[1], [0], [0], [1], [0, 0, 1, 1], [], []>} : vector<2x32xf32>, vector<32x128xf32>, vector<2x128xf32> -> vector<2x128xf32>
    %cst_82 = arith.constant dense<0.000000e+00> : vector<2x128xf32>
    %173 = tpu.matmul %94, %24, %cst_82 {dimension_numbers = #tpu.dot_dimension_numbers<[1], [0], [0], [1], [0, 0, 1, 1], [], []>} : vector<2x32xf32>, vector<32x128xf32>, vector<2x128xf32> -> vector<2x128xf32>
    %174 = arith.addf %172, %173 : vector<2x128xf32>
    %175 = vector.extract_strided_slice %22 {offsets = [2, 0], sizes = [2, 128], strides = [1, 1]} : vector<16x128xf32> to vector<2x128xf32>
    %176 = arith.addf %174, %175 : vector<2x128xf32>
    %177 = vector.extract_strided_slice %176 {offsets = [0, 0], sizes = [2, 32], strides = [1, 1]} : vector<2x128xf32> to vector<2x32xf32>
    %178 = arith.negf %177 : vector<2x32xf32>
    %179 = math.exp %178 : vector<2x32xf32>
    %cst_83 = arith.constant 1.000000e+00 : f32
    %180 = vector.broadcast %cst_83 : f32 to vector<2x32xf32>
    %181 = arith.addf %180, %179 : vector<2x32xf32>
    %182 = arith.divf %180, %181 : vector<2x32xf32>
    %183 = vector.extract_strided_slice %176 {offsets = [0, 32], sizes = [2, 32], strides = [1, 1]} : vector<2x128xf32> to vector<2x32xf32>
    %184 = arith.negf %183 : vector<2x32xf32>
    %185 = math.exp %184 : vector<2x32xf32>
    %cst_84 = arith.constant 1.000000e+00 : f32
    %186 = vector.broadcast %cst_84 : f32 to vector<2x32xf32>
    %187 = arith.addf %186, %185 : vector<2x32xf32>
    %188 = arith.divf %186, %187 : vector<2x32xf32>
    %189 = vector.extract_strided_slice %176 {offsets = [0, 64], sizes = [2, 32], strides = [1, 1]} : vector<2x128xf32> to vector<2x32xf32>
    %190 = math.tanh %189 : vector<2x32xf32>
    %191 = vector.extract_strided_slice %176 {offsets = [0, 96], sizes = [2, 32], strides = [1, 1]} : vector<2x128xf32> to vector<2x32xf32>
    %192 = arith.negf %191 : vector<2x32xf32>
    %193 = math.exp %192 : vector<2x32xf32>
    %cst_85 = arith.constant 1.000000e+00 : f32
    %194 = vector.broadcast %cst_85 : f32 to vector<2x32xf32>
    %195 = arith.addf %194, %193 : vector<2x32xf32>
    %196 = arith.divf %194, %195 : vector<2x32xf32>
    %197 = arith.mulf %188, %99 : vector<2x32xf32>
    %198 = arith.mulf %182, %190 : vector<2x32xf32>
    %199 = arith.addf %197, %198 : vector<2x32xf32>
    %200 = math.tanh %199 : vector<2x32xf32>
    %201 = arith.mulf %196, %200 : vector<2x32xf32>
    %cst_86 = arith.constant 1.000000e-01 : f32
    %202 = vector.broadcast %cst_86 : f32 to vector<2x32xf32>
    %203 = arith.mulf %202, %94 : vector<2x32xf32>
    %cst_87 = arith.constant 0.899999976 : f32
    %204 = vector.broadcast %cst_87 : f32 to vector<2x32xf32>
    %205 = arith.mulf %204, %201 : vector<2x32xf32>
    %206 = arith.addf %203, %205 : vector<2x32xf32>
    %cst_88 = arith.constant 1.000000e-01 : f32
    %207 = vector.broadcast %cst_88 : f32 to vector<2x32xf32>
    %208 = arith.mulf %207, %99 : vector<2x32xf32>
    %cst_89 = arith.constant 0.899999976 : f32
    %209 = vector.broadcast %cst_89 : f32 to vector<2x32xf32>
    %210 = arith.mulf %209, %199 : vector<2x32xf32>
    %211 = arith.addf %208, %210 : vector<2x32xf32>
    %cst_90 = arith.constant dense<0.000000e+00> : vector<2x128xf32>
    %212 = tpu.matmul %206, %25, %cst_90 {dimension_numbers = #tpu.dot_dimension_numbers<[1], [0], [0], [1], [0, 0, 1, 1], [], []>} : vector<2x32xf32>, vector<32x128xf32>, vector<2x128xf32> -> vector<2x128xf32>
    %cst_91 = arith.constant dense<0.000000e+00> : vector<2x128xf32>
    %213 = tpu.matmul %134, %26, %cst_91 {dimension_numbers = #tpu.dot_dimension_numbers<[1], [0], [0], [1], [0, 0, 1, 1], [], []>} : vector<2x32xf32>, vector<32x128xf32>, vector<2x128xf32> -> vector<2x128xf32>
    %214 = arith.addf %212, %213 : vector<2x128xf32>
    %215 = vector.broadcast %27 : vector<1x128xf32> to vector<2x128xf32>
    %216 = arith.addf %214, %215 : vector<2x128xf32>
    %217 = vector.extract_strided_slice %216 {offsets = [0, 0], sizes = [2, 32], strides = [1, 1]} : vector<2x128xf32> to vector<2x32xf32>
    %218 = arith.negf %217 : vector<2x32xf32>
    %219 = math.exp %218 : vector<2x32xf32>
    %cst_92 = arith.constant 1.000000e+00 : f32
    %220 = vector.broadcast %cst_92 : f32 to vector<2x32xf32>
    %221 = arith.addf %220, %219 : vector<2x32xf32>
    %222 = arith.divf %220, %221 : vector<2x32xf32>
    %223 = vector.extract_strided_slice %216 {offsets = [0, 32], sizes = [2, 32], strides = [1, 1]} : vector<2x128xf32> to vector<2x32xf32>
    %224 = arith.negf %223 : vector<2x32xf32>
    %225 = math.exp %224 : vector<2x32xf32>
    %cst_93 = arith.constant 1.000000e+00 : f32
    %226 = vector.broadcast %cst_93 : f32 to vector<2x32xf32>
    %227 = arith.addf %226, %225 : vector<2x32xf32>
    %228 = arith.divf %226, %227 : vector<2x32xf32>
    %229 = vector.extract_strided_slice %216 {offsets = [0, 64], sizes = [2, 32], strides = [1, 1]} : vector<2x128xf32> to vector<2x32xf32>
    %230 = math.tanh %229 : vector<2x32xf32>
    %231 = vector.extract_strided_slice %216 {offsets = [0, 96], sizes = [2, 32], strides = [1, 1]} : vector<2x128xf32> to vector<2x32xf32>
    %232 = arith.negf %231 : vector<2x32xf32>
    %233 = math.exp %232 : vector<2x32xf32>
    %cst_94 = arith.constant 1.000000e+00 : f32
    %234 = vector.broadcast %cst_94 : f32 to vector<2x32xf32>
    %235 = arith.addf %234, %233 : vector<2x32xf32>
    %236 = arith.divf %234, %235 : vector<2x32xf32>
    %237 = arith.mulf %228, %139 : vector<2x32xf32>
    %238 = arith.mulf %222, %230 : vector<2x32xf32>
    %239 = arith.addf %237, %238 : vector<2x32xf32>
    %240 = math.tanh %239 : vector<2x32xf32>
    %241 = arith.mulf %236, %240 : vector<2x32xf32>
    %cst_95 = arith.constant 1.000000e-01 : f32
    %242 = vector.broadcast %cst_95 : f32 to vector<2x32xf32>
    %243 = arith.mulf %242, %134 : vector<2x32xf32>
    %cst_96 = arith.constant 0.899999976 : f32
    %244 = vector.broadcast %cst_96 : f32 to vector<2x32xf32>
    %245 = arith.mulf %244, %241 : vector<2x32xf32>
    %246 = arith.addf %243, %245 : vector<2x32xf32>
    %cst_97 = arith.constant 1.000000e-01 : f32
    %247 = vector.broadcast %cst_97 : f32 to vector<2x32xf32>
    %248 = arith.mulf %247, %139 : vector<2x32xf32>
    %cst_98 = arith.constant 0.899999976 : f32
    %249 = vector.broadcast %cst_98 : f32 to vector<2x32xf32>
    %250 = arith.mulf %249, %239 : vector<2x32xf32>
    %251 = arith.addf %248, %250 : vector<2x32xf32>
    %cst_99 = arith.constant dense<0.000000e+00> : vector<2x9xf32>
    %252 = tpu.matmul %246, %29, %cst_99 {dimension_numbers = #tpu.dot_dimension_numbers<[1], [0], [0], [1], [0, 0, 1, 1], [], []>} : vector<2x32xf32>, vector<32x9xf32>, vector<2x9xf32> -> vector<2x9xf32>
    %cst_100 = arith.constant dense<0.000000e+00> : vector<2x9xf32>
    %253 = tpu.matmul %171, %30, %cst_100 {dimension_numbers = #tpu.dot_dimension_numbers<[1], [0], [0], [1], [0, 0, 1, 1], [], []>} : vector<2x32xf32>, vector<32x9xf32>, vector<2x9xf32> -> vector<2x9xf32>
    %254 = arith.addf %252, %253 : vector<2x9xf32>
    %255 = vector.broadcast %31 : vector<1x9xf32> to vector<2x9xf32>
    %256 = arith.addf %254, %255 : vector<2x9xf32>
    %c1 = arith.constant 1 : index
    %c0_101 = arith.constant 0 : index
    %c0_102 = arith.constant 0 : index
    %257 = vector.load %arg23[%c1, %c0_101, %c0_102] : memref<8x2x9xf32, #tpu.memory_space<vmem>>, vector<1x2x9xf32>
    %258 = vector.shape_cast %257 : vector<1x2x9xf32> to vector<2x9xf32>
    %259 = vector.shape_cast %256 : vector<2x9xf32> to vector<1x2x9xf32>
    tpu.vector_store %arg23[%c1, %c0_101, %c0_102], %259 {strides = array<i32>} : memref<8x2x9xf32, #tpu.memory_space<vmem>>, vector<1x2x9xf32>,
    %cst_103 = arith.constant dense<0.000000e+00> : vector<2x16xf32>
    %260 = tpu.matmul %206, %28, %cst_103 {dimension_numbers = #tpu.dot_dimension_numbers<[1], [0], [0], [1], [0, 0, 1, 1], [], []>} : vector<2x32xf32>, vector<32x16xf32>, vector<2x16xf32> -> vector<2x16xf32>
    %261 = vector.shape_cast %260 : vector<2x16xf32> to vector<2x1x16xf32>
    %262 = vector.broadcast %261 : vector<2x1x16xf32> to vector<2x8x16xf32>
    %263 = arith.addf %8, %262 : vector<2x8x16xf32>
    %264 = math.tanh %263 : vector<2x8x16xf32>
    %265 = vector.shape_cast %4 : vector<1x16xf32> to vector<1x1x16xf32>
    %266 = vector.broadcast %265 : vector<1x1x16xf32> to vector<2x8x16xf32>
    %267 = arith.mulf %264, %266 : vector<2x8x16xf32>
    %cst_104 = arith.constant dense<0.000000e+00> : vector<2x8xf32>
    %268 = vector.multi_reduction <add>, %267, %cst_104 [2] : vector<2x8x16xf32> to vector<2x8xf32>
    %cst_105 = arith.constant -1.000000e+30 : f32
    %269 = vector.broadcast %cst_105 : f32 to vector<2x8xf32>
    %270 = arith.select %3, %268, %269 : vector<2x8xi1>, vector<2x8xf32>
    %cst_106 = arith.constant dense<0xFF800000> : vector<2xf32>
    %271 = vector.multi_reduction <maximumf>, %270, %cst_106 [1] : vector<2x8xf32> to vector<2xf32>
    %272 = vector.shape_cast %271 : vector<2xf32> to vector<2x1xf32>
    %273 = vector.broadcast %272 : vector<2x1xf32> to vector<2x8xf32>
    %274 = arith.subf %270, %273 : vector<2x8xf32>
    %275 = math.exp %274 : vector<2x8xf32>
    %cst_107 = arith.constant dense<0.000000e+00> : vector<2xf32>
    %276 = vector.multi_reduction <add>, %275, %cst_107 [1] : vector<2x8xf32> to vector<2xf32>
    %277 = vector.shape_cast %276 : vector<2xf32> to vector<2x1xf32>
    %278 = vector.broadcast %277 : vector<2x1xf32> to vector<2x8xf32>
    %279 = arith.divf %275, %278 : vector<2x8xf32>
    %280 = vector.shape_cast %279 : vector<2x8xf32> to vector<2x8x1xf32>
    %281 = vector.broadcast %280 : vector<2x8x1xf32> to vector<2x8x32xf32>
    %282 = arith.mulf %281, %0 : vector<2x8x32xf32>
    %cst_108 = arith.constant dense<0.000000e+00> : vector<2x32xf32>
    %283 = vector.multi_reduction <add>, %282, %cst_108 [1] : vector<2x8x32xf32> to vector<2x32xf32>
    %cst_109 = arith.constant dense<0.000000e+00> : vector<2x128xf32>
    %284 = tpu.matmul %283, %23, %cst_109 {dimension_numbers = #tpu.dot_dimension_numbers<[1], [0], [0], [1], [0, 0, 1, 1], [], []>} : vector<2x32xf32>, vector<32x128xf32>, vector<2x128xf32> -> vector<2x128xf32>
    %cst_110 = arith.constant dense<0.000000e+00> : vector<2x128xf32>
    %285 = tpu.matmul %206, %24, %cst_110 {dimension_numbers = #tpu.dot_dimension_numbers<[1], [0], [0], [1], [0, 0, 1, 1], [], []>} : vector<2x32xf32>, vector<32x128xf32>, vector<2x128xf32> -> vector<2x128xf32>
    %286 = arith.addf %284, %285 : vector<2x128xf32>
    %287 = vector.extract_strided_slice %22 {offsets = [4, 0], sizes = [2, 128], strides = [1, 1]} : vector<16x128xf32> to vector<2x128xf32>
    %288 = arith.addf %286, %287 : vector<2x128xf32>
    %289 = vector.extract_strided_slice %288 {offsets = [0, 0], sizes = [2, 32], strides = [1, 1]} : vector<2x128xf32> to vector<2x32xf32>
    %290 = arith.negf %289 : vector<2x32xf32>
    %291 = math.exp %290 : vector<2x32xf32>
    %cst_111 = arith.constant 1.000000e+00 : f32
    %292 = vector.broadcast %cst_111 : f32 to vector<2x32xf32>
    %293 = arith.addf %292, %291 : vector<2x32xf32>
    %294 = arith.divf %292, %293 : vector<2x32xf32>
    %295 = vector.extract_strided_slice %288 {offsets = [0, 32], sizes = [2, 32], strides = [1, 1]} : vector<2x128xf32> to vector<2x32xf32>
    %296 = arith.negf %295 : vector<2x32xf32>
    %297 = math.exp %296 : vector<2x32xf32>
    %cst_112 = arith.constant 1.000000e+00 : f32
    %298 = vector.broadcast %cst_112 : f32 to vector<2x32xf32>
    %299 = arith.addf %298, %297 : vector<2x32xf32>
    %300 = arith.divf %298, %299 : vector<2x32xf32>
    %301 = vector.extract_strided_slice %288 {offsets = [0, 64], sizes = [2, 32], strides = [1, 1]} : vector<2x128xf32> to vector<2x32xf32>
    %302 = math.tanh %301 : vector<2x32xf32>
    %303 = vector.extract_strided_slice %288 {offsets = [0, 96], sizes = [2, 32], strides = [1, 1]} : vector<2x128xf32> to vector<2x32xf32>
    %304 = arith.negf %303 : vector<2x32xf32>
    %305 = math.exp %304 : vector<2x32xf32>
    %cst_113 = arith.constant 1.000000e+00 : f32
    %306 = vector.broadcast %cst_113 : f32 to vector<2x32xf32>
    %307 = arith.addf %306, %305 : vector<2x32xf32>
    %308 = arith.divf %306, %307 : vector<2x32xf32>
    %309 = arith.mulf %300, %211 : vector<2x32xf32>
    %310 = arith.mulf %294, %302 : vector<2x32xf32>
    %311 = arith.addf %309, %310 : vector<2x32xf32>
    %312 = math.tanh %311 : vector<2x32xf32>
    %313 = arith.mulf %308, %312 : vector<2x32xf32>
    %cst_114 = arith.constant 1.000000e-01 : f32
    %314 = vector.broadcast %cst_114 : f32 to vector<2x32xf32>
    %315 = arith.mulf %314, %206 : vector<2x32xf32>
    %cst_115 = arith.constant 0.899999976 : f32
    %316 = vector.broadcast %cst_115 : f32 to vector<2x32xf32>
    %317 = arith.mulf %316, %313 : vector<2x32xf32>
    %318 = arith.addf %315, %317 : vector<2x32xf32>
    %cst_116 = arith.constant 1.000000e-01 : f32
    %319 = vector.broadcast %cst_116 : f32 to vector<2x32xf32>
    %320 = arith.mulf %319, %211 : vector<2x32xf32>
    %cst_117 = arith.constant 0.899999976 : f32
    %321 = vector.broadcast %cst_117 : f32 to vector<2x32xf32>
    %322 = arith.mulf %321, %311 : vector<2x32xf32>
    %323 = arith.addf %320, %322 : vector<2x32xf32>
    %cst_118 = arith.constant dense<0.000000e+00> : vector<2x128xf32>
    %324 = tpu.matmul %318, %25, %cst_118 {dimension_numbers = #tpu.dot_dimension_numbers<[1], [0], [0], [1], [0, 0, 1, 1], [], []>} : vector<2x32xf32>, vector<32x128xf32>, vector<2x128xf32> -> vector<2x128xf32>
    %cst_119 = arith.constant dense<0.000000e+00> : vector<2x128xf32>
    %325 = tpu.matmul %246, %26, %cst_119 {dimension_numbers = #tpu.dot_dimension_numbers<[1], [0], [0], [1], [0, 0, 1, 1], [], []>} : vector<2x32xf32>, vector<32x128xf32>, vector<2x128xf32> -> vector<2x128xf32>
    %326 = arith.addf %324, %325 : vector<2x128xf32>
    %327 = vector.broadcast %27 : vector<1x128xf32> to vector<2x128xf32>
    %328 = arith.addf %326, %327 : vector<2x128xf32>
    %329 = vector.extract_strided_slice %328 {offsets = [0, 0], sizes = [2, 32], strides = [1, 1]} : vector<2x128xf32> to vector<2x32xf32>
    %330 = arith.negf %329 : vector<2x32xf32>
    %331 = math.exp %330 : vector<2x32xf32>
    %cst_120 = arith.constant 1.000000e+00 : f32
    %332 = vector.broadcast %cst_120 : f32 to vector<2x32xf32>
    %333 = arith.addf %332, %331 : vector<2x32xf32>
    %334 = arith.divf %332, %333 : vector<2x32xf32>
    %335 = vector.extract_strided_slice %328 {offsets = [0, 32], sizes = [2, 32], strides = [1, 1]} : vector<2x128xf32> to vector<2x32xf32>
    %336 = arith.negf %335 : vector<2x32xf32>
    %337 = math.exp %336 : vector<2x32xf32>
    %cst_121 = arith.constant 1.000000e+00 : f32
    %338 = vector.broadcast %cst_121 : f32 to vector<2x32xf32>
    %339 = arith.addf %338, %337 : vector<2x32xf32>
    %340 = arith.divf %338, %339 : vector<2x32xf32>
    %341 = vector.extract_strided_slice %328 {offsets = [0, 64], sizes = [2, 32], strides = [1, 1]} : vector<2x128xf32> to vector<2x32xf32>
    %342 = math.tanh %341 : vector<2x32xf32>
    %343 = vector.extract_strided_slice %328 {offsets = [0, 96], sizes = [2, 32], strides = [1, 1]} : vector<2x128xf32> to vector<2x32xf32>
    %344 = arith.negf %343 : vector<2x32xf32>
    %345 = math.exp %344 : vector<2x32xf32>
    %cst_122 = arith.constant 1.000000e+00 : f32
    %346 = vector.broadcast %cst_122 : f32 to vector<2x32xf32>
    %347 = arith.addf %346, %345 : vector<2x32xf32>
    %348 = arith.divf %346, %347 : vector<2x32xf32>
    %349 = arith.mulf %340, %251 : vector<2x32xf32>
    %350 = arith.mulf %334, %342 : vector<2x32xf32>
    %351 = arith.addf %349, %350 : vector<2x32xf32>
    %352 = math.tanh %351 : vector<2x32xf32>
    %353 = arith.mulf %348, %352 : vector<2x32xf32>
    %cst_123 = arith.constant 1.000000e-01 : f32
    %354 = vector.broadcast %cst_123 : f32 to vector<2x32xf32>
    %355 = arith.mulf %354, %246 : vector<2x32xf32>
    %cst_124 = arith.constant 0.899999976 : f32
    %356 = vector.broadcast %cst_124 : f32 to vector<2x32xf32>
    %357 = arith.mulf %356, %353 : vector<2x32xf32>
    %358 = arith.addf %355, %357 : vector<2x32xf32>
    %cst_125 = arith.constant 1.000000e-01 : f32
    %359 = vector.broadcast %cst_125 : f32 to vector<2x32xf32>
    %360 = arith.mulf %359, %251 : vector<2x32xf32>
    %cst_126 = arith.constant 0.899999976 : f32
    %361 = vector.broadcast %cst_126 : f32 to vector<2x32xf32>
    %362 = arith.mulf %361, %351 : vector<2x32xf32>
    %363 = arith.addf %360, %362 : vector<2x32xf32>
    %cst_127 = arith.constant dense<0.000000e+00> : vector<2x9xf32>
    %364 = tpu.matmul %358, %29, %cst_127 {dimension_numbers = #tpu.dot_dimension_numbers<[1], [0], [0], [1], [0, 0, 1, 1], [], []>} : vector<2x32xf32>, vector<32x9xf32>, vector<2x9xf32> -> vector<2x9xf32>
    %cst_128 = arith.constant dense<0.000000e+00> : vector<2x9xf32>
    %365 = tpu.matmul %283, %30, %cst_128 {dimension_numbers = #tpu.dot_dimension_numbers<[1], [0], [0], [1], [0, 0, 1, 1], [], []>} : vector<2x32xf32>, vector<32x9xf32>, vector<2x9xf32> -> vector<2x9xf32>
    %366 = arith.addf %364, %365 : vector<2x9xf32>
    %367 = vector.broadcast %31 : vector<1x9xf32> to vector<2x9xf32>
    %368 = arith.addf %366, %367 : vector<2x9xf32>
    %c2 = arith.constant 2 : index
    %c0_129 = arith.constant 0 : index
    %c0_130 = arith.constant 0 : index
    %369 = vector.load %arg23[%c2, %c0_129, %c0_130] : memref<8x2x9xf32, #tpu.memory_space<vmem>>, vector<1x2x9xf32>
    %370 = vector.shape_cast %369 : vector<1x2x9xf32> to vector<2x9xf32>
    %371 = vector.shape_cast %368 : vector<2x9xf32> to vector<1x2x9xf32>
    tpu.vector_store %arg23[%c2, %c0_129, %c0_130], %371 {strides = array<i32>} : memref<8x2x9xf32, #tpu.memory_space<vmem>>, vector<1x2x9xf32>,
    %cst_131 = arith.constant dense<0.000000e+00> : vector<2x16xf32>
    %372 = tpu.matmul %318, %28, %cst_131 {dimension_numbers = #tpu.dot_dimension_numbers<[1], [0], [0], [1], [0, 0, 1, 1], [], []>} : vector<2x32xf32>, vector<32x16xf32>, vector<2x16xf32> -> vector<2x16xf32>
    %373 = vector.shape_cast %372 : vector<2x16xf32> to vector<2x1x16xf32>
    %374 = vector.broadcast %373 : vector<2x1x16xf32> to vector<2x8x16xf32>
    %375 = arith.addf %8, %374 : vector<2x8x16xf32>
    %376 = math.tanh %375 : vector<2x8x16xf32>
    %377 = vector.shape_cast %4 : vector<1x16xf32> to vector<1x1x16xf32>
    %378 = vector.broadcast %377 : vector<1x1x16xf32> to vector<2x8x16xf32>
    %379 = arith.mulf %376, %378 : vector<2x8x16xf32>
    %cst_132 = arith.constant dense<0.000000e+00> : vector<2x8xf32>
    %380 = vector.multi_reduction <add>, %379, %cst_132 [2] : vector<2x8x16xf32> to vector<2x8xf32>
    %cst_133 = arith.constant -1.000000e+30 : f32
    %381 = vector.broadcast %cst_133 : f32 to vector<2x8xf32>
    %382 = arith.select %3, %380, %381 : vector<2x8xi1>, vector<2x8xf32>
    %cst_134 = arith.constant dense<0xFF800000> : vector<2xf32>
    %383 = vector.multi_reduction <maximumf>, %382, %cst_134 [1] : vector<2x8xf32> to vector<2xf32>
    %384 = vector.shape_cast %383 : vector<2xf32> to vector<2x1xf32>
    %385 = vector.broadcast %384 : vector<2x1xf32> to vector<2x8xf32>
    %386 = arith.subf %382, %385 : vector<2x8xf32>
    %387 = math.exp %386 : vector<2x8xf32>
    %cst_135 = arith.constant dense<0.000000e+00> : vector<2xf32>
    %388 = vector.multi_reduction <add>, %387, %cst_135 [1] : vector<2x8xf32> to vector<2xf32>
    %389 = vector.shape_cast %388 : vector<2xf32> to vector<2x1xf32>
    %390 = vector.broadcast %389 : vector<2x1xf32> to vector<2x8xf32>
    %391 = arith.divf %387, %390 : vector<2x8xf32>
    %392 = vector.shape_cast %391 : vector<2x8xf32> to vector<2x8x1xf32>
    %393 = vector.broadcast %392 : vector<2x8x1xf32> to vector<2x8x32xf32>
    %394 = arith.mulf %393, %0 : vector<2x8x32xf32>
    %cst_136 = arith.constant dense<0.000000e+00> : vector<2x32xf32>
    %395 = vector.multi_reduction <add>, %394, %cst_136 [1] : vector<2x8x32xf32> to vector<2x32xf32>
    %cst_137 = arith.constant dense<0.000000e+00> : vector<2x128xf32>
    %396 = tpu.matmul %395, %23, %cst_137 {dimension_numbers = #tpu.dot_dimension_numbers<[1], [0], [0], [1], [0, 0, 1, 1], [], []>} : vector<2x32xf32>, vector<32x128xf32>, vector<2x128xf32> -> vector<2x128xf32>
    %cst_138 = arith.constant dense<0.000000e+00> : vector<2x128xf32>
    %397 = tpu.matmul %318, %24, %cst_138 {dimension_numbers = #tpu.dot_dimension_numbers<[1], [0], [0], [1], [0, 0, 1, 1], [], []>} : vector<2x32xf32>, vector<32x128xf32>, vector<2x128xf32> -> vector<2x128xf32>
    %398 = arith.addf %396, %397 : vector<2x128xf32>
    %399 = vector.extract_strided_slice %22 {offsets = [6, 0], sizes = [2, 128], strides = [1, 1]} : vector<16x128xf32> to vector<2x128xf32>
    %400 = arith.addf %398, %399 : vector<2x128xf32>
    %401 = vector.extract_strided_slice %400 {offsets = [0, 0], sizes = [2, 32], strides = [1, 1]} : vector<2x128xf32> to vector<2x32xf32>
    %402 = arith.negf %401 : vector<2x32xf32>
    %403 = math.exp %402 : vector<2x32xf32>
    %cst_139 = arith.constant 1.000000e+00 : f32
    %404 = vector.broadcast %cst_139 : f32 to vector<2x32xf32>
    %405 = arith.addf %404, %403 : vector<2x32xf32>
    %406 = arith.divf %404, %405 : vector<2x32xf32>
    %407 = vector.extract_strided_slice %400 {offsets = [0, 32], sizes = [2, 32], strides = [1, 1]} : vector<2x128xf32> to vector<2x32xf32>
    %408 = arith.negf %407 : vector<2x32xf32>
    %409 = math.exp %408 : vector<2x32xf32>
    %cst_140 = arith.constant 1.000000e+00 : f32
    %410 = vector.broadcast %cst_140 : f32 to vector<2x32xf32>
    %411 = arith.addf %410, %409 : vector<2x32xf32>
    %412 = arith.divf %410, %411 : vector<2x32xf32>
    %413 = vector.extract_strided_slice %400 {offsets = [0, 64], sizes = [2, 32], strides = [1, 1]} : vector<2x128xf32> to vector<2x32xf32>
    %414 = math.tanh %413 : vector<2x32xf32>
    %415 = vector.extract_strided_slice %400 {offsets = [0, 96], sizes = [2, 32], strides = [1, 1]} : vector<2x128xf32> to vector<2x32xf32>
    %416 = arith.negf %415 : vector<2x32xf32>
    %417 = math.exp %416 : vector<2x32xf32>
    %cst_141 = arith.constant 1.000000e+00 : f32
    %418 = vector.broadcast %cst_141 : f32 to vector<2x32xf32>
    %419 = arith.addf %418, %417 : vector<2x32xf32>
    %420 = arith.divf %418, %419 : vector<2x32xf32>
    %421 = arith.mulf %412, %323 : vector<2x32xf32>
    %422 = arith.mulf %406, %414 : vector<2x32xf32>
    %423 = arith.addf %421, %422 : vector<2x32xf32>
    %424 = math.tanh %423 : vector<2x32xf32>
    %425 = arith.mulf %420, %424 : vector<2x32xf32>
    %cst_142 = arith.constant 1.000000e-01 : f32
    %426 = vector.broadcast %cst_142 : f32 to vector<2x32xf32>
    %427 = arith.mulf %426, %318 : vector<2x32xf32>
    %cst_143 = arith.constant 0.899999976 : f32
    %428 = vector.broadcast %cst_143 : f32 to vector<2x32xf32>
    %429 = arith.mulf %428, %425 : vector<2x32xf32>
    %430 = arith.addf %427, %429 : vector<2x32xf32>
    %cst_144 = arith.constant 1.000000e-01 : f32
    %431 = vector.broadcast %cst_144 : f32 to vector<2x32xf32>
    %432 = arith.mulf %431, %323 : vector<2x32xf32>
    %cst_145 = arith.constant 0.899999976 : f32
    %433 = vector.broadcast %cst_145 : f32 to vector<2x32xf32>
    %434 = arith.mulf %433, %423 : vector<2x32xf32>
    %435 = arith.addf %432, %434 : vector<2x32xf32>
    %cst_146 = arith.constant dense<0.000000e+00> : vector<2x128xf32>
    %436 = tpu.matmul %430, %25, %cst_146 {dimension_numbers = #tpu.dot_dimension_numbers<[1], [0], [0], [1], [0, 0, 1, 1], [], []>} : vector<2x32xf32>, vector<32x128xf32>, vector<2x128xf32> -> vector<2x128xf32>
    %cst_147 = arith.constant dense<0.000000e+00> : vector<2x128xf32>
    %437 = tpu.matmul %358, %26, %cst_147 {dimension_numbers = #tpu.dot_dimension_numbers<[1], [0], [0], [1], [0, 0, 1, 1], [], []>} : vector<2x32xf32>, vector<32x128xf32>, vector<2x128xf32> -> vector<2x128xf32>
    %438 = arith.addf %436, %437 : vector<2x128xf32>
    %439 = vector.broadcast %27 : vector<1x128xf32> to vector<2x128xf32>
    %440 = arith.addf %438, %439 : vector<2x128xf32>
    %441 = vector.extract_strided_slice %440 {offsets = [0, 0], sizes = [2, 32], strides = [1, 1]} : vector<2x128xf32> to vector<2x32xf32>
    %442 = arith.negf %441 : vector<2x32xf32>
    %443 = math.exp %442 : vector<2x32xf32>
    %cst_148 = arith.constant 1.000000e+00 : f32
    %444 = vector.broadcast %cst_148 : f32 to vector<2x32xf32>
    %445 = arith.addf %444, %443 : vector<2x32xf32>
    %446 = arith.divf %444, %445 : vector<2x32xf32>
    %447 = vector.extract_strided_slice %440 {offsets = [0, 32], sizes = [2, 32], strides = [1, 1]} : vector<2x128xf32> to vector<2x32xf32>
    %448 = arith.negf %447 : vector<2x32xf32>
    %449 = math.exp %448 : vector<2x32xf32>
    %cst_149 = arith.constant 1.000000e+00 : f32
    %450 = vector.broadcast %cst_149 : f32 to vector<2x32xf32>
    %451 = arith.addf %450, %449 : vector<2x32xf32>
    %452 = arith.divf %450, %451 : vector<2x32xf32>
    %453 = vector.extract_strided_slice %440 {offsets = [0, 64], sizes = [2, 32], strides = [1, 1]} : vector<2x128xf32> to vector<2x32xf32>
    %454 = math.tanh %453 : vector<2x32xf32>
    %455 = vector.extract_strided_slice %440 {offsets = [0, 96], sizes = [2, 32], strides = [1, 1]} : vector<2x128xf32> to vector<2x32xf32>
    %456 = arith.negf %455 : vector<2x32xf32>
    %457 = math.exp %456 : vector<2x32xf32>
    %cst_150 = arith.constant 1.000000e+00 : f32
    %458 = vector.broadcast %cst_150 : f32 to vector<2x32xf32>
    %459 = arith.addf %458, %457 : vector<2x32xf32>
    %460 = arith.divf %458, %459 : vector<2x32xf32>
    %461 = arith.mulf %452, %363 : vector<2x32xf32>
    %462 = arith.mulf %446, %454 : vector<2x32xf32>
    %463 = arith.addf %461, %462 : vector<2x32xf32>
    %464 = math.tanh %463 : vector<2x32xf32>
    %465 = arith.mulf %460, %464 : vector<2x32xf32>
    %cst_151 = arith.constant 1.000000e-01 : f32
    %466 = vector.broadcast %cst_151 : f32 to vector<2x32xf32>
    %467 = arith.mulf %466, %358 : vector<2x32xf32>
    %cst_152 = arith.constant 0.899999976 : f32
    %468 = vector.broadcast %cst_152 : f32 to vector<2x32xf32>
    %469 = arith.mulf %468, %465 : vector<2x32xf32>
    %470 = arith.addf %467, %469 : vector<2x32xf32>
    %cst_153 = arith.constant 1.000000e-01 : f32
    %471 = vector.broadcast %cst_153 : f32 to vector<2x32xf32>
    %472 = arith.mulf %471, %363 : vector<2x32xf32>
    %cst_154 = arith.constant 0.899999976 : f32
    %473 = vector.broadcast %cst_154 : f32 to vector<2x32xf32>
    %474 = arith.mulf %473, %463 : vector<2x32xf32>
    %475 = arith.addf %472, %474 : vector<2x32xf32>
    %cst_155 = arith.constant dense<0.000000e+00> : vector<2x9xf32>
    %476 = tpu.matmul %470, %29, %cst_155 {dimension_numbers = #tpu.dot_dimension_numbers<[1], [0], [0], [1], [0, 0, 1, 1], [], []>} : vector<2x32xf32>, vector<32x9xf32>, vector<2x9xf32> -> vector<2x9xf32>
    %cst_156 = arith.constant dense<0.000000e+00> : vector<2x9xf32>
    %477 = tpu.matmul %395, %30, %cst_156 {dimension_numbers = #tpu.dot_dimension_numbers<[1], [0], [0], [1], [0, 0, 1, 1], [], []>} : vector<2x32xf32>, vector<32x9xf32>, vector<2x9xf32> -> vector<2x9xf32>
    %478 = arith.addf %476, %477 : vector<2x9xf32>
    %479 = vector.broadcast %31 : vector<1x9xf32> to vector<2x9xf32>
    %480 = arith.addf %478, %479 : vector<2x9xf32>
    %c3 = arith.constant 3 : index
    %c0_157 = arith.constant 0 : index
    %c0_158 = arith.constant 0 : index
    %481 = vector.load %arg23[%c3, %c0_157, %c0_158] : memref<8x2x9xf32, #tpu.memory_space<vmem>>, vector<1x2x9xf32>
    %482 = vector.shape_cast %481 : vector<1x2x9xf32> to vector<2x9xf32>
    %483 = vector.shape_cast %480 : vector<2x9xf32> to vector<1x2x9xf32>
    tpu.vector_store %arg23[%c3, %c0_157, %c0_158], %483 {strides = array<i32>} : memref<8x2x9xf32, #tpu.memory_space<vmem>>, vector<1x2x9xf32>,
    %cst_159 = arith.constant dense<0.000000e+00> : vector<2x16xf32>
    %484 = tpu.matmul %430, %28, %cst_159 {dimension_numbers = #tpu.dot_dimension_numbers<[1], [0], [0], [1], [0, 0, 1, 1], [], []>} : vector<2x32xf32>, vector<32x16xf32>, vector<2x16xf32> -> vector<2x16xf32>
    %485 = vector.shape_cast %484 : vector<2x16xf32> to vector<2x1x16xf32>
    %486 = vector.broadcast %485 : vector<2x1x16xf32> to vector<2x8x16xf32>
    %487 = arith.addf %8, %486 : vector<2x8x16xf32>
    %488 = math.tanh %487 : vector<2x8x16xf32>
    %489 = vector.shape_cast %4 : vector<1x16xf32> to vector<1x1x16xf32>
    %490 = vector.broadcast %489 : vector<1x1x16xf32> to vector<2x8x16xf32>
    %491 = arith.mulf %488, %490 : vector<2x8x16xf32>
    %cst_160 = arith.constant dense<0.000000e+00> : vector<2x8xf32>
    %492 = vector.multi_reduction <add>, %491, %cst_160 [2] : vector<2x8x16xf32> to vector<2x8xf32>
    %cst_161 = arith.constant -1.000000e+30 : f32
    %493 = vector.broadcast %cst_161 : f32 to vector<2x8xf32>
    %494 = arith.select %3, %492, %493 : vector<2x8xi1>, vector<2x8xf32>
    %cst_162 = arith.constant dense<0xFF800000> : vector<2xf32>
    %495 = vector.multi_reduction <maximumf>, %494, %cst_162 [1] : vector<2x8xf32> to vector<2xf32>
    %496 = vector.shape_cast %495 : vector<2xf32> to vector<2x1xf32>
    %497 = vector.broadcast %496 : vector<2x1xf32> to vector<2x8xf32>
    %498 = arith.subf %494, %497 : vector<2x8xf32>
    %499 = math.exp %498 : vector<2x8xf32>
    %cst_163 = arith.constant dense<0.000000e+00> : vector<2xf32>
    %500 = vector.multi_reduction <add>, %499, %cst_163 [1] : vector<2x8xf32> to vector<2xf32>
    %501 = vector.shape_cast %500 : vector<2xf32> to vector<2x1xf32>
    %502 = vector.broadcast %501 : vector<2x1xf32> to vector<2x8xf32>
    %503 = arith.divf %499, %502 : vector<2x8xf32>
    %504 = vector.shape_cast %503 : vector<2x8xf32> to vector<2x8x1xf32>
    %505 = vector.broadcast %504 : vector<2x8x1xf32> to vector<2x8x32xf32>
    %506 = arith.mulf %505, %0 : vector<2x8x32xf32>
    %cst_164 = arith.constant dense<0.000000e+00> : vector<2x32xf32>
    %507 = vector.multi_reduction <add>, %506, %cst_164 [1] : vector<2x8x32xf32> to vector<2x32xf32>
    %cst_165 = arith.constant dense<0.000000e+00> : vector<2x128xf32>
    %508 = tpu.matmul %507, %23, %cst_165 {dimension_numbers = #tpu.dot_dimension_numbers<[1], [0], [0], [1], [0, 0, 1, 1], [], []>} : vector<2x32xf32>, vector<32x128xf32>, vector<2x128xf32> -> vector<2x128xf32>
    %cst_166 = arith.constant dense<0.000000e+00> : vector<2x128xf32>
    %509 = tpu.matmul %430, %24, %cst_166 {dimension_numbers = #tpu.dot_dimension_numbers<[1], [0], [0], [1], [0, 0, 1, 1], [], []>} : vector<2x32xf32>, vector<32x128xf32>, vector<2x128xf32> -> vector<2x128xf32>
    %510 = arith.addf %508, %509 : vector<2x128xf32>
    %511 = vector.extract_strided_slice %22 {offsets = [8, 0], sizes = [2, 128], strides = [1, 1]} : vector<16x128xf32> to vector<2x128xf32>
    %512 = arith.addf %510, %511 : vector<2x128xf32>
    %513 = vector.extract_strided_slice %512 {offsets = [0, 0], sizes = [2, 32], strides = [1, 1]} : vector<2x128xf32> to vector<2x32xf32>
    %514 = arith.negf %513 : vector<2x32xf32>
    %515 = math.exp %514 : vector<2x32xf32>
    %cst_167 = arith.constant 1.000000e+00 : f32
    %516 = vector.broadcast %cst_167 : f32 to vector<2x32xf32>
    %517 = arith.addf %516, %515 : vector<2x32xf32>
    %518 = arith.divf %516, %517 : vector<2x32xf32>
    %519 = vector.extract_strided_slice %512 {offsets = [0, 32], sizes = [2, 32], strides = [1, 1]} : vector<2x128xf32> to vector<2x32xf32>
    %520 = arith.negf %519 : vector<2x32xf32>
    %521 = math.exp %520 : vector<2x32xf32>
    %cst_168 = arith.constant 1.000000e+00 : f32
    %522 = vector.broadcast %cst_168 : f32 to vector<2x32xf32>
    %523 = arith.addf %522, %521 : vector<2x32xf32>
    %524 = arith.divf %522, %523 : vector<2x32xf32>
    %525 = vector.extract_strided_slice %512 {offsets = [0, 64], sizes = [2, 32], strides = [1, 1]} : vector<2x128xf32> to vector<2x32xf32>
    %526 = math.tanh %525 : vector<2x32xf32>
    %527 = vector.extract_strided_slice %512 {offsets = [0, 96], sizes = [2, 32], strides = [1, 1]} : vector<2x128xf32> to vector<2x32xf32>
    %528 = arith.negf %527 : vector<2x32xf32>
    %529 = math.exp %528 : vector<2x32xf32>
    %cst_169 = arith.constant 1.000000e+00 : f32
    %530 = vector.broadcast %cst_169 : f32 to vector<2x32xf32>
    %531 = arith.addf %530, %529 : vector<2x32xf32>
    %532 = arith.divf %530, %531 : vector<2x32xf32>
    %533 = arith.mulf %524, %435 : vector<2x32xf32>
    %534 = arith.mulf %518, %526 : vector<2x32xf32>
    %535 = arith.addf %533, %534 : vector<2x32xf32>
    %536 = math.tanh %535 : vector<2x32xf32>
    %537 = arith.mulf %532, %536 : vector<2x32xf32>
    %cst_170 = arith.constant 1.000000e-01 : f32
    %538 = vector.broadcast %cst_170 : f32 to vector<2x32xf32>
    %539 = arith.mulf %538, %430 : vector<2x32xf32>
    %cst_171 = arith.constant 0.899999976 : f32
    %540 = vector.broadcast %cst_171 : f32 to vector<2x32xf32>
    %541 = arith.mulf %540, %537 : vector<2x32xf32>
    %542 = arith.addf %539, %541 : vector<2x32xf32>
    %cst_172 = arith.constant 1.000000e-01 : f32
    %543 = vector.broadcast %cst_172 : f32 to vector<2x32xf32>
    %544 = arith.mulf %543, %435 : vector<2x32xf32>
    %cst_173 = arith.constant 0.899999976 : f32
    %545 = vector.broadcast %cst_173 : f32 to vector<2x32xf32>
    %546 = arith.mulf %545, %535 : vector<2x32xf32>
    %547 = arith.addf %544, %546 : vector<2x32xf32>
    %cst_174 = arith.constant dense<0.000000e+00> : vector<2x128xf32>
    %548 = tpu.matmul %542, %25, %cst_174 {dimension_numbers = #tpu.dot_dimension_numbers<[1], [0], [0], [1], [0, 0, 1, 1], [], []>} : vector<2x32xf32>, vector<32x128xf32>, vector<2x128xf32> -> vector<2x128xf32>
    %cst_175 = arith.constant dense<0.000000e+00> : vector<2x128xf32>
    %549 = tpu.matmul %470, %26, %cst_175 {dimension_numbers = #tpu.dot_dimension_numbers<[1], [0], [0], [1], [0, 0, 1, 1], [], []>} : vector<2x32xf32>, vector<32x128xf32>, vector<2x128xf32> -> vector<2x128xf32>
    %550 = arith.addf %548, %549 : vector<2x128xf32>
    %551 = vector.broadcast %27 : vector<1x128xf32> to vector<2x128xf32>
    %552 = arith.addf %550, %551 : vector<2x128xf32>
    %553 = vector.extract_strided_slice %552 {offsets = [0, 0], sizes = [2, 32], strides = [1, 1]} : vector<2x128xf32> to vector<2x32xf32>
    %554 = arith.negf %553 : vector<2x32xf32>
    %555 = math.exp %554 : vector<2x32xf32>
    %cst_176 = arith.constant 1.000000e+00 : f32
    %556 = vector.broadcast %cst_176 : f32 to vector<2x32xf32>
    %557 = arith.addf %556, %555 : vector<2x32xf32>
    %558 = arith.divf %556, %557 : vector<2x32xf32>
    %559 = vector.extract_strided_slice %552 {offsets = [0, 32], sizes = [2, 32], strides = [1, 1]} : vector<2x128xf32> to vector<2x32xf32>
    %560 = arith.negf %559 : vector<2x32xf32>
    %561 = math.exp %560 : vector<2x32xf32>
    %cst_177 = arith.constant 1.000000e+00 : f32
    %562 = vector.broadcast %cst_177 : f32 to vector<2x32xf32>
    %563 = arith.addf %562, %561 : vector<2x32xf32>
    %564 = arith.divf %562, %563 : vector<2x32xf32>
    %565 = vector.extract_strided_slice %552 {offsets = [0, 64], sizes = [2, 32], strides = [1, 1]} : vector<2x128xf32> to vector<2x32xf32>
    %566 = math.tanh %565 : vector<2x32xf32>
    %567 = vector.extract_strided_slice %552 {offsets = [0, 96], sizes = [2, 32], strides = [1, 1]} : vector<2x128xf32> to vector<2x32xf32>
    %568 = arith.negf %567 : vector<2x32xf32>
    %569 = math.exp %568 : vector<2x32xf32>
    %cst_178 = arith.constant 1.000000e+00 : f32
    %570 = vector.broadcast %cst_178 : f32 to vector<2x32xf32>
    %571 = arith.addf %570, %569 : vector<2x32xf32>
    %572 = arith.divf %570, %571 : vector<2x32xf32>
    %573 = arith.mulf %564, %475 : vector<2x32xf32>
    %574 = arith.mulf %558, %566 : vector<2x32xf32>
    %575 = arith.addf %573, %574 : vector<2x32xf32>
    %576 = math.tanh %575 : vector<2x32xf32>
    %577 = arith.mulf %572, %576 : vector<2x32xf32>
    %cst_179 = arith.constant 1.000000e-01 : f32
    %578 = vector.broadcast %cst_179 : f32 to vector<2x32xf32>
    %579 = arith.mulf %578, %470 : vector<2x32xf32>
    %cst_180 = arith.constant 0.899999976 : f32
    %580 = vector.broadcast %cst_180 : f32 to vector<2x32xf32>
    %581 = arith.mulf %580, %577 : vector<2x32xf32>
    %582 = arith.addf %579, %581 : vector<2x32xf32>
    %cst_181 = arith.constant 1.000000e-01 : f32
    %583 = vector.broadcast %cst_181 : f32 to vector<2x32xf32>
    %584 = arith.mulf %583, %475 : vector<2x32xf32>
    %cst_182 = arith.constant 0.899999976 : f32
    %585 = vector.broadcast %cst_182 : f32 to vector<2x32xf32>
    %586 = arith.mulf %585, %575 : vector<2x32xf32>
    %587 = arith.addf %584, %586 : vector<2x32xf32>
    %cst_183 = arith.constant dense<0.000000e+00> : vector<2x9xf32>
    %588 = tpu.matmul %582, %29, %cst_183 {dimension_numbers = #tpu.dot_dimension_numbers<[1], [0], [0], [1], [0, 0, 1, 1], [], []>} : vector<2x32xf32>, vector<32x9xf32>, vector<2x9xf32> -> vector<2x9xf32>
    %cst_184 = arith.constant dense<0.000000e+00> : vector<2x9xf32>
    %589 = tpu.matmul %507, %30, %cst_184 {dimension_numbers = #tpu.dot_dimension_numbers<[1], [0], [0], [1], [0, 0, 1, 1], [], []>} : vector<2x32xf32>, vector<32x9xf32>, vector<2x9xf32> -> vector<2x9xf32>
    %590 = arith.addf %588, %589 : vector<2x9xf32>
    %591 = vector.broadcast %31 : vector<1x9xf32> to vector<2x9xf32>
    %592 = arith.addf %590, %591 : vector<2x9xf32>
    %c4 = arith.constant 4 : index
    %c0_185 = arith.constant 0 : index
    %c0_186 = arith.constant 0 : index
    %593 = vector.load %arg23[%c4, %c0_185, %c0_186] : memref<8x2x9xf32, #tpu.memory_space<vmem>>, vector<1x2x9xf32>
    %594 = vector.shape_cast %593 : vector<1x2x9xf32> to vector<2x9xf32>
    %595 = vector.shape_cast %592 : vector<2x9xf32> to vector<1x2x9xf32>
    tpu.vector_store %arg23[%c4, %c0_185, %c0_186], %595 {strides = array<i32>} : memref<8x2x9xf32, #tpu.memory_space<vmem>>, vector<1x2x9xf32>,
    %cst_187 = arith.constant dense<0.000000e+00> : vector<2x16xf32>
    %596 = tpu.matmul %542, %28, %cst_187 {dimension_numbers = #tpu.dot_dimension_numbers<[1], [0], [0], [1], [0, 0, 1, 1], [], []>} : vector<2x32xf32>, vector<32x16xf32>, vector<2x16xf32> -> vector<2x16xf32>
    %597 = vector.shape_cast %596 : vector<2x16xf32> to vector<2x1x16xf32>
    %598 = vector.broadcast %597 : vector<2x1x16xf32> to vector<2x8x16xf32>
    %599 = arith.addf %8, %598 : vector<2x8x16xf32>
    %600 = math.tanh %599 : vector<2x8x16xf32>
    %601 = vector.shape_cast %4 : vector<1x16xf32> to vector<1x1x16xf32>
    %602 = vector.broadcast %601 : vector<1x1x16xf32> to vector<2x8x16xf32>
    %603 = arith.mulf %600, %602 : vector<2x8x16xf32>
    %cst_188 = arith.constant dense<0.000000e+00> : vector<2x8xf32>
    %604 = vector.multi_reduction <add>, %603, %cst_188 [2] : vector<2x8x16xf32> to vector<2x8xf32>
    %cst_189 = arith.constant -1.000000e+30 : f32
    %605 = vector.broadcast %cst_189 : f32 to vector<2x8xf32>
    %606 = arith.select %3, %604, %605 : vector<2x8xi1>, vector<2x8xf32>
    %cst_190 = arith.constant dense<0xFF800000> : vector<2xf32>
    %607 = vector.multi_reduction <maximumf>, %606, %cst_190 [1] : vector<2x8xf32> to vector<2xf32>
    %608 = vector.shape_cast %607 : vector<2xf32> to vector<2x1xf32>
    %609 = vector.broadcast %608 : vector<2x1xf32> to vector<2x8xf32>
    %610 = arith.subf %606, %609 : vector<2x8xf32>
    %611 = math.exp %610 : vector<2x8xf32>
    %cst_191 = arith.constant dense<0.000000e+00> : vector<2xf32>
    %612 = vector.multi_reduction <add>, %611, %cst_191 [1] : vector<2x8xf32> to vector<2xf32>
    %613 = vector.shape_cast %612 : vector<2xf32> to vector<2x1xf32>
    %614 = vector.broadcast %613 : vector<2x1xf32> to vector<2x8xf32>
    %615 = arith.divf %611, %614 : vector<2x8xf32>
    %616 = vector.shape_cast %615 : vector<2x8xf32> to vector<2x8x1xf32>
    %617 = vector.broadcast %616 : vector<2x8x1xf32> to vector<2x8x32xf32>
    %618 = arith.mulf %617, %0 : vector<2x8x32xf32>
    %cst_192 = arith.constant dense<0.000000e+00> : vector<2x32xf32>
    %619 = vector.multi_reduction <add>, %618, %cst_192 [1] : vector<2x8x32xf32> to vector<2x32xf32>
    %cst_193 = arith.constant dense<0.000000e+00> : vector<2x128xf32>
    %620 = tpu.matmul %619, %23, %cst_193 {dimension_numbers = #tpu.dot_dimension_numbers<[1], [0], [0], [1], [0, 0, 1, 1], [], []>} : vector<2x32xf32>, vector<32x128xf32>, vector<2x128xf32> -> vector<2x128xf32>
    %cst_194 = arith.constant dense<0.000000e+00> : vector<2x128xf32>
    %621 = tpu.matmul %542, %24, %cst_194 {dimension_numbers = #tpu.dot_dimension_numbers<[1], [0], [0], [1], [0, 0, 1, 1], [], []>} : vector<2x32xf32>, vector<32x128xf32>, vector<2x128xf32> -> vector<2x128xf32>
    %622 = arith.addf %620, %621 : vector<2x128xf32>
    %623 = vector.extract_strided_slice %22 {offsets = [10, 0], sizes = [2, 128], strides = [1, 1]} : vector<16x128xf32> to vector<2x128xf32>
    %624 = arith.addf %622, %623 : vector<2x128xf32>
    %625 = vector.extract_strided_slice %624 {offsets = [0, 0], sizes = [2, 32], strides = [1, 1]} : vector<2x128xf32> to vector<2x32xf32>
    %626 = arith.negf %625 : vector<2x32xf32>
    %627 = math.exp %626 : vector<2x32xf32>
    %cst_195 = arith.constant 1.000000e+00 : f32
    %628 = vector.broadcast %cst_195 : f32 to vector<2x32xf32>
    %629 = arith.addf %628, %627 : vector<2x32xf32>
    %630 = arith.divf %628, %629 : vector<2x32xf32>
    %631 = vector.extract_strided_slice %624 {offsets = [0, 32], sizes = [2, 32], strides = [1, 1]} : vector<2x128xf32> to vector<2x32xf32>
    %632 = arith.negf %631 : vector<2x32xf32>
    %633 = math.exp %632 : vector<2x32xf32>
    %cst_196 = arith.constant 1.000000e+00 : f32
    %634 = vector.broadcast %cst_196 : f32 to vector<2x32xf32>
    %635 = arith.addf %634, %633 : vector<2x32xf32>
    %636 = arith.divf %634, %635 : vector<2x32xf32>
    %637 = vector.extract_strided_slice %624 {offsets = [0, 64], sizes = [2, 32], strides = [1, 1]} : vector<2x128xf32> to vector<2x32xf32>
    %638 = math.tanh %637 : vector<2x32xf32>
    %639 = vector.extract_strided_slice %624 {offsets = [0, 96], sizes = [2, 32], strides = [1, 1]} : vector<2x128xf32> to vector<2x32xf32>
    %640 = arith.negf %639 : vector<2x32xf32>
    %641 = math.exp %640 : vector<2x32xf32>
    %cst_197 = arith.constant 1.000000e+00 : f32
    %642 = vector.broadcast %cst_197 : f32 to vector<2x32xf32>
    %643 = arith.addf %642, %641 : vector<2x32xf32>
    %644 = arith.divf %642, %643 : vector<2x32xf32>
    %645 = arith.mulf %636, %547 : vector<2x32xf32>
    %646 = arith.mulf %630, %638 : vector<2x32xf32>
    %647 = arith.addf %645, %646 : vector<2x32xf32>
    %648 = math.tanh %647 : vector<2x32xf32>
    %649 = arith.mulf %644, %648 : vector<2x32xf32>
    %cst_198 = arith.constant 1.000000e-01 : f32
    %650 = vector.broadcast %cst_198 : f32 to vector<2x32xf32>
    %651 = arith.mulf %650, %542 : vector<2x32xf32>
    %cst_199 = arith.constant 0.899999976 : f32
    %652 = vector.broadcast %cst_199 : f32 to vector<2x32xf32>
    %653 = arith.mulf %652, %649 : vector<2x32xf32>
    %654 = arith.addf %651, %653 : vector<2x32xf32>
    %cst_200 = arith.constant 1.000000e-01 : f32
    %655 = vector.broadcast %cst_200 : f32 to vector<2x32xf32>
    %656 = arith.mulf %655, %547 : vector<2x32xf32>
    %cst_201 = arith.constant 0.899999976 : f32
    %657 = vector.broadcast %cst_201 : f32 to vector<2x32xf32>
    %658 = arith.mulf %657, %647 : vector<2x32xf32>
    %659 = arith.addf %656, %658 : vector<2x32xf32>
    %cst_202 = arith.constant dense<0.000000e+00> : vector<2x128xf32>
    %660 = tpu.matmul %654, %25, %cst_202 {dimension_numbers = #tpu.dot_dimension_numbers<[1], [0], [0], [1], [0, 0, 1, 1], [], []>} : vector<2x32xf32>, vector<32x128xf32>, vector<2x128xf32> -> vector<2x128xf32>
    %cst_203 = arith.constant dense<0.000000e+00> : vector<2x128xf32>
    %661 = tpu.matmul %582, %26, %cst_203 {dimension_numbers = #tpu.dot_dimension_numbers<[1], [0], [0], [1], [0, 0, 1, 1], [], []>} : vector<2x32xf32>, vector<32x128xf32>, vector<2x128xf32> -> vector<2x128xf32>
    %662 = arith.addf %660, %661 : vector<2x128xf32>
    %663 = vector.broadcast %27 : vector<1x128xf32> to vector<2x128xf32>
    %664 = arith.addf %662, %663 : vector<2x128xf32>
    %665 = vector.extract_strided_slice %664 {offsets = [0, 0], sizes = [2, 32], strides = [1, 1]} : vector<2x128xf32> to vector<2x32xf32>
    %666 = arith.negf %665 : vector<2x32xf32>
    %667 = math.exp %666 : vector<2x32xf32>
    %cst_204 = arith.constant 1.000000e+00 : f32
    %668 = vector.broadcast %cst_204 : f32 to vector<2x32xf32>
    %669 = arith.addf %668, %667 : vector<2x32xf32>
    %670 = arith.divf %668, %669 : vector<2x32xf32>
    %671 = vector.extract_strided_slice %664 {offsets = [0, 32], sizes = [2, 32], strides = [1, 1]} : vector<2x128xf32> to vector<2x32xf32>
    %672 = arith.negf %671 : vector<2x32xf32>
    %673 = math.exp %672 : vector<2x32xf32>
    %cst_205 = arith.constant 1.000000e+00 : f32
    %674 = vector.broadcast %cst_205 : f32 to vector<2x32xf32>
    %675 = arith.addf %674, %673 : vector<2x32xf32>
    %676 = arith.divf %674, %675 : vector<2x32xf32>
    %677 = vector.extract_strided_slice %664 {offsets = [0, 64], sizes = [2, 32], strides = [1, 1]} : vector<2x128xf32> to vector<2x32xf32>
    %678 = math.tanh %677 : vector<2x32xf32>
    %679 = vector.extract_strided_slice %664 {offsets = [0, 96], sizes = [2, 32], strides = [1, 1]} : vector<2x128xf32> to vector<2x32xf32>
    %680 = arith.negf %679 : vector<2x32xf32>
    %681 = math.exp %680 : vector<2x32xf32>
    %cst_206 = arith.constant 1.000000e+00 : f32
    %682 = vector.broadcast %cst_206 : f32 to vector<2x32xf32>
    %683 = arith.addf %682, %681 : vector<2x32xf32>
    %684 = arith.divf %682, %683 : vector<2x32xf32>
    %685 = arith.mulf %676, %587 : vector<2x32xf32>
    %686 = arith.mulf %670, %678 : vector<2x32xf32>
    %687 = arith.addf %685, %686 : vector<2x32xf32>
    %688 = math.tanh %687 : vector<2x32xf32>
    %689 = arith.mulf %684, %688 : vector<2x32xf32>
    %cst_207 = arith.constant 1.000000e-01 : f32
    %690 = vector.broadcast %cst_207 : f32 to vector<2x32xf32>
    %691 = arith.mulf %690, %582 : vector<2x32xf32>
    %cst_208 = arith.constant 0.899999976 : f32
    %692 = vector.broadcast %cst_208 : f32 to vector<2x32xf32>
    %693 = arith.mulf %692, %689 : vector<2x32xf32>
    %694 = arith.addf %691, %693 : vector<2x32xf32>
    %cst_209 = arith.constant 1.000000e-01 : f32
    %695 = vector.broadcast %cst_209 : f32 to vector<2x32xf32>
    %696 = arith.mulf %695, %587 : vector<2x32xf32>
    %cst_210 = arith.constant 0.899999976 : f32
    %697 = vector.broadcast %cst_210 : f32 to vector<2x32xf32>
    %698 = arith.mulf %697, %687 : vector<2x32xf32>
    %699 = arith.addf %696, %698 : vector<2x32xf32>
    %cst_211 = arith.constant dense<0.000000e+00> : vector<2x9xf32>
    %700 = tpu.matmul %694, %29, %cst_211 {dimension_numbers = #tpu.dot_dimension_numbers<[1], [0], [0], [1], [0, 0, 1, 1], [], []>} : vector<2x32xf32>, vector<32x9xf32>, vector<2x9xf32> -> vector<2x9xf32>
    %cst_212 = arith.constant dense<0.000000e+00> : vector<2x9xf32>
    %701 = tpu.matmul %619, %30, %cst_212 {dimension_numbers = #tpu.dot_dimension_numbers<[1], [0], [0], [1], [0, 0, 1, 1], [], []>} : vector<2x32xf32>, vector<32x9xf32>, vector<2x9xf32> -> vector<2x9xf32>
    %702 = arith.addf %700, %701 : vector<2x9xf32>
    %703 = vector.broadcast %31 : vector<1x9xf32> to vector<2x9xf32>
    %704 = arith.addf %702, %703 : vector<2x9xf32>
    %c5 = arith.constant 5 : index
    %c0_213 = arith.constant 0 : index
    %c0_214 = arith.constant 0 : index
    %705 = vector.load %arg23[%c5, %c0_213, %c0_214] : memref<8x2x9xf32, #tpu.memory_space<vmem>>, vector<1x2x9xf32>
    %706 = vector.shape_cast %705 : vector<1x2x9xf32> to vector<2x9xf32>
    %707 = vector.shape_cast %704 : vector<2x9xf32> to vector<1x2x9xf32>
    tpu.vector_store %arg23[%c5, %c0_213, %c0_214], %707 {strides = array<i32>} : memref<8x2x9xf32, #tpu.memory_space<vmem>>, vector<1x2x9xf32>,
    %cst_215 = arith.constant dense<0.000000e+00> : vector<2x16xf32>
    %708 = tpu.matmul %654, %28, %cst_215 {dimension_numbers = #tpu.dot_dimension_numbers<[1], [0], [0], [1], [0, 0, 1, 1], [], []>} : vector<2x32xf32>, vector<32x16xf32>, vector<2x16xf32> -> vector<2x16xf32>
    %709 = vector.shape_cast %708 : vector<2x16xf32> to vector<2x1x16xf32>
    %710 = vector.broadcast %709 : vector<2x1x16xf32> to vector<2x8x16xf32>
    %711 = arith.addf %8, %710 : vector<2x8x16xf32>
    %712 = math.tanh %711 : vector<2x8x16xf32>
    %713 = vector.shape_cast %4 : vector<1x16xf32> to vector<1x1x16xf32>
    %714 = vector.broadcast %713 : vector<1x1x16xf32> to vector<2x8x16xf32>
    %715 = arith.mulf %712, %714 : vector<2x8x16xf32>
    %cst_216 = arith.constant dense<0.000000e+00> : vector<2x8xf32>
    %716 = vector.multi_reduction <add>, %715, %cst_216 [2] : vector<2x8x16xf32> to vector<2x8xf32>
    %cst_217 = arith.constant -1.000000e+30 : f32
    %717 = vector.broadcast %cst_217 : f32 to vector<2x8xf32>
    %718 = arith.select %3, %716, %717 : vector<2x8xi1>, vector<2x8xf32>
    %cst_218 = arith.constant dense<0xFF800000> : vector<2xf32>
    %719 = vector.multi_reduction <maximumf>, %718, %cst_218 [1] : vector<2x8xf32> to vector<2xf32>
    %720 = vector.shape_cast %719 : vector<2xf32> to vector<2x1xf32>
    %721 = vector.broadcast %720 : vector<2x1xf32> to vector<2x8xf32>
    %722 = arith.subf %718, %721 : vector<2x8xf32>
    %723 = math.exp %722 : vector<2x8xf32>
    %cst_219 = arith.constant dense<0.000000e+00> : vector<2xf32>
    %724 = vector.multi_reduction <add>, %723, %cst_219 [1] : vector<2x8xf32> to vector<2xf32>
    %725 = vector.shape_cast %724 : vector<2xf32> to vector<2x1xf32>
    %726 = vector.broadcast %725 : vector<2x1xf32> to vector<2x8xf32>
    %727 = arith.divf %723, %726 : vector<2x8xf32>
    %728 = vector.shape_cast %727 : vector<2x8xf32> to vector<2x8x1xf32>
    %729 = vector.broadcast %728 : vector<2x8x1xf32> to vector<2x8x32xf32>
    %730 = arith.mulf %729, %0 : vector<2x8x32xf32>
    %cst_220 = arith.constant dense<0.000000e+00> : vector<2x32xf32>
    %731 = vector.multi_reduction <add>, %730, %cst_220 [1] : vector<2x8x32xf32> to vector<2x32xf32>
    %cst_221 = arith.constant dense<0.000000e+00> : vector<2x128xf32>
    %732 = tpu.matmul %731, %23, %cst_221 {dimension_numbers = #tpu.dot_dimension_numbers<[1], [0], [0], [1], [0, 0, 1, 1], [], []>} : vector<2x32xf32>, vector<32x128xf32>, vector<2x128xf32> -> vector<2x128xf32>
    %cst_222 = arith.constant dense<0.000000e+00> : vector<2x128xf32>
    %733 = tpu.matmul %654, %24, %cst_222 {dimension_numbers = #tpu.dot_dimension_numbers<[1], [0], [0], [1], [0, 0, 1, 1], [], []>} : vector<2x32xf32>, vector<32x128xf32>, vector<2x128xf32> -> vector<2x128xf32>
    %734 = arith.addf %732, %733 : vector<2x128xf32>
    %735 = vector.extract_strided_slice %22 {offsets = [12, 0], sizes = [2, 128], strides = [1, 1]} : vector<16x128xf32> to vector<2x128xf32>
    %736 = arith.addf %734, %735 : vector<2x128xf32>
    %737 = vector.extract_strided_slice %736 {offsets = [0, 0], sizes = [2, 32], strides = [1, 1]} : vector<2x128xf32> to vector<2x32xf32>
    %738 = arith.negf %737 : vector<2x32xf32>
    %739 = math.exp %738 : vector<2x32xf32>
    %cst_223 = arith.constant 1.000000e+00 : f32
    %740 = vector.broadcast %cst_223 : f32 to vector<2x32xf32>
    %741 = arith.addf %740, %739 : vector<2x32xf32>
    %742 = arith.divf %740, %741 : vector<2x32xf32>
    %743 = vector.extract_strided_slice %736 {offsets = [0, 32], sizes = [2, 32], strides = [1, 1]} : vector<2x128xf32> to vector<2x32xf32>
    %744 = arith.negf %743 : vector<2x32xf32>
    %745 = math.exp %744 : vector<2x32xf32>
    %cst_224 = arith.constant 1.000000e+00 : f32
    %746 = vector.broadcast %cst_224 : f32 to vector<2x32xf32>
    %747 = arith.addf %746, %745 : vector<2x32xf32>
    %748 = arith.divf %746, %747 : vector<2x32xf32>
    %749 = vector.extract_strided_slice %736 {offsets = [0, 64], sizes = [2, 32], strides = [1, 1]} : vector<2x128xf32> to vector<2x32xf32>
    %750 = math.tanh %749 : vector<2x32xf32>
    %751 = vector.extract_strided_slice %736 {offsets = [0, 96], sizes = [2, 32], strides = [1, 1]} : vector<2x128xf32> to vector<2x32xf32>
    %752 = arith.negf %751 : vector<2x32xf32>
    %753 = math.exp %752 : vector<2x32xf32>
    %cst_225 = arith.constant 1.000000e+00 : f32
    %754 = vector.broadcast %cst_225 : f32 to vector<2x32xf32>
    %755 = arith.addf %754, %753 : vector<2x32xf32>
    %756 = arith.divf %754, %755 : vector<2x32xf32>
    %757 = arith.mulf %748, %659 : vector<2x32xf32>
    %758 = arith.mulf %742, %750 : vector<2x32xf32>
    %759 = arith.addf %757, %758 : vector<2x32xf32>
    %760 = math.tanh %759 : vector<2x32xf32>
    %761 = arith.mulf %756, %760 : vector<2x32xf32>
    %cst_226 = arith.constant 1.000000e-01 : f32
    %762 = vector.broadcast %cst_226 : f32 to vector<2x32xf32>
    %763 = arith.mulf %762, %654 : vector<2x32xf32>
    %cst_227 = arith.constant 0.899999976 : f32
    %764 = vector.broadcast %cst_227 : f32 to vector<2x32xf32>
    %765 = arith.mulf %764, %761 : vector<2x32xf32>
    %766 = arith.addf %763, %765 : vector<2x32xf32>
    %cst_228 = arith.constant 1.000000e-01 : f32
    %767 = vector.broadcast %cst_228 : f32 to vector<2x32xf32>
    %768 = arith.mulf %767, %659 : vector<2x32xf32>
    %cst_229 = arith.constant 0.899999976 : f32
    %769 = vector.broadcast %cst_229 : f32 to vector<2x32xf32>
    %770 = arith.mulf %769, %759 : vector<2x32xf32>
    %771 = arith.addf %768, %770 : vector<2x32xf32>
    %cst_230 = arith.constant dense<0.000000e+00> : vector<2x128xf32>
    %772 = tpu.matmul %766, %25, %cst_230 {dimension_numbers = #tpu.dot_dimension_numbers<[1], [0], [0], [1], [0, 0, 1, 1], [], []>} : vector<2x32xf32>, vector<32x128xf32>, vector<2x128xf32> -> vector<2x128xf32>
    %cst_231 = arith.constant dense<0.000000e+00> : vector<2x128xf32>
    %773 = tpu.matmul %694, %26, %cst_231 {dimension_numbers = #tpu.dot_dimension_numbers<[1], [0], [0], [1], [0, 0, 1, 1], [], []>} : vector<2x32xf32>, vector<32x128xf32>, vector<2x128xf32> -> vector<2x128xf32>
    %774 = arith.addf %772, %773 : vector<2x128xf32>
    %775 = vector.broadcast %27 : vector<1x128xf32> to vector<2x128xf32>
    %776 = arith.addf %774, %775 : vector<2x128xf32>
    %777 = vector.extract_strided_slice %776 {offsets = [0, 0], sizes = [2, 32], strides = [1, 1]} : vector<2x128xf32> to vector<2x32xf32>
    %778 = arith.negf %777 : vector<2x32xf32>
    %779 = math.exp %778 : vector<2x32xf32>
    %cst_232 = arith.constant 1.000000e+00 : f32
    %780 = vector.broadcast %cst_232 : f32 to vector<2x32xf32>
    %781 = arith.addf %780, %779 : vector<2x32xf32>
    %782 = arith.divf %780, %781 : vector<2x32xf32>
    %783 = vector.extract_strided_slice %776 {offsets = [0, 32], sizes = [2, 32], strides = [1, 1]} : vector<2x128xf32> to vector<2x32xf32>
    %784 = arith.negf %783 : vector<2x32xf32>
    %785 = math.exp %784 : vector<2x32xf32>
    %cst_233 = arith.constant 1.000000e+00 : f32
    %786 = vector.broadcast %cst_233 : f32 to vector<2x32xf32>
    %787 = arith.addf %786, %785 : vector<2x32xf32>
    %788 = arith.divf %786, %787 : vector<2x32xf32>
    %789 = vector.extract_strided_slice %776 {offsets = [0, 64], sizes = [2, 32], strides = [1, 1]} : vector<2x128xf32> to vector<2x32xf32>
    %790 = math.tanh %789 : vector<2x32xf32>
    %791 = vector.extract_strided_slice %776 {offsets = [0, 96], sizes = [2, 32], strides = [1, 1]} : vector<2x128xf32> to vector<2x32xf32>
    %792 = arith.negf %791 : vector<2x32xf32>
    %793 = math.exp %792 : vector<2x32xf32>
    %cst_234 = arith.constant 1.000000e+00 : f32
    %794 = vector.broadcast %cst_234 : f32 to vector<2x32xf32>
    %795 = arith.addf %794, %793 : vector<2x32xf32>
    %796 = arith.divf %794, %795 : vector<2x32xf32>
    %797 = arith.mulf %788, %699 : vector<2x32xf32>
    %798 = arith.mulf %782, %790 : vector<2x32xf32>
    %799 = arith.addf %797, %798 : vector<2x32xf32>
    %800 = math.tanh %799 : vector<2x32xf32>
    %801 = arith.mulf %796, %800 : vector<2x32xf32>
    %cst_235 = arith.constant 1.000000e-01 : f32
    %802 = vector.broadcast %cst_235 : f32 to vector<2x32xf32>
    %803 = arith.mulf %802, %694 : vector<2x32xf32>
    %cst_236 = arith.constant 0.899999976 : f32
    %804 = vector.broadcast %cst_236 : f32 to vector<2x32xf32>
    %805 = arith.mulf %804, %801 : vector<2x32xf32>
    %806 = arith.addf %803, %805 : vector<2x32xf32>
    %cst_237 = arith.constant 1.000000e-01 : f32
    %807 = vector.broadcast %cst_237 : f32 to vector<2x32xf32>
    %808 = arith.mulf %807, %699 : vector<2x32xf32>
    %cst_238 = arith.constant 0.899999976 : f32
    %809 = vector.broadcast %cst_238 : f32 to vector<2x32xf32>
    %810 = arith.mulf %809, %799 : vector<2x32xf32>
    %811 = arith.addf %808, %810 : vector<2x32xf32>
    %cst_239 = arith.constant dense<0.000000e+00> : vector<2x9xf32>
    %812 = tpu.matmul %806, %29, %cst_239 {dimension_numbers = #tpu.dot_dimension_numbers<[1], [0], [0], [1], [0, 0, 1, 1], [], []>} : vector<2x32xf32>, vector<32x9xf32>, vector<2x9xf32> -> vector<2x9xf32>
    %cst_240 = arith.constant dense<0.000000e+00> : vector<2x9xf32>
    %813 = tpu.matmul %731, %30, %cst_240 {dimension_numbers = #tpu.dot_dimension_numbers<[1], [0], [0], [1], [0, 0, 1, 1], [], []>} : vector<2x32xf32>, vector<32x9xf32>, vector<2x9xf32> -> vector<2x9xf32>
    %814 = arith.addf %812, %813 : vector<2x9xf32>
    %815 = vector.broadcast %31 : vector<1x9xf32> to vector<2x9xf32>
    %816 = arith.addf %814, %815 : vector<2x9xf32>
    %c6 = arith.constant 6 : index
    %c0_241 = arith.constant 0 : index
    %c0_242 = arith.constant 0 : index
    %817 = vector.load %arg23[%c6, %c0_241, %c0_242] : memref<8x2x9xf32, #tpu.memory_space<vmem>>, vector<1x2x9xf32>
    %818 = vector.shape_cast %817 : vector<1x2x9xf32> to vector<2x9xf32>
    %819 = vector.shape_cast %816 : vector<2x9xf32> to vector<1x2x9xf32>
    tpu.vector_store %arg23[%c6, %c0_241, %c0_242], %819 {strides = array<i32>} : memref<8x2x9xf32, #tpu.memory_space<vmem>>, vector<1x2x9xf32>,
    %cst_243 = arith.constant dense<0.000000e+00> : vector<2x16xf32>
    %820 = tpu.matmul %766, %28, %cst_243 {dimension_numbers = #tpu.dot_dimension_numbers<[1], [0], [0], [1], [0, 0, 1, 1], [], []>} : vector<2x32xf32>, vector<32x16xf32>, vector<2x16xf32> -> vector<2x16xf32>
    %821 = vector.shape_cast %820 : vector<2x16xf32> to vector<2x1x16xf32>
    %822 = vector.broadcast %821 : vector<2x1x16xf32> to vector<2x8x16xf32>
    %823 = arith.addf %8, %822 : vector<2x8x16xf32>
    %824 = math.tanh %823 : vector<2x8x16xf32>
    %825 = vector.shape_cast %4 : vector<1x16xf32> to vector<1x1x16xf32>
    %826 = vector.broadcast %825 : vector<1x1x16xf32> to vector<2x8x16xf32>
    %827 = arith.mulf %824, %826 : vector<2x8x16xf32>
    %cst_244 = arith.constant dense<0.000000e+00> : vector<2x8xf32>
    %828 = vector.multi_reduction <add>, %827, %cst_244 [2] : vector<2x8x16xf32> to vector<2x8xf32>
    %cst_245 = arith.constant -1.000000e+30 : f32
    %829 = vector.broadcast %cst_245 : f32 to vector<2x8xf32>
    %830 = arith.select %3, %828, %829 : vector<2x8xi1>, vector<2x8xf32>
    %cst_246 = arith.constant dense<0xFF800000> : vector<2xf32>
    %831 = vector.multi_reduction <maximumf>, %830, %cst_246 [1] : vector<2x8xf32> to vector<2xf32>
    %832 = vector.shape_cast %831 : vector<2xf32> to vector<2x1xf32>
    %833 = vector.broadcast %832 : vector<2x1xf32> to vector<2x8xf32>
    %834 = arith.subf %830, %833 : vector<2x8xf32>
    %835 = math.exp %834 : vector<2x8xf32>
    %cst_247 = arith.constant dense<0.000000e+00> : vector<2xf32>
    %836 = vector.multi_reduction <add>, %835, %cst_247 [1] : vector<2x8xf32> to vector<2xf32>
    %837 = vector.shape_cast %836 : vector<2xf32> to vector<2x1xf32>
    %838 = vector.broadcast %837 : vector<2x1xf32> to vector<2x8xf32>
    %839 = arith.divf %835, %838 : vector<2x8xf32>
    %840 = vector.shape_cast %839 : vector<2x8xf32> to vector<2x8x1xf32>
    %841 = vector.broadcast %840 : vector<2x8x1xf32> to vector<2x8x32xf32>
    %842 = arith.mulf %841, %0 : vector<2x8x32xf32>
    %cst_248 = arith.constant dense<0.000000e+00> : vector<2x32xf32>
    %843 = vector.multi_reduction <add>, %842, %cst_248 [1] : vector<2x8x32xf32> to vector<2x32xf32>
    %cst_249 = arith.constant dense<0.000000e+00> : vector<2x128xf32>
    %844 = tpu.matmul %843, %23, %cst_249 {dimension_numbers = #tpu.dot_dimension_numbers<[1], [0], [0], [1], [0, 0, 1, 1], [], []>} : vector<2x32xf32>, vector<32x128xf32>, vector<2x128xf32> -> vector<2x128xf32>
    %cst_250 = arith.constant dense<0.000000e+00> : vector<2x128xf32>
    %845 = tpu.matmul %766, %24, %cst_250 {dimension_numbers = #tpu.dot_dimension_numbers<[1], [0], [0], [1], [0, 0, 1, 1], [], []>} : vector<2x32xf32>, vector<32x128xf32>, vector<2x128xf32> -> vector<2x128xf32>
    %846 = arith.addf %844, %845 : vector<2x128xf32>
    %847 = vector.extract_strided_slice %22 {offsets = [14, 0], sizes = [2, 128], strides = [1, 1]} : vector<16x128xf32> to vector<2x128xf32>
    %848 = arith.addf %846, %847 : vector<2x128xf32>
    %849 = vector.extract_strided_slice %848 {offsets = [0, 0], sizes = [2, 32], strides = [1, 1]} : vector<2x128xf32> to vector<2x32xf32>
    %850 = arith.negf %849 : vector<2x32xf32>
    %851 = math.exp %850 : vector<2x32xf32>
    %cst_251 = arith.constant 1.000000e+00 : f32
    %852 = vector.broadcast %cst_251 : f32 to vector<2x32xf32>
    %853 = arith.addf %852, %851 : vector<2x32xf32>
    %854 = arith.divf %852, %853 : vector<2x32xf32>
    %855 = vector.extract_strided_slice %848 {offsets = [0, 32], sizes = [2, 32], strides = [1, 1]} : vector<2x128xf32> to vector<2x32xf32>
    %856 = arith.negf %855 : vector<2x32xf32>
    %857 = math.exp %856 : vector<2x32xf32>
    %cst_252 = arith.constant 1.000000e+00 : f32
    %858 = vector.broadcast %cst_252 : f32 to vector<2x32xf32>
    %859 = arith.addf %858, %857 : vector<2x32xf32>
    %860 = arith.divf %858, %859 : vector<2x32xf32>
    %861 = vector.extract_strided_slice %848 {offsets = [0, 64], sizes = [2, 32], strides = [1, 1]} : vector<2x128xf32> to vector<2x32xf32>
    %862 = math.tanh %861 : vector<2x32xf32>
    %863 = vector.extract_strided_slice %848 {offsets = [0, 96], sizes = [2, 32], strides = [1, 1]} : vector<2x128xf32> to vector<2x32xf32>
    %864 = arith.negf %863 : vector<2x32xf32>
    %865 = math.exp %864 : vector<2x32xf32>
    %cst_253 = arith.constant 1.000000e+00 : f32
    %866 = vector.broadcast %cst_253 : f32 to vector<2x32xf32>
    %867 = arith.addf %866, %865 : vector<2x32xf32>
    %868 = arith.divf %866, %867 : vector<2x32xf32>
    %869 = arith.mulf %860, %771 : vector<2x32xf32>
    %870 = arith.mulf %854, %862 : vector<2x32xf32>
    %871 = arith.addf %869, %870 : vector<2x32xf32>
    %872 = math.tanh %871 : vector<2x32xf32>
    %873 = arith.mulf %868, %872 : vector<2x32xf32>
    %cst_254 = arith.constant 1.000000e-01 : f32
    %874 = vector.broadcast %cst_254 : f32 to vector<2x32xf32>
    %875 = arith.mulf %874, %766 : vector<2x32xf32>
    %cst_255 = arith.constant 0.899999976 : f32
    %876 = vector.broadcast %cst_255 : f32 to vector<2x32xf32>
    %877 = arith.mulf %876, %873 : vector<2x32xf32>
    %878 = arith.addf %875, %877 : vector<2x32xf32>
    %cst_256 = arith.constant dense<0.000000e+00> : vector<2x128xf32>
    %879 = tpu.matmul %878, %25, %cst_256 {dimension_numbers = #tpu.dot_dimension_numbers<[1], [0], [0], [1], [0, 0, 1, 1], [], []>} : vector<2x32xf32>, vector<32x128xf32>, vector<2x128xf32> -> vector<2x128xf32>
    %cst_257 = arith.constant dense<0.000000e+00> : vector<2x128xf32>
    %880 = tpu.matmul %806, %26, %cst_257 {dimension_numbers = #tpu.dot_dimension_numbers<[1], [0], [0], [1], [0, 0, 1, 1], [], []>} : vector<2x32xf32>, vector<32x128xf32>, vector<2x128xf32> -> vector<2x128xf32>
    %881 = arith.addf %879, %880 : vector<2x128xf32>
    %882 = vector.broadcast %27 : vector<1x128xf32> to vector<2x128xf32>
    %883 = arith.addf %881, %882 : vector<2x128xf32>
    %884 = vector.extract_strided_slice %883 {offsets = [0, 0], sizes = [2, 32], strides = [1, 1]} : vector<2x128xf32> to vector<2x32xf32>
    %885 = arith.negf %884 : vector<2x32xf32>
    %886 = math.exp %885 : vector<2x32xf32>
    %cst_258 = arith.constant 1.000000e+00 : f32
    %887 = vector.broadcast %cst_258 : f32 to vector<2x32xf32>
    %888 = arith.addf %887, %886 : vector<2x32xf32>
    %889 = arith.divf %887, %888 : vector<2x32xf32>
    %890 = vector.extract_strided_slice %883 {offsets = [0, 32], sizes = [2, 32], strides = [1, 1]} : vector<2x128xf32> to vector<2x32xf32>
    %891 = arith.negf %890 : vector<2x32xf32>
    %892 = math.exp %891 : vector<2x32xf32>
    %cst_259 = arith.constant 1.000000e+00 : f32
    %893 = vector.broadcast %cst_259 : f32 to vector<2x32xf32>
    %894 = arith.addf %893, %892 : vector<2x32xf32>
    %895 = arith.divf %893, %894 : vector<2x32xf32>
    %896 = vector.extract_strided_slice %883 {offsets = [0, 64], sizes = [2, 32], strides = [1, 1]} : vector<2x128xf32> to vector<2x32xf32>
    %897 = math.tanh %896 : vector<2x32xf32>
    %898 = vector.extract_strided_slice %883 {offsets = [0, 96], sizes = [2, 32], strides = [1, 1]} : vector<2x128xf32> to vector<2x32xf32>
    %899 = arith.negf %898 : vector<2x32xf32>
    %900 = math.exp %899 : vector<2x32xf32>
    %cst_260 = arith.constant 1.000000e+00 : f32
    %901 = vector.broadcast %cst_260 : f32 to vector<2x32xf32>
    %902 = arith.addf %901, %900 : vector<2x32xf32>
    %903 = arith.divf %901, %902 : vector<2x32xf32>
    %904 = arith.mulf %895, %811 : vector<2x32xf32>
    %905 = arith.mulf %889, %897 : vector<2x32xf32>
    %906 = arith.addf %904, %905 : vector<2x32xf32>
    %907 = math.tanh %906 : vector<2x32xf32>
    %908 = arith.mulf %903, %907 : vector<2x32xf32>
    %cst_261 = arith.constant 1.000000e-01 : f32
    %909 = vector.broadcast %cst_261 : f32 to vector<2x32xf32>
    %910 = arith.mulf %909, %806 : vector<2x32xf32>
    %cst_262 = arith.constant 0.899999976 : f32
    %911 = vector.broadcast %cst_262 : f32 to vector<2x32xf32>
    %912 = arith.mulf %911, %908 : vector<2x32xf32>
    %913 = arith.addf %910, %912 : vector<2x32xf32>
    %cst_263 = arith.constant dense<0.000000e+00> : vector<2x9xf32>
    %914 = tpu.matmul %913, %29, %cst_263 {dimension_numbers = #tpu.dot_dimension_numbers<[1], [0], [0], [1], [0, 0, 1, 1], [], []>} : vector<2x32xf32>, vector<32x9xf32>, vector<2x9xf32> -> vector<2x9xf32>
    %cst_264 = arith.constant dense<0.000000e+00> : vector<2x9xf32>
    %915 = tpu.matmul %843, %30, %cst_264 {dimension_numbers = #tpu.dot_dimension_numbers<[1], [0], [0], [1], [0, 0, 1, 1], [], []>} : vector<2x32xf32>, vector<32x9xf32>, vector<2x9xf32> -> vector<2x9xf32>
    %916 = arith.addf %914, %915 : vector<2x9xf32>
    %917 = vector.broadcast %31 : vector<1x9xf32> to vector<2x9xf32>
    %918 = arith.addf %916, %917 : vector<2x9xf32>
    %c7 = arith.constant 7 : index
    %c0_265 = arith.constant 0 : index
    %c0_266 = arith.constant 0 : index
    %919 = vector.load %arg23[%c7, %c0_265, %c0_266] : memref<8x2x9xf32, #tpu.memory_space<vmem>>, vector<1x2x9xf32>
    %920 = vector.shape_cast %919 : vector<1x2x9xf32> to vector<2x9xf32>
    %921 = vector.shape_cast %918 : vector<2x9xf32> to vector<1x2x9xf32>
    tpu.vector_store %arg23[%c7, %c0_265, %c0_266], %921 {strides = array<i32>} : memref<8x2x9xf32, #tpu.memory_space<vmem>>, vector<1x2x9xf32>,
    %c0_267 = arith.constant 0 : index
    %c0_268 = arith.constant 0 : index
    %c0_269 = arith.constant 0 : index
    %922 = vector.load %arg23[%c0_267, %c0_268, %c0_269] : memref<8x2x9xf32, #tpu.memory_space<vmem>>, vector<8x2x9xf32>
    %923 = vector.extract_strided_slice %922 {offsets = [0, 0, 0], sizes = [8, 2, 8], strides = [1, 1, 1]} : vector<8x2x9xf32> to vector<8x2x8xf32>
    %cst_270 = arith.constant 0.000000e+00 : f32
    %924 = vector.broadcast %cst_270 : f32 to vector<12x2x8xf32>
    %c0_271 = arith.constant 0 : index
    %c0_272 = arith.constant 0 : index
    %c0_273 = arith.constant 0 : index
    %925 = vector.load %arg25[%c0_271, %c0_272, %c0_273] : memref<12x2x8xf32, #tpu.memory_space<vmem>>, vector<12x2x8xf32>
    tpu.vector_store %arg25[%c0_271, %c0_272, %c0_273], %924 {strides = array<i32>} : memref<12x2x8xf32, #tpu.memory_space<vmem>>, vector<12x2x8xf32>,
    %cst_274 = arith.constant 0.000000e+00 : f32
    %926 = vector.broadcast %cst_274 : f32 to vector<12x2x16xf32>
    %c0_275 = arith.constant 0 : index
    %c0_276 = arith.constant 0 : index
    %c0_277 = arith.constant 0 : index
    %927 = vector.load %arg26[%c0_275, %c0_276, %c0_277] : memref<12x2x16xf32, #tpu.memory_space<vmem>>, vector<12x2x16xf32>
    tpu.vector_store %arg26[%c0_275, %c0_276, %c0_277], %926 {strides = array<i32>} : memref<12x2x16xf32, #tpu.memory_space<vmem>>, vector<12x2x16xf32>,
    %c2_278 = arith.constant 2 : index
    %c0_279 = arith.constant 0 : index
    %c0_280 = arith.constant 0 : index
    %928 = vector.load %arg25[%c2_278, %c0_279, %c0_280] : memref<12x2x8xf32, #tpu.memory_space<vmem>>, vector<8x2x8xf32>
    tpu.vector_store %arg25[%c2_278, %c0_279, %c0_280], %923 {strides = array<i32>} : memref<12x2x8xf32, #tpu.memory_space<vmem>>, vector<8x2x8xf32>,
    %c0_281 = arith.constant 0 : index
    %c0_282 = arith.constant 0 : index
    %c0_283 = arith.constant 0 : index
    %929 = vector.load %arg18[%c0_281, %c0_282, %c0_283] : memref<5x8x16xf32, #tpu.memory_space<vmem>>, vector<5x8x16xf32>
    %cst_284 = arith.constant 0.000000e+00 : f32
    %930 = vector.broadcast %cst_284 : f32 to vector<16x16xf32>
    %c0_285 = arith.constant 0 : index
    %c0_286 = arith.constant 0 : index
    %c0_287 = arith.constant 0 : index
    %931 = vector.load %arg25[%c0_285, %c0_286, %c0_287] : memref<12x2x8xf32, #tpu.memory_space<vmem>>, vector<8x2x8xf32>
    %932 = vector.shape_cast %931 : vector<8x2x8xf32> to vector<16x8xf32>
    %933 = vector.extract_strided_slice %929 {offsets = [0, 0, 0], sizes = [1, 8, 16], strides = [1, 1, 1]} : vector<5x8x16xf32> to vector<1x8x16xf32>
    %934 = vector.shape_cast %933 : vector<1x8x16xf32> to vector<8x16xf32>
    %cst_288 = arith.constant dense<0.000000e+00> : vector<16x16xf32>
    %935 = tpu.matmul %932, %934, %cst_288 {dimension_numbers = #tpu.dot_dimension_numbers<[1], [0], [0], [1], [0, 0, 1, 1], [], []>} : vector<16x8xf32>, vector<8x16xf32>, vector<16x16xf32> -> vector<16x16xf32>
    %936 = arith.addf %930, %935 : vector<16x16xf32>
    %c1_289 = arith.constant 1 : index
    %c0_290 = arith.constant 0 : index
    %c0_291 = arith.constant 0 : index
    %937 = vector.load %arg25[%c1_289, %c0_290, %c0_291] : memref<12x2x8xf32, #tpu.memory_space<vmem>>, vector<8x2x8xf32>
    %938 = vector.shape_cast %937 : vector<8x2x8xf32> to vector<16x8xf32>
    %939 = vector.extract_strided_slice %929 {offsets = [1, 0, 0], sizes = [1, 8, 16], strides = [1, 1, 1]} : vector<5x8x16xf32> to vector<1x8x16xf32>
    %940 = vector.shape_cast %939 : vector<1x8x16xf32> to vector<8x16xf32>
    %cst_292 = arith.constant dense<0.000000e+00> : vector<16x16xf32>
    %941 = tpu.matmul %938, %940, %cst_292 {dimension_numbers = #tpu.dot_dimension_numbers<[1], [0], [0], [1], [0, 0, 1, 1], [], []>} : vector<16x8xf32>, vector<8x16xf32>, vector<16x16xf32> -> vector<16x16xf32>
    %942 = arith.addf %936, %941 : vector<16x16xf32>
    %c2_293 = arith.constant 2 : index
    %c0_294 = arith.constant 0 : index
    %c0_295 = arith.constant 0 : index
    %943 = vector.load %arg25[%c2_293, %c0_294, %c0_295] : memref<12x2x8xf32, #tpu.memory_space<vmem>>, vector<8x2x8xf32>
    %944 = vector.shape_cast %943 : vector<8x2x8xf32> to vector<16x8xf32>
    %945 = vector.extract_strided_slice %929 {offsets = [2, 0, 0], sizes = [1, 8, 16], strides = [1, 1, 1]} : vector<5x8x16xf32> to vector<1x8x16xf32>
    %946 = vector.shape_cast %945 : vector<1x8x16xf32> to vector<8x16xf32>
    %cst_296 = arith.constant dense<0.000000e+00> : vector<16x16xf32>
    %947 = tpu.matmul %944, %946, %cst_296 {dimension_numbers = #tpu.dot_dimension_numbers<[1], [0], [0], [1], [0, 0, 1, 1], [], []>} : vector<16x8xf32>, vector<8x16xf32>, vector<16x16xf32> -> vector<16x16xf32>
    %948 = arith.addf %942, %947 : vector<16x16xf32>
    %c3_297 = arith.constant 3 : index
    %c0_298 = arith.constant 0 : index
    %c0_299 = arith.constant 0 : index
    %949 = vector.load %arg25[%c3_297, %c0_298, %c0_299] : memref<12x2x8xf32, #tpu.memory_space<vmem>>, vector<8x2x8xf32>
    %950 = vector.shape_cast %949 : vector<8x2x8xf32> to vector<16x8xf32>
    %951 = vector.extract_strided_slice %929 {offsets = [3, 0, 0], sizes = [1, 8, 16], strides = [1, 1, 1]} : vector<5x8x16xf32> to vector<1x8x16xf32>
    %952 = vector.shape_cast %951 : vector<1x8x16xf32> to vector<8x16xf32>
    %cst_300 = arith.constant dense<0.000000e+00> : vector<16x16xf32>
    %953 = tpu.matmul %950, %952, %cst_300 {dimension_numbers = #tpu.dot_dimension_numbers<[1], [0], [0], [1], [0, 0, 1, 1], [], []>} : vector<16x8xf32>, vector<8x16xf32>, vector<16x16xf32> -> vector<16x16xf32>
    %954 = arith.addf %948, %953 : vector<16x16xf32>
    %c4_301 = arith.constant 4 : index
    %c0_302 = arith.constant 0 : index
    %c0_303 = arith.constant 0 : index
    %955 = vector.load %arg25[%c4_301, %c0_302, %c0_303] : memref<12x2x8xf32, #tpu.memory_space<vmem>>, vector<8x2x8xf32>
    %956 = vector.shape_cast %955 : vector<8x2x8xf32> to vector<16x8xf32>
    %957 = vector.extract_strided_slice %929 {offsets = [4, 0, 0], sizes = [1, 8, 16], strides = [1, 1, 1]} : vector<5x8x16xf32> to vector<1x8x16xf32>
    %958 = vector.shape_cast %957 : vector<1x8x16xf32> to vector<8x16xf32>
    %cst_304 = arith.constant dense<0.000000e+00> : vector<16x16xf32>
    %959 = tpu.matmul %956, %958, %cst_304 {dimension_numbers = #tpu.dot_dimension_numbers<[1], [0], [0], [1], [0, 0, 1, 1], [], []>} : vector<16x8xf32>, vector<8x16xf32>, vector<16x16xf32> -> vector<16x16xf32>
    %960 = arith.addf %954, %959 : vector<16x16xf32>
    %cst_305 = arith.constant 0.999994993 : f32
    %961 = vector.broadcast %cst_305 : f32 to vector<16x16xf32>
    %962 = arith.mulf %960, %961 : vector<16x16xf32>
    %963 = math.tanh %962 : vector<16x16xf32>
    %964 = vector.shape_cast %963 : vector<16x16xf32> to vector<8x2x16xf32>
    %c2_306 = arith.constant 2 : index
    %c0_307 = arith.constant 0 : index
    %c0_308 = arith.constant 0 : index
    %965 = vector.load %arg26[%c2_306, %c0_307, %c0_308] : memref<12x2x16xf32, #tpu.memory_space<vmem>>, vector<8x2x16xf32>
    tpu.vector_store %arg26[%c2_306, %c0_307, %c0_308], %964 {strides = array<i32>} : memref<12x2x16xf32, #tpu.memory_space<vmem>>, vector<8x2x16xf32>,
    %c0_309 = arith.constant 0 : index
    %c0_310 = arith.constant 0 : index
    %c0_311 = arith.constant 0 : index
    %966 = vector.load %arg19[%c0_309, %c0_310, %c0_311] : memref<5x16x16xf32, #tpu.memory_space<vmem>>, vector<5x16x16xf32>
    %cst_312 = arith.constant 0.000000e+00 : f32
    %967 = vector.broadcast %cst_312 : f32 to vector<16x16xf32>
    %c0_313 = arith.constant 0 : index
    %c0_314 = arith.constant 0 : index
    %c0_315 = arith.constant 0 : index
    %968 = vector.load %arg26[%c0_313, %c0_314, %c0_315] : memref<12x2x16xf32, #tpu.memory_space<vmem>>, vector<8x2x16xf32>
    %969 = vector.shape_cast %968 : vector<8x2x16xf32> to vector<16x16xf32>
    %970 = vector.extract_strided_slice %966 {offsets = [0, 0, 0], sizes = [1, 16, 16], strides = [1, 1, 1]} : vector<5x16x16xf32> to vector<1x16x16xf32>
    %971 = vector.shape_cast %970 : vector<1x16x16xf32> to vector<16x16xf32>
    %cst_316 = arith.constant dense<0.000000e+00> : vector<16x16xf32>
    %972 = tpu.matmul %969, %971, %cst_316 {dimension_numbers = #tpu.dot_dimension_numbers<[1], [0], [0], [1], [0, 0, 1, 1], [], []>} : vector<16x16xf32>, vector<16x16xf32>, vector<16x16xf32> -> vector<16x16xf32>
    %973 = arith.addf %967, %972 : vector<16x16xf32>
    %c1_317 = arith.constant 1 : index
    %c0_318 = arith.constant 0 : index
    %c0_319 = arith.constant 0 : index
    %974 = vector.load %arg26[%c1_317, %c0_318, %c0_319] : memref<12x2x16xf32, #tpu.memory_space<vmem>>, vector<8x2x16xf32>
    %975 = vector.shape_cast %974 : vector<8x2x16xf32> to vector<16x16xf32>
    %976 = vector.extract_strided_slice %966 {offsets = [1, 0, 0], sizes = [1, 16, 16], strides = [1, 1, 1]} : vector<5x16x16xf32> to vector<1x16x16xf32>
    %977 = vector.shape_cast %976 : vector<1x16x16xf32> to vector<16x16xf32>
    %cst_320 = arith.constant dense<0.000000e+00> : vector<16x16xf32>
    %978 = tpu.matmul %975, %977, %cst_320 {dimension_numbers = #tpu.dot_dimension_numbers<[1], [0], [0], [1], [0, 0, 1, 1], [], []>} : vector<16x16xf32>, vector<16x16xf32>, vector<16x16xf32> -> vector<16x16xf32>
    %979 = arith.addf %973, %978 : vector<16x16xf32>
    %c2_321 = arith.constant 2 : index
    %c0_322 = arith.constant 0 : index
    %c0_323 = arith.constant 0 : index
    %980 = vector.load %arg26[%c2_321, %c0_322, %c0_323] : memref<12x2x16xf32, #tpu.memory_space<vmem>>, vector<8x2x16xf32>
    %981 = vector.shape_cast %980 : vector<8x2x16xf32> to vector<16x16xf32>
    %982 = vector.extract_strided_slice %966 {offsets = [2, 0, 0], sizes = [1, 16, 16], strides = [1, 1, 1]} : vector<5x16x16xf32> to vector<1x16x16xf32>
    %983 = vector.shape_cast %982 : vector<1x16x16xf32> to vector<16x16xf32>
    %cst_324 = arith.constant dense<0.000000e+00> : vector<16x16xf32>
    %984 = tpu.matmul %981, %983, %cst_324 {dimension_numbers = #tpu.dot_dimension_numbers<[1], [0], [0], [1], [0, 0, 1, 1], [], []>} : vector<16x16xf32>, vector<16x16xf32>, vector<16x16xf32> -> vector<16x16xf32>
    %985 = arith.addf %979, %984 : vector<16x16xf32>
    %c3_325 = arith.constant 3 : index
    %c0_326 = arith.constant 0 : index
    %c0_327 = arith.constant 0 : index
    %986 = vector.load %arg26[%c3_325, %c0_326, %c0_327] : memref<12x2x16xf32, #tpu.memory_space<vmem>>, vector<8x2x16xf32>
    %987 = vector.shape_cast %986 : vector<8x2x16xf32> to vector<16x16xf32>
    %988 = vector.extract_strided_slice %966 {offsets = [3, 0, 0], sizes = [1, 16, 16], strides = [1, 1, 1]} : vector<5x16x16xf32> to vector<1x16x16xf32>
    %989 = vector.shape_cast %988 : vector<1x16x16xf32> to vector<16x16xf32>
    %cst_328 = arith.constant dense<0.000000e+00> : vector<16x16xf32>
    %990 = tpu.matmul %987, %989, %cst_328 {dimension_numbers = #tpu.dot_dimension_numbers<[1], [0], [0], [1], [0, 0, 1, 1], [], []>} : vector<16x16xf32>, vector<16x16xf32>, vector<16x16xf32> -> vector<16x16xf32>
    %991 = arith.addf %985, %990 : vector<16x16xf32>
    %c4_329 = arith.constant 4 : index
    %c0_330 = arith.constant 0 : index
    %c0_331 = arith.constant 0 : index
    %992 = vector.load %arg26[%c4_329, %c0_330, %c0_331] : memref<12x2x16xf32, #tpu.memory_space<vmem>>, vector<8x2x16xf32>
    %993 = vector.shape_cast %992 : vector<8x2x16xf32> to vector<16x16xf32>
    %994 = vector.extract_strided_slice %966 {offsets = [4, 0, 0], sizes = [1, 16, 16], strides = [1, 1, 1]} : vector<5x16x16xf32> to vector<1x16x16xf32>
    %995 = vector.shape_cast %994 : vector<1x16x16xf32> to vector<16x16xf32>
    %cst_332 = arith.constant dense<0.000000e+00> : vector<16x16xf32>
    %996 = tpu.matmul %993, %995, %cst_332 {dimension_numbers = #tpu.dot_dimension_numbers<[1], [0], [0], [1], [0, 0, 1, 1], [], []>} : vector<16x16xf32>, vector<16x16xf32>, vector<16x16xf32> -> vector<16x16xf32>
    %997 = arith.addf %991, %996 : vector<16x16xf32>
    %cst_333 = arith.constant 0.999994993 : f32
    %998 = vector.broadcast %cst_333 : f32 to vector<16x16xf32>
    %999 = arith.mulf %997, %998 : vector<16x16xf32>
    %1000 = math.tanh %999 : vector<16x16xf32>
    %1001 = vector.shape_cast %1000 : vector<16x16xf32> to vector<8x2x16xf32>
    %c2_334 = arith.constant 2 : index
    %c0_335 = arith.constant 0 : index
    %c0_336 = arith.constant 0 : index
    %1002 = vector.load %arg26[%c2_334, %c0_335, %c0_336] : memref<12x2x16xf32, #tpu.memory_space<vmem>>, vector<8x2x16xf32>
    tpu.vector_store %arg26[%c2_334, %c0_335, %c0_336], %1001 {strides = array<i32>} : memref<12x2x16xf32, #tpu.memory_space<vmem>>, vector<8x2x16xf32>,
    %c0_337 = arith.constant 0 : index
    %c0_338 = arith.constant 0 : index
    %c0_339 = arith.constant 0 : index
    %1003 = vector.load %arg20[%c0_337, %c0_338, %c0_339] : memref<5x16x16xf32, #tpu.memory_space<vmem>>, vector<5x16x16xf32>
    %cst_340 = arith.constant 0.000000e+00 : f32
    %1004 = vector.broadcast %cst_340 : f32 to vector<16x16xf32>
    %c0_341 = arith.constant 0 : index
    %c0_342 = arith.constant 0 : index
    %c0_343 = arith.constant 0 : index
    %1005 = vector.load %arg26[%c0_341, %c0_342, %c0_343] : memref<12x2x16xf32, #tpu.memory_space<vmem>>, vector<8x2x16xf32>
    %1006 = vector.shape_cast %1005 : vector<8x2x16xf32> to vector<16x16xf32>
    %1007 = vector.extract_strided_slice %1003 {offsets = [0, 0, 0], sizes = [1, 16, 16], strides = [1, 1, 1]} : vector<5x16x16xf32> to vector<1x16x16xf32>
    %1008 = vector.shape_cast %1007 : vector<1x16x16xf32> to vector<16x16xf32>
    %cst_344 = arith.constant dense<0.000000e+00> : vector<16x16xf32>
    %1009 = tpu.matmul %1006, %1008, %cst_344 {dimension_numbers = #tpu.dot_dimension_numbers<[1], [0], [0], [1], [0, 0, 1, 1], [], []>} : vector<16x16xf32>, vector<16x16xf32>, vector<16x16xf32> -> vector<16x16xf32>
    %1010 = arith.addf %1004, %1009 : vector<16x16xf32>
    %c1_345 = arith.constant 1 : index
    %c0_346 = arith.constant 0 : index
    %c0_347 = arith.constant 0 : index
    %1011 = vector.load %arg26[%c1_345, %c0_346, %c0_347] : memref<12x2x16xf32, #tpu.memory_space<vmem>>, vector<8x2x16xf32>
    %1012 = vector.shape_cast %1011 : vector<8x2x16xf32> to vector<16x16xf32>
    %1013 = vector.extract_strided_slice %1003 {offsets = [1, 0, 0], sizes = [1, 16, 16], strides = [1, 1, 1]} : vector<5x16x16xf32> to vector<1x16x16xf32>
    %1014 = vector.shape_cast %1013 : vector<1x16x16xf32> to vector<16x16xf32>
    %cst_348 = arith.constant dense<0.000000e+00> : vector<16x16xf32>
    %1015 = tpu.matmul %1012, %1014, %cst_348 {dimension_numbers = #tpu.dot_dimension_numbers<[1], [0], [0], [1], [0, 0, 1, 1], [], []>} : vector<16x16xf32>, vector<16x16xf32>, vector<16x16xf32> -> vector<16x16xf32>
    %1016 = arith.addf %1010, %1015 : vector<16x16xf32>
    %c2_349 = arith.constant 2 : index
    %c0_350 = arith.constant 0 : index
    %c0_351 = arith.constant 0 : index
    %1017 = vector.load %arg26[%c2_349, %c0_350, %c0_351] : memref<12x2x16xf32, #tpu.memory_space<vmem>>, vector<8x2x16xf32>
    %1018 = vector.shape_cast %1017 : vector<8x2x16xf32> to vector<16x16xf32>
    %1019 = vector.extract_strided_slice %1003 {offsets = [2, 0, 0], sizes = [1, 16, 16], strides = [1, 1, 1]} : vector<5x16x16xf32> to vector<1x16x16xf32>
    %1020 = vector.shape_cast %1019 : vector<1x16x16xf32> to vector<16x16xf32>
    %cst_352 = arith.constant dense<0.000000e+00> : vector<16x16xf32>
    %1021 = tpu.matmul %1018, %1020, %cst_352 {dimension_numbers = #tpu.dot_dimension_numbers<[1], [0], [0], [1], [0, 0, 1, 1], [], []>} : vector<16x16xf32>, vector<16x16xf32>, vector<16x16xf32> -> vector<16x16xf32>
    %1022 = arith.addf %1016, %1021 : vector<16x16xf32>
    %c3_353 = arith.constant 3 : index
    %c0_354 = arith.constant 0 : index
    %c0_355 = arith.constant 0 : index
    %1023 = vector.load %arg26[%c3_353, %c0_354, %c0_355] : memref<12x2x16xf32, #tpu.memory_space<vmem>>, vector<8x2x16xf32>
    %1024 = vector.shape_cast %1023 : vector<8x2x16xf32> to vector<16x16xf32>
    %1025 = vector.extract_strided_slice %1003 {offsets = [3, 0, 0], sizes = [1, 16, 16], strides = [1, 1, 1]} : vector<5x16x16xf32> to vector<1x16x16xf32>
    %1026 = vector.shape_cast %1025 : vector<1x16x16xf32> to vector<16x16xf32>
    %cst_356 = arith.constant dense<0.000000e+00> : vector<16x16xf32>
    %1027 = tpu.matmul %1024, %1026, %cst_356 {dimension_numbers = #tpu.dot_dimension_numbers<[1], [0], [0], [1], [0, 0, 1, 1], [], []>} : vector<16x16xf32>, vector<16x16xf32>, vector<16x16xf32> -> vector<16x16xf32>
    %1028 = arith.addf %1022, %1027 : vector<16x16xf32>
    %c4_357 = arith.constant 4 : index
    %c0_358 = arith.constant 0 : index
    %c0_359 = arith.constant 0 : index
    %1029 = vector.load %arg26[%c4_357, %c0_358, %c0_359] : memref<12x2x16xf32, #tpu.memory_space<vmem>>, vector<8x2x16xf32>
    %1030 = vector.shape_cast %1029 : vector<8x2x16xf32> to vector<16x16xf32>
    %1031 = vector.extract_strided_slice %1003 {offsets = [4, 0, 0], sizes = [1, 16, 16], strides = [1, 1, 1]} : vector<5x16x16xf32> to vector<1x16x16xf32>
    %1032 = vector.shape_cast %1031 : vector<1x16x16xf32> to vector<16x16xf32>
    %cst_360 = arith.constant dense<0.000000e+00> : vector<16x16xf32>
    %1033 = tpu.matmul %1030, %1032, %cst_360 {dimension_numbers = #tpu.dot_dimension_numbers<[1], [0], [0], [1], [0, 0, 1, 1], [], []>} : vector<16x16xf32>, vector<16x16xf32>, vector<16x16xf32> -> vector<16x16xf32>
    %1034 = arith.addf %1028, %1033 : vector<16x16xf32>
    %cst_361 = arith.constant 0.999994993 : f32
    %1035 = vector.broadcast %cst_361 : f32 to vector<16x16xf32>
    %1036 = arith.mulf %1034, %1035 : vector<16x16xf32>
    %1037 = math.tanh %1036 : vector<16x16xf32>
    %1038 = vector.shape_cast %1037 : vector<16x16xf32> to vector<8x2x16xf32>
    %c2_362 = arith.constant 2 : index
    %c0_363 = arith.constant 0 : index
    %c0_364 = arith.constant 0 : index
    %1039 = vector.load %arg26[%c2_362, %c0_363, %c0_364] : memref<12x2x16xf32, #tpu.memory_space<vmem>>, vector<8x2x16xf32>
    tpu.vector_store %arg26[%c2_362, %c0_363, %c0_364], %1038 {strides = array<i32>} : memref<12x2x16xf32, #tpu.memory_space<vmem>>, vector<8x2x16xf32>,
    %c0_365 = arith.constant 0 : index
    %c0_366 = arith.constant 0 : index
    %c0_367 = arith.constant 0 : index
    %1040 = vector.load %arg21[%c0_365, %c0_366, %c0_367] : memref<5x16x16xf32, #tpu.memory_space<vmem>>, vector<5x16x16xf32>
    %cst_368 = arith.constant 0.000000e+00 : f32
    %1041 = vector.broadcast %cst_368 : f32 to vector<16x16xf32>
    %c0_369 = arith.constant 0 : index
    %c0_370 = arith.constant 0 : index
    %c0_371 = arith.constant 0 : index
    %1042 = vector.load %arg26[%c0_369, %c0_370, %c0_371] : memref<12x2x16xf32, #tpu.memory_space<vmem>>, vector<8x2x16xf32>
    %1043 = vector.shape_cast %1042 : vector<8x2x16xf32> to vector<16x16xf32>
    %1044 = vector.extract_strided_slice %1040 {offsets = [0, 0, 0], sizes = [1, 16, 16], strides = [1, 1, 1]} : vector<5x16x16xf32> to vector<1x16x16xf32>
    %1045 = vector.shape_cast %1044 : vector<1x16x16xf32> to vector<16x16xf32>
    %cst_372 = arith.constant dense<0.000000e+00> : vector<16x16xf32>
    %1046 = tpu.matmul %1043, %1045, %cst_372 {dimension_numbers = #tpu.dot_dimension_numbers<[1], [0], [0], [1], [0, 0, 1, 1], [], []>} : vector<16x16xf32>, vector<16x16xf32>, vector<16x16xf32> -> vector<16x16xf32>
    %1047 = arith.addf %1041, %1046 : vector<16x16xf32>
    %c1_373 = arith.constant 1 : index
    %c0_374 = arith.constant 0 : index
    %c0_375 = arith.constant 0 : index
    %1048 = vector.load %arg26[%c1_373, %c0_374, %c0_375] : memref<12x2x16xf32, #tpu.memory_space<vmem>>, vector<8x2x16xf32>
    %1049 = vector.shape_cast %1048 : vector<8x2x16xf32> to vector<16x16xf32>
    %1050 = vector.extract_strided_slice %1040 {offsets = [1, 0, 0], sizes = [1, 16, 16], strides = [1, 1, 1]} : vector<5x16x16xf32> to vector<1x16x16xf32>
    %1051 = vector.shape_cast %1050 : vector<1x16x16xf32> to vector<16x16xf32>
    %cst_376 = arith.constant dense<0.000000e+00> : vector<16x16xf32>
    %1052 = tpu.matmul %1049, %1051, %cst_376 {dimension_numbers = #tpu.dot_dimension_numbers<[1], [0], [0], [1], [0, 0, 1, 1], [], []>} : vector<16x16xf32>, vector<16x16xf32>, vector<16x16xf32> -> vector<16x16xf32>
    %1053 = arith.addf %1047, %1052 : vector<16x16xf32>
    %c2_377 = arith.constant 2 : index
    %c0_378 = arith.constant 0 : index
    %c0_379 = arith.constant 0 : index
    %1054 = vector.load %arg26[%c2_377, %c0_378, %c0_379] : memref<12x2x16xf32, #tpu.memory_space<vmem>>, vector<8x2x16xf32>
    %1055 = vector.shape_cast %1054 : vector<8x2x16xf32> to vector<16x16xf32>
    %1056 = vector.extract_strided_slice %1040 {offsets = [2, 0, 0], sizes = [1, 16, 16], strides = [1, 1, 1]} : vector<5x16x16xf32> to vector<1x16x16xf32>
    %1057 = vector.shape_cast %1056 : vector<1x16x16xf32> to vector<16x16xf32>
    %cst_380 = arith.constant dense<0.000000e+00> : vector<16x16xf32>
    %1058 = tpu.matmul %1055, %1057, %cst_380 {dimension_numbers = #tpu.dot_dimension_numbers<[1], [0], [0], [1], [0, 0, 1, 1], [], []>} : vector<16x16xf32>, vector<16x16xf32>, vector<16x16xf32> -> vector<16x16xf32>
    %1059 = arith.addf %1053, %1058 : vector<16x16xf32>
    %c3_381 = arith.constant 3 : index
    %c0_382 = arith.constant 0 : index
    %c0_383 = arith.constant 0 : index
    %1060 = vector.load %arg26[%c3_381, %c0_382, %c0_383] : memref<12x2x16xf32, #tpu.memory_space<vmem>>, vector<8x2x16xf32>
    %1061 = vector.shape_cast %1060 : vector<8x2x16xf32> to vector<16x16xf32>
    %1062 = vector.extract_strided_slice %1040 {offsets = [3, 0, 0], sizes = [1, 16, 16], strides = [1, 1, 1]} : vector<5x16x16xf32> to vector<1x16x16xf32>
    %1063 = vector.shape_cast %1062 : vector<1x16x16xf32> to vector<16x16xf32>
    %cst_384 = arith.constant dense<0.000000e+00> : vector<16x16xf32>
    %1064 = tpu.matmul %1061, %1063, %cst_384 {dimension_numbers = #tpu.dot_dimension_numbers<[1], [0], [0], [1], [0, 0, 1, 1], [], []>} : vector<16x16xf32>, vector<16x16xf32>, vector<16x16xf32> -> vector<16x16xf32>
    %1065 = arith.addf %1059, %1064 : vector<16x16xf32>
    %c4_385 = arith.constant 4 : index
    %c0_386 = arith.constant 0 : index
    %c0_387 = arith.constant 0 : index
    %1066 = vector.load %arg26[%c4_385, %c0_386, %c0_387] : memref<12x2x16xf32, #tpu.memory_space<vmem>>, vector<8x2x16xf32>
    %1067 = vector.shape_cast %1066 : vector<8x2x16xf32> to vector<16x16xf32>
    %1068 = vector.extract_strided_slice %1040 {offsets = [4, 0, 0], sizes = [1, 16, 16], strides = [1, 1, 1]} : vector<5x16x16xf32> to vector<1x16x16xf32>
    %1069 = vector.shape_cast %1068 : vector<1x16x16xf32> to vector<16x16xf32>
    %cst_388 = arith.constant dense<0.000000e+00> : vector<16x16xf32>
    %1070 = tpu.matmul %1067, %1069, %cst_388 {dimension_numbers = #tpu.dot_dimension_numbers<[1], [0], [0], [1], [0, 0, 1, 1], [], []>} : vector<16x16xf32>, vector<16x16xf32>, vector<16x16xf32> -> vector<16x16xf32>
    %1071 = arith.addf %1065, %1070 : vector<16x16xf32>
    %cst_389 = arith.constant 0.999994993 : f32
    %1072 = vector.broadcast %cst_389 : f32 to vector<16x16xf32>
    %1073 = arith.mulf %1071, %1072 : vector<16x16xf32>
    %1074 = math.tanh %1073 : vector<16x16xf32>
    %1075 = vector.shape_cast %1074 : vector<16x16xf32> to vector<8x2x16xf32>
    %c2_390 = arith.constant 2 : index
    %c0_391 = arith.constant 0 : index
    %c0_392 = arith.constant 0 : index
    %1076 = vector.load %arg26[%c2_390, %c0_391, %c0_392] : memref<12x2x16xf32, #tpu.memory_space<vmem>>, vector<8x2x16xf32>
    tpu.vector_store %arg26[%c2_390, %c0_391, %c0_392], %1075 {strides = array<i32>} : memref<12x2x16xf32, #tpu.memory_space<vmem>>, vector<8x2x16xf32>,
    %c0_393 = arith.constant 0 : index
    %c0_394 = arith.constant 0 : index
    %c0_395 = arith.constant 0 : index
    %1077 = vector.load %arg22[%c0_393, %c0_394, %c0_395] : memref<5x16x8xf32, #tpu.memory_space<vmem>>, vector<5x16x8xf32>
    %cst_396 = arith.constant 0.000000e+00 : f32
    %1078 = vector.broadcast %cst_396 : f32 to vector<16x8xf32>
    %c0_397 = arith.constant 0 : index
    %c0_398 = arith.constant 0 : index
    %c0_399 = arith.constant 0 : index
    %1079 = vector.load %arg26[%c0_397, %c0_398, %c0_399] : memref<12x2x16xf32, #tpu.memory_space<vmem>>, vector<8x2x16xf32>
    %1080 = vector.shape_cast %1079 : vector<8x2x16xf32> to vector<16x16xf32>
    %1081 = vector.extract_strided_slice %1077 {offsets = [0, 0, 0], sizes = [1, 16, 8], strides = [1, 1, 1]} : vector<5x16x8xf32> to vector<1x16x8xf32>
    %1082 = vector.shape_cast %1081 : vector<1x16x8xf32> to vector<16x8xf32>
    %cst_400 = arith.constant dense<0.000000e+00> : vector<16x8xf32>
    %1083 = tpu.matmul %1080, %1082, %cst_400 {dimension_numbers = #tpu.dot_dimension_numbers<[1], [0], [0], [1], [0, 0, 1, 1], [], []>} : vector<16x16xf32>, vector<16x8xf32>, vector<16x8xf32> -> vector<16x8xf32>
    %1084 = arith.addf %1078, %1083 : vector<16x8xf32>
    %c1_401 = arith.constant 1 : index
    %c0_402 = arith.constant 0 : index
    %c0_403 = arith.constant 0 : index
    %1085 = vector.load %arg26[%c1_401, %c0_402, %c0_403] : memref<12x2x16xf32, #tpu.memory_space<vmem>>, vector<8x2x16xf32>
    %1086 = vector.shape_cast %1085 : vector<8x2x16xf32> to vector<16x16xf32>
    %1087 = vector.extract_strided_slice %1077 {offsets = [1, 0, 0], sizes = [1, 16, 8], strides = [1, 1, 1]} : vector<5x16x8xf32> to vector<1x16x8xf32>
    %1088 = vector.shape_cast %1087 : vector<1x16x8xf32> to vector<16x8xf32>
    %cst_404 = arith.constant dense<0.000000e+00> : vector<16x8xf32>
    %1089 = tpu.matmul %1086, %1088, %cst_404 {dimension_numbers = #tpu.dot_dimension_numbers<[1], [0], [0], [1], [0, 0, 1, 1], [], []>} : vector<16x16xf32>, vector<16x8xf32>, vector<16x8xf32> -> vector<16x8xf32>
    %1090 = arith.addf %1084, %1089 : vector<16x8xf32>
    %c2_405 = arith.constant 2 : index
    %c0_406 = arith.constant 0 : index
    %c0_407 = arith.constant 0 : index
    %1091 = vector.load %arg26[%c2_405, %c0_406, %c0_407] : memref<12x2x16xf32, #tpu.memory_space<vmem>>, vector<8x2x16xf32>
    %1092 = vector.shape_cast %1091 : vector<8x2x16xf32> to vector<16x16xf32>
    %1093 = vector.extract_strided_slice %1077 {offsets = [2, 0, 0], sizes = [1, 16, 8], strides = [1, 1, 1]} : vector<5x16x8xf32> to vector<1x16x8xf32>
    %1094 = vector.shape_cast %1093 : vector<1x16x8xf32> to vector<16x8xf32>
    %cst_408 = arith.constant dense<0.000000e+00> : vector<16x8xf32>
    %1095 = tpu.matmul %1092, %1094, %cst_408 {dimension_numbers = #tpu.dot_dimension_numbers<[1], [0], [0], [1], [0, 0, 1, 1], [], []>} : vector<16x16xf32>, vector<16x8xf32>, vector<16x8xf32> -> vector<16x8xf32>
    %1096 = arith.addf %1090, %1095 : vector<16x8xf32>
    %c3_409 = arith.constant 3 : index
    %c0_410 = arith.constant 0 : index
    %c0_411 = arith.constant 0 : index
    %1097 = vector.load %arg26[%c3_409, %c0_410, %c0_411] : memref<12x2x16xf32, #tpu.memory_space<vmem>>, vector<8x2x16xf32>
    %1098 = vector.shape_cast %1097 : vector<8x2x16xf32> to vector<16x16xf32>
    %1099 = vector.extract_strided_slice %1077 {offsets = [3, 0, 0], sizes = [1, 16, 8], strides = [1, 1, 1]} : vector<5x16x8xf32> to vector<1x16x8xf32>
    %1100 = vector.shape_cast %1099 : vector<1x16x8xf32> to vector<16x8xf32>
    %cst_412 = arith.constant dense<0.000000e+00> : vector<16x8xf32>
    %1101 = tpu.matmul %1098, %1100, %cst_412 {dimension_numbers = #tpu.dot_dimension_numbers<[1], [0], [0], [1], [0, 0, 1, 1], [], []>} : vector<16x16xf32>, vector<16x8xf32>, vector<16x8xf32> -> vector<16x8xf32>
    %1102 = arith.addf %1096, %1101 : vector<16x8xf32>
    %c4_413 = arith.constant 4 : index
    %c0_414 = arith.constant 0 : index
    %c0_415 = arith.constant 0 : index
    %1103 = vector.load %arg26[%c4_413, %c0_414, %c0_415] : memref<12x2x16xf32, #tpu.memory_space<vmem>>, vector<8x2x16xf32>
    %1104 = vector.shape_cast %1103 : vector<8x2x16xf32> to vector<16x16xf32>
    %1105 = vector.extract_strided_slice %1077 {offsets = [4, 0, 0], sizes = [1, 16, 8], strides = [1, 1, 1]} : vector<5x16x8xf32> to vector<1x16x8xf32>
    %1106 = vector.shape_cast %1105 : vector<1x16x8xf32> to vector<16x8xf32>
    %cst_416 = arith.constant dense<0.000000e+00> : vector<16x8xf32>
    %1107 = tpu.matmul %1104, %1106, %cst_416 {dimension_numbers = #tpu.dot_dimension_numbers<[1], [0], [0], [1], [0, 0, 1, 1], [], []>} : vector<16x16xf32>, vector<16x8xf32>, vector<16x8xf32> -> vector<16x8xf32>
    %1108 = arith.addf %1102, %1107 : vector<16x8xf32>
    %cst_417 = arith.constant 0.999994993 : f32
    %1109 = vector.broadcast %cst_417 : f32 to vector<16x8xf32>
    %1110 = arith.mulf %1108, %1109 : vector<16x8xf32>
    %1111 = vector.shape_cast %1110 : vector<16x8xf32> to vector<8x2x8xf32>
    %1112 = arith.addf %923, %1111 : vector<8x2x8xf32>
    %c0_418 = arith.constant 0 : index
    %c0_419 = arith.constant 0 : index
    %c0_420 = arith.constant 0 : index
    %1113 = vector.load %arg24[%c0_418, %c0_419, %c0_420] : memref<8x2x8xf32, #tpu.memory_space<vmem>>, vector<8x2x8xf32>
    tpu.vector_store %arg24[%c0_418, %c0_419, %c0_420], %1112 {strides = array<i32>} : memref<8x2x8xf32, #tpu.memory_space<vmem>>, vector<8x2x8xf32>,
    return
  }
}

</mosaic_0001>

<bundles_post_ra>
// kernel: tpu_custom_call.1
= control target key start
LH: loop header
LB: loop body
LE: loop exit
PB: predicated region body
PF: predicated region fallthrough
CT: control target
= control target key end

     0   :  { %s13782_s0 = inlined_call_operand.vmem [shape: f32[16,8], index: 0, kind: input, shape index: {}]   ;;  %s13783_s1 = inlined_call_operand.hbm [shape: f32[2,8,32], index: 1, kind: input, shape index: {}]   ;;  %s13784_s2 = inlined_call_operand.hbm [shape: f32[2,8], index: 2, kind: input, shape index: {}]   ;;  %s13785_s3 = inlined_call_operand.vmem [shape: f32[32,16], index: 3, kind: input, shape index: {}]   ;;  %s13786_s4 = inlined_call_operand.vmem [shape: f32[32,16], index: 4, kind: input, shape index: {}]   ;;  %s13787_s5 = inlined_call_operand.vmem [shape: f32[1,16], index: 5, kind: input, shape index: {}]   ;;  %s13788_s6 = inlined_call_operand.hbm [shape: f32[8,16], index: 6, kind: input, shape index: {}]   ;;  %s13789_s7 = inlined_call_operand.hbm [shape: f32[16,16], index: 7, kind: input, shape index: {}]   ;;  %s13790_s8 = inlined_call_operand.hbm [shape: f32[16,128], index: 8, kind: input, shape index: {}]   ;;  %s13791_s9 = inlined_call_operand.hbm [shape: f32[1,128], index: 9, kind: input, shape index: {}]   ;;  %s13792_s10 = inlined_call_operand.vmem [shape: f32[32,128], index: 10, kind: input, shape index: {}]   ;;  %s13793_s11 = inlined_call_operand.hbm [shape: f32[32,128], index: 11, kind: input, shape index: {}]   ;;  %s13794_s12 = inlined_call_operand.hbm [shape: f32[32,128], index: 12, kind: input, shape index: {}]   ;;  %s13795_s13 = inlined_call_operand.hbm [shape: f32[32,128], index: 13, kind: input, shape index: {}]   ;;  %s13796_s14 = inlined_call_operand.vmem [shape: f32[1,128], index: 14, kind: input, shape index: {}]   ;;  %s13797_s15 = inlined_call_operand.vmem [shape: f32[32,9], index: 15, kind: input, shape index: {}]   ;;  %s13798_s16 = inlined_call_operand.vmem [shape: f32[32,9], index: 16, kind: input, shape index: {}]   ;;  %s13799_s17 = inlined_call_operand.vmem [shape: f32[1,9], index: 17, kind: input, shape index: {}]   ;;  %s13800_s18 = inlined_call_operand.vmem [shape: f32[5,8,16], index: 18, kind: input, shape index: {}]   ;;  %s13801_s19 = inlined_call_operand.vmem [shape: f32[5,16,16], index: 19, kind: input, shape index: {}]   ;;  %s13802_s20 = inlined_call_operand.vmem [shape: f32[5,16,16], index: 20, kind: input, shape index: {}]   ;;  %s13803_s21 = inlined_call_operand.vmem [shape: f32[5,16,16], index: 21, kind: input, shape index: {}]   ;;  %s13804_s22 = inlined_call_operand.vmem [shape: f32[5,16,8], index: 22, kind: input, shape index: {}]   ;;  %s13805_s23 = inlined_call_operand.hbm [shape: f32[8,2,9], index: 23, kind: output, shape index: {0}]   ;;  %s13806_s24 = inlined_call_operand.hbm [shape: f32[8,2,8], index: 24, kind: output, shape index: {1}]  }
   0x1   :  { %13817 = sst [smem:[#allocation29_spill]] %s13782_s0 }
   0x2   :  { %13818 = sst [smem:[#allocation30_spill]] %s13783_s1 }
   0x3   :  { %13819 = sst [smem:[#allocation31_spill]] %s13784_s2 }
   0x4   :  { %13820 = sst [smem:[#allocation32_spill]] %s13785_s3 }
   0x5   :  { %13821 = sst [smem:[#allocation33_spill]] %s13786_s4 }
   0x6   :  { %13822 = sst [smem:[#allocation34_spill]] %s13787_s5 }
   0x7   :  { %13823 = sst [smem:[#allocation35_spill]] %s13788_s6 }
   0x8   :  { %13824 = sst [smem:[#allocation36_spill]] %s13789_s7 }
   0x9   :  { %13825 = sst [smem:[#allocation37_spill]] %s13790_s8 }
   0xa   :  { %13826 = sst [smem:[#allocation38_spill]] %s13806_s24 }
   0xb   :  { %30 = vsyncpa [#allocation5], 0 }
   0xc   :  { %31 = vsyncpa [#allocation8], 0 }
   0xd   :  { %32 = vsyncpa [#allocation11], 0 }
   0xe   :  { %33 = vsyncpa [#allocation14], 0 }
   0xf   :  { %34 = vsyncpa [#allocation17], 0 }
  0x10   :  { %35 = vsyncpa [#allocation6], 0 }
  0x11   :  { %36 = vsyncpa [#allocation21], 0  ;;  %s11932_s5 = smov [#allocation7]   ;;  %s13827_s6 = sld [smem:[#allocation31_spill]] }
  0x12   :  { %s57_s26 = sshll.u32 %s11932_s5, 4  ;;  %s58_s26 = int_to_ptr.vmem [resolvable:$true] %s57_s26 }
  0x17   :  { %s11676_s2 = scalar_lea.hbm %s13827_s6, 32 }
  0x18   :  { %p11677_p0 = scmp.ne.s32.totalorder %s13827_s6, %s11676_s2  ;;  %p11680_p1 = scmp.lt.u32.totalorder %s11676_s2, %s13827_s6 }
  0x1a   :  { %p11682_p2 = pnand %p11680_p1, %p11677_p0 }
  0x1c   :  { %11685 = shalt.err (!%p11682_p2)
}
  0x1d   :  { %s11686_s3 = scalar_lea.vmem %s58_s26, 32  ;;  %p11691_p4 = scmp.lt.s32.totalorder %s58_s26, %s58_s26 }
  0x1e   :  { %p11687_p3 = scmp.ne.s32.totalorder %s58_s26, %s11686_s3  ;;  %p11692_p5 = scmp.lt.s32.totalorder %s11686_s3, %s11686_s3 }
  0x20   :  { %p11693_p6 = por %p11692_p5, %p11691_p4 }
  0x22   :  { %p11694_p7 = pnand %p11693_p6, %p11687_p3 }
  0x24   :  { %11697 = shalt.err (!%p11694_p7)
}
  0x25   :  { %60 = dma.hbm_to_vmem [thread:$0]  %s13827_s6, 32, %s58_s26, [#allocation8]  }
  0x26   :  { %s11933_s4 = smov [#allocation10]   ;;  %s11934_s5 = smov [#allocation13]  }
  0x27   :  { %s82_s1 = sshll.u32 %s11933_s4, 4  ;;  %s107_s27 = sshll.u32 %s11934_s5, 4  ;;  %s83_s1 = int_to_ptr.vmem [resolvable:$true] %s82_s1  ;;  %s108_s27 = int_to_ptr.vmem [resolvable:$true] %s107_s27 }
  0x28   :  { %s13828_s29 = sld [smem:[#allocation36_spill]] }
  0x2e   :  { %s11698_s0 = scalar_lea.hbm %s13828_s29, 256 }
  0x2f   :  { %p11699_p8 = scmp.ne.s32.totalorder %s13828_s29, %s11698_s0  ;;  %p11702_p9 = scmp.lt.u32.totalorder %s11698_s0, %s13828_s29 }
  0x31   :  { %p11704_p10 = pnand %p11702_p9, %p11699_p8 }
  0x33   :  { %11707 = shalt.err (!%p11704_p10)
}
  0x34   :  { %s11708_s26 = scalar_lea.vmem %s83_s1, 256  ;;  %p11713_p12 = scmp.lt.s32.totalorder %s83_s1, %s83_s1 }
  0x35   :  { %p11709_p11 = scmp.ne.s32.totalorder %s83_s1, %s11708_s26  ;;  %p11714_p13 = scmp.lt.s32.totalorder %s11708_s26, %s11708_s26 }
  0x37   :  { %p11715_p0 = por %p11714_p13, %p11713_p12 }
  0x39   :  { %p11716_p1 = pnand %p11715_p0, %p11709_p11 }
  0x3b   :  { %11719 = shalt.err (!%p11716_p1)
}
  0x3c   :  { %s11935_s6 = smov 128   ;;  %s11936_s25 = smov 8  }
  0x3d   :  { %88 = dma.hbm_to_vmem [thread:$0]  %s13828_s29, 256, %s83_s1, [#allocation11], %s11935_s6, %s11935_s6, %s11936_s25  }
  0x3e   :  { %s11720_s28 = scalar_lea.hbm %s13791_s9, 16 }
  0x3f   :  { %p11721_p2 = scmp.ne.s32.totalorder %s13791_s9, %s11720_s28  ;;  %p11724_p3 = scmp.lt.u32.totalorder %s11720_s28, %s13791_s9 }
  0x41   :  { %p11726_p4 = pnand %p11724_p3, %p11721_p2 }
  0x43   :  { %11729 = shalt.err (!%p11726_p4)
}
  0x44   :  { %s11730_s3 = scalar_lea.vmem %s108_s27, 16  ;;  %s11734_s26 = scalar_lea.vmem %s108_s27, 32 }
  0x45   :  { %p11731_p5 = scmp.ne.s32.totalorder %s108_s27, %s11730_s3  ;;  %p11735_p6 = scmp.lt.s32.totalorder %s108_s27, %s108_s27 }
  0x46   :  { %p11736_p7 = scmp.lt.s32.totalorder %s11734_s26, %s11730_s3 }
  0x48   :  { %p11737_p8 = por %p11736_p7, %p11735_p6 }
  0x4a   :  { %p11738_p9 = pnand %p11737_p8, %p11731_p5 }
  0x4c   :  { %11741 = shalt.err (!%p11738_p9)
}
  0x4d   :  { %110 = dma.hbm_to_vmem [thread:$0]  %s13791_s9, 16, %s108_s27, [#allocation14]  }
  0x4e   :  { %s11937_s8 = smov [#allocation16]   ;;  %s11938_s24 = smov [#allocation4]  }
  0x4f   :  { %s130_s4 = sshll.u32 %s11937_s8, 4  ;;  %s44_s5 = sshll.u32 %s11938_s24, 4  ;;  %s131_s4 = int_to_ptr.vmem [resolvable:$true] %s130_s4  ;;  %s45_s5 = int_to_ptr.vmem [resolvable:$true] %s44_s5 }
  0x50   :  { %s11742_s0 = scalar_lea.hbm %s13794_s12, 512 }
  0x51   :  { %p11743_p10 = scmp.ne.s32.totalorder %s13794_s12, %s11742_s0  ;;  %p11746_p11 = scmp.lt.u32.totalorder %s11742_s0, %s13794_s12 }
  0x53   :  { %p11748_p12 = pnand %p11746_p11, %p11743_p10 }
  0x55   :  { %11751 = shalt.err (!%p11748_p12)
}
  0x56   :  { %s11752_s9 = scalar_lea.vmem %s131_s4, 512  ;;  %p11757_p0 = scmp.lt.s32.totalorder %s131_s4, %s131_s4 }
  0x57   :  { %p11753_p13 = scmp.ne.s32.totalorder %s131_s4, %s11752_s9  ;;  %p11758_p1 = scmp.lt.s32.totalorder %s11752_s9, %s11752_s9 }
  0x59   :  { %p11759_p2 = por %p11758_p1, %p11757_p0 }
  0x5b   :  { %p11760_p3 = pnand %p11759_p2, %p11753_p13 }
  0x5d   :  { %11763 = shalt.err (!%p11760_p3)
}
  0x5e   :  { %136 = dma.hbm_to_vmem [thread:$0]  %s13794_s12, 512, %s131_s4, [#allocation17], %s11935_s6, %s11935_s6, %s11936_s25  }
  0x5f   :  { %s13829_s24 = sld [smem:[#allocation30_spill]] }
  0x65   :  { %s11764_s28 = scalar_lea.hbm %s13829_s24, 256 }
  0x66   :  { %p11765_p4 = scmp.ne.s32.totalorder %s13829_s24, %s11764_s28  ;;  %p11768_p5 = scmp.lt.u32.totalorder %s11764_s28, %s13829_s24 }
  0x68   :  { %p11770_p6 = pnand %p11768_p5, %p11765_p4 }
  0x6a   :  { %11773 = shalt.err (!%p11770_p6)
}
  0x6b   :  { %s11774_s3 = scalar_lea.vmem %s45_s5, 256  ;;  %p11779_p8 = scmp.lt.s32.totalorder %s45_s5, %s45_s5 }
  0x6c   :  { %p11775_p7 = scmp.ne.s32.totalorder %s45_s5, %s11774_s3  ;;  %p11780_p9 = scmp.lt.s32.totalorder %s11774_s3, %s11774_s3 }
  0x6e   :  { %p11781_p10 = por %p11780_p9, %p11779_p8 }
  0x70   :  { %p11782_p11 = pnand %p11781_p10, %p11775_p7 }
  0x72   :  { %11785 = shalt.err (!%p11782_p11)
}
  0x73   :  { %50 = dma.hbm_to_vmem [thread:$0]  %s13829_s24, 256, %s45_s5, [#allocation5], %s11935_s6, %s11935_s6, %s11936_s25  }
  0x74   :  { %s11939_s26 = smov [#allocation9]   ;;  %s11940_s27 = smov [#allocation12]  }
  0x75   :  { %s73_s9 = sshll.u32 %s11939_s26, 4  ;;  %s94_s1 = sshll.u32 %s11940_s27, 4  ;;  %s74_s9 = int_to_ptr.vmem [resolvable:$true] %s73_s9  ;;  %s95_s1 = int_to_ptr.vmem [resolvable:$true] %s94_s1 }
  0x76   :  { %s13830_s28 = sld [smem:[#allocation35_spill]] }
  0x7c   :  { %s11786_s2 = scalar_lea.hbm %s13830_s28, 128 }
  0x7d   :  { %p11787_p12 = scmp.ne.s32.totalorder %s13830_s28, %s11786_s2  ;;  %p11790_p13 = scmp.lt.u32.totalorder %s11786_s2, %s13830_s28 }
  0x7f   :  { %p11792_p0 = pnand %p11790_p13, %p11787_p12 }
  0x81   :  { %11795 = shalt.err (!%p11792_p0)
}
  0x82   :  { %s11796_s5 = scalar_lea.vmem %s74_s9, 128  ;;  %p11801_p2 = scmp.lt.s32.totalorder %s74_s9, %s74_s9 }
  0x83   :  { %p11797_p1 = scmp.ne.s32.totalorder %s74_s9, %s11796_s5  ;;  %p11802_p3 = scmp.lt.s32.totalorder %s11796_s5, %s11796_s5 }
  0x85   :  { %p11803_p4 = por %p11802_p3, %p11801_p2 }
  0x87   :  { %p11804_p5 = pnand %p11803_p4, %p11797_p1 }
  0x89   :  { %11807 = shalt.err (!%p11804_p5)
}
  0x8a   :  { %76 = dma.hbm_to_vmem [thread:$0]  %s13830_s28, 128, %s74_s9, [#allocation8]  }
  0x8b   :  { %s13831_s27 = sld [smem:[#allocation37_spill]] }
  0x91   :  { %s11808_s29 = scalar_lea.hbm %s13831_s27, 256 }
  0x92   :  { %p11809_p6 = scmp.ne.s32.totalorder %s13831_s27, %s11808_s29  ;;  %p11812_p7 = scmp.lt.u32.totalorder %s11808_s29, %s13831_s27 }
  0x94   :  { %p11814_p8 = pnand %p11812_p7, %p11809_p6 }
  0x96   :  { %11817 = shalt.err (!%p11814_p8)
}
  0x97   :  { %s11818_s30 = scalar_lea.vmem %s95_s1, 256  ;;  %p11823_p10 = scmp.lt.s32.totalorder %s95_s1, %s95_s1 }
  0x98   :  { %p11819_p9 = scmp.ne.s32.totalorder %s95_s1, %s11818_s30  ;;  %p11824_p11 = scmp.lt.s32.totalorder %s11818_s30, %s11818_s30 }
  0x9a   :  { %p11825_p12 = por %p11824_p11, %p11823_p10 }
  0x9c   :  { %p11826_p13 = pnand %p11825_p12, %p11819_p9 }
  0x9e   :  { %11829 = shalt.err (!%p11826_p13)
}
  0x9f   :  { %100 = dma.hbm_to_vmem [thread:$0]  %s13831_s27, 256, %s95_s1, [#allocation11], %s11935_s6, %s11935_s6, %s11936_s25  }
  0xa0   :  { %s11941_s3 = smov [#allocation15]   ;;  %s11942_s24 = smov [#allocation18]  }
  0xa1   :  { %s118_s5 = sshll.u32 %s11941_s3, 4  ;;  %s142_s12 = sshll.u32 %s11942_s24, 4  ;;  %s119_s5 = int_to_ptr.vmem [resolvable:$true] %s118_s5  ;;  %s143_s12 = int_to_ptr.vmem [resolvable:$true] %s142_s12 }
  0xa2   :  { %s11830_s29 = scalar_lea.hbm %s13793_s11, 512 }
  0xa3   :  { %p11831_p0 = scmp.ne.s32.totalorder %s13793_s11, %s11830_s29  ;;  %p11834_p1 = scmp.lt.u32.totalorder %s11830_s29, %s13793_s11 }
  0xa5   :  { %p11836_p2 = pnand %p11834_p1, %p11831_p0 }
  0xa7   :  { %11839 = shalt.err (!%p11836_p2)
}
  0xa8   :  { %s11840_s1 = scalar_lea.vmem %s119_s5, 512  ;;  %p11845_p4 = scmp.lt.s32.totalorder %s119_s5, %s119_s5 }
  0xa9   :  { %p11841_p3 = scmp.ne.s32.totalorder %s119_s5, %s11840_s1  ;;  %p11846_p5 = scmp.lt.s32.totalorder %s11840_s1, %s11840_s1 }
  0xab   :  { %p11847_p6 = por %p11846_p5, %p11845_p4 }
  0xad   :  { %p11848_p7 = pnand %p11847_p6, %p11841_p3 }
  0xaf   :  { %11851 = shalt.err (!%p11848_p7)
}
  0xb0   :  { %124 = dma.hbm_to_vmem [thread:$0]  %s13793_s11, 512, %s119_s5, [#allocation14], %s11935_s6, %s11935_s6, %s11936_s25  }
  0xb1   :  { %s11852_s3 = scalar_lea.hbm %s13795_s13, 512 }
  0xb2   :  { %p11853_p8 = scmp.ne.s32.totalorder %s13795_s13, %s11852_s3  ;;  %p11856_p9 = scmp.lt.u32.totalorder %s11852_s3, %s13795_s13 }
  0xb4   :  { %p11858_p10 = pnand %p11856_p9, %p11853_p8 }
  0xb6   :  { %11861 = shalt.err (!%p11858_p10)
}
  0xb7   :  { %s11862_s8 = scalar_lea.vmem %s143_s12, 512  ;;  %p11867_p12 = scmp.lt.s32.totalorder %s143_s12, %s143_s12 }
  0xb8   :  { %p11863_p11 = scmp.ne.s32.totalorder %s143_s12, %s11862_s8  ;;  %p11868_p13 = scmp.lt.s32.totalorder %s11862_s8, %s11862_s8 }
  0xba   :  { %p11869_p0 = por %p11868_p13, %p11867_p12 }
  0xbc   :  { %p11870_p1 = pnand %p11869_p0, %p11863_p11 }
  0xbe   :  { %11873 = shalt.err (!%p11870_p1)
}
  0xbf   :  { %148 = dma.hbm_to_vmem [thread:$0]  %s13795_s13, 512, %s143_s12, [#allocation17], %s11935_s6, %s11935_s6, %s11936_s25  }
  0xc0   :  { %11918 = dma.done.wait [#allocation5], 256  }
  0xc1   :  { %11919 = vsyncadd [#allocation5], 4294967040 }
  0xc2   :  { %11920 = dma.done.wait [#allocation8], 160  }
  0xc3   :  { %11921 = vsyncadd [#allocation8], 4294967136 }
  0xc4   :  { %11922 = dma.done.wait [#allocation11], 512  }
  0xc5   :  { %11923 = vsyncadd [#allocation11], 4294966784 }
  0xc6   :  { %11924 = dma.done.wait [#allocation14], 528  }
  0xc7   :  { %11925 = vsyncadd [#allocation14], 4294966768 }
  0xc8   :  { %11926 = dma.done.wait [#allocation17], 1024  }
  0xc9   :  { %11927 = vsyncadd [#allocation17], 4294966272  ;;  %v11943_v0 = vmov 0.0|0.0   ;;  %vm11944_vm0 = vmmov 0   ;;  %v11945_v1 = vmov 0.0   ;;  %s13832_s6 = sld [smem:[#allocation33_spill]]  ;;  %v655_v20 = vlaneseq }
  0xca   :  { %10981 = vmatprep.subr.bf16.mxu0 %v11943_v0  ;;  %10192 = vmatprep.mubr.msk.f32.mxu0 %vm11944_vm0, %v11945_v1  ;;  %s13833_s1 = sld [smem:[#allocation32_spill]]  ;;  %vm203_vm1 = vcmask 261120   ;;  %v12233_v12 = vld [vmem:[#allocation4] sm:$0xff]  ;;  %v12243_v15 = vld [vmem:[#allocation4 + $0x8] sm:$0xff]  ;;  %v287_v16 = vld [vmem:[#allocation9] sm:$0xff]  ;;  %s13834_s2 = sld [smem:[#allocation29_spill]] }
  0xcb   :  { %10162 = vmatprep.mubr.msk.f32.mxu1 %vm203_vm1, %v12233_v12  ;;  %vm288_vm2 = vcmask 64512   ;;  %v11946_v18 = vmov 1966171168   ;;  %v12254_v22 = vshrl.u32 %v655_v20, 7  ;;  %s13835_s25 = sld [smem:[#allocation34_spill]]  ;;  %vm374_vm3 = vcmask 130048  }
  0xcc   :  { %v653_v19 = vunpack.c.l.s4 %v11946_v18  ;;  %vm718_vm4 = vcmask 58368   ;;  %v705_v45 = vand.u32 127, %v655_v20  ;;  %v12313_v48 = vld [vmem:[#allocation7] sm:$0x3]  ;;  %vm714_vm5 = vcmask 1041409   ;;  %v372_v55 = vld [vmem:[#allocation10] sm:$0xff] }
  0xcd   :  { %v12261_v26 = vsub.s32 0, %v12254_v22  ;;  %5967 = vst.msk [vmem:[#allocation2] sm:$0x3] %vm718_vm4, %v11945_v1  ;;  %5968 = vst.msk [vmem:[#allocation2 + $0x2] sm:$0x3] %vm718_vm4, %v11945_v1  ;;  %vm197_vm6 = vcmp.gt.f32.partialorder %v12313_v48, 0.0 }
  0xce   :  { %v654_v21 = vunpack.c.0.s8 %v653_v19  ;;  %5969 = vst.msk [vmem:[#allocation2 + $0x4] sm:$0x3] %vm718_vm4, %v11945_v1  ;;  %5970 = vst.msk [vmem:[#allocation2 + $0x6] sm:$0x3] %vm718_vm4, %v11945_v1  ;;  %v12311_v47 = vsub.s32 %v705_v45, %v12254_v22  ;;  %v373_v56 = vld [vmem:[#allocation10 + $0x8] sm:$0xff]  ;;  %v554_v19 = vld [vmem:[#allocation15 + $0x10] sm:$0xff] }
  0xcf   :  { %v565_v2 = vld [vmem:[%s13832_s6] sm:$0xff]  ;;  %v566_v3 = vld [vmem:[%s13832_s6 + $0x8] sm:$0xff]  ;;  %v567_v7 = vld [vmem:[%s13832_s6 + $0x10] sm:$0xff]  ;;  %5971 = vst.msk [vmem:[#allocation2 + $0x8] sm:$0x3] %vm718_vm4, %v11945_v1  ;;  %v10973_v57 = vpack.c.bf16 %v373_v56, %v372_v55  ;;  %vm1266_vm7 = vcmask 66560  }
  0xd0   :  { %v199_v4 = vld [vmem:[%s13833_s1] sm:$0xff]  ;;  %v12216_v5 = vpack.c.bf16 %v566_v3, %v565_v2  ;;  %v200_v6 = vld [vmem:[%s13833_s1 + $0x8] sm:$0xff]  ;;  %v568_v8 = vld [vmem:[%s13832_s6 + $0x18] sm:$0xff]  ;;  %v12257_v23 = vsub.s32 %v654_v21, %v12254_v22  ;;  %5972 = vst.msk [vmem:[#allocation2 + $0xa] sm:$0x3] %vm718_vm4, %v11945_v1  ;;  %vm5979_vm8 = vcmask 123904  }
  0xd1   :  { %v10965_v9 = vpack.c.bf16 %v200_v6, %v199_v4  ;;  %v201_v10 = vld [vmem:[%s13833_s1 + $0x10] sm:$0xff]  ;;  %v202_v11 = vld [vmem:[%s13833_s1 + $0x18] sm:$0xff]  ;;  %v12236_v13 = vpack.c.bf16 %v568_v8, %v567_v7  ;;  %v285_v17 = vld [vmem:[%s13834_s2] sm:$0xff]  ;;  %5973 = vst.msk [vmem:[#allocation2 + $0xc] sm:$0x3] %vm718_vm4, %v11945_v1 }
  0xd2   :  { %10983 = vmatpush3.bf16.msra.mxu0 %v12216_v5  ;;  %v10969_v14 = vpack.c.bf16 %v202_v11, %v201_v10  ;;  %v12276_v37 = vld [vmem:[%s13835_s25] ss:$0 sm:$0xff]  ;;  %v286_v44 = vld [vmem:[%s13834_s2 + $0x8] sm:$0xff]  ;;  %5974 = vst.msk [vmem:[#allocation2 + $0xe] sm:$0x3] %vm718_vm4, %v11945_v1  ;;  %v553_v10 = vld [vmem:[#allocation15 + $0x8] sm:$0xff] }
  0xd3   :  { %10966 = vmatprep.subr.bf16.mxu1 %v10965_v9  ;;  %10984 = vmatprep.subr.bf16.mxu0 %v11943_v0  ;;  %5975 = vst.msk [vmem:[#allocation2 + $0x10] sm:$0x3] %vm718_vm4, %v11945_v1  ;;  %5976 = vst.msk [vmem:[#allocation2 + $0x12] sm:$0x3] %vm718_vm4, %v11945_v1  ;;  %v458_v6 = vld [vmem:[#allocation12] sm:$0xff]  ;;  %v459_v7 = vld [vmem:[#allocation12 + $0x8] sm:$0xff] }
  0xd4   :  { %10968 = vmatpush3.bf16.msra.mxu1 %v10965_v9  ;;  %5977 = vst.msk [vmem:[#allocation2 + $0x14] sm:$0x3] %vm718_vm4, %v11945_v1  ;;  %5978 = vst.msk [vmem:[#allocation2 + $0x16] sm:$0x3] %vm718_vm4, %v11945_v1  ;;  %v10977_v8 = vpack.c.bf16 %v459_v7, %v458_v6  ;;  %v552_v9 = vld [vmem:[#allocation15] sm:$0xff]  ;;  %v555_v20 = vld [vmem:[#allocation15 + $0x18] sm:$0xff] }
  0xd5   :  { %10970 = vmatprep.subr.bf16.mxu1 %v10969_v14  ;;  %v12326_v18 = vpack.c.bf16 %v553_v10, %v552_v9  ;;  %v12331_v21 = vpack.c.bf16 %v555_v20, %v554_v19  ;;  %v551_v45 = vld [vmem:[%s13792_s10 + $0x18] sm:$0xff]  ;;  %5986 = vst.msk [vmem:[#allocation3 + $0xc] sm:$0x3] %vm5979_vm8, %v11945_v1  ;;  %5987 = vst.msk [vmem:[#allocation3 + $0xe] sm:$0x3] %vm5979_vm8, %v11945_v1 }
  0xd6   :  { %10986 = vmatpush3.bf16.msra.mxu0 %v12236_v13  ;;  %5988 = vst.msk [vmem:[#allocation3 + $0x10] sm:$0x3] %vm5979_vm8, %v11945_v1  ;;  %5989 = vst.msk [vmem:[#allocation3 + $0x12] sm:$0x3] %vm5979_vm8, %v11945_v1 }
  0xd7   :  { %10993 = vmatprep.subr.bf16.mxu0 %v11943_v0  ;;  %5980 = vst.msk [vmem:[#allocation3] sm:$0x3] %vm5979_vm8, %v11945_v1  ;;  %5981 = vst.msk [vmem:[#allocation3 + $0x2] sm:$0x3] %vm5979_vm8, %v11945_v1 }
  0xd8   :  { %10972 = vmatpush3.bf16.msra.mxu1 %v10969_v14  ;;  %5982 = vst.msk [vmem:[#allocation3 + $0x4] sm:$0x3] %vm5979_vm8, %v11945_v1  ;;  %5983 = vst.msk [vmem:[#allocation3 + $0x6] sm:$0x3] %vm5979_vm8, %v11945_v1 }
  0xd9   :  { %10193 = vmatmul.mubr.f32.vlgmr.msra.gmra.mrb[0].mxu0 %v11945_v1  ;;  %10165 = vmatprep.subr.mxu1 %v287_v16  ;;  %5984 = vst.msk [vmem:[#allocation3 + $0x8] sm:$0x3] %vm5979_vm8, %v11945_v1  ;;  %5985 = vst.msk [vmem:[#allocation3 + $0xa] sm:$0x3] %vm5979_vm8, %v11945_v1 }
  0xda   :  { %10214 = vmatprep.mubr.msk.f32.mxu0 %vm11944_vm0, %v11945_v1  ;;  %5990 = vst.msk [vmem:[#allocation3 + $0x14] sm:$0x3] %vm5979_vm8, %v11945_v1  ;;  %5991 = vst.msk [vmem:[#allocation3 + $0x16] sm:$0x3] %vm5979_vm8, %v11945_v1 }
  0xdb   :  { %10163 = vmatmul.mubr.msk.f32.vlgmr.msra.gmra.mrb[0].mxu1 %vm203_vm1, %v12243_v15 }
  0xdc   :  { %10167 = vmatprep.mubr.msk.f32.mxu1 %vm288_vm2, %v285_v17  ;;  %10166 = vmatpush3.msra.mxu1 %v287_v16 }
  0xdd   :  { %10974 = vmatprep.subr.bf16.mxu1 %v10973_v57 }
  0xdf   :  { %10168 = vmatmul.mubr.msk.f32.vlgmr.msra.gmra.mrb[2].mxu1 %vm288_vm2, %v286_v44  ;;  %v550_v44 = vld [vmem:[%s13792_s10 + $0x10] sm:$0xff] }
  0xe0   :  { %10976 = vmatpush3.bf16.msra.mxu1 %v10973_v57 }
  0xe1   :  { %10978 = vmatprep.subr.bf16.mxu1 %v10977_v8 }
 0x1ac   :  { %v647_v24 = vpop.f32.mrb[0].mxu0 }
 0x1ad   :  { %v658_v25 = vrot.slane %v647_v24, %v12257_v23  ;;  %v10194_v27 = vpop.f32.mrb[1].mxu0 }
 0x1ae   :  { %v12263_v28 = vpop.f32.mrb[0].mxu1  ;;  %v561_v27 = vld [vmem:[#allocation18 + $0x8] sm:$0xff] }
 0x1af   :  { %v659_v29 = vcombine.high %v658_v25, %v658_v25  ;;  %v666_v30 = vrot.slane %v658_v25, %v12257_v23  ;;  %v12266_v31 = vpop.f32.mrb[1].mxu1  ;;  %v560_v25 = vld [vmem:[#allocation18] sm:$0xff] }
 0x1b1   :  { %v673_v32 = vrot.slane %v659_v29, %v12257_v23  ;;  %v677_v33 = vrot.slane %v666_v30, %v12261_v26  ;;  %v12338_v29 = vpack.c.bf16 %v561_v27, %v560_v25  ;;  %v562_v30 = vld [vmem:[#allocation18 + $0x10] sm:$0xff] }
 0x1b2   :  { %v10169_v58 = vpop.f32.mrb[2].mxu1 }
 0x1b3   :  { %v681_v34 = vrot.slane %v673_v32, %v12261_v26  ;;  %v684_v35 = vadd.f32 %v677_v33, %v12266_v31  ;;  %v371_v59 = vmax.f32 %v10169_v58, 0.0  ;;  %v361_v60 = vpop.f32.mrb[3].mxu1  ;;  %v563_v32 = vld [vmem:[#allocation18 + $0x18] sm:$0xff] }
 0x1b4   :  { %v370_v61 = vmax.f32 %v361_v60, 0.0  ;;  %v12345_v33 = vpack.c.bf16 %v563_v32, %v562_v30 }
 0x1b5   :  { %11458 = vtanh.f32 %v684_v35  ;;  %v685_v36 = vadd.f32 %v12263_v28, %v681_v34  ;;  %v548_v34 = vld [vmem:[%s13792_s10] sm:$0xff]  ;;  %v549_v35 = vld [vmem:[%s13792_s10 + $0x8] sm:$0xff]  ;;  %s11947_s10 = smov 64  }
 0x1b6   :  { %10174 = vmatprep.mubr.msk.f32.mxu1 %vm374_vm3, %v370_v61 }
 0x1b7   :  { %11460 = vtanh.f32 %v685_v36  ;;  %10175 = vmatmul.mubr.msk.f32.vlgmr.msra.gmra.mrb[4].mxu1 %vm374_vm3, %v371_v59  ;;  %v573_v36 = vld [vmem:[%s13798_s16] sm:$0xff] }
 0x1b8   :  { %10980 = vmatpush3.bf16.msra.mxu1 %v10977_v8 }
 0x1b9   :  { %10987 = vmatprep.subr.bf16.mxu1 %v11943_v0 }
 0x1bf   :  { %v11459_v38 = vpop.eup %11458 }
 0x1c0   :  { %v694_v39 = vmul.f32 %v11459_v38, %v12276_v37  ;;  %v12358_v38 = vsub.s32 1, %v12254_v22 }
 0x1c1   :  { %v11461_v40 = vpop.eup %11460 }
 0x1c2   :  { %v696_v41 = vsel %vm374_vm3, %v694_v39, 0.0  ;;  %v695_v42 = vmul.f32 %v11461_v40, %v12276_v37  ;;  %v12361_v39 = vpack.c.bf16 %v549_v35, %v548_v34  ;;  %v574_v40 = vld [vmem:[%s13798_s16 + $0x8] sm:$0xff] }
 0x1c3   :  { %697 = vadd.xlane.f32.xlu0 %v696_v41 }
 0x1c4   :  { %v699_v43 = vsel %vm374_vm3, %v695_v42, 0.0  ;;  %v12366_v42 = vpack.c.bf16 %v574_v40, %v573_v36  ;;  %10995 = vmatpush3.bf16.msra.mxu0 %v12361_v39 }
 0x1c5   :  { %10996 = vmatprep.subr.bf16.mxu0 %v11943_v0 }
 0x1c7   :  { %700 = vadd.xlane.f32.xlu0 %v699_v43 }
 0x250   :  { %v698_v46 = vpop.xlane.xlu0 %697 }
 0x251   :  { %v709_v50 = vrot.slane %v698_v46, %v12311_v47  ;;  %v575_v46 = vld [vmem:[%s13798_s16 + $0x10] sm:$0xff] }
 0x254   :  { %v701_v49 = vpop.xlane.xlu0 %700 }
 0x255   :  { %v713_v51 = vrot.slane %v701_v49, %v12311_v47 }
 0x257   :  { %v715_v52 = vsel %vm714_vm5, %v713_v51, %v709_v50  ;;  %v12384_v51 = vpack.c.bf16 %v551_v45, %v550_v44 }
 0x258   :  { %v717_v53 = vsel %vm197_vm6, %v715_v52, -1e+30  ;;  %v576_v52 = vld [vmem:[%s13798_s16 + $0x18] sm:$0xff]  ;;  %s11948_s16 = smov 32  }
 0x259   :  { %v719_v54 = vsel %vm718_vm4, %v717_v53, -inf  ;;  %10998 = vmatpush3.bf16.msra.mxu0 %v12384_v51 }
 0x25a   :  { %720 = vmax.xlane.f32.xlu1 %v719_v54  ;;  %11005 = vmatprep.subr.bf16.mxu0 %v11943_v0 }
 0x28a   :  { %v10176_v11 = vpop.f32.mrb[4].mxu1 }
 0x28b   :  { %v457_v14 = vmax.f32 %v10176_v11, 0.0  ;;  %v447_v16 = vpop.f32.mrb[5].mxu1 }
 0x28c   :  { %v456_v17 = vmax.f32 %v447_v16, 0.0 }
 0x28e   :  { %10181 = vmatprep.mubr.msk.f32.mxu1 %vm374_vm3, %v456_v17 }
 0x28f   :  { %10182 = vmatmul.mubr.msk.f32.vlgmr.msra.gmra.mrb[6].mxu1 %vm374_vm3, %v457_v14  ;;  %v9637_v14 = vld [vmem:[#allocation13] ss:$0 sm:$0xff] }
 0x290   :  { %10989 = vmatpush3.bf16.msra.mxu1 %v12326_v18  ;;  %10203 = vmatprep.mubr.msk.f32.mxu1 %vm11944_vm0, %v11945_v1 }
 0x291   :  { %10990 = vmatprep.subr.bf16.mxu1 %v11943_v0 }
 0x294   :  { %10992 = vmatpush3.bf16.msra.mxu1 %v12331_v21 }
 0x295   :  { %10999 = vmatprep.subr.bf16.mxu1 %v11943_v0 }
 0x297   :  { %10204 = vmatmul.mubr.f32.vlgmr.msra.gmra.mrb[8].mxu1 %v11945_v1 }
 0x298   :  { %11001 = vmatpush3.bf16.msra.mxu1 %v12338_v29  ;;  %10225 = vmatprep.mubr.msk.f32.mxu1 %vm11944_vm0, %v11945_v1 }
 0x299   :  { %11002 = vmatprep.subr.bf16.mxu1 %v11943_v0 }
 0x29c   :  { %11004 = vmatpush3.bf16.msra.mxu1 %v12345_v33 }
 0x29d   :  { %11011 = vmatprep.subr.bf16.mxu1 %v11943_v0 }
 0x29f   :  { %10226 = vmatmul.mubr.f32.vlgmr.msra.gmra.mrb[10].mxu1 %v11945_v1 }
 0x2a0   :  { %11013 = vmatpush3.bf16.msra.mxu1 %v12366_v42  ;;  %10247 = vmatprep.mubr.msk.f32.mxu1 %vm11944_vm0, %v11945_v1 }
 0x2a1   :  { %11014 = vmatprep.subr.bf16.mxu1 %v11943_v0 }
 0x2e7   :  { %v721_v62 = vpop.xlane.xlu1 %720 }
 0x2e8   :  { %v722_v63 = vsub.f32 %v717_v53, %v721_v62  ;;  %v12391_v53 = vpack.c.bf16 %v576_v52, %v575_v46 }
 0x2ea   :  { %v723_v2 = vmul.f32 1.442695, %v722_v63  ;;  %11016 = vmatpush3.bf16.msra.mxu1 %v12391_v53 }
 0x2eb   :  { %11023 = vmatprep.subr.bf16.mxu1 %v11943_v0 }
 0x2ec   :  { %11462 = vpow2.f32 %v723_v2 }
 0x2f6   :  { %v11463_v3 = vpop.eup %11462 }
 0x2f7   :  { %v725_v4 = vsel %vm718_vm4, %v11463_v3, 0.0 }
 0x2f8   :  { %726 = vadd.xlane.f32.xlu1 %v725_v4 }
 0x362   :  { %v10183_v16 = vpop.f32.mrb[6].mxu1 }
 0x363   :  { %v12412_v17 = vadd.f32 %v10183_v16, %v9637_v14  ;;  %v539_v19 = vpop.f32.mrb[7].mxu1 }
 0x364   :  { %v12416_v34 = vadd.f32 %v9637_v14, %v539_v19 }
 0x36a   :  { %v826_v20 = vpop.f32.mrb[8].mxu1 }
 0x385   :  { %v727_v24 = vpop.xlane.xlu1 %726 }
 0x386   :  { %11464 = vrcp.f32 %v727_v24  ;;  %v10205_v24 = vpop.f32.mrb[9].mxu1 }
 0x387   :  { %v1000_v25 = vpop.f32.mrb[10].mxu1 }
 0x388   :  { %v10227_v27 = vpop.f32.mrb[11].mxu1 }
 0x390   :  { %v11465_v41 = vpop.eup %11464 }
 0x391   :  { %v729_v43 = vmul.f32 %v11465_v41, %v11463_v3 }
 0x393   :  { %v740_v49 = vrot.slane %v729_v43, %v12358_v38  ;;  %v733_v50 = vrot.slane %v729_v43, %v12261_v26 }
 0x395   :  { %742 = vbcast.lane.b32.xlu1 %v740_v49, 256  ;;  %735 = vbcast.lane.b32.xlu0 %v733_v50, 256 }
 0x407   :  { %v743_v54 = vpop.permute.xlu1 %742  ;;  %v736_v55 = vpop.permute.xlu0 %735 }
 0x408   :  { %v745_v56 = vmul.f32 %v743_v54, %v12243_v15  ;;  %v744_v57 = vmul.f32 %v736_v55, %v12233_v12 }
 0x40a   :  { %v753_v58 = vsel %vm203_vm1, %v745_v56, 0.0  ;;  %v746_v59 = vsel %vm203_vm1, %v744_v57, 0.0  ;;  %v556_v57 = vld [vmem:[#allocation16] sm:$0xff] }
 0x40b   :  { %v754_v60 = vrot.slane %v753_v58, 4  ;;  %v747_v61 = vrot.slane %v746_v59, 4 }
 0x40d   :  { %v755_v62 = vadd.f32 %v754_v60, %v753_v58  ;;  %v748_v63 = vadd.f32 %v747_v61, %v746_v59  ;;  %v557_v58 = vld [vmem:[#allocation16 + $0x8] sm:$0xff]  ;;  %v558_v59 = vld [vmem:[#allocation16 + $0x10] sm:$0xff]  ;;  %v559_v61 = vld [vmem:[#allocation16 + $0x18] sm:$0xff] }
 0x40e   :  { %v12424_v60 = vpack.c.bf16 %v557_v58, %v556_v57 }
 0x40f   :  { %v756_v2 = vrot.slane %v755_v62, 2  ;;  %v749_v3 = vrot.slane %v748_v63, 2 }
 0x411   :  { %v757_v4 = vadd.f32 %v756_v2, %v755_v62  ;;  %v750_v6 = vadd.f32 %v749_v3, %v748_v63  ;;  %v12427_v62 = vpack.c.bf16 %v559_v61, %v558_v59 }
 0x413   :  { %v758_v7 = vrot.slane %v757_v4, 1  ;;  %v751_v8 = vrot.slane %v750_v6, 1 }
 0x415   :  { %v759_v9 = vadd.f32 %v758_v7, %v757_v4  ;;  %v752_v10 = vadd.f32 %v751_v8, %v750_v6 }
 0x417   :  { %v832_v11 = vsel %vm714_vm5, %v759_v9, %v752_v10 }
 0x418   :  { %10215 = vmatmul.mubr.msk.f32.vlgmr.msra.gmra.mrb[2].mxu0 %vm203_vm1, %v832_v11  ;;  %10248 = vmatmul.mubr.msk.f32.vlgmr.msra.gmra.mrb[12].mxu1 %vm203_vm1, %v832_v11 }
 0x419   :  { %11025 = vmatpush3.bf16.msra.mxu1 %v12216_v5  ;;  %10236 = vmatprep.mubr.msk.f32.mxu0 %vm11944_vm0, %v11945_v1 }
 0x41a   :  { %11026 = vmatprep.subr.bf16.mxu1 %v11943_v0  ;;  %10269 = vmatprep.mubr.msk.f32.mxu1 %vm11944_vm0, %v11945_v1 }
 0x41b   :  { %11007 = vmatpush3.bf16.msra.mxu0 %v12424_v60 }
 0x41c   :  { %11008 = vmatprep.subr.bf16.mxu0 %v11943_v0 }
 0x41d   :  { %11028 = vmatpush3.bf16.msra.mxu1 %v12236_v13 }
 0x41e   :  { %11035 = vmatprep.subr.bf16.mxu1 %v11943_v0 }
 0x41f   :  { %11010 = vmatpush3.bf16.msra.mxu0 %v12427_v62 }
 0x420   :  { %11017 = vmatprep.subr.bf16.mxu0 %v11943_v0 }
 0x4eb   :  { %v901_v30 = vpop.f32.mrb[2].mxu0  ;;  %v12414_v32 = vpop.f32.mrb[12].mxu1 }
 0x4ec   :  { %v902_v35 = vadd.f32 %v901_v30, %v826_v20  ;;  %v10216_v36 = vpop.f32.mrb[3].mxu0  ;;  %v10249_v40 = vpop.f32.mrb[13].mxu1 }
 0x4ee   :  { %v905_v41 = vadd.f32 %v902_v35, %v12416_v34 }
 0x4f0   :  { %11466 = vtanh.f32 %v905_v41  ;;  %v9642_v44 = vmul.f32 -1.442695, %v905_v41 }
 0x4f2   :  { %11468 = vpow2.f32 %v9642_v44 }
 0x4fa   :  { %v11467_v43 = vpop.eup %11466 }
 0x4fb   :  { %915 = vrot.lane.b32.xlu1 %v11467_v43, %s11947_s10 }
 0x4fc   :  { %v11469_v45 = vpop.eup %11468 }
 0x4fd   :  { %v909_v46 = vadd.f32 1.0, %v11469_v45  ;;  %v12465_v45 = vld [vmem:[%s13796_s14] ss:$0 sm:$0xff] }
 0x4ff   :  { %11470 = vrcp.f32 %v909_v46 }
 0x509   :  { %v11471_v49 = vpop.eup %11470 }
 0x50a   :  { %v913_v54 = vmul.f32 0.0, %v11471_v49 }
 0x56d   :  { %v916_v50 = vpop.permute.xlu1 %915 }
 0x56e   :  { %v918_v52 = vmul.f32 %v11471_v49, %v916_v50 }
 0x570   :  { %920 = vrot.lane.b32.xlu1 %v918_v52, %s11948_s16 }
 0x5e2   :  { %v921_v55 = vpop.permute.xlu1 %920 }
 0x5e3   :  { %v12421_v56 = vadd.f32 %v921_v55, %v913_v54 }
 0x5e5   :  { %11472 = vtanh.f32 %v12421_v56 }
 0x5ef   :  { %v11473_v63 = vpop.eup %11472 }
 0x5f0   :  { %926 = vrot.lane.b32.xlu0 %v11473_v63, %s11947_s10 }
 0x662   :  { %v927_v2 = vpop.permute.xlu0 %926 }
 0x663   :  { %v929_v3 = vmul.f32 %v11471_v49, %v927_v2 }
 0x665   :  { %v12433_v4 = vmul.f32 0.9, %v929_v3 }
 0x667   :  { %1005 = vrot.lane.b32.xlu1 %v12433_v4, %s11948_s16 }
 0x6d9   :  { %v12437_v6 = vpop.permute.xlu1 %1005 }
 0x6da   :  { %10237 = vmatmul.mubr.msk.f32.vlgmr.msra.gmra.mrb[4].mxu0 %vm203_vm1, %v12437_v6  ;;  %10270 = vmatmul.mubr.msk.f32.vlgmr.msra.gmra.mrb[14].mxu1 %vm203_vm1, %v12437_v6 }
 0x6db   :  { %10258 = vmatprep.mubr.msk.f32.mxu0 %vm11944_vm0, %v11945_v1  ;;  %11037 = vmatpush3.bf16.msra.mxu1 %v12361_v39 }
 0x6dc   :  { %11038 = vmatprep.subr.bf16.mxu1 %v11943_v0  ;;  %10291 = vmatprep.mubr.msk.f32.mxu1 %vm11944_vm0, %v11945_v1 }
 0x6df   :  { %11040 = vmatpush3.bf16.msra.mxu1 %v12384_v51 }
 0x6e0   :  { %11047 = vmatprep.subr.bf16.mxu1 %v11943_v0 }
 0x7ad   :  { %v1075_v7 = vpop.f32.mrb[4].mxu0  ;;  %v1334_v8 = vpop.f32.mrb[14].mxu1 }
 0x7ae   :  { %v1076_v9 = vadd.f32 %v1075_v7, %v1000_v25  ;;  %v1345_v10 = vrot.slane %v1334_v8, %v12257_v23  ;;  %v10238_v11 = vpop.f32.mrb[5].mxu0  ;;  %v10271_v14 = vpop.f32.mrb[15].mxu1 }
 0x7b0   :  { %v1346_v16 = vcombine.high %v1345_v10, %v1345_v10  ;;  %v1353_v19 = vrot.slane %v1345_v10, %v12257_v23  ;;  %v1085_v46 = vadd.f32 %v12465_v45, %v1076_v9 }
 0x7b2   :  { %v1360_v20 = vrot.slane %v1346_v16, %v12257_v23  ;;  %v1364_v24 = vrot.slane %v1353_v19, %v12261_v26  ;;  %v9645_v50 = vmul.f32 -1.442695, %v1085_v46 }
 0x7b4   :  { %v1368_v27 = vrot.slane %v1360_v20, %v12261_v26  ;;  %v1371_v30 = vadd.f32 %v1364_v24, %v12266_v31 }
 0x7b6   :  { %v1372_v35 = vadd.f32 %v12263_v28, %v1368_v27  ;;  %11474 = vtanh.f32 %v1371_v30 }
 0x7b8   :  { %11476 = vtanh.f32 %v1372_v35  ;;  %v569_v35 = vld [vmem:[%s13797_s15] sm:$0xff] }
 0x7b9   :  { %11478 = vtanh.f32 %v1085_v46 }
 0x7ba   :  { %11480 = vpow2.f32 %v9645_v50 }
 0x7c0   :  { %v11475_v25 = vpop.eup %11474 }
 0x7c1   :  { %v1375_v36 = vmul.f32 %v11475_v25, %v12276_v37  ;;  %v570_v25 = vld [vmem:[%s13797_s15 + $0x8] sm:$0xff] }
 0x7c2   :  { %v11477_v40 = vpop.eup %11476 }
 0x7c3   :  { %v1377_v41 = vsel %vm374_vm3, %v1375_v36, 0.0  ;;  %v1376_v43 = vmul.f32 %v11477_v40, %v12276_v37  ;;  %v11479_v49 = vpop.eup %11478  ;;  %v12487_v36 = vpack.c.bf16 %v570_v25, %v569_v35  ;;  %v571_v40 = vld [vmem:[%s13797_s15 + $0x10] sm:$0xff] }
 0x7c4   :  { %1378 = vadd.xlane.f32.xlu0 %v1377_v41  ;;  %v11481_v58 = vpop.eup %11480  ;;  %v572_v41 = vld [vmem:[%s13797_s15 + $0x18] sm:$0xff] }
 0x7c5   :  { %v1380_v44 = vsel %vm374_vm3, %v1376_v43, 0.0  ;;  %v1089_v2 = vadd.f32 1.0, %v11481_v58  ;;  %11019 = vmatpush3.bf16.msra.mxu0 %v12487_v36  ;;  %v12497_v43 = vpack.c.bf16 %v572_v41, %v571_v40 }
 0x7c6   :  { %1381 = vadd.xlane.f32.xlu1 %v1380_v44  ;;  %11020 = vmatprep.subr.bf16.mxu0 %v11943_v0 }
 0x7c7   :  { %11482 = vrcp.f32 %v1089_v2 }
 0x7c9   :  { %11022 = vmatpush3.bf16.msra.mxu0 %v12497_v43 }
 0x7ca   :  { %11029 = vmatprep.subr.bf16.mxu0 %v11943_v0 }
 0x7d1   :  { %v11483_v7 = vpop.eup %11482 }
 0x7d2   :  { %v1093_v14 = vmul.f32 0.0, %v11483_v7 }
 0x7da   :  { %1095 = vrot.lane.b32.xlu0 %v11479_v49, %s11947_s10 }
 0x851   :  { %v1379_v52 = vpop.xlane.xlu0 %1378 }
 0x852   :  { %v1388_v55 = vrot.slane %v1379_v52, %v12311_v47 }
 0x853   :  { %v1382_v54 = vpop.xlane.xlu1 %1381 }
 0x854   :  { %v1392_v57 = vrot.slane %v1382_v54, %v12311_v47 }
 0x855   :  { %v1096_v3 = vpop.permute.xlu0 %1095 }
 0x856   :  { %v1393_v59 = vsel %vm714_vm5, %v1392_v57, %v1388_v55  ;;  %v1098_v8 = vmul.f32 %v11483_v7, %v1096_v3 }
 0x857   :  { %v1395_v61 = vsel %vm197_vm6, %v1393_v59, -1e+30 }
 0x858   :  { %v1396_v63 = vsel %vm718_vm4, %v1395_v61, -inf }
 0x859   :  { %1397 = vmax.xlane.f32.xlu1 %v1396_v63 }
 0x86a   :  { %1100 = vrot.lane.b32.xlu1 %v1098_v8, %s11948_s16 }
 0x8e6   :  { %v1398_v9 = vpop.xlane.xlu1 %1397 }
 0x8e7   :  { %v1399_v10 = vsub.f32 %v1395_v61, %v1398_v9 }
 0x8e9   :  { %v1400_v11 = vmul.f32 1.442695, %v1399_v10 }
 0x8ea   :  { %v1101_v16 = vpop.permute.xlu1 %1100 }
 0x8eb   :  { %11484 = vpow2.f32 %v1400_v11  ;;  %v12476_v19 = vadd.f32 %v1101_v16, %v1093_v14 }
 0x8ed   :  { %11486 = vtanh.f32 %v12476_v19 }
 0x8f5   :  { %v11485_v20 = vpop.eup %11484 }
 0x8f6   :  { %v1402_v24 = vsel %vm718_vm4, %v11485_v20, 0.0 }
 0x8f7   :  { %v11487_v27 = vpop.eup %11486  ;;  %1403 = vadd.xlane.f32.xlu0 %v1402_v24 }
 0x8f8   :  { %1106 = vrot.lane.b32.xlu1 %v11487_v27, %s11947_s10 }
 0x96a   :  { %v1107_v50 = vpop.permute.xlu1 %1106 }
 0x96b   :  { %v1109_v52 = vmul.f32 %v11483_v7, %v1107_v50 }
 0x96d   :  { %v12503_v55 = vmul.f32 0.9, %v1109_v52 }
 0x984   :  { %v1404_v30 = vpop.xlane.xlu0 %1403 }
 0x985   :  { %11488 = vrcp.f32 %v1404_v30 }
 0x98f   :  { %v11489_v44 = vpop.eup %11488 }
 0x990   :  { %v1406_v46 = vmul.f32 %v11489_v44, %v11485_v20 }
 0x992   :  { %v1410_v49 = vrot.slane %v1406_v46, %v12261_v26  ;;  %v1417_v54 = vrot.slane %v1406_v46, %v12358_v38 }
 0x994   :  { %1412 = vbcast.lane.b32.xlu1 %v1410_v49, 256 }
 0x998   :  { %1419 = vbcast.lane.b32.xlu1 %v1417_v54, 256 }
 0x99c   :  { %1185 = vrot.lane.b32.xlu1 %v12503_v55, %s11948_s16 }
 0xa06   :  { %v1413_v57 = vpop.permute.xlu1 %1412 }
 0xa07   :  { %v1421_v58 = vmul.f32 %v1413_v57, %v12233_v12 }
 0xa09   :  { %v1423_v59 = vsel %vm203_vm1, %v1421_v58, 0.0  ;;  %v1583_v58 = vrot.slane %v12416_v34, 2 }
 0xa0a   :  { %v1424_v61 = vrot.slane %v1423_v59, 4  ;;  %v1420_v63 = vpop.permute.xlu1 %1419 }
 0xa0b   :  { %v1422_v2 = vmul.f32 %v1420_v63, %v12243_v15 }
 0xa0c   :  { %v1425_v3 = vadd.f32 %v1424_v61, %v1423_v59 }
 0xa0d   :  { %v1430_v7 = vsel %vm203_vm1, %v1422_v2, 0.0 }
 0xa0e   :  { %v1426_v8 = vrot.slane %v1425_v3, 2  ;;  %v1431_v9 = vrot.slane %v1430_v7, 4  ;;  %v1186_v10 = vpop.permute.xlu1 %1185 }
 0xa0f   :  { %10259 = vmatmul.mubr.msk.f32.vlgmr.msra.gmra.mrb[6].mxu0 %vm203_vm1, %v1186_v10 }
 0xa10   :  { %v1427_v11 = vadd.f32 %v1426_v8, %v1425_v3  ;;  %v1432_v14 = vadd.f32 %v1431_v9, %v1430_v7  ;;  %11031 = vmatpush3.bf16.msra.mxu0 %v12326_v18  ;;  %10280 = vmatprep.mubr.msk.f32.mxu0 %vm11944_vm0, %v11945_v1 }
 0xa11   :  { %11032 = vmatprep.subr.bf16.mxu0 %v11943_v0 }
 0xa12   :  { %v1433_v16 = vrot.slane %v1432_v14, 2  ;;  %v1428_v20 = vrot.slane %v1427_v11, 1 }
 0xa14   :  { %v1434_v24 = vadd.f32 %v1433_v16, %v1432_v14  ;;  %11034 = vmatpush3.bf16.msra.mxu0 %v12331_v21  ;;  %v1429_v30 = vadd.f32 %v1428_v20, %v1427_v11  ;;  %v12566_v20 = vmul.f32 0.9, %v12421_v56 }
 0xa15   :  { %11041 = vmatprep.subr.bf16.mxu0 %v11943_v0 }
 0xa16   :  { %v1435_v27 = vrot.slane %v1434_v24, 1 }
 0xa17   :  { %10281 = vmatmul.mubr.msk.f32.vlgmr.msra.gmra.mrb[8].mxu0 %vm203_vm1, %v12437_v6  ;;  %v12551_v6 = vld [vmem:[%s13799_s17] ss:$0 sm:$0xff] }
 0xa18   :  { %v1436_v35 = vadd.f32 %v1435_v27, %v1434_v24  ;;  %11043 = vmatpush3.bf16.msra.mxu0 %v12338_v29  ;;  %10302 = vmatprep.mubr.msk.f32.mxu0 %vm11944_vm0, %v11945_v1 }
 0xa19   :  { %11044 = vmatprep.subr.bf16.mxu0 %v11943_v0 }
 0xa1a   :  { %v1509_v25 = vsel %vm714_vm5, %v1436_v35, %v1429_v30 }
 0xa1b   :  { %10292 = vmatmul.mubr.msk.f32.vlgmr.msra.gmra.mrb[16].mxu1 %vm203_vm1, %v1509_v25 }
 0xa1c   :  { %11046 = vmatpush3.bf16.msra.mxu0 %v12345_v33  ;;  %11049 = vmatpush3.bf16.msra.mxu1 %v12424_v60 }
 0xa1d   :  { %11053 = vmatprep.subr.bf16.mxu0 %v11943_v0  ;;  %11050 = vmatprep.subr.bf16.mxu1 %v11943_v0 }
 0xa1e   :  { %10313 = vmatprep.mubr.msk.f32.mxu1 %vm11944_vm0, %v11945_v1 }
 0xa1f   :  { %10303 = vmatmul.mubr.msk.f32.vlgmr.msra.gmra.mrb[10].mxu0 %vm203_vm1, %v1186_v10 }
 0xa20   :  { %11055 = vmatpush3.bf16.msra.mxu0 %v12366_v42  ;;  %10324 = vmatprep.mubr.msk.f32.mxu0 %vm11944_vm0, %v11945_v1 }
 0xa21   :  { %11056 = vmatprep.subr.bf16.mxu0 %v11943_v0  ;;  %11052 = vmatpush3.bf16.msra.mxu1 %v12427_v62 }
 0xa22   :  { %11059 = vmatprep.subr.bf16.mxu1 %v11943_v0 }
 0xa24   :  { %11058 = vmatpush3.bf16.msra.mxu0 %v12391_v53 }
 0xa25   :  { %11065 = vmatprep.subr.bf16.mxu0 %v11943_v0 }
 0xa27   :  { %10325 = vmatmul.mubr.msk.f32.vlgmr.msra.gmra.mrb[12].mxu0 %vm203_vm1, %v1509_v25 }
 0xa28   :  { %11067 = vmatpush3.bf16.msra.mxu0 %v12216_v5  ;;  %10346 = vmatprep.mubr.msk.f32.mxu0 %vm11944_vm0, %v11945_v1 }
 0xa29   :  { %11068 = vmatprep.subr.bf16.mxu0 %v11943_v0 }
 0xa2c   :  { %11070 = vmatpush3.bf16.msra.mxu0 %v12236_v13 }
 0xa2d   :  { %11077 = vmatprep.subr.bf16.mxu0 %v11943_v0 }
 0xae2   :  { %v1255_v40 = vpop.f32.mrb[6].mxu0 }
 0xae3   :  { %v1256_v41 = vadd.f32 %v1255_v40, %v12414_v32  ;;  %v10260_v44 = vpop.f32.mrb[7].mxu0 }
 0xae5   :  { %v1265_v46 = vadd.f32 %v12551_v6, %v1256_v41  ;;  %v1610_v41 = vmul.f32 0.1, %v12433_v4 }
 0xae7   :  { %1267 = vst.msk [vmem:[#allocation19] sm:$0x3] %vm1266_vm7, %v1265_v46 }
 0xaea   :  { %v1503_v49 = vpop.f32.mrb[8].mxu0 }
 0xaeb   :  { %v10282_v50 = vpop.f32.mrb[9].mxu0 }
 0xaee   :  { %v12556_v52 = vld [vmem:[#allocation19] sm:$0x3]  ;;  %v1578_v54 = vpop.f32.mrb[16].mxu1 }
 0xaef   :  { %5993 = vst.msk [vmem:[#allocation2 + $0x4] sm:$0x3] %vm718_vm4, %v12556_v52  ;;  %v1579_v57 = vadd.f32 %v1578_v54, %v1503_v49  ;;  %v10293_v59 = vpop.f32.mrb[17].mxu1 }
 0xaf1   :  { %v1585_v61 = vadd.f32 %v1583_v58, %v1579_v57 }
 0xaf2   :  { %v1682_v32 = vpop.f32.mrb[10].mxu0 }
 0xaf3   :  { %11490 = vtanh.f32 %v1585_v61  ;;  %v10304_v63 = vpop.f32.mrb[11].mxu0  ;;  %v9652_v8 = vmul.f32 -1.442695, %v1585_v61 }
 0xaf5   :  { %11492 = vpow2.f32 %v9652_v8 }
 0xafa   :  { %v12561_v2 = vpop.f32.mrb[12].mxu0 }
 0xafb   :  { %v10326_v3 = vpop.f32.mrb[13].mxu0 }
 0xafd   :  { %v11491_v7 = vpop.eup %11490 }
 0xafe   :  { %1595 = vrot.lane.b32.xlu1 %v11491_v7, %s11947_s10 }
 0xaff   :  { %v11493_v9 = vpop.eup %11492 }
 0xb00   :  { %v1589_v10 = vadd.f32 1.0, %v11493_v9 }
 0xb02   :  { %11494 = vrcp.f32 %v1589_v10 }
 0xb0c   :  { %v11495_v11 = vpop.eup %11494 }
 0xb0d   :  { %v1593_v24 = vmul.f32 %v11495_v11, %v12566_v20 }
 0xb70   :  { %v1596_v14 = vpop.permute.xlu1 %1595 }
 0xb71   :  { %v1598_v16 = vmul.f32 %v11495_v11, %v1596_v14 }
 0xb73   :  { %1600 = vrot.lane.b32.xlu1 %v1598_v16, %s11948_s16 }
 0xbe5   :  { %v1601_v27 = vpop.permute.xlu1 %1600 }
 0xbe6   :  { %v12569_v30 = vadd.f32 %v1601_v27, %v1593_v24 }
 0xbe8   :  { %11496 = vtanh.f32 %v12569_v30 }
 0xbf2   :  { %v11497_v35 = vpop.eup %11496 }
 0xbf3   :  { %1606 = vrot.lane.b32.xlu0 %v11497_v35, %s11947_s10 }
 0xc65   :  { %v1607_v25 = vpop.permute.xlu0 %1606 }
 0xc66   :  { %v1609_v40 = vmul.f32 %v11495_v11, %v1607_v25 }
 0xc68   :  { %v1611_v44 = vmul.f32 0.9, %v1609_v40 }
 0xc6a   :  { %v12574_v46 = vadd.f32 %v1611_v44, %v1610_v41 }
 0xc6c   :  { %1687 = vrot.lane.b32.xlu1 %v12574_v46, %s11948_s16 }
 0xcde   :  { %v12578_v56 = vpop.permute.xlu1 %1687 }
 0xcdf   :  { %10314 = vmatmul.mubr.msk.f32.vlgmr.msra.gmra.mrb[18].mxu1 %vm203_vm1, %v12578_v56  ;;  %10347 = vmatmul.mubr.msk.f32.vlgmr.msra.gmra.mrb[14].mxu0 %vm203_vm1, %v12578_v56 }
 0xce0   :  { %11061 = vmatpush3.bf16.msra.mxu1 %v12487_v36  ;;  %10335 = vmatprep.mubr.msk.f32.mxu1 %vm11944_vm0, %v11945_v1 }
 0xce1   :  { %11062 = vmatprep.subr.bf16.mxu1 %v11943_v0  ;;  %11079 = vmatpush3.bf16.msra.mxu0 %v12361_v39 }
 0xce2   :  { %11080 = vmatprep.subr.bf16.mxu0 %v11943_v0  ;;  %10368 = vmatprep.mubr.msk.f32.mxu0 %vm11944_vm0, %v11945_v1 }
 0xce4   :  { %11064 = vmatpush3.bf16.msra.mxu1 %v12497_v43 }
 0xce5   :  { %11071 = vmatprep.subr.bf16.mxu1 %v11943_v0  ;;  %11082 = vmatpush3.bf16.msra.mxu0 %v12384_v51 }
 0xce6   :  { %11089 = vmatprep.subr.bf16.mxu0 %v11943_v0 }
 0xdb2   :  { %v1757_v4 = vpop.f32.mrb[18].mxu1  ;;  %v2006_v49 = vpop.f32.mrb[14].mxu0 }
 0xdb3   :  { %v1758_v50 = vadd.f32 %v1757_v4, %v1682_v32  ;;  %v2017_v54 = vrot.slane %v2006_v49, %v12257_v23  ;;  %v10315_v57 = vpop.f32.mrb[19].mxu1  ;;  %v10348_v58 = vpop.f32.mrb[15].mxu0 }
 0xdb5   :  { %v2018_v59 = vcombine.high %v2017_v54, %v2017_v54  ;;  %v2025_v61 = vrot.slane %v2017_v54, %v12257_v23  ;;  %v1761_v27 = vadd.f32 %v12465_v45, %v1758_v50 }
 0xdb7   :  { %v2032_v63 = vrot.slane %v2018_v59, %v12257_v23  ;;  %v2036_v3 = vrot.slane %v2025_v61, %v12261_v26  ;;  %v9655_v25 = vmul.f32 -1.442695, %v1761_v27 }
 0xdb9   :  { %v2040_v7 = vrot.slane %v2032_v63, %v12261_v26  ;;  %v2043_v8 = vadd.f32 %v2036_v3, %v12266_v31  ;;  %v12617_v3 = vmul.f32 0.9, %v12476_v19 }
 0xdbb   :  { %v2044_v9 = vadd.f32 %v12263_v28, %v2040_v7  ;;  %11498 = vtanh.f32 %v2043_v8 }
 0xdbd   :  { %11500 = vtanh.f32 %v2044_v9 }
 0xdbe   :  { %11502 = vtanh.f32 %v1761_v27 }
 0xdbf   :  { %11504 = vpow2.f32 %v9655_v25 }
 0xdc5   :  { %v11499_v32 = vpop.eup %11498 }
 0xdc6   :  { %v2047_v10 = vmul.f32 %v11499_v32, %v12276_v37 }
 0xdc7   :  { %v11501_v11 = vpop.eup %11500 }
 0xdc8   :  { %v2049_v14 = vsel %vm374_vm3, %v2047_v10, 0.0  ;;  %v2048_v16 = vmul.f32 %v11501_v11, %v12276_v37  ;;  %v11503_v35 = vpop.eup %11502 }
 0xdc9   :  { %2050 = vadd.xlane.f32.xlu1 %v2049_v14  ;;  %v11505_v54 = vpop.eup %11504 }
 0xdca   :  { %v2052_v24 = vsel %vm374_vm3, %v2048_v16, 0.0  ;;  %v1765_v57 = vadd.f32 1.0, %v11505_v54 }
 0xdcb   :  { %2053 = vadd.xlane.f32.xlu0 %v2052_v24 }
 0xdcc   :  { %11506 = vrcp.f32 %v1765_v57 }
 0xdd6   :  { %v11507_v59 = vpop.eup %11506 }
 0xdd7   :  { %v1769_v9 = vmul.f32 %v11507_v59, %v12617_v3 }
 0xdda   :  { %1771 = vrot.lane.b32.xlu1 %v11503_v35, %s11947_s10 }
 0xe56   :  { %v2051_v40 = vpop.xlane.xlu1 %2050 }
 0xe57   :  { %v2060_v44 = vrot.slane %v2051_v40, %v12311_v47 }
 0xe58   :  { %v2054_v41 = vpop.xlane.xlu0 %2053 }
 0xe59   :  { %v2064_v4 = vrot.slane %v2054_v41, %v12311_v47 }
 0xe5a   :  { %v1772_v58 = vpop.permute.xlu1 %1771 }
 0xe5b   :  { %v2065_v37 = vsel %vm714_vm5, %v2064_v4, %v2060_v44  ;;  %v1774_v61 = vmul.f32 %v11507_v59, %v1772_v58  ;;  %v1786_v4 = vmul.f32 0.1, %v12503_v55 }
 0xe5c   :  { %v2067_v49 = vsel %vm197_vm6, %v2065_v37, -1e+30 }
 0xe5d   :  { %v2068_v50 = vsel %vm718_vm4, %v2067_v49, -inf }
 0xe5e   :  { %2069 = vmax.xlane.f32.xlu0 %v2068_v50 }
 0xe74   :  { %1776 = vrot.lane.b32.xlu0 %v1774_v61, %s11948_s16 }
 0xeeb   :  { %v2070_v63 = vpop.xlane.xlu0 %2069 }
 0xeec   :  { %v2071_v7 = vsub.f32 %v2067_v49, %v2070_v63 }
 0xeee   :  { %v2072_v8 = vmul.f32 1.442695, %v2071_v7 }
 0xeef   :  { %v1777_v32 = vpop.permute.xlu0 %1776 }
 0xef0   :  { %11508 = vpow2.f32 %v2072_v8  ;;  %v12620_v10 = vadd.f32 %v1777_v32, %v1769_v9 }
 0xef2   :  { %11510 = vtanh.f32 %v12620_v10 }
 0xefa   :  { %v11509_v11 = vpop.eup %11508 }
 0xefb   :  { %v2074_v14 = vsel %vm718_vm4, %v11509_v11, 0.0 }
 0xefc   :  { %v11511_v16 = vpop.eup %11510  ;;  %2075 = vadd.xlane.f32.xlu1 %v2074_v14 }
 0xefd   :  { %1782 = vrot.lane.b32.xlu0 %v11511_v16, %s11947_s10 }
 0xf6f   :  { %v1783_v27 = vpop.permute.xlu0 %1782 }
 0xf70   :  { %v1785_v25 = vmul.f32 %v11507_v59, %v1783_v27 }
 0xf72   :  { %v1787_v41 = vmul.f32 0.9, %v1785_v25 }
 0xf74   :  { %v12628_v37 = vadd.f32 %v1787_v41, %v1786_v4 }
 0xf89   :  { %v2076_v24 = vpop.xlane.xlu1 %2075 }
 0xf8a   :  { %11512 = vrcp.f32 %v2076_v24 }
 0xf94   :  { %v11513_v19 = vpop.eup %11512 }
 0xf95   :  { %v2078_v35 = vmul.f32 %v11513_v19, %v11509_v11 }
 0xf97   :  { %v2082_v40 = vrot.slane %v2078_v35, %v12261_v26  ;;  %v2089_v44 = vrot.slane %v2078_v35, %v12358_v38 }
 0xf99   :  { %2084 = vbcast.lane.b32.xlu0 %v2082_v40, 256 }
 0xf9d   :  { %2091 = vbcast.lane.b32.xlu0 %v2089_v44, 256 }
 0xfa1   :  { %1863 = vrot.lane.b32.xlu0 %v12628_v37, %s11948_s16 }
0x100b   :  { %v2085_v49 = vpop.permute.xlu0 %2084 }
0x100c   :  { %v2093_v50 = vmul.f32 %v2085_v49, %v12233_v12 }
0x100e   :  { %v2095_v54 = vsel %vm203_vm1, %v2093_v50, 0.0  ;;  %v2254_v50 = vrot.slane %v12416_v34, 4 }
0x100f   :  { %v2096_v57 = vrot.slane %v2095_v54, 4  ;;  %v2092_v58 = vpop.permute.xlu0 %2091 }
0x1010   :  { %v2094_v59 = vmul.f32 %v2092_v58, %v12243_v15 }
0x1011   :  { %v2097_v61 = vadd.f32 %v2096_v57, %v2095_v54 }
0x1012   :  { %v2102_v63 = vsel %vm203_vm1, %v2094_v59, 0.0 }
0x1013   :  { %v2098_v7 = vrot.slane %v2097_v61, 2  ;;  %v2103_v55 = vrot.slane %v2102_v63, 4  ;;  %v1864_v8 = vpop.permute.xlu0 %1863 }
0x1014   :  { %10336 = vmatmul.mubr.msk.f32.vlgmr.msra.gmra.mrb[20].mxu1 %vm203_vm1, %v1864_v8 }
0x1015   :  { %v2099_v9 = vadd.f32 %v2098_v7, %v2097_v61  ;;  %v2104_v32 = vadd.f32 %v2103_v55, %v2102_v63  ;;  %11073 = vmatpush3.bf16.msra.mxu1 %v12326_v18  ;;  %10357 = vmatprep.mubr.msk.f32.mxu1 %vm11944_vm0, %v11945_v1 }
0x1016   :  { %11074 = vmatprep.subr.bf16.mxu1 %v11943_v0 }
0x1017   :  { %v2105_v12 = vrot.slane %v2104_v32, 2  ;;  %v2100_v11 = vrot.slane %v2099_v9, 1 }
0x1019   :  { %v2106_v15 = vadd.f32 %v2105_v12, %v2104_v32  ;;  %11076 = vmatpush3.bf16.msra.mxu1 %v12331_v21  ;;  %v2101_v16 = vadd.f32 %v2100_v11, %v2099_v9  ;;  %v1614_v11 = vmul.f32 0.9, %v12569_v30 }
0x101a   :  { %11083 = vmatprep.subr.bf16.mxu1 %v11943_v0 }
0x101b   :  { %v2107_v14 = vrot.slane %v2106_v15, 1 }
0x101c   :  { %10358 = vmatmul.mubr.msk.f32.vlgmr.msra.gmra.mrb[22].mxu1 %vm203_vm1, %v12578_v56 }
0x101d   :  { %v2108_v24 = vadd.f32 %v2107_v14, %v2106_v15  ;;  %11085 = vmatpush3.bf16.msra.mxu1 %v12338_v29  ;;  %10379 = vmatprep.mubr.msk.f32.mxu1 %vm11944_vm0, %v11945_v1  ;;  %v1613_v15 = vmul.f32 0.1, %v12566_v20 }
0x101e   :  { %11086 = vmatprep.subr.bf16.mxu1 %v11943_v0 }
0x101f   :  { %v2181_v19 = vsel %vm714_vm5, %v2108_v24, %v2101_v16  ;;  %v12687_v14 = vadd.f32 %v1614_v11, %v1613_v15 }
0x1020   :  { %10369 = vmatmul.mubr.msk.f32.vlgmr.msra.gmra.mrb[16].mxu0 %vm203_vm1, %v2181_v19 }
0x1021   :  { %11088 = vmatpush3.bf16.msra.mxu1 %v12345_v33  ;;  %11091 = vmatpush3.bf16.msra.mxu0 %v12424_v60 }
0x1022   :  { %11095 = vmatprep.subr.bf16.mxu1 %v11943_v0  ;;  %11092 = vmatprep.subr.bf16.mxu0 %v11943_v0 }
0x1023   :  { %10390 = vmatprep.mubr.msk.f32.mxu0 %vm11944_vm0, %v11945_v1 }
0x1024   :  { %10380 = vmatmul.mubr.msk.f32.vlgmr.msra.gmra.mrb[24].mxu1 %vm203_vm1, %v1864_v8 }
0x1025   :  { %11097 = vmatpush3.bf16.msra.mxu1 %v12366_v42  ;;  %10401 = vmatprep.mubr.msk.f32.mxu1 %vm11944_vm0, %v11945_v1 }
0x1026   :  { %11098 = vmatprep.subr.bf16.mxu1 %v11943_v0  ;;  %11094 = vmatpush3.bf16.msra.mxu0 %v12427_v62 }
0x1027   :  { %11101 = vmatprep.subr.bf16.mxu0 %v11943_v0 }
0x1029   :  { %11100 = vmatpush3.bf16.msra.mxu1 %v12391_v53 }
0x102a   :  { %11107 = vmatprep.subr.bf16.mxu1 %v11943_v0 }
0x102c   :  { %10402 = vmatmul.mubr.msk.f32.vlgmr.msra.gmra.mrb[26].mxu1 %vm203_vm1, %v2181_v19 }
0x102d   :  { %11109 = vmatpush3.bf16.msra.mxu1 %v12216_v5  ;;  %10423 = vmatprep.mubr.msk.f32.mxu1 %vm11944_vm0, %v11945_v1 }
0x102e   :  { %11110 = vmatprep.subr.bf16.mxu1 %v11943_v0 }
0x1031   :  { %11112 = vmatpush3.bf16.msra.mxu1 %v12236_v13 }
0x1032   :  { %11119 = vmatprep.subr.bf16.mxu1 %v11943_v0 }
0x10e7   :  { %v1933_v56 = vpop.f32.mrb[20].mxu1 }
0x10e8   :  { %v1934_v27 = vadd.f32 %v1933_v56, %v12561_v2  ;;  %v10337_v35 = vpop.f32.mrb[21].mxu1 }
0x10ea   :  { %v1937_v25 = vadd.f32 %v12551_v6, %v1934_v27 }
0x10ec   :  { %1939 = vst.msk [vmem:[#allocation19 + $0x2] sm:$0x3] %vm1266_vm7, %v1937_v25  ;;  %v2281_v25 = vmul.f32 0.1, %v12574_v46 }
0x10ef   :  { %v2175_v40 = vpop.f32.mrb[22].mxu1 }
0x10f0   :  { %v10359_v41 = vpop.f32.mrb[23].mxu1 }
0x10f3   :  { %v12676_v44 = vld [vmem:[#allocation19 + $0x2] sm:$0x3]  ;;  %v2250_v4 = vpop.f32.mrb[16].mxu0 }
0x10f4   :  { %5994 = vst.msk [vmem:[#allocation2 + $0x6] sm:$0x3] %vm718_vm4, %v12676_v44  ;;  %v2251_v49 = vadd.f32 %v2250_v4, %v2175_v40  ;;  %v10370_v54 = vpop.f32.mrb[17].mxu0 }
0x10f6   :  { %v2256_v57 = vadd.f32 %v2254_v50, %v2251_v49 }
0x10f7   :  { %v2353_v58 = vpop.f32.mrb[24].mxu1 }
0x10f8   :  { %11514 = vtanh.f32 %v2256_v57  ;;  %v10381_v2 = vpop.f32.mrb[25].mxu1  ;;  %v9661_v7 = vmul.f32 -1.442695, %v2256_v57 }
0x10fa   :  { %11516 = vpow2.f32 %v9661_v7 }
0x10ff   :  { %v12681_v59 = vpop.f32.mrb[26].mxu1 }
0x1100   :  { %v10403_v61 = vpop.f32.mrb[27].mxu1 }
0x1102   :  { %v11515_v63 = vpop.eup %11514 }
0x1103   :  { %2266 = vrot.lane.b32.xlu1 %v11515_v63, %s11947_s10 }
0x1104   :  { %v11517_v55 = vpop.eup %11516 }
0x1105   :  { %v2260_v8 = vadd.f32 1.0, %v11517_v55 }
0x1107   :  { %11518 = vrcp.f32 %v2260_v8 }
0x1111   :  { %v11519_v9 = vpop.eup %11518 }
0x1112   :  { %v2264_v16 = vmul.f32 %v11519_v9, %v12687_v14 }
0x1175   :  { %v2267_v32 = vpop.permute.xlu1 %2266 }
0x1176   :  { %v2269_v12 = vmul.f32 %v11519_v9, %v2267_v32 }
0x1178   :  { %2271 = vrot.lane.b32.xlu0 %v2269_v12, %s11948_s16 }
0x11ea   :  { %v2272_v24 = vpop.permute.xlu0 %2271 }
0x11eb   :  { %v12690_v19 = vadd.f32 %v2272_v24, %v2264_v16 }
0x11ed   :  { %11520 = vtanh.f32 %v12690_v19 }
0x11f7   :  { %v11521_v56 = vpop.eup %11520 }
0x11f8   :  { %2277 = vrot.lane.b32.xlu0 %v11521_v56, %s11947_s10 }
0x126a   :  { %v2278_v27 = vpop.permute.xlu0 %2277 }
0x126b   :  { %v2280_v35 = vmul.f32 %v11519_v9, %v2278_v27  ;;  %v12727_v9 = vld [vmem:[%s13835_s25] ss:$0 sm:$0xff] }
0x126d   :  { %v2282_v40 = vmul.f32 0.9, %v2280_v35 }
0x126f   :  { %v12695_v30 = vadd.f32 %v2282_v40, %v2281_v25 }
0x1271   :  { %2358 = vrot.lane.b32.xlu0 %v12695_v30, %s11948_s16 }
0x12e3   :  { %v12699_v20 = vpop.permute.xlu0 %2358 }
0x12e4   :  { %10391 = vmatmul.mubr.msk.f32.vlgmr.msra.gmra.mrb[18].mxu0 %vm203_vm1, %v12699_v20  ;;  %10424 = vmatmul.mubr.msk.f32.vlgmr.msra.gmra.mrb[28].mxu1 %vm203_vm1, %v12699_v20 }
0x12e5   :  { %11103 = vmatpush3.bf16.msra.mxu0 %v12487_v36  ;;  %10412 = vmatprep.mubr.msk.f32.mxu0 %vm11944_vm0, %v11945_v1 }
0x12e6   :  { %11104 = vmatprep.subr.bf16.mxu0 %v11943_v0  ;;  %11121 = vmatpush3.bf16.msra.mxu1 %v12361_v39 }
0x12e7   :  { %11122 = vmatprep.subr.bf16.mxu1 %v11943_v0  ;;  %10445 = vmatprep.mubr.msk.f32.mxu1 %vm11944_vm0, %v11945_v1 }
0x12e9   :  { %11106 = vmatpush3.bf16.msra.mxu0 %v12497_v43 }
0x12ea   :  { %11113 = vmatprep.subr.bf16.mxu0 %v11943_v0  ;;  %11124 = vmatpush3.bf16.msra.mxu1 %v12384_v51 }
0x12eb   :  { %11131 = vmatprep.subr.bf16.mxu1 %v11943_v0 }
0x13b7   :  { %v2428_v46 = vpop.f32.mrb[18].mxu0  ;;  %v2677_v41 = vpop.f32.mrb[28].mxu1 }
0x13b8   :  { %v2429_v4 = vadd.f32 %v2428_v46, %v2353_v58  ;;  %v2688_v49 = vrot.slane %v2677_v41, %v12257_v23  ;;  %v10392_v50 = vpop.f32.mrb[19].mxu0  ;;  %v10425_v54 = vpop.f32.mrb[29].mxu1 }
0x13ba   :  { %v2689_v57 = vcombine.high %v2688_v49, %v2688_v49  ;;  %v2696_v2 = vrot.slane %v2688_v49, %v12257_v23  ;;  %v2432_v24 = vadd.f32 %v12465_v45, %v2429_v4 }
0x13bc   :  { %v2703_v61 = vrot.slane %v2689_v57, %v12257_v23  ;;  %v2707_v63 = vrot.slane %v2696_v2, %v12261_v26  ;;  %v9664_v27 = vmul.f32 -1.442695, %v2432_v24 }
0x13be   :  { %v2711_v7 = vrot.slane %v2703_v61, %v12261_v26  ;;  %v2714_v55 = vadd.f32 %v2707_v63, %v12266_v31  ;;  %v1790_v61 = vmul.f32 0.9, %v12620_v10  ;;  %v1789_v63 = vmul.f32 0.1, %v12617_v3 }
0x13c0   :  { %v2715_v8 = vadd.f32 %v12263_v28, %v2711_v7  ;;  %11522 = vtanh.f32 %v2714_v55 }
0x13c2   :  { %11524 = vtanh.f32 %v2715_v8  ;;  %v12744_v8 = vadd.f32 %v1790_v61, %v1789_v63  ;;  %v12763_v61 = vld [vmem:[#allocation4 + $0x8] sm:$0xff] }
0x13c3   :  { %11526 = vtanh.f32 %v2432_v24 }
0x13c4   :  { %11528 = vpow2.f32 %v9664_v27 }
0x13ca   :  { %v11523_v58 = vpop.eup %11522 }
0x13cb   :  { %v2718_v32 = vmul.f32 %v12727_v9, %v11523_v58 }
0x13cc   :  { %v11525_v12 = vpop.eup %11524 }
0x13cd   :  { %v2720_v11 = vsel %vm374_vm3, %v2718_v32, 0.0  ;;  %v2719_v15 = vmul.f32 %v12727_v9, %v11525_v12  ;;  %v11527_v56 = vpop.eup %11526 }
0x13ce   :  { %2721 = vadd.xlane.f32.xlu0 %v2720_v11  ;;  %v11529_v41 = vpop.eup %11528 }
0x13cf   :  { %v2723_v16 = vsel %vm374_vm3, %v2719_v15, 0.0  ;;  %v2436_v4 = vadd.f32 1.0, %v11529_v41  ;;  %v2457_v41 = vmul.f32 0.1, %v12628_v37 }
0x13d0   :  { %2724 = vadd.xlane.f32.xlu1 %v2723_v16 }
0x13d1   :  { %11530 = vrcp.f32 %v2436_v4 }
0x13db   :  { %v11531_v57 = vpop.eup %11530 }
0x13dc   :  { %v2440_v32 = vmul.f32 %v11531_v57, %v12744_v8 }
0x13e4   :  { %2442 = vrot.lane.b32.xlu0 %v11527_v56, %s11947_s10 }
0x145b   :  { %v2722_v35 = vpop.xlane.xlu0 %2721 }
0x145c   :  { %v2731_v40 = vrot.slane %v2722_v35, %v12311_v47 }
0x145d   :  { %v2725_v25 = vpop.xlane.xlu1 %2724 }
0x145e   :  { %v2735_v46 = vrot.slane %v2725_v25, %v12311_v47 }
0x145f   :  { %v2443_v54 = vpop.permute.xlu0 %2442 }
0x1460   :  { %v2736_v49 = vsel %vm714_vm5, %v2735_v46, %v2731_v40  ;;  %v2445_v2 = vmul.f32 %v11531_v57, %v2443_v54 }
0x1461   :  { %v2738_v50 = vsel %vm197_vm6, %v2736_v49, -1e+30 }
0x1462   :  { %v2739_v45 = vsel %vm718_vm4, %v2738_v50, -inf }
0x1463   :  { %2740 = vmax.xlane.f32.xlu1 %v2739_v45  ;;  %v12759_v45 = vld [vmem:[#allocation4] sm:$0xff] }
0x1474   :  { %2447 = vrot.lane.b32.xlu1 %v2445_v2, %s11948_s16 }
0x14f0   :  { %v2741_v7 = vpop.xlane.xlu1 %2740 }
0x14f1   :  { %v2742_v55 = vsub.f32 %v2738_v50, %v2741_v7 }
0x14f3   :  { %v2743_v58 = vmul.f32 1.442695, %v2742_v55 }
0x14f4   :  { %v2448_v12 = vpop.permute.xlu1 %2447 }
0x14f5   :  { %11532 = vpow2.f32 %v2743_v58  ;;  %v12747_v11 = vadd.f32 %v2448_v12, %v2440_v32 }
0x14f7   :  { %11534 = vtanh.f32 %v12747_v11 }
0x14ff   :  { %v11533_v15 = vpop.eup %11532 }
0x1500   :  { %v2745_v16 = vsel %vm718_vm4, %v11533_v15, 0.0 }
0x1501   :  { %v11535_v24 = vpop.eup %11534  ;;  %2746 = vadd.xlane.f32.xlu0 %v2745_v16 }
0x1502   :  { %2453 = vrot.lane.b32.xlu1 %v11535_v24, %s11947_s10 }
0x1574   :  { %v2454_v56 = vpop.permute.xlu1 %2453 }
0x1575   :  { %v2456_v35 = vmul.f32 %v11531_v57, %v2454_v56 }
0x1577   :  { %v2458_v40 = vmul.f32 0.9, %v2456_v35 }
0x1579   :  { %v12755_v49 = vadd.f32 %v2458_v40, %v2457_v41 }
0x158e   :  { %v2747_v3 = vpop.xlane.xlu0 %2746 }
0x158f   :  { %11536 = vrcp.f32 %v2747_v3 }
0x1599   :  { %v11537_v10 = vpop.eup %11536 }
0x159a   :  { %v2749_v27 = vmul.f32 %v11537_v10, %v11533_v15 }
0x159c   :  { %v2753_v25 = vrot.slane %v2749_v27, %v12261_v26  ;;  %v2760_v46 = vrot.slane %v2749_v27, %v12358_v38 }
0x159e   :  { %2755 = vbcast.lane.b32.xlu1 %v2753_v25, 256 }
0x15a2   :  { %2762 = vbcast.lane.b32.xlu1 %v2760_v46, 256 }
0x15a6   :  { %2534 = vrot.lane.b32.xlu1 %v12755_v49, %s11948_s16 }
0x1610   :  { %v2756_v50 = vpop.permute.xlu1 %2755 }
0x1611   :  { %v2764_v4 = vmul.f32 %v12759_v45, %v2756_v50 }
0x1613   :  { %v2766_v54 = vsel %vm203_vm1, %v2764_v4, 0.0 }
0x1614   :  { %v2767_v57 = vrot.slane %v2766_v54, 4  ;;  %v2763_v2 = vpop.permute.xlu1 %2762 }
0x1615   :  { %v2765_v63 = vmul.f32 %v12763_v61, %v2763_v2  ;;  %v2925_v2 = vrot.slane %v12416_v34, 6  ;;  %v2285_v34 = vmul.f32 0.9, %v12690_v19 }
0x1616   :  { %v2768_v37 = vadd.f32 %v2767_v57, %v2766_v54 }
0x1617   :  { %v2773_v7 = vsel %vm203_vm1, %v2765_v63, 0.0 }
0x1618   :  { %v2769_v55 = vrot.slane %v2768_v37, 2  ;;  %v2774_v58 = vrot.slane %v2773_v7, 4  ;;  %v2535_v32 = vpop.permute.xlu1 %2534 }
0x1619   :  { %10413 = vmatmul.mubr.msk.f32.vlgmr.msra.gmra.mrb[20].mxu0 %vm203_vm1, %v2535_v32 }
0x161a   :  { %v2770_v12 = vadd.f32 %v2769_v55, %v2768_v37  ;;  %v2775_v15 = vadd.f32 %v2774_v58, %v2773_v7  ;;  %11115 = vmatpush3.bf16.msra.mxu0 %v12326_v18  ;;  %10434 = vmatprep.mubr.msk.f32.mxu0 %vm11944_vm0, %v11945_v1 }
0x161b   :  { %11116 = vmatprep.subr.bf16.mxu0 %v11943_v0 }
0x161c   :  { %v2776_v16 = vrot.slane %v2775_v15, 2  ;;  %v2771_v24 = vrot.slane %v2770_v12, 1 }
0x161e   :  { %v2777_v3 = vadd.f32 %v2776_v16, %v2775_v15  ;;  %11118 = vmatpush3.bf16.msra.mxu0 %v12331_v21  ;;  %v2772_v56 = vadd.f32 %v2771_v24, %v2770_v12 }
0x161f   :  { %11125 = vmatprep.subr.bf16.mxu0 %v11943_v0 }
0x1620   :  { %v2778_v10 = vrot.slane %v2777_v3, 1 }
0x1621   :  { %10435 = vmatmul.mubr.msk.f32.vlgmr.msra.gmra.mrb[22].mxu0 %vm203_vm1, %v12699_v20 }
0x1622   :  { %v2779_v27 = vadd.f32 %v2778_v10, %v2777_v3  ;;  %11127 = vmatpush3.bf16.msra.mxu0 %v12338_v29  ;;  %10456 = vmatprep.mubr.msk.f32.mxu0 %vm11944_vm0, %v11945_v1  ;;  %v2284_v10 = vmul.f32 0.1, %v12687_v14 }
0x1623   :  { %11128 = vmatprep.subr.bf16.mxu0 %v11943_v0 }
0x1624   :  { %v2852_v35 = vsel %vm714_vm5, %v2779_v27, %v2772_v56  ;;  %v12818_v56 = vadd.f32 %v2285_v34, %v2284_v10 }
0x1625   :  { %10446 = vmatmul.mubr.msk.f32.vlgmr.msra.gmra.mrb[30].mxu1 %vm203_vm1, %v2852_v35 }
0x1626   :  { %11130 = vmatpush3.bf16.msra.mxu0 %v12345_v33  ;;  %11133 = vmatpush3.bf16.msra.mxu1 %v12424_v60 }
0x1627   :  { %11137 = vmatprep.subr.bf16.mxu0 %v11943_v0  ;;  %11134 = vmatprep.subr.bf16.mxu1 %v11943_v0 }
0x1628   :  { %10467 = vmatprep.mubr.msk.f32.mxu1 %vm11944_vm0, %v11945_v1 }
0x1629   :  { %10457 = vmatmul.mubr.msk.f32.vlgmr.msra.gmra.mrb[24].mxu0 %vm203_vm1, %v2535_v32 }
0x162a   :  { %11139 = vmatpush3.bf16.msra.mxu0 %v12366_v42  ;;  %10478 = vmatprep.mubr.msk.f32.mxu0 %vm11944_vm0, %v11945_v1 }
0x162b   :  { %11140 = vmatprep.subr.bf16.mxu0 %v11943_v0  ;;  %11136 = vmatpush3.bf16.msra.mxu1 %v12427_v62 }
0x162c   :  { %11143 = vmatprep.subr.bf16.mxu1 %v11943_v0 }
0x162e   :  { %11142 = vmatpush3.bf16.msra.mxu0 %v12391_v53 }
0x162f   :  { %11149 = vmatprep.subr.bf16.mxu0 %v11943_v0 }
0x1631   :  { %10479 = vmatmul.mubr.msk.f32.vlgmr.msra.gmra.mrb[26].mxu0 %vm203_vm1, %v2852_v35 }
0x1632   :  { %11151 = vmatpush3.bf16.msra.mxu0 %v12216_v5  ;;  %10500 = vmatprep.mubr.msk.f32.mxu0 %vm11944_vm0, %v11945_v1 }
0x1633   :  { %11152 = vmatprep.subr.bf16.mxu0 %v11943_v0 }
0x1636   :  { %11154 = vmatpush3.bf16.msra.mxu0 %v12236_v13 }
0x1637   :  { %11161 = vmatprep.subr.bf16.mxu0 %v11943_v0 }
0x16ec   :  { %v2604_v20 = vpop.f32.mrb[20].mxu0 }
0x16ed   :  { %v2605_v25 = vadd.f32 %v2604_v20, %v12681_v59  ;;  %v10414_v40 = vpop.f32.mrb[21].mxu0 }
0x16ef   :  { %v2608_v46 = vadd.f32 %v12551_v6, %v2605_v25 }
0x16f1   :  { %2610 = vst.msk [vmem:[#allocation19 + $0x4] sm:$0x3] %vm1266_vm7, %v2608_v46 }
0x16f4   :  { %v2846_v41 = vpop.f32.mrb[22].mxu0 }
0x16f5   :  { %v10436_v50 = vpop.f32.mrb[23].mxu0 }
0x16f8   :  { %v12807_v4 = vld [vmem:[#allocation19 + $0x4] sm:$0x3]  ;;  %v2921_v54 = vpop.f32.mrb[30].mxu1 }
0x16f9   :  { %5995 = vst.msk [vmem:[#allocation2 + $0x8] sm:$0x3] %vm718_vm4, %v12807_v4  ;;  %v2922_v57 = vadd.f32 %v2921_v54, %v2846_v41  ;;  %v10447_v63 = vpop.f32.mrb[31].mxu1  ;;  %v2952_v41 = vmul.f32 0.1, %v12695_v30 }
0x16fb   :  { %v2927_v37 = vadd.f32 %v2925_v2, %v2922_v57 }
0x16fc   :  { %v3024_v7 = vpop.f32.mrb[24].mxu0 }
0x16fd   :  { %11538 = vtanh.f32 %v2927_v37  ;;  %v10458_v59 = vpop.f32.mrb[25].mxu0  ;;  %v9670_v32 = vmul.f32 -1.442695, %v2927_v37 }
0x16ff   :  { %11540 = vpow2.f32 %v9670_v32 }
0x1704   :  { %v12812_v55 = vpop.f32.mrb[26].mxu0 }
0x1705   :  { %v10480_v6 = vpop.f32.mrb[27].mxu0 }
0x1707   :  { %v11539_v58 = vpop.eup %11538 }
0x1708   :  { %2937 = vrot.lane.b32.xlu1 %v11539_v58, %s11947_s10 }
0x1709   :  { %v11541_v12 = vpop.eup %11540 }
0x170a   :  { %v2931_v15 = vadd.f32 1.0, %v11541_v12 }
0x170c   :  { %11542 = vrcp.f32 %v2931_v15 }
0x1716   :  { %v11543_v16 = vpop.eup %11542 }
0x1717   :  { %v2935_v27 = vmul.f32 %v11543_v16, %v12818_v56 }
0x177a   :  { %v2938_v24 = vpop.permute.xlu1 %2937 }
0x177b   :  { %v2940_v3 = vmul.f32 %v11543_v16, %v2938_v24 }
0x177d   :  { %2942 = vrot.lane.b32.xlu1 %v2940_v3, %s11948_s16 }
0x17ef   :  { %v2943_v35 = vpop.permute.xlu1 %2942 }
0x17f0   :  { %v12821_v20 = vadd.f32 %v2943_v35, %v2935_v27  ;;  %v12862_v35 = vld [vmem:[%s13796_s14] ss:$0 sm:$0xff] }
0x17f2   :  { %11544 = vtanh.f32 %v12821_v20 }
0x17fc   :  { %v11545_v25 = vpop.eup %11544 }
0x17fd   :  { %2948 = vrot.lane.b32.xlu0 %v11545_v25, %s11947_s10 }
0x186f   :  { %v2949_v40 = vpop.permute.xlu0 %2948 }
0x1870   :  { %v2951_v46 = vmul.f32 %v11543_v16, %v2949_v40 }
0x1872   :  { %v2953_v50 = vmul.f32 0.9, %v2951_v46 }
0x1874   :  { %v12826_v19 = vadd.f32 %v2953_v50, %v2952_v41 }
0x1876   :  { %3029 = vrot.lane.b32.xlu1 %v12826_v19, %s11948_s16 }
0x18e8   :  { %v12830_v14 = vpop.permute.xlu1 %3029 }
0x18e9   :  { %10468 = vmatmul.mubr.msk.f32.vlgmr.msra.gmra.mrb[32].mxu1 %vm203_vm1, %v12830_v14  ;;  %10501 = vmatmul.mubr.msk.f32.vlgmr.msra.gmra.mrb[28].mxu0 %vm203_vm1, %v12830_v14 }
0x18ea   :  { %11145 = vmatpush3.bf16.msra.mxu1 %v12487_v36  ;;  %10489 = vmatprep.mubr.msk.f32.mxu1 %vm11944_vm0, %v11945_v1 }
0x18eb   :  { %11146 = vmatprep.subr.bf16.mxu1 %v11943_v0  ;;  %11163 = vmatpush3.bf16.msra.mxu0 %v12361_v39 }
0x18ec   :  { %11164 = vmatprep.subr.bf16.mxu0 %v11943_v0  ;;  %10522 = vmatprep.mubr.msk.f32.mxu0 %vm11944_vm0, %v11945_v1 }
0x18ee   :  { %11148 = vmatpush3.bf16.msra.mxu1 %v12497_v43 }
0x18ef   :  { %11155 = vmatprep.subr.bf16.mxu1 %v11943_v0  ;;  %11166 = vmatpush3.bf16.msra.mxu0 %v12384_v51 }
0x18f0   :  { %11173 = vmatprep.subr.bf16.mxu0 %v11943_v0 }
0x19bc   :  { %v3099_v30 = vpop.f32.mrb[32].mxu1  ;;  %v3348_v54 = vpop.f32.mrb[28].mxu0 }
0x19bd   :  { %v3100_v57 = vadd.f32 %v3099_v30, %v3024_v7  ;;  %v3359_v2 = vrot.slane %v3348_v54, %v12257_v23  ;;  %v10469_v63 = vpop.f32.mrb[33].mxu1  ;;  %v10502_v37 = vpop.f32.mrb[29].mxu0 }
0x19bf   :  { %v3360_v59 = vcombine.high %v3359_v2, %v3359_v2  ;;  %v3367_v6 = vrot.slane %v3359_v2, %v12257_v23  ;;  %v3103_v25 = vadd.f32 %v12862_v35, %v3100_v57 }
0x19c1   :  { %v3374_v58 = vrot.slane %v3360_v59, %v12257_v23  ;;  %v3378_v32 = vrot.slane %v3367_v6, %v12261_v26  ;;  %v9673_v46 = vmul.f32 -1.442695, %v3103_v25 }
0x19c3   :  { %v3382_v12 = vrot.slane %v3374_v58, %v12261_v26  ;;  %v3385_v15 = vadd.f32 %v3378_v32, %v12266_v31 }
0x19c5   :  { %v3386_v16 = vadd.f32 %v12263_v28, %v3382_v12  ;;  %11546 = vtanh.f32 %v3385_v15  ;;  %v2461_v12 = vmul.f32 0.9, %v12747_v11  ;;  %v2460_v15 = vmul.f32 0.1, %v12744_v8 }
0x19c7   :  { %11548 = vtanh.f32 %v3386_v16 }
0x19c8   :  { %11550 = vtanh.f32 %v3103_v25 }
0x19c9   :  { %11552 = vpow2.f32 %v9673_v46 }
0x19cf   :  { %v11547_v7 = vpop.eup %11546 }
0x19d0   :  { %v3389_v24 = vmul.f32 %v12727_v9, %v11547_v7 }
0x19d1   :  { %v11549_v3 = vpop.eup %11548 }
0x19d2   :  { %v3391_v34 = vsel %vm374_vm3, %v3389_v24, 0.0  ;;  %v3390_v10 = vmul.f32 %v12727_v9, %v11549_v3  ;;  %v11551_v40 = vpop.eup %11550  ;;  %v12875_v24 = vadd.f32 %v2461_v12, %v2460_v15 }
0x19d3   :  { %3392 = vadd.xlane.f32.xlu1 %v3391_v34  ;;  %v11553_v37 = vpop.eup %11552 }
0x19d4   :  { %v3394_v27 = vsel %vm374_vm3, %v3390_v10, 0.0  ;;  %v3107_v59 = vadd.f32 1.0, %v11553_v37 }
0x19d5   :  { %3395 = vadd.xlane.f32.xlu0 %v3394_v27 }
0x19d6   :  { %11554 = vrcp.f32 %v3107_v59 }
0x19e0   :  { %v11555_v58 = vpop.eup %11554 }
0x19e1   :  { %v3111_v34 = vmul.f32 %v11555_v58, %v12875_v24 }
0x19e4   :  { %3113 = vrot.lane.b32.xlu1 %v11551_v40, %s11947_s10 }
0x1a60   :  { %v3393_v41 = vpop.xlane.xlu1 %3392 }
0x1a61   :  { %v3402_v30 = vrot.slane %v3393_v41, %v12311_v47 }
0x1a62   :  { %v3396_v50 = vpop.xlane.xlu0 %3395 }
0x1a63   :  { %v3406_v54 = vrot.slane %v3396_v50, %v12311_v47 }
0x1a64   :  { %v3114_v6 = vpop.permute.xlu1 %3113 }
0x1a65   :  { %v3407_v2 = vsel %vm714_vm5, %v3406_v54, %v3402_v30  ;;  %v3116_v32 = vmul.f32 %v11555_v58, %v3114_v6 }
0x1a66   :  { %v3409_v63 = vsel %vm197_vm6, %v3407_v2, -1e+30 }
0x1a67   :  { %v3410_v57 = vsel %vm718_vm4, %v3409_v63, -inf }
0x1a68   :  { %3411 = vmax.xlane.f32.xlu0 %v3410_v57  ;;  %v3128_v57 = vmul.f32 0.1, %v12755_v49 }
0x1a7e   :  { %3118 = vrot.lane.b32.xlu0 %v3116_v32, %s11948_s16 }
0x1af5   :  { %v3412_v16 = vpop.xlane.xlu0 %3411 }
0x1af6   :  { %v3413_v7 = vsub.f32 %v3409_v63, %v3412_v16 }
0x1af8   :  { %v3414_v3 = vmul.f32 1.442695, %v3413_v7 }
0x1af9   :  { %v3119_v10 = vpop.permute.xlu0 %3118 }
0x1afa   :  { %11556 = vpow2.f32 %v3414_v3  ;;  %v12878_v27 = vadd.f32 %v3119_v10, %v3111_v34 }
0x1afc   :  { %11558 = vtanh.f32 %v12878_v27 }
0x1b04   :  { %v11557_v25 = vpop.eup %11556 }
0x1b05   :  { %v3416_v40 = vsel %vm718_vm4, %v11557_v25, 0.0 }
0x1b06   :  { %v11559_v46 = vpop.eup %11558  ;;  %3417 = vadd.xlane.f32.xlu1 %v3416_v40 }
0x1b07   :  { %3124 = vrot.lane.b32.xlu0 %v11559_v46, %s11947_s10 }
0x1b79   :  { %v3125_v41 = vpop.permute.xlu0 %3124 }
0x1b7a   :  { %v3127_v30 = vmul.f32 %v11555_v58, %v3125_v41 }
0x1b7c   :  { %v3129_v2 = vmul.f32 0.9, %v3127_v30 }
0x1b7e   :  { %v12886_v37 = vadd.f32 %v3129_v2, %v3128_v57 }
0x1b93   :  { %v3418_v8 = vpop.xlane.xlu1 %3417 }
0x1b94   :  { %11560 = vrcp.f32 %v3418_v8 }
0x1b9e   :  { %v11561_v11 = vpop.eup %11560 }
0x1b9f   :  { %v3420_v50 = vmul.f32 %v11561_v11, %v11557_v25 }
0x1ba1   :  { %v3424_v54 = vrot.slane %v3420_v50, %v12261_v26  ;;  %v3431_v63 = vrot.slane %v3420_v50, %v12358_v38 }
0x1ba3   :  { %3426 = vbcast.lane.b32.xlu0 %v3424_v54, 256 }
0x1ba7   :  { %3433 = vbcast.lane.b32.xlu0 %v3431_v63, 256  ;;  %v12935_v63 = vld [vmem:[%s13799_s17] ss:$0 sm:$0xff] }
0x1bab   :  { %3205 = vrot.lane.b32.xlu0 %v12886_v37, %s11948_s16 }
0x1c15   :  { %v3427_v59 = vpop.permute.xlu0 %3426 }
0x1c16   :  { %v3435_v6 = vmul.f32 %v12759_v45, %v3427_v59 }
0x1c18   :  { %v3437_v32 = vsel %vm203_vm1, %v3435_v6, 0.0 }
0x1c19   :  { %v3438_v58 = vrot.slane %v3437_v32, 4  ;;  %v3434_v12 = vpop.permute.xlu0 %3433 }
0x1c1a   :  { %v3436_v15 = vmul.f32 %v12763_v61, %v3434_v12 }
0x1c1b   :  { %v3439_v16 = vadd.f32 %v3438_v58, %v3437_v32 }
0x1c1c   :  { %v3444_v7 = vsel %vm203_vm1, %v3436_v15, 0.0 }
0x1c1d   :  { %v3440_v3 = vrot.slane %v3439_v16, 2  ;;  %v3445_v49 = vrot.slane %v3444_v7, 4  ;;  %v3206_v34 = vpop.permute.xlu0 %3205 }
0x1c1e   :  { %10490 = vmatmul.mubr.msk.f32.vlgmr.msra.gmra.mrb[34].mxu1 %vm203_vm1, %v3206_v34 }
0x1c1f   :  { %v3441_v10 = vadd.f32 %v3440_v3, %v3439_v16  ;;  %v3446_v25 = vadd.f32 %v3445_v49, %v3444_v7  ;;  %11157 = vmatpush3.bf16.msra.mxu1 %v12326_v18  ;;  %10511 = vmatprep.mubr.msk.f32.mxu1 %vm11944_vm0, %v11945_v1 }
0x1c20   :  { %11158 = vmatprep.subr.bf16.mxu1 %v11943_v0 }
0x1c21   :  { %v3447_v40 = vrot.slane %v3446_v25, 2  ;;  %v3442_v46 = vrot.slane %v3441_v10, 1 }
0x1c23   :  { %v3448_v8 = vadd.f32 %v3447_v40, %v3446_v25  ;;  %11160 = vmatpush3.bf16.msra.mxu1 %v12331_v21  ;;  %v3443_v41 = vadd.f32 %v3442_v46, %v3441_v10 }
0x1c24   :  { %11167 = vmatprep.subr.bf16.mxu1 %v11943_v0 }
0x1c25   :  { %v3449_v11 = vrot.slane %v3448_v8, 1 }
0x1c26   :  { %10512 = vmatmul.mubr.msk.f32.vlgmr.msra.gmra.mrb[36].mxu1 %vm203_vm1, %v12830_v14 }
0x1c27   :  { %v3450_v50 = vadd.f32 %v3449_v11, %v3448_v8  ;;  %11169 = vmatpush3.bf16.msra.mxu1 %v12338_v29  ;;  %10533 = vmatprep.mubr.msk.f32.mxu1 %vm11944_vm0, %v11945_v1 }
0x1c28   :  { %11170 = vmatprep.subr.bf16.mxu1 %v11943_v0 }
0x1c29   :  { %v3523_v30 = vsel %vm714_vm5, %v3450_v50, %v3443_v41  ;;  %v2956_v41 = vmul.f32 0.9, %v12821_v20  ;;  %v2955_v50 = vmul.f32 0.1, %v12818_v56 }
0x1c2a   :  { %10523 = vmatmul.mubr.msk.f32.vlgmr.msra.gmra.mrb[30].mxu0 %vm203_vm1, %v3523_v30 }
0x1c2b   :  { %11172 = vmatpush3.bf16.msra.mxu1 %v12345_v33  ;;  %11175 = vmatpush3.bf16.msra.mxu0 %v12424_v60 }
0x1c2c   :  { %11179 = vmatprep.subr.bf16.mxu1 %v11943_v0  ;;  %11176 = vmatprep.subr.bf16.mxu0 %v11943_v0 }
0x1c2d   :  { %10544 = vmatprep.mubr.msk.f32.mxu0 %vm11944_vm0, %v11945_v1 }
0x1c2e   :  { %10534 = vmatmul.mubr.msk.f32.vlgmr.msra.gmra.mrb[38].mxu1 %vm203_vm1, %v3206_v34 }
0x1c2f   :  { %11181 = vmatpush3.bf16.msra.mxu1 %v12366_v42  ;;  %10555 = vmatprep.mubr.msk.f32.mxu1 %vm11944_vm0, %v11945_v1 }
0x1c30   :  { %11182 = vmatprep.subr.bf16.mxu1 %v11943_v0  ;;  %11178 = vmatpush3.bf16.msra.mxu0 %v12427_v62 }
0x1c31   :  { %11185 = vmatprep.subr.bf16.mxu0 %v11943_v0 }
0x1c33   :  { %11184 = vmatpush3.bf16.msra.mxu1 %v12391_v53 }
0x1c34   :  { %11191 = vmatprep.subr.bf16.mxu1 %v11943_v0 }
0x1c36   :  { %10556 = vmatmul.mubr.msk.f32.vlgmr.msra.gmra.mrb[40].mxu1 %vm203_vm1, %v3523_v30  ;;  %v12950_v30 = vadd.f32 %v2956_v41, %v2955_v50 }
0x1c37   :  { %11193 = vmatpush3.bf16.msra.mxu1 %v12216_v5  ;;  %10577 = vmatprep.mubr.msk.f32.mxu1 %vm11944_vm0, %v11945_v1 }
0x1c38   :  { %11194 = vmatprep.subr.bf16.mxu1 %v11943_v0 }
0x1c3b   :  { %11196 = vmatpush3.bf16.msra.mxu1 %v12236_v13 }
0x1c3c   :  { %11203 = vmatprep.subr.bf16.mxu1 %v11943_v0 }
0x1cf1   :  { %v3275_v14 = vpop.f32.mrb[34].mxu1 }
0x1cf2   :  { %v3276_v54 = vadd.f32 %v3275_v14, %v12812_v55  ;;  %v10491_v2 = vpop.f32.mrb[35].mxu1 }
0x1cf4   :  { %v3279_v57 = vadd.f32 %v12935_v63, %v3276_v54 }
0x1cf6   :  { %3281 = vst.msk [vmem:[#allocation19 + $0x6] sm:$0x3] %vm1266_vm7, %v3279_v57 }
0x1cf9   :  { %v3517_v59 = vpop.f32.mrb[36].mxu1 }
0x1cfa   :  { %v10513_v6 = vpop.f32.mrb[37].mxu1 }
0x1cfd   :  { %v12939_v32 = vld [vmem:[#allocation19 + $0x6] sm:$0x3]  ;;  %v3592_v58 = vpop.f32.mrb[30].mxu0 }
0x1cfe   :  { %5996 = vst.msk [vmem:[#allocation2 + $0xa] sm:$0x3] %vm718_vm4, %v12939_v32  ;;  %v3593_v12 = vadd.f32 %v3592_v58, %v3517_v59  ;;  %v10524_v55 = vpop.f32.mrb[31].mxu0  ;;  %v3621_v58 = vmul.f32 0.1, %v12826_v19 }
0x1d00   :  { %v3596_v15 = vadd.f32 %v3593_v12, %v12412_v17 }
0x1d01   :  { %v3693_v16 = vpop.f32.mrb[38].mxu1 }
0x1d02   :  { %11562 = vtanh.f32 %v3596_v15  ;;  %v10535_v7 = vpop.f32.mrb[39].mxu1  ;;  %v9679_v10 = vmul.f32 -1.442695, %v3596_v15 }
0x1d04   :  { %11564 = vpow2.f32 %v9679_v10 }
0x1d09   :  { %v12944_v3 = vpop.f32.mrb[40].mxu1 }
0x1d0a   :  { %v10557_v49 = vpop.f32.mrb[41].mxu1 }
0x1d0c   :  { %v11563_v34 = vpop.eup %11562 }
0x1d0d   :  { %3606 = vrot.lane.b32.xlu1 %v11563_v34, %s11947_s10 }
0x1d0e   :  { %v11565_v25 = vpop.eup %11564 }
0x1d0f   :  { %v3600_v40 = vadd.f32 1.0, %v11565_v25 }
0x1d11   :  { %11566 = vrcp.f32 %v3600_v40 }
0x1d1b   :  { %v11567_v46 = vpop.eup %11566 }
0x1d1c   :  { %v3604_v14 = vmul.f32 %v11567_v46, %v12950_v30 }
0x1d7f   :  { %v3607_v8 = vpop.permute.xlu1 %3606 }
0x1d80   :  { %v3609_v11 = vmul.f32 %v11567_v46, %v3607_v8 }
0x1d82   :  { %3611 = vrot.lane.b32.xlu0 %v3609_v11, %s11948_s16 }
0x1df4   :  { %v3612_v54 = vpop.permute.xlu0 %3611 }
0x1df5   :  { %v12953_v2 = vadd.f32 %v3612_v54, %v3604_v14 }
0x1df7   :  { %11568 = vtanh.f32 %v12953_v2 }
0x1e01   :  { %v11569_v57 = vpop.eup %11568 }
0x1e02   :  { %3617 = vrot.lane.b32.xlu0 %v11569_v57, %s11947_s10 }
0x1e74   :  { %v3618_v59 = vpop.permute.xlu0 %3617 }
0x1e75   :  { %v3620_v6 = vmul.f32 %v11567_v46, %v3618_v59 }
0x1e77   :  { %v3622_v12 = vmul.f32 0.9, %v3620_v6 }
0x1e79   :  { %v12958_v20 = vadd.f32 %v3622_v12, %v3621_v58 }
0x1e7b   :  { %3698 = vrot.lane.b32.xlu0 %v12958_v20, %s11948_s16 }
0x1eed   :  { %v12962_v56 = vpop.permute.xlu0 %3698 }
0x1eee   :  { %10545 = vmatmul.mubr.msk.f32.vlgmr.msra.gmra.mrb[32].mxu0 %vm203_vm1, %v12962_v56  ;;  %10578 = vmatmul.mubr.msk.f32.vlgmr.msra.gmra.mrb[42].mxu1 %vm203_vm1, %v12962_v56 }
0x1eef   :  { %11187 = vmatpush3.bf16.msra.mxu0 %v12487_v36  ;;  %10566 = vmatprep.mubr.msk.f32.mxu0 %vm11944_vm0, %v11945_v1 }
0x1ef0   :  { %11188 = vmatprep.subr.bf16.mxu0 %v11943_v0  ;;  %11205 = vmatpush3.bf16.msra.mxu1 %v12361_v39 }
0x1ef1   :  { %11206 = vmatprep.subr.bf16.mxu1 %v11943_v0  ;;  %10599 = vmatprep.mubr.msk.f32.mxu1 %vm11944_vm0, %v11945_v1 }
0x1ef3   :  { %11190 = vmatpush3.bf16.msra.mxu0 %v12497_v43 }
0x1ef4   :  { %11197 = vmatprep.subr.bf16.mxu0 %v11943_v0  ;;  %11208 = vmatpush3.bf16.msra.mxu1 %v12384_v51 }
0x1ef5   :  { %11215 = vmatprep.subr.bf16.mxu1 %v11943_v0 }
0x1fc1   :  { %v3768_v19 = vpop.f32.mrb[32].mxu0  ;;  %v4017_v55 = vpop.f32.mrb[42].mxu1 }
0x1fc2   :  { %v3769_v15 = vadd.f32 %v3768_v19, %v3693_v16  ;;  %v4028_v7 = vrot.slane %v4017_v55, %v12257_v23  ;;  %v10546_v49 = vpop.f32.mrb[33].mxu0  ;;  %v10579_v34 = vpop.f32.mrb[43].mxu1 }
0x1fc4   :  { %v4029_v10 = vcombine.high %v4028_v7, %v4028_v7  ;;  %v4036_v25 = vrot.slane %v4028_v7, %v12257_v23  ;;  %v3772_v6 = vadd.f32 %v12862_v35, %v3769_v15 }
0x1fc6   :  { %v4043_v40 = vrot.slane %v4029_v10, %v12257_v23  ;;  %v4047_v46 = vrot.slane %v4036_v25, %v12261_v26  ;;  %v9682_v12 = vmul.f32 -1.442695, %v3772_v6 }
0x1fc8   :  { %v4051_v8 = vrot.slane %v4043_v40, %v12261_v26  ;;  %v4054_v11 = vadd.f32 %v4047_v46, %v12266_v31 }
0x1fca   :  { %v4055_v41 = vadd.f32 %v12263_v28, %v4051_v8  ;;  %11570 = vtanh.f32 %v4054_v11  ;;  %v3132_v11 = vmul.f32 0.9, %v12878_v27 }
0x1fcc   :  { %11572 = vtanh.f32 %v4055_v41  ;;  %v3131_v41 = vmul.f32 0.1, %v12875_v24 }
0x1fcd   :  { %11574 = vtanh.f32 %v3772_v6 }
0x1fce   :  { %11576 = vpow2.f32 %v9682_v12 }
0x1fd4   :  { %v11571_v16 = vpop.eup %11570 }
0x1fd5   :  { %v4058_v50 = vmul.f32 %v12727_v9, %v11571_v16 }
0x1fd6   :  { %v11573_v14 = vpop.eup %11572 }
0x1fd7   :  { %v4060_v54 = vsel %vm374_vm3, %v4058_v50, 0.0  ;;  %v4059_v57 = vmul.f32 %v12727_v9, %v11573_v14  ;;  %v11575_v58 = vpop.eup %11574  ;;  %v13002_v14 = vadd.f32 %v3132_v11, %v3131_v41 }
0x1fd8   :  { %4061 = vadd.xlane.f32.xlu0 %v4060_v54  ;;  %v11577_v34 = vpop.eup %11576 }
0x1fd9   :  { %v4063_v59 = vsel %vm374_vm3, %v4059_v57, 0.0  ;;  %v3776_v25 = vadd.f32 1.0, %v11577_v34 }
0x1fda   :  { %4064 = vadd.xlane.f32.xlu1 %v4063_v59 }
0x1fdb   :  { %11578 = vrcp.f32 %v3776_v25 }
0x1fe5   :  { %v11579_v46 = vpop.eup %11578 }
0x1fe6   :  { %v3780_v57 = vmul.f32 %v11579_v46, %v13002_v14 }
0x1fee   :  { %3782 = vrot.lane.b32.xlu0 %v11575_v58, %s11947_s10 }
0x2065   :  { %v4062_v19 = vpop.xlane.xlu0 %4061 }
0x2066   :  { %v4071_v7 = vrot.slane %v4062_v19, %v12311_v47 }
0x2067   :  { %v4065_v55 = vpop.xlane.xlu1 %4064 }
0x2068   :  { %v4075_v49 = vrot.slane %v4065_v55, %v12311_v47 }
0x2069   :  { %v3783_v40 = vpop.permute.xlu0 %3782 }
0x206a   :  { %v4076_v9 = vsel %vm714_vm5, %v4075_v49, %v4071_v7  ;;  %v3785_v8 = vmul.f32 %v11579_v46, %v3783_v40 }
0x206b   :  { %v4078_v10 = vsel %vm197_vm6, %v4076_v9, -1e+30 }
0x206c   :  { %v4079_v15 = vsel %vm718_vm4, %v4078_v10, -inf }
0x206d   :  { %4080 = vmax.xlane.f32.xlu1 %v4079_v15  ;;  %v3797_v15 = vmul.f32 0.1, %v12886_v37 }
0x207e   :  { %3787 = vrot.lane.b32.xlu1 %v3785_v8, %s11948_s16 }
0x20fa   :  { %v4081_v16 = vpop.xlane.xlu1 %4080 }
0x20fb   :  { %v4082_v50 = vsub.f32 %v4078_v10, %v4081_v16 }
0x20fd   :  { %v4083_v54 = vmul.f32 1.442695, %v4082_v50 }
0x20fe   :  { %v3788_v59 = vpop.permute.xlu1 %3787 }
0x20ff   :  { %11580 = vpow2.f32 %v4083_v54  ;;  %v13005_v6 = vadd.f32 %v3788_v59, %v3780_v57 }
0x2101   :  { %11582 = vtanh.f32 %v13005_v6 }
0x2109   :  { %v11581_v58 = vpop.eup %11580 }
0x210a   :  { %v4085_v12 = vsel %vm718_vm4, %v11581_v58, 0.0 }
0x210b   :  { %v11583_v19 = vpop.eup %11582  ;;  %4086 = vadd.xlane.f32.xlu0 %v4085_v12 }
0x210c   :  { %3793 = vrot.lane.b32.xlu1 %v11583_v19, %s11947_s10 }
0x217e   :  { %v3794_v55 = vpop.permute.xlu1 %3793 }
0x217f   :  { %v3796_v49 = vmul.f32 %v11579_v46, %v3794_v55 }
0x2181   :  { %v3798_v9 = vmul.f32 0.9, %v3796_v49 }
0x2183   :  { %v13013_v25 = vadd.f32 %v3798_v9, %v3797_v15 }
0x2198   :  { %v4087_v24 = vpop.xlane.xlu0 %4086 }
0x2199   :  { %11584 = vrcp.f32 %v4087_v24 }
0x21a3   :  { %v11585_v27 = vpop.eup %11584 }
0x21a4   :  { %v4089_v7 = vmul.f32 %v11585_v27, %v11581_v58 }
0x21a6   :  { %v4093_v34 = vrot.slane %v4089_v7, %v12261_v26  ;;  %v4100_v10 = vrot.slane %v4089_v7, %v12358_v38 }
0x21a8   :  { %4095 = vbcast.lane.b32.xlu1 %v4093_v34, 256 }
0x21ac   :  { %4102 = vbcast.lane.b32.xlu1 %v4100_v10, 256 }
0x21b0   :  { %3874 = vrot.lane.b32.xlu1 %v13013_v25, %s11948_s16 }
0x221a   :  { %v4096_v40 = vpop.permute.xlu1 %4095 }
0x221b   :  { %v4104_v8 = vmul.f32 %v12759_v45, %v4096_v40 }
0x221d   :  { %v4106_v11 = vsel %vm203_vm1, %v4104_v8, 0.0 }
0x221e   :  { %v4107_v46 = vrot.slane %v4106_v11, 4  ;;  %v4103_v41 = vpop.permute.xlu1 %4102 }
0x221f   :  { %v4105_v16 = vmul.f32 %v12763_v61, %v4103_v41 }
0x2220   :  { %v4108_v50 = vadd.f32 %v4107_v46, %v4106_v11  ;;  %v4266_v46 = vrot.slane %v12412_v17, 2 }
0x2221   :  { %v4113_v54 = vsel %vm203_vm1, %v4105_v16, 0.0 }
0x2222   :  { %v4109_v57 = vrot.slane %v4108_v50, 2  ;;  %v4114_v37 = vrot.slane %v4113_v54, 4  ;;  %v3875_v59 = vpop.permute.xlu1 %3874 }
0x2223   :  { %10567 = vmatmul.mubr.msk.f32.vlgmr.msra.gmra.mrb[34].mxu0 %vm203_vm1, %v3875_v59 }
0x2224   :  { %v4110_v58 = vadd.f32 %v4109_v57, %v4108_v50  ;;  %v4115_v12 = vadd.f32 %v4114_v37, %v4113_v54  ;;  %11199 = vmatpush3.bf16.msra.mxu0 %v12326_v18  ;;  %10588 = vmatprep.mubr.msk.f32.mxu0 %vm11944_vm0, %v11945_v1 }
0x2225   :  { %11200 = vmatprep.subr.bf16.mxu0 %v11943_v0 }
0x2226   :  { %v4116_v45 = vrot.slane %v4115_v12, 2  ;;  %v4111_v19 = vrot.slane %v4110_v58, 1 }
0x2228   :  { %v4117_v61 = vadd.f32 %v4116_v45, %v4115_v12  ;;  %11202 = vmatpush3.bf16.msra.mxu0 %v12331_v21  ;;  %v4112_v27 = vadd.f32 %v4111_v19, %v4110_v58 }
0x2229   :  { %11209 = vmatprep.subr.bf16.mxu0 %v11943_v0 }
0x222a   :  { %v4118_v24 = vrot.slane %v4117_v61, 1 }
0x222b   :  { %10589 = vmatmul.mubr.msk.f32.vlgmr.msra.gmra.mrb[36].mxu0 %vm203_vm1, %v12962_v56 }
0x222c   :  { %v4119_v55 = vadd.f32 %v4118_v24, %v4117_v61  ;;  %11211 = vmatpush3.bf16.msra.mxu0 %v12338_v29  ;;  %10610 = vmatprep.mubr.msk.f32.mxu0 %vm11944_vm0, %v11945_v1  ;;  %v3625_v24 = vmul.f32 0.9, %v12953_v2 }
0x222d   :  { %11212 = vmatprep.subr.bf16.mxu0 %v11943_v0 }
0x222e   :  { %v4192_v7 = vsel %vm714_vm5, %v4119_v55, %v4112_v27  ;;  %v3624_v27 = vmul.f32 0.1, %v12950_v30 }
0x222f   :  { %10600 = vmatmul.mubr.msk.f32.vlgmr.msra.gmra.mrb[44].mxu1 %vm203_vm1, %v4192_v7 }
0x2230   :  { %11214 = vmatpush3.bf16.msra.mxu0 %v12345_v33  ;;  %11217 = vmatpush3.bf16.msra.mxu1 %v12424_v60  ;;  %v13072_v55 = vadd.f32 %v3625_v24, %v3624_v27 }
0x2231   :  { %11221 = vmatprep.subr.bf16.mxu0 %v11943_v0  ;;  %11218 = vmatprep.subr.bf16.mxu1 %v11943_v0 }
0x2232   :  { %10621 = vmatprep.mubr.msk.f32.mxu1 %vm11944_vm0, %v11945_v1 }
0x2233   :  { %10611 = vmatmul.mubr.msk.f32.vlgmr.msra.gmra.mrb[38].mxu0 %vm203_vm1, %v3875_v59 }
0x2234   :  { %11223 = vmatpush3.bf16.msra.mxu0 %v12366_v42  ;;  %10632 = vmatprep.mubr.msk.f32.mxu0 %vm11944_vm0, %v11945_v1 }
0x2235   :  { %11224 = vmatprep.subr.bf16.mxu0 %v11943_v0  ;;  %11220 = vmatpush3.bf16.msra.mxu1 %v12427_v62 }
0x2236   :  { %11227 = vmatprep.subr.bf16.mxu1 %v11943_v0 }
0x2238   :  { %11226 = vmatpush3.bf16.msra.mxu0 %v12391_v53 }
0x2239   :  { %11233 = vmatprep.subr.bf16.mxu0 %v11943_v0 }
0x223b   :  { %10633 = vmatmul.mubr.msk.f32.vlgmr.msra.gmra.mrb[40].mxu0 %vm203_vm1, %v4192_v7 }
0x223c   :  { %11235 = vmatpush3.bf16.msra.mxu0 %v12216_v5  ;;  %10654 = vmatprep.mubr.msk.f32.mxu0 %vm11944_vm0, %v11945_v1 }
0x223d   :  { %11236 = vmatprep.subr.bf16.mxu0 %v11943_v0 }
0x2240   :  { %11238 = vmatpush3.bf16.msra.mxu0 %v12236_v13 }
0x2241   :  { %11245 = vmatprep.subr.bf16.mxu0 %v11943_v0 }
0x22f6   :  { %v3944_v56 = vpop.f32.mrb[34].mxu0 }
0x22f7   :  { %v3945_v49 = vadd.f32 %v3944_v56, %v12944_v3  ;;  %v10568_v34 = vpop.f32.mrb[35].mxu0 }
0x22f9   :  { %v3948_v9 = vadd.f32 %v12935_v63, %v3945_v49 }
0x22fb   :  { %3950 = vst.msk [vmem:[#allocation19 + $0x8] sm:$0x3] %vm1266_vm7, %v3948_v9 }
0x22fe   :  { %v4186_v10 = vpop.f32.mrb[36].mxu0 }
0x22ff   :  { %v10590_v15 = vpop.f32.mrb[37].mxu0 }
0x2300   :  { %v4293_v15 = vmul.f32 0.1, %v12958_v20 }
0x2302   :  { %v13061_v40 = vld [vmem:[#allocation19 + $0x8] sm:$0x3]  ;;  %v4261_v8 = vpop.f32.mrb[44].mxu1 }
0x2303   :  { %5997 = vst.msk [vmem:[#allocation2 + $0xc] sm:$0x3] %vm718_vm4, %v13061_v40  ;;  %v4262_v11 = vadd.f32 %v4261_v8, %v4186_v10  ;;  %v10601_v41 = vpop.f32.mrb[45].mxu1 }
0x2305   :  { %v4268_v16 = vadd.f32 %v4266_v46, %v4262_v11 }
0x2306   :  { %v4365_v50 = vpop.f32.mrb[38].mxu0 }
0x2307   :  { %11586 = vtanh.f32 %v4268_v16  ;;  %v10612_v3 = vpop.f32.mrb[39].mxu0  ;;  %v9688_v59 = vmul.f32 -1.442695, %v4268_v16 }
0x2309   :  { %11588 = vpow2.f32 %v9688_v59 }
0x230e   :  { %v13066_v54 = vpop.f32.mrb[40].mxu0 }
0x230f   :  { %v10634_v57 = vpop.f32.mrb[41].mxu0 }
0x2311   :  { %v11587_v37 = vpop.eup %11586 }
0x2312   :  { %4278 = vrot.lane.b32.xlu1 %v11587_v37, %s11947_s10 }
0x2313   :  { %v11589_v58 = vpop.eup %11588 }
0x2314   :  { %v4272_v12 = vadd.f32 1.0, %v11589_v58 }
0x2316   :  { %11590 = vrcp.f32 %v4272_v12 }
0x2320   :  { %v11591_v45 = vpop.eup %11590 }
0x2321   :  { %v4276_v7 = vmul.f32 %v11591_v45, %v13072_v55 }
0x2384   :  { %v4279_v19 = vpop.permute.xlu1 %4278 }
0x2385   :  { %v4281_v61 = vmul.f32 %v11591_v45, %v4279_v19 }
0x2387   :  { %4283 = vrot.lane.b32.xlu1 %v4281_v61, %s11948_s16  ;;  %v13112_v61 = vld [vmem:[%s13835_s25] ss:$0 sm:$0xff] }
0x23f9   :  { %v4284_v56 = vpop.permute.xlu1 %4283 }
0x23fa   :  { %v13075_v49 = vadd.f32 %v4284_v56, %v4276_v7 }
0x23fc   :  { %11592 = vtanh.f32 %v13075_v49 }
0x2406   :  { %v11593_v34 = vpop.eup %11592 }
0x2407   :  { %4289 = vrot.lane.b32.xlu0 %v11593_v34, %s11947_s10 }
0x2479   :  { %v4290_v9 = vpop.permute.xlu0 %4289 }
0x247a   :  { %v4292_v10 = vmul.f32 %v11591_v45, %v4290_v9 }
0x247c   :  { %v4294_v8 = vmul.f32 0.9, %v4292_v10 }
0x247e   :  { %v13080_v2 = vadd.f32 %v4294_v8, %v4293_v15 }
0x2480   :  { %4370 = vrot.lane.b32.xlu1 %v13080_v2, %s11948_s16 }
0x24f2   :  { %v13084_v30 = vpop.permute.xlu1 %4370 }
0x24f3   :  { %10622 = vmatmul.mubr.msk.f32.vlgmr.msra.gmra.mrb[46].mxu1 %vm203_vm1, %v13084_v30  ;;  %10655 = vmatmul.mubr.msk.f32.vlgmr.msra.gmra.mrb[42].mxu0 %vm203_vm1, %v13084_v30 }
0x24f4   :  { %11229 = vmatpush3.bf16.msra.mxu1 %v12487_v36  ;;  %10643 = vmatprep.mubr.msk.f32.mxu1 %vm11944_vm0, %v11945_v1 }
0x24f5   :  { %11230 = vmatprep.subr.bf16.mxu1 %v11943_v0  ;;  %11247 = vmatpush3.bf16.msra.mxu0 %v12361_v39 }
0x24f6   :  { %11248 = vmatprep.subr.bf16.mxu0 %v11943_v0  ;;  %10676 = vmatprep.mubr.msk.f32.mxu0 %vm11944_vm0, %v11945_v1 }
0x24f8   :  { %11232 = vmatpush3.bf16.msra.mxu1 %v12497_v43 }
0x24f9   :  { %11239 = vmatprep.subr.bf16.mxu1 %v11943_v0  ;;  %11250 = vmatpush3.bf16.msra.mxu0 %v12384_v51 }
0x24fa   :  { %11257 = vmatprep.subr.bf16.mxu0 %v11943_v0 }
0x25c6   :  { %v4440_v20 = vpop.f32.mrb[46].mxu1  ;;  %v4689_v11 = vpop.f32.mrb[42].mxu0 }
0x25c7   :  { %v4441_v46 = vadd.f32 %v4440_v20, %v4365_v50  ;;  %v4700_v41 = vrot.slane %v4689_v11, %v12257_v23  ;;  %v10623_v16 = vpop.f32.mrb[47].mxu1  ;;  %v10656_v3 = vpop.f32.mrb[43].mxu0 }
0x25c9   :  { %v4701_v57 = vcombine.high %v4700_v41, %v4700_v41  ;;  %v4708_v37 = vrot.slane %v4700_v41, %v12257_v23  ;;  %v4444_v9 = vadd.f32 %v12862_v35, %v4441_v46 }
0x25cb   :  { %v4715_v59 = vrot.slane %v4701_v57, %v12257_v23  ;;  %v4719_v58 = vrot.slane %v4708_v37, %v12261_v26  ;;  %v9691_v15 = vmul.f32 -1.442695, %v4444_v9 }
0x25cd   :  { %v4723_v12 = vrot.slane %v4715_v59, %v12261_v26  ;;  %v4726_v45 = vadd.f32 %v4719_v58, %v12266_v31 }
0x25cf   :  { %v4727_v19 = vadd.f32 %v12263_v28, %v4723_v12  ;;  %11594 = vtanh.f32 %v4726_v45  ;;  %v3801_v12 = vmul.f32 0.9, %v13005_v6  ;;  %v3800_v45 = vmul.f32 0.1, %v13002_v14 }
0x25d1   :  { %11596 = vtanh.f32 %v4727_v19 }
0x25d2   :  { %11598 = vtanh.f32 %v4444_v9 }
0x25d3   :  { %11600 = vpow2.f32 %v9691_v15 }
0x25d9   :  { %v11595_v50 = vpop.eup %11594 }
0x25da   :  { %v4730_v24 = vmul.f32 %v13112_v61, %v11595_v50 }
0x25db   :  { %v11597_v27 = vpop.eup %11596 }
0x25dc   :  { %v4732_v7 = vsel %vm374_vm3, %v4730_v24, 0.0  ;;  %v4731_v56 = vmul.f32 %v13112_v61, %v11597_v27  ;;  %v11599_v10 = vpop.eup %11598  ;;  %v13129_v24 = vadd.f32 %v3801_v12, %v3800_v45 }
0x25dd   :  { %4733 = vadd.xlane.f32.xlu1 %v4732_v7  ;;  %v11601_v46 = vpop.eup %11600 }
0x25de   :  { %v4735_v34 = vsel %vm374_vm3, %v4731_v56, 0.0  ;;  %v4448_v57 = vadd.f32 1.0, %v11601_v46 }
0x25df   :  { %4736 = vadd.xlane.f32.xlu0 %v4735_v34 }
0x25e0   :  { %11602 = vrcp.f32 %v4448_v57 }
0x25ea   :  { %v11603_v59 = vpop.eup %11602 }
0x25eb   :  { %v4452_v7 = vmul.f32 %v11603_v59, %v13129_v24 }
0x25ee   :  { %4454 = vrot.lane.b32.xlu1 %v11599_v10, %s11947_s10 }
0x266a   :  { %v4734_v8 = vpop.xlane.xlu1 %4733 }
0x266b   :  { %v4743_v11 = vrot.slane %v4734_v8, %v12311_v47 }
0x266c   :  { %v4737_v20 = vpop.xlane.xlu0 %4736 }
0x266d   :  { %v4747_v41 = vrot.slane %v4737_v20, %v12311_v47 }
0x266e   :  { %v4455_v37 = vpop.permute.xlu1 %4454 }
0x266f   :  { %v4748_v16 = vsel %vm714_vm5, %v4747_v41, %v4743_v11  ;;  %v4457_v58 = vmul.f32 %v11603_v59, %v4455_v37  ;;  %v13144_v37 = vld [vmem:[#allocation4] sm:$0xff] }
0x2670   :  { %v4750_v3 = vsel %vm197_vm6, %v4748_v16, -1e+30 }
0x2671   :  { %v4751_v35 = vsel %vm718_vm4, %v4750_v3, -inf }
0x2672   :  { %4752 = vmax.xlane.f32.xlu0 %v4751_v35  ;;  %v4469_v35 = vmul.f32 0.1, %v13013_v25 }
0x2688   :  { %4459 = vrot.lane.b32.xlu0 %v4457_v58, %s11948_s16 }
0x26ff   :  { %v4753_v19 = vpop.xlane.xlu0 %4752 }
0x2700   :  { %v4754_v50 = vsub.f32 %v4750_v3, %v4753_v19  ;;  %v13148_v19 = vld [vmem:[#allocation4 + $0x8] sm:$0xff] }
0x2702   :  { %v4755_v27 = vmul.f32 1.442695, %v4754_v50 }
0x2703   :  { %v4460_v56 = vpop.permute.xlu0 %4459 }
0x2704   :  { %11604 = vpow2.f32 %v4755_v27  ;;  %v13132_v34 = vadd.f32 %v4460_v56, %v4452_v7 }
0x2706   :  { %11606 = vtanh.f32 %v13132_v34 }
0x270e   :  { %v11605_v9 = vpop.eup %11604 }
0x270f   :  { %v4757_v10 = vsel %vm718_vm4, %v11605_v9, 0.0 }
0x2710   :  { %v11607_v15 = vpop.eup %11606  ;;  %4758 = vadd.xlane.f32.xlu1 %v4757_v10 }
0x2711   :  { %4465 = vrot.lane.b32.xlu0 %v11607_v15, %s11947_s10 }
0x2783   :  { %v4466_v8 = vpop.permute.xlu0 %4465 }
0x2784   :  { %v4468_v11 = vmul.f32 %v11603_v59, %v4466_v8 }
0x2786   :  { %v4470_v16 = vmul.f32 0.9, %v4468_v11 }
0x2788   :  { %v13140_v46 = vadd.f32 %v4470_v16, %v4469_v35 }
0x279d   :  { %v4759_v14 = vpop.xlane.xlu1 %4758 }
0x279e   :  { %11608 = vrcp.f32 %v4759_v14 }
0x27a8   :  { %v11609_v6 = vpop.eup %11608 }
0x27a9   :  { %v4761_v20 = vmul.f32 %v11609_v6, %v11605_v9 }
0x27ab   :  { %v4765_v41 = vrot.slane %v4761_v20, %v12261_v26  ;;  %v4772_v3 = vrot.slane %v4761_v20, %v12358_v38 }
0x27ad   :  { %4767 = vbcast.lane.b32.xlu0 %v4765_v41, 256 }
0x27b1   :  { %4774 = vbcast.lane.b32.xlu0 %v4772_v3, 256 }
0x27b5   :  { %4546 = vrot.lane.b32.xlu0 %v13140_v46, %s11948_s16 }
0x281f   :  { %v4768_v57 = vpop.permute.xlu0 %4767 }
0x2820   :  { %v4776_v58 = vmul.f32 %v13144_v37, %v4768_v57 }
0x2822   :  { %v4778_v59 = vsel %vm203_vm1, %v4776_v58, 0.0 }
0x2823   :  { %v4779_v12 = vrot.slane %v4778_v59, 4  ;;  %v4775_v45 = vpop.permute.xlu0 %4774 }
0x2824   :  { %v4777_v50 = vmul.f32 %v13148_v19, %v4775_v45 }
0x2825   :  { %v4780_v25 = vadd.f32 %v4779_v12, %v4778_v59 }
0x2826   :  { %v4785_v27 = vsel %vm203_vm1, %v4777_v50, 0.0 }
0x2827   :  { %v4781_v7 = vrot.slane %v4780_v25, 2  ;;  %v4786_v56 = vrot.slane %v4785_v27, 4  ;;  %v4547_v9 = vpop.permute.xlu0 %4546 }
0x2828   :  { %10644 = vmatmul.mubr.msk.f32.vlgmr.msra.gmra.mrb[48].mxu1 %vm203_vm1, %v4547_v9 }
0x2829   :  { %v4782_v10 = vadd.f32 %v4781_v7, %v4780_v25  ;;  %v4787_v15 = vadd.f32 %v4786_v56, %v4785_v27  ;;  %11241 = vmatpush3.bf16.msra.mxu1 %v12326_v18  ;;  %10665 = vmatprep.mubr.msk.f32.mxu1 %vm11944_vm0, %v11945_v1 }
0x282a   :  { %11242 = vmatprep.subr.bf16.mxu1 %v11943_v0 }
0x282b   :  { %v4788_v14 = vrot.slane %v4787_v15, 2  ;;  %v4783_v6 = vrot.slane %v4782_v10, 1 }
0x282d   :  { %v4789_v8 = vadd.f32 %v4788_v14, %v4787_v15  ;;  %11244 = vmatpush3.bf16.msra.mxu1 %v12331_v21  ;;  %v4784_v11 = vadd.f32 %v4783_v6, %v4782_v10 }
0x282e   :  { %11251 = vmatprep.subr.bf16.mxu1 %v11943_v0 }
0x282f   :  { %v4790_v20 = vrot.slane %v4789_v8, 1 }
0x2830   :  { %10666 = vmatmul.mubr.msk.f32.vlgmr.msra.gmra.mrb[50].mxu1 %vm203_vm1, %v13084_v30 }
0x2831   :  { %v4791_v41 = vadd.f32 %v4790_v20, %v4789_v8  ;;  %11253 = vmatpush3.bf16.msra.mxu1 %v12338_v29  ;;  %10687 = vmatprep.mubr.msk.f32.mxu1 %vm11944_vm0, %v11945_v1  ;;  %v4297_v20 = vmul.f32 0.9, %v13075_v49 }
0x2832   :  { %11254 = vmatprep.subr.bf16.mxu1 %v11943_v0 }
0x2833   :  { %v4864_v16 = vsel %vm714_vm5, %v4791_v41, %v4784_v11  ;;  %v4296_v11 = vmul.f32 0.1, %v13072_v55 }
0x2834   :  { %10677 = vmatmul.mubr.msk.f32.vlgmr.msra.gmra.mrb[44].mxu0 %vm203_vm1, %v4864_v16 }
0x2835   :  { %11256 = vmatpush3.bf16.msra.mxu1 %v12345_v33  ;;  %11259 = vmatpush3.bf16.msra.mxu0 %v12424_v60  ;;  %v13203_v41 = vadd.f32 %v4297_v20, %v4296_v11 }
0x2836   :  { %11263 = vmatprep.subr.bf16.mxu1 %v11943_v0  ;;  %11260 = vmatprep.subr.bf16.mxu0 %v11943_v0 }
0x2837   :  { %10698 = vmatprep.mubr.msk.f32.mxu0 %vm11944_vm0, %v11945_v1 }
0x2838   :  { %10688 = vmatmul.mubr.msk.f32.vlgmr.msra.gmra.mrb[52].mxu1 %vm203_vm1, %v4547_v9 }
0x2839   :  { %11265 = vmatpush3.bf16.msra.mxu1 %v12366_v42  ;;  %10709 = vmatprep.mubr.msk.f32.mxu1 %vm11944_vm0, %v11945_v1 }
0x283a   :  { %11266 = vmatprep.subr.bf16.mxu1 %v11943_v0  ;;  %11262 = vmatpush3.bf16.msra.mxu0 %v12427_v62 }
0x283b   :  { %11269 = vmatprep.subr.bf16.mxu0 %v11943_v0 }
0x283d   :  { %11268 = vmatpush3.bf16.msra.mxu1 %v12391_v53 }
0x283e   :  { %11275 = vmatprep.subr.bf16.mxu1 %v11943_v0 }
0x2840   :  { %10710 = vmatmul.mubr.msk.f32.vlgmr.msra.gmra.mrb[54].mxu1 %vm203_vm1, %v4864_v16 }
0x2841   :  { %11277 = vmatpush3.bf16.msra.mxu1 %v12216_v5  ;;  %10731 = vmatprep.mubr.msk.f32.mxu1 %vm11944_vm0, %v11945_v1 }
0x2842   :  { %11278 = vmatprep.subr.bf16.mxu1 %v11943_v0 }
0x2845   :  { %11280 = vmatpush3.bf16.msra.mxu1 %v12236_v13  ;;  %v4937_v13 = vrot.slane %v12412_v17, 4 }
0x2846   :  { %11287 = vmatprep.subr.bf16.mxu1 %v11943_v0 }
0x28fb   :  { %v4616_v30 = vpop.f32.mrb[48].mxu1 }
0x28fc   :  { %v4617_v3 = vadd.f32 %v4616_v30, %v13066_v54  ;;  %v10645_v35 = vpop.f32.mrb[49].mxu1 }
0x28fe   :  { %v4620_v57 = vadd.f32 %v12935_v63, %v4617_v3 }
0x2900   :  { %4622 = vst.msk [vmem:[#allocation19 + $0xa] sm:$0x3] %vm1266_vm7, %v4620_v57 }
0x2903   :  { %v4858_v58 = vpop.f32.mrb[50].mxu1 }
0x2904   :  { %v10667_v59 = vpop.f32.mrb[51].mxu1 }
0x2905   :  { %v4964_v59 = vmul.f32 0.1, %v13080_v2 }
0x2907   :  { %v13192_v5 = vld [vmem:[#allocation19 + $0xa] sm:$0x3]  ;;  %v4933_v12 = vpop.f32.mrb[44].mxu0 }
0x2908   :  { %5998 = vst.msk [vmem:[#allocation2 + $0xe] sm:$0x3] %vm718_vm4, %v13192_v5  ;;  %v4934_v45 = vadd.f32 %v4933_v12, %v4858_v58  ;;  %v10678_v50 = vpop.f32.mrb[45].mxu0 }
0x290a   :  { %v4939_v25 = vadd.f32 %v4937_v13, %v4934_v45 }
0x290b   :  { %v5036_v27 = vpop.f32.mrb[52].mxu1 }
0x290c   :  { %11610 = vtanh.f32 %v4939_v25  ;;  %v10689_v54 = vpop.f32.mrb[53].mxu1  ;;  %v9697_v9 = vmul.f32 -1.442695, %v4939_v25 }
0x290e   :  { %11612 = vpow2.f32 %v9697_v9 }
0x2913   :  { %v13197_v7 = vpop.f32.mrb[54].mxu1 }
0x2914   :  { %v10711_v63 = vpop.f32.mrb[55].mxu1 }
0x2916   :  { %v11611_v56 = vpop.eup %11610 }
0x2917   :  { %4949 = vrot.lane.b32.xlu1 %v11611_v56, %s11947_s10 }
0x2918   :  { %v11613_v10 = vpop.eup %11612 }
0x2919   :  { %v4943_v15 = vadd.f32 1.0, %v11613_v10 }
0x291b   :  { %11614 = vrcp.f32 %v4943_v15 }
0x2925   :  { %v11615_v14 = vpop.eup %11614 }
0x2926   :  { %v4947_v16 = vmul.f32 %v11615_v14, %v13203_v41 }
0x2989   :  { %v4950_v6 = vpop.permute.xlu1 %4949 }
0x298a   :  { %v4952_v8 = vmul.f32 %v11615_v14, %v4950_v6 }
0x298c   :  { %4954 = vrot.lane.b32.xlu0 %v4952_v8, %s11948_s16 }
0x29fe   :  { %v4955_v30 = vpop.permute.xlu0 %4954 }
0x29ff   :  { %v13206_v3 = vadd.f32 %v4955_v30, %v4947_v16 }
0x2a01   :  { %11616 = vtanh.f32 %v13206_v3 }
0x2a0b   :  { %v11617_v35 = vpop.eup %11616 }
0x2a0c   :  { %4960 = vrot.lane.b32.xlu0 %v11617_v35, %s11947_s10 }
0x2a7e   :  { %v4961_v57 = vpop.permute.xlu0 %4960 }
0x2a7f   :  { %v4963_v58 = vmul.f32 %v11615_v14, %v4961_v57 }
0x2a81   :  { %v4965_v12 = vmul.f32 0.9, %v4963_v58 }
0x2a83   :  { %v13211_v49 = vadd.f32 %v4965_v12, %v4964_v59 }
0x2a85   :  { %5041 = vrot.lane.b32.xlu0 %v13211_v49, %s11948_s16 }
0x2af7   :  { %v13215_v55 = vpop.permute.xlu0 %5041 }
0x2af8   :  { %10699 = vmatmul.mubr.msk.f32.vlgmr.msra.gmra.mrb[46].mxu0 %vm203_vm1, %v13215_v55  ;;  %10732 = vmatmul.mubr.msk.f32.vlgmr.msra.gmra.mrb[56].mxu1 %vm203_vm1, %v13215_v55 }
0x2af9   :  { %11271 = vmatpush3.bf16.msra.mxu0 %v12487_v36  ;;  %10720 = vmatprep.mubr.msk.f32.mxu0 %vm11944_vm0, %v11945_v1 }
0x2afa   :  { %11272 = vmatprep.subr.bf16.mxu0 %v11943_v0  ;;  %11289 = vmatpush3.bf16.msra.mxu1 %v12361_v39 }
0x2afb   :  { %11290 = vmatprep.subr.bf16.mxu1 %v11943_v0  ;;  %10753 = vmatprep.mubr.msk.f32.mxu1 %vm11944_vm0, %v11945_v1 }
0x2afd   :  { %11274 = vmatpush3.bf16.msra.mxu0 %v12497_v43 }
0x2afe   :  { %11281 = vmatprep.subr.bf16.mxu0 %v11943_v0  ;;  %11292 = vmatpush3.bf16.msra.mxu1 %v12384_v51 }
0x2aff   :  { %11299 = vmatprep.subr.bf16.mxu1 %v11943_v0 }
0x2bcb   :  { %v5111_v2 = vpop.f32.mrb[46].mxu0  ;;  %v5360_v45 = vpop.f32.mrb[56].mxu1 }
0x2bcc   :  { %v5112_v13 = vadd.f32 %v5111_v2, %v5036_v27  ;;  %v5371_v50 = vrot.slane %v5360_v45, %v12257_v23  ;;  %v10700_v25 = vpop.f32.mrb[47].mxu0  ;;  %v10733_v39 = vpop.f32.mrb[57].mxu1 }
0x2bcd   :  { %v4473_v39 = vmul.f32 0.9, %v13132_v34 }
0x2bce   :  { %v5372_v54 = vcombine.high %v5371_v50, %v5371_v50  ;;  %v5379_v63 = vrot.slane %v5371_v50, %v12257_v23 }
0x2bd0   :  { %v5386_v56 = vrot.slane %v5372_v54, %v12257_v23  ;;  %v5390_v9 = vrot.slane %v5379_v63, %v12261_v26 }
0x2bd2   :  { %v5394_v10 = vrot.slane %v5386_v56, %v12261_v26  ;;  %v5397_v51 = vadd.f32 %v5390_v9, %v12266_v31  ;;  %v13247_v31 = vld [vmem:[%s13796_s14] ss:$0 sm:$0xff] }
0x2bd4   :  { %v5398_v15 = vadd.f32 %v12263_v28, %v5394_v10  ;;  %11618 = vtanh.f32 %v5397_v51  ;;  %v5115_v28 = vadd.f32 %v13247_v31, %v5112_v13 }
0x2bd6   :  { %11620 = vtanh.f32 %v5398_v15  ;;  %v9700_v16 = vmul.f32 -1.442695, %v5115_v28 }
0x2bd7   :  { %11622 = vtanh.f32 %v5115_v28 }
0x2bd8   :  { %11624 = vpow2.f32 %v9700_v16  ;;  %v5140_v16 = vmul.f32 0.1, %v13140_v46 }
0x2bde   :  { %v11619_v27 = vpop.eup %11618 }
0x2bdf   :  { %v5401_v14 = vmul.f32 %v13112_v61, %v11619_v27 }
0x2be0   :  { %v11621_v6 = vpop.eup %11620 }
0x2be1   :  { %v5403_v8 = vsel %vm374_vm3, %v5401_v14, 0.0  ;;  %v5402_v20 = vmul.f32 %v13112_v61, %v11621_v6  ;;  %v11623_v11 = vpop.eup %11622 }
0x2be2   :  { %5404 = vadd.xlane.f32.xlu0 %v5403_v8  ;;  %v11625_v58 = vpop.eup %11624 }
0x2be3   :  { %v5406_v23 = vsel %vm374_vm3, %v5402_v20, 0.0  ;;  %v5119_v45 = vadd.f32 1.0, %v11625_v58 }
0x2be4   :  { %5407 = vadd.xlane.f32.xlu1 %v5406_v23 }
0x2be5   :  { %11626 = vrcp.f32 %v5119_v45 }
0x2bef   :  { %v11627_v50 = vpop.eup %11626 }
0x2bf8   :  { %5125 = vrot.lane.b32.xlu0 %v11623_v11, %s11947_s10 }
0x2c6f   :  { %v5405_v30 = vpop.xlane.xlu0 %5404 }
0x2c70   :  { %v5414_v61 = vrot.slane %v5405_v30, %v12311_v47 }
0x2c71   :  { %v5408_v35 = vpop.xlane.xlu1 %5407 }
0x2c72   :  { %v5418_v57 = vrot.slane %v5408_v35, %v12311_v47  ;;  %v4472_v47 = vmul.f32 0.1, %v13129_v24 }
0x2c73   :  { %v5126_v13 = vpop.permute.xlu0 %5125 }
0x2c74   :  { %v5419_v59 = vsel %vm714_vm5, %v5418_v57, %v5414_v61  ;;  %v5128_v25 = vmul.f32 %v11627_v50, %v5126_v13  ;;  %v13260_v56 = vadd.f32 %v4473_v39, %v4472_v47  ;;  %v11949_v47 = vmov 1983009808  }
0x2c75   :  { %v5421_v12 = vsel %vm197_vm6, %v5419_v59, -1e+30 }
0x2c76   :  { %v5422_v2 = vsel %vm718_vm4, %v5421_v12, -inf  ;;  %v5123_v9 = vmul.f32 %v11627_v50, %v13260_v56 }
0x2c77   :  { %5423 = vmax.xlane.f32.xlu1 %v5422_v2 }
0x2c88   :  { %5130 = vrot.lane.b32.xlu1 %v5128_v25, %s11948_s16 }
0x2d04   :  { %v5424_v54 = vpop.xlane.xlu1 %5423 }
0x2d05   :  { %v5425_v63 = vsub.f32 %v5421_v12, %v5424_v54  ;;  %v6034_v54 = vunpack.c.l.s4 %v11949_v47  ;;  %v6013_v47 = vld [vmem:[#allocation2 + $0xe] sm:$0x3] }
0x2d07   :  { %v5426_v48 = vmul.f32 1.442695, %v5425_v63 }
0x2d08   :  { %v5131_v10 = vpop.permute.xlu1 %5130 }
0x2d09   :  { %11628 = vpow2.f32 %v5426_v48  ;;  %v13263_v51 = vadd.f32 %v5131_v10, %v5123_v9  ;;  %v6035_v9 = vunpack.c.0.s8 %v6034_v54  ;;  %v6016_v10 = vld [vmem:[#allocation2 + $0x4] sm:$0x3] }
0x2d0b   :  { %11630 = vtanh.f32 %v13263_v51 }
0x2d13   :  { %v11629_v15 = vpop.eup %11628 }
0x2d14   :  { %v5428_v27 = vsel %vm718_vm4, %v11629_v15, 0.0 }
0x2d15   :  { %v11631_v14 = vpop.eup %11630  ;;  %5429 = vadd.xlane.f32.xlu0 %v5428_v27  ;;  %v13302_v27 = vsub.s32 %v6035_v9, %v12254_v22  ;;  %v6012_v9 = vld [vmem:[#allocation2 + $0xc] sm:$0x3] }
0x2d16   :  { %5136 = vrot.lane.b32.xlu1 %v11631_v14, %s11947_s10 }
0x2d88   :  { %v5137_v6 = vpop.permute.xlu1 %5136 }
0x2d89   :  { %v5139_v20 = vmul.f32 %v11627_v50, %v5137_v6  ;;  %v13325_v6 = vld [vmem:[%s13799_s17] ss:$0 sm:$0xff] }
0x2d8b   :  { %v5141_v28 = vmul.f32 0.9, %v5139_v20 }
0x2d8d   :  { %v13271_v30 = vadd.f32 %v5141_v28, %v5140_v16 }
0x2da2   :  { %v5430_v24 = vpop.xlane.xlu0 %5429 }
0x2da3   :  { %11632 = vrcp.f32 %v5430_v24 }
0x2dad   :  { %v11633_v34 = vpop.eup %11632 }
0x2dae   :  { %v5432_v8 = vmul.f32 %v11633_v34, %v11629_v15 }
0x2db0   :  { %v5436_v23 = vrot.slane %v5432_v8, %v12261_v26  ;;  %v5443_v11 = vrot.slane %v5432_v8, %v12358_v38 }
0x2db2   :  { %5438 = vbcast.lane.b32.xlu1 %v5436_v23, 256 }
0x2db6   :  { %5445 = vbcast.lane.b32.xlu1 %v5443_v11, 256 }
0x2dba   :  { %5217 = vrot.lane.b32.xlu1 %v13271_v30, %s11948_s16 }
0x2e24   :  { %v5439_v35 = vpop.permute.xlu1 %5438 }
0x2e25   :  { %v5447_v61 = vmul.f32 %v13144_v37, %v5439_v35 }
0x2e27   :  { %v5449_v57 = vsel %vm203_vm1, %v5447_v61, 0.0 }
0x2e28   :  { %v5450_v58 = vrot.slane %v5449_v57, 4  ;;  %v5446_v59 = vpop.permute.xlu1 %5445 }
0x2e29   :  { %v5448_v26 = vmul.f32 %v13148_v19, %v5446_v59  ;;  %v6009_v59 = vld [vmem:[#allocation2 + $0x6] sm:$0x3] }
0x2e2a   :  { %v5451_v12 = vadd.f32 %v5450_v58, %v5449_v57  ;;  %v6006_v57 = vld [vmem:[#allocation2] sm:$0x3]  ;;  %v6007_v58 = vld [vmem:[#allocation2 + $0x2] sm:$0x3] }
0x2e2b   :  { %v5456_v38 = vsel %vm203_vm1, %v5448_v26, 0.0 }
0x2e2c   :  { %v5452_v2 = vrot.slane %v5451_v12, 2  ;;  %v5457_v46 = vrot.slane %v5456_v38, 4  ;;  %v5218_v45 = vpop.permute.xlu1 %5217 }
0x2e2d   :  { %10721 = vmatmul.mubr.msk.f32.vlgmr.msra.gmra.mrb[48].mxu0 %vm203_vm1, %v5218_v45 }
0x2e2e   :  { %v5453_v13 = vadd.f32 %v5452_v2, %v5451_v12  ;;  %v5458_v50 = vadd.f32 %v5457_v46, %v5456_v38  ;;  %11283 = vmatpush3.bf16.msra.mxu0 %v12326_v18  ;;  %10742 = vmatprep.mubr.msk.f32.mxu0 %vm11944_vm0, %v11945_v1  ;;  %v6020_v12 = vld [vmem:[#allocation2 + $0xc] sm:$0x3]  ;;  %v6008_v2 = vld [vmem:[#allocation2 + $0x4] sm:$0x3]  ;;  %v6019_v46 = vld [vmem:[#allocation2 + $0xa] sm:$0x3] }
0x2e2f   :  { %11284 = vmatprep.subr.bf16.mxu0 %v11943_v0 }
0x2e30   :  { %v5459_v37 = vrot.slane %v5458_v50, 2  ;;  %v5454_v25 = vrot.slane %v5453_v13, 1 }
0x2e32   :  { %v5460_v19 = vadd.f32 %v5459_v37, %v5458_v50  ;;  %11286 = vmatpush3.bf16.msra.mxu0 %v12331_v21  ;;  %v5455_v63 = vadd.f32 %v5454_v25, %v5453_v13  ;;  %v6018_v21 = vld [vmem:[#allocation2 + $0x8] sm:$0x3]  ;;  %v6153_v13 = vcombine.low %v6008_v2, %v6009_v59  ;;  %v6048_v50 = vcombine.low %v6019_v46, %v6020_v12  ;;  %v6021_v37 = vld [vmem:[#allocation2 + $0xe] sm:$0x3] }
0x2e33   :  { %11293 = vmatprep.subr.bf16.mxu0 %v11943_v0  ;;  %v4967_v2 = vmul.f32 0.1, %v13203_v41 }
0x2e34   :  { %v5461_v39 = vrot.slane %v5460_v19, 1  ;;  %v6056_v54 = vrot.slane %v6048_v50, %v13302_v27 }
0x2e35   :  { %10743 = vmatmul.mubr.msk.f32.vlgmr.msra.gmra.mrb[50].mxu0 %vm203_vm1, %v13215_v55  ;;  %v6015_v55 = vld [vmem:[#allocation2 + $0x2] sm:$0x3] }
0x2e36   :  { %v5462_v18 = vadd.f32 %v5461_v39, %v5460_v19  ;;  %11295 = vmatpush3.bf16.msra.mxu0 %v12338_v29  ;;  %10764 = vmatprep.mubr.msk.f32.mxu0 %vm11944_vm0, %v11945_v1  ;;  %v6017_v29 = vld [vmem:[#allocation2 + $0x6] sm:$0x3]  ;;  %v6167_v39 = vrot.slane %v6153_v13, %v13302_v27 }
0x2e37   :  { %11296 = vmatprep.subr.bf16.mxu0 %v11943_v0  ;;  %v6032_v15 = vcombine.low %v6017_v29, %v6018_v21  ;;  %v6011_v21 = vld [vmem:[#allocation2 + $0xa] sm:$0x3]  ;;  %v6170_v29 = vcombine.low %v6012_v9, %v6013_v47 }
0x2e38   :  { %v5535_v48 = vsel %vm714_vm5, %v5462_v18, %v5455_v63  ;;  %v6268_v18 = vld [vmem:[#allocation2 + $0xa] sm:$0x3] }
0x2e39   :  { %10754 = vmatmul.mubr.msk.f32.vlgmr.msra.gmra.mrb[58].mxu1 %vm203_vm1, %v5535_v48 }
0x2e3a   :  { %11298 = vmatpush3.bf16.msra.mxu0 %v12345_v33  ;;  %11301 = vmatpush3.bf16.msra.mxu1 %v12424_v60  ;;  %v6031_v33 = vcombine.low %v6015_v55, %v6016_v10  ;;  %v6046_v60 = vrot.slane %v6032_v15, %v13302_v27  ;;  %v6266_v15 = vld [vmem:[#allocation2 + $0x6] sm:$0x3] }
0x2e3b   :  { %11305 = vmatprep.subr.bf16.mxu0 %v11943_v0  ;;  %11302 = vmatprep.subr.bf16.mxu1 %v11943_v0 }
0x2e3c   :  { %10775 = vmatprep.mubr.msk.f32.mxu1 %vm11944_vm0, %v11945_v1  ;;  %v6039_v14 = vrot.slane %v6031_v33, %v13302_v27  ;;  %v6267_v33 = vld [vmem:[#allocation2 + $0x8] sm:$0x3] }
0x2e3d   :  { %10765 = vmatmul.mubr.msk.f32.vlgmr.msra.gmra.mrb[52].mxu0 %vm203_vm1, %v5218_v45  ;;  %v6152_v45 = vcombine.low %v6006_v57, %v6007_v58 }
0x2e3e   :  { %11307 = vmatpush3.bf16.msra.mxu0 %v12366_v42  ;;  %10786 = vmatprep.mubr.msk.f32.mxu0 %vm11944_vm0, %v11945_v1  ;;  %v6047_v22 = vcombine.low %v6039_v14, %v6046_v60  ;;  %v6002_v42 = vld [vmem:[%s13800_s18 + $0x8] sm:$0xff] }
0x2e3f   :  { %11308 = vmatprep.subr.bf16.mxu0 %v11943_v0  ;;  %11304 = vmatpush3.bf16.msra.mxu1 %v12427_v62  ;;  %v6001_v62 = vld [vmem:[%s13800_s18] sm:$0xff]  ;;  %v6010_v14 = vld [vmem:[#allocation2 + $0x8] sm:$0x3] }
0x2e40   :  { %11311 = vmatprep.subr.bf16.mxu1 %v11943_v0 }
0x2e42   :  { %11310 = vmatpush3.bf16.msra.mxu0 %v12391_v53 }
0x2e43   :  { %10800 = vmatprep.subr.mxu0 %v6002_v42 }
0x2e45   :  { %10787 = vmatmul.mubr.msk.f32.vlgmr.msra.gmra.mrb[54].mxu0 %vm203_vm1, %v5535_v48 }
0x2e46   :  { %10802 = vmatprep.mubr.msk.f32.mxu0 %vm288_vm2, %v6047_v22  ;;  %10801 = vmatpush3.msra.mxu0 %v6002_v42  ;;  %v6282_v22 = vcombine.low %v6267_v33, %v6268_v18 }
0x2e47   :  { %10805 = vmatprep.subr.mxu0 %v6001_v62 }
0x2f00   :  { %v5287_v24 = vpop.f32.mrb[48].mxu0 }
0x2f01   :  { %v5288_v53 = vadd.f32 %v5287_v24, %v13197_v7  ;;  %v10722_v34 = vpop.f32.mrb[49].mxu0  ;;  %v5608_v7 = vrot.slane %v12412_v17, 6  ;;  %v6160_v17 = vrot.slane %v6152_v45, %v13302_v27  ;;  %v6169_v24 = vcombine.low %v6010_v14, %v6011_v21 }
0x2f03   :  { %v5291_v8 = vadd.f32 %v13325_v6, %v5288_v53  ;;  %v6168_v60 = vcombine.low %v6160_v17, %v6167_v39  ;;  %v6265_v53 = vld [vmem:[#allocation2 + $0x4] sm:$0x3] }
0x2f04   :  { %v6281_v34 = vcombine.low %v6265_v53, %v6266_v15 }
0x2f05   :  { %5293 = vst.msk [vmem:[#allocation19 + $0xc] sm:$0x3] %vm1266_vm7, %v5291_v8  ;;  %v6184_v8 = vrot.slane %v6170_v29, %v13302_v27 }
0x2f08   :  { %v5529_v20 = vpop.f32.mrb[50].mxu0 }
0x2f09   :  { %v10744_v23 = vpop.f32.mrb[51].mxu0 }
0x2f0a   :  { %v6177_v23 = vrot.slane %v6169_v24, %v13302_v27 }
0x2f0c   :  { %v13329_v28 = vld [vmem:[#allocation19 + $0xc] sm:$0x3]  ;;  %v5604_v11 = vpop.f32.mrb[58].mxu1 }
0x2f0d   :  { %5999 = vst.msk [vmem:[#allocation2 + $0x10] sm:$0x3] %vm718_vm4, %v13329_v28  ;;  %v5605_v16 = vadd.f32 %v5604_v11, %v5529_v20  ;;  %v10755_v35 = vpop.f32.mrb[59].mxu1  ;;  %v6296_v20 = vrot.slane %v6282_v22, %v13302_v27  ;;  %v6289_v11 = vrot.slane %v6281_v34, %v13302_v27  ;;  %v5808_v22 = vmul.f32 0.1, %v13271_v30 }
0x2f0f   :  { %v5610_v61 = vadd.f32 %v5608_v7, %v5605_v16  ;;  %v6185_v16 = vcombine.low %v6177_v23, %v6184_v8  ;;  %v6297_v7 = vcombine.low %v6289_v11, %v6296_v20  ;;  %v6400_v11 = vld [vmem:[#allocation2 + $0xc] sm:$0x3] }
0x2f10   :  { %v13334_v26 = vpop.f32.mrb[52].mxu0 }
0x2f11   :  { %11634 = vtanh.f32 %v5610_v61  ;;  %v10766_v38 = vpop.f32.mrb[53].mxu0  ;;  %v9706_v35 = vmul.f32 -1.442695, %v5610_v61 }
0x2f12   :  { %v4968_v38 = vmul.f32 0.9, %v13206_v3 }
0x2f13   :  { %11636 = vpow2.f32 %v9706_v35  ;;  %v6399_v35 = vld [vmem:[#allocation2 + $0xa] sm:$0x3] }
0x2f14   :  { %v6022_v25 = vld [vmem:[#allocation2 + $0x10] sm:$0x3]  ;;  %v4969_v46 = vadd.f32 %v4968_v38, %v4967_v2 }
0x2f15   :  { %v6049_v19 = vcombine.low %v6021_v37, %v6022_v25 }
0x2f17   :  { %v6063_v63 = vrot.slane %v6049_v19, %v13302_v27  ;;  %v5635_v19 = vmul.f32 0.1, %v13211_v49 }
0x2f18   :  { %v13340_v48 = vpop.f32.mrb[54].mxu0 }
0x2f19   :  { %v10788_v55 = vpop.f32.mrb[55].mxu0  ;;  %v6064_v10 = vcombine.low %v6056_v54, %v6063_v63 }
0x2f1b   :  { %v11635_v42 = vpop.eup %11634  ;;  %10803 = vmatmul.mubr.msk.f32.vlgmr.msra.gmra.mrb[56].mxu0 %vm288_vm2, %v6064_v10 }
0x2f1c   :  { %10807 = vmatprep.mubr.msk.f32.mxu0 %vm288_vm2, %v6168_v60  ;;  %5620 = vrot.lane.b32.xlu1 %v11635_v42, %s11947_s10 }
0x2f1d   :  { %10806 = vmatpush3.msra.mxu0 %v6001_v62  ;;  %v11637_v57 = vpop.eup %11636 }
0x2f1e   :  { %v5614_v58 = vadd.f32 1.0, %v11637_v57  ;;  %v6269_v57 = vld [vmem:[#allocation2 + $0xc] sm:$0x3] }
0x2f20   :  { %11638 = vrcp.f32 %v5614_v58  ;;  %v6414_v58 = vcombine.low %v6399_v35, %v6400_v11 }
0x2f23   :  { %10808 = vmatmul.mubr.msk.f32.vlgmr.msra.gmra.mrb[56].mxu0 %vm288_vm2, %v6185_v16  ;;  %v6270_v16 = vld [vmem:[#allocation2 + $0xe] sm:$0x3] }
0x2f24   :  { %10812 = vmatprep.mubr.msk.f32.mxu0 %vm288_vm2, %v6297_v7  ;;  %v6398_v7 = vld [vmem:[#allocation2 + $0x8] sm:$0x3] }
0x2f2a   :  { %v11639_v62 = vpop.eup %11638 }
0x2f2b   :  { %v5618_v45 = vmul.f32 %v11639_v62, %v4969_v46  ;;  %v6404_v46 = vld [vmem:[#allocation2 + $0x14] sm:$0x3] }
0x2f8e   :  { %v5621_v59 = vpop.permute.xlu1 %5620 }
0x2f8f   :  { %v5623_v12 = vmul.f32 %v11639_v62, %v5621_v59  ;;  %v6271_v59 = vld [vmem:[#allocation2 + $0x10] sm:$0x3] }
0x2f91   :  { %5625 = vrot.lane.b32.xlu1 %v5623_v12, %s11948_s16 }
0x3003   :  { %v5626_v13 = vpop.permute.xlu1 %5625 }
0x3004   :  { %v5628_v50 = vadd.f32 %v5626_v13, %v5618_v45 }
0x3006   :  { %11640 = vtanh.f32 %v5628_v50  ;;  %v6532_v50 = vld [vmem:[#allocation2 + $0xe] sm:$0x3] }
0x3010   :  { %v11641_v37 = vpop.eup %11640 }
0x3011   :  { %5631 = vrot.lane.b32.xlu0 %v11641_v37, %s11947_s10 }
0x3083   :  { %v5632_v61 = vpop.permute.xlu0 %5631 }
0x3084   :  { %v5634_v25 = vmul.f32 %v11639_v62, %v5632_v61  ;;  %v6397_v62 = vld [vmem:[#allocation2 + $0x6] sm:$0x3]  ;;  %v6402_v61 = vld [vmem:[#allocation2 + $0x10] sm:$0x3] }
0x3085   :  { %v6413_v12 = vcombine.low %v6397_v62, %v6398_v7 }
0x3086   :  { %v5636_v17 = vmul.f32 0.9, %v5634_v25 }
0x3087   :  { %v6421_v37 = vrot.slane %v6413_v12, %v13302_v27 }
0x3088   :  { %v5637_v39 = vadd.f32 %v5636_v17, %v5635_v19  ;;  %v6530_v17 = vld [vmem:[#allocation2 + $0xa] sm:$0x3] }
0x308a   :  { %5709 = vrot.lane.b32.xlu1 %v5637_v39, %s11948_s16  ;;  %v6531_v39 = vld [vmem:[#allocation2 + $0xc] sm:$0x3] }
0x30fc   :  { %v5710_v47 = vpop.permute.xlu1 %5709 }
0x30fd   :  { %10776 = vmatmul.mubr.msk.f32.vlgmr.msra.gmra.mrb[60].mxu1 %vm203_vm1, %v5710_v47 }
0x30fe   :  { %11313 = vmatpush3.bf16.msra.mxu1 %v12487_v36  ;;  %10797 = vmatprep.mubr.msk.f32.mxu1 %vm11944_vm0, %v11945_v1  ;;  %v6298_v1 = vcombine.low %v6269_v57, %v6270_v16 }
0x30ff   :  { %11314 = vmatprep.subr.bf16.mxu1 %v11943_v0 }
0x3100   :  { %v6306_v45 = vrot.slane %v6298_v1, %v13302_v27 }
0x3102   :  { %11316 = vmatpush3.bf16.msra.mxu1 %v12497_v43  ;;  %v5144_v43 = vmul.f32 0.9, %v13263_v51  ;;  %v6004_v51 = vld [vmem:[%s13800_s18 + $0x18] sm:$0xff] }
0x31d0   :  { %v5779_v41 = vpop.f32.mrb[60].mxu1 }
0x31d1   :  { %v5780_v3 = vadd.f32 %v5779_v41, %v13334_v26  ;;  %v10777_v49 = vpop.f32.mrb[61].mxu1  ;;  %v5143_v26 = vmul.f32 0.1, %v13260_v56  ;;  %v6003_v56 = vld [vmem:[%s13800_s18 + $0x10] sm:$0xff]  ;;  %v6005_v41 = vld [vmem:[%s13800_s18 + $0x20] sm:$0xff] }
0x31d2   :  { %10810 = vmatprep.subr.mxu0 %v6003_v56  ;;  %v6546_v49 = vcombine.low %v6531_v39, %v6532_v50 }
0x31d3   :  { %v5783_v54 = vadd.f32 %v13247_v31, %v5780_v3  ;;  %v5145_v10 = vadd.f32 %v5144_v43, %v5143_v26  ;;  %10811 = vmatpush3.msra.mxu0 %v6003_v56  ;;  %v6401_v3 = vld [vmem:[#allocation2 + $0xe] sm:$0x3]  ;;  %v6717_v56 = vld [vmem:[%s13801_s19] sm:$0xff] }
0x31d4   :  { %10815 = vmatprep.subr.mxu0 %v6004_v51 }
0x31d5   :  { %11642 = vtanh.f32 %v5783_v54  ;;  %v9709_v18 = vmul.f32 -1.442695, %v5783_v54  ;;  %v6430_v54 = vcombine.low %v6401_v3, %v6402_v61 }
0x31d7   :  { %11644 = vpow2.f32 %v9709_v18  ;;  %v6438_v43 = vrot.slane %v6430_v54, %v13302_v27 }
0x31df   :  { %v11643_v63 = vpop.eup %11642 }
0x31e0   :  { %5793 = vrot.lane.b32.xlu1 %v11643_v63, %s11947_s10  ;;  %v6529_v63 = vld [vmem:[#allocation2 + $0x8] sm:$0x3] }
0x31e1   :  { %v11645_v36 = vpop.eup %11644  ;;  %v6545_v18 = vcombine.low %v6529_v63, %v6530_v17 }
0x31e2   :  { %v5787_v21 = vadd.f32 1.0, %v11645_v36 }
0x31e3   :  { %v6553_v26 = vrot.slane %v6545_v18, %v13302_v27 }
0x31e4   :  { %11646 = vrcp.f32 %v5787_v21  ;;  %v6560_v21 = vrot.slane %v6546_v49, %v13302_v27 }
0x31ee   :  { %v11647_v9 = vpop.eup %11646 }
0x31ef   :  { %v5791_v31 = vmul.f32 %v11647_v9, %v5145_v10  ;;  %v6533_v10 = vld [vmem:[#allocation2 + $0x10] sm:$0x3] }
0x3252   :  { %v5794_v55 = vpop.permute.xlu1 %5793 }
0x3253   :  { %v5796_v0 = vmul.f32 %v11647_v9, %v5794_v55  ;;  %v6535_v55 = vld [vmem:[#allocation2 + $0x14] sm:$0x3] }
0x3255   :  { %5798 = vrot.lane.b32.xlu1 %v5796_v0, %s11948_s16  ;;  %v6536_v0 = vld [vmem:[#allocation2 + $0x16] sm:$0x3] }
0x32c7   :  { %v5799_v29 = vpop.permute.xlu1 %5798 }
0x32c8   :  { %v5801_v15 = vadd.f32 %v5799_v29, %v5791_v31 }
0x32ca   :  { %11648 = vtanh.f32 %v5801_v15  ;;  %v6563_v15 = vcombine.low %v6535_v55, %v6536_v0  ;;  %v6721_v0 = vld [vmem:[%s13801_s19 + $0x20] sm:$0xff] }
0x32d4   :  { %v11649_v33 = vpop.eup %11648 }
0x32d5   :  { %5804 = vrot.lane.b32.xlu1 %v11649_v33, %s11947_s10  ;;  %v6561_v33 = vcombine.low %v6553_v26, %v6560_v21 }
0x3347   :  { %v5805_v60 = vpop.permute.xlu1 %5804 }
0x3348   :  { %v5807_v14 = vmul.f32 %v11647_v9, %v5805_v60 }
0x334a   :  { %v5809_v42 = vmul.f32 0.9, %v5807_v14  ;;  %v6577_v14 = vrot.slane %v6563_v15, %v13302_v27 }
0x334c   :  { %v5810_v24 = vadd.f32 %v5809_v42, %v5808_v22  ;;  %v6719_v42 = vld [vmem:[%s13801_s19 + $0x10] sm:$0xff] }
0x334e   :  { %5882 = vrot.lane.b32.xlu1 %v5810_v24, %s11948_s16  ;;  %v6720_v24 = vld [vmem:[%s13801_s19 + $0x18] sm:$0xff] }
0x33c0   :  { %v5883_v53 = vpop.permute.xlu1 %5882 }
0x33c1   :  { %10798 = vmatmul.mubr.msk.f32.vlgmr.msra.gmra.mrb[62].mxu1 %vm203_vm1, %v5883_v53  ;;  %v11317_v53 = vpack.c.bf16 %v6720_v24, %v6719_v42 }
0x33c3   :  { %11318 = vmatprep.subr.bf16.mxu1 %v11317_v53 }
0x33c4   :  { %11320 = vmatpush3.bf16.msra.mxu1 %v11317_v53 }
0x3494   :  { %v5952_v30 = vpop.f32.mrb[62].mxu1 }
0x3495   :  { %v5953_v34 = vadd.f32 %v5952_v30, %v13340_v48  ;;  %v10799_v8 = vpop.f32.mrb[63].mxu1 }
0x3497   :  { %v5956_v20 = vadd.f32 %v13325_v6, %v5953_v34  ;;  %v6428_v6 = vrot.slane %v6414_v58, %v13302_v27 }
0x3499   :  { %5958 = vst.msk [vmem:[#allocation19 + $0xe] sm:$0x3] %vm1266_vm7, %v5956_v20  ;;  %v6429_v47 = vcombine.low %v6421_v37, %v6428_v6 }
0x34a0   :  { %v13406_v23 = vld [vmem:[#allocation19 + $0xe] sm:$0x3] }
0x34a1   :  { %6000 = vst.msk [vmem:[#allocation2 + $0x12] sm:$0x3] %vm718_vm4, %v13406_v23 }
0x34a8   :  { %v6272_v48 = vld [vmem:[#allocation2 + $0x12] sm:$0x3] }
0x34a9   :  { %v6299_v38 = vcombine.low %v6271_v59, %v6272_v48  ;;  %v6403_v2 = vld [vmem:[#allocation2 + $0x12] sm:$0x3] }
0x34aa   :  { %v6431_v19 = vcombine.low %v6403_v2, %v6404_v46  ;;  %v6534_v9 = vld [vmem:[#allocation2 + $0x12] sm:$0x3]  ;;  %v6736_v2 = vld [vmem:[#allocation3 + $0x2] sm:$0x3]  ;;  %v6727_v46 = vld [vmem:[#allocation3] sm:$0x3] }
0x34ab   :  { %v6313_v13 = vrot.slane %v6299_v38, %v13302_v27  ;;  %v6562_v29 = vcombine.low %v6533_v10, %v6534_v9 }
0x34ac   :  { %v6445_v36 = vrot.slane %v6431_v19, %v13302_v27 }
0x34ad   :  { %v6314_v25 = vcombine.low %v6306_v45, %v6313_v13  ;;  %v6570_v60 = vrot.slane %v6562_v29, %v13302_v27  ;;  %v6728_v45 = vld [vmem:[#allocation3 + $0x2] sm:$0x3] }
0x34ae   :  { %v6446_v31 = vcombine.low %v6438_v43, %v6445_v36  ;;  %v6722_v43 = vld [vmem:[%s13801_s19 + $0x28] sm:$0xff] }
0x34af   :  { %10813 = vmatmul.mubr.msk.f32.vlgmr.msra.gmra.mrb[56].mxu0 %vm288_vm2, %v6314_v25  ;;  %v6578_v22 = vcombine.low %v6570_v60, %v6577_v14 }
0x34b0   :  { %10816 = vmatpush3.msra.mxu0 %v6004_v51  ;;  %10817 = vmatprep.mubr.msk.f32.mxu0 %vm288_vm2, %v6429_v47  ;;  %v6718_v51 = vld [vmem:[%s13801_s19 + $0x8] sm:$0xff]  ;;  %v6873_v47 = vcombine.low %v6727_v46, %v6728_v45 }
0x34b1   :  { %10820 = vmatprep.subr.mxu0 %v6005_v41  ;;  %v13440_v30 = vpack.c.bf16 %v6718_v51, %v6717_v56 }
0x34b2   :  { %v6881_v9 = vrot.slane %v6873_v47, %v13302_v27  ;;  %v6725_v47 = vld [vmem:[%s13801_s19 + $0x40] sm:$0xff] }
0x34b3   :  { %11322 = vmatprep.subr.bf16.mxu1 %v13440_v30 }
0x34b7   :  { %10818 = vmatmul.mubr.msk.f32.vlgmr.msra.gmra.mrb[56].mxu0 %vm288_vm2, %v6446_v31 }
0x34b8   :  { %10821 = vmatpush3.msra.mxu0 %v6005_v41  ;;  %10822 = vmatprep.mubr.msk.f32.mxu0 %vm288_vm2, %v6561_v33 }
0x34bf   :  { %10823 = vmatmul.mubr.msk.f32.vlgmr.msra.gmra.mrb[56].mxu0 %vm288_vm2, %v6578_v22  ;;  %v11325_v22 = vpack.c.bf16 %v6722_v43, %v6721_v0 }
0x3592   :  { %v10824_v34 = vpop.f32.mrb[56].mxu0 }
0x3593   :  { %v6661_v8 = vmul.f32 0.999995, %v10824_v34  ;;  %v6649_v20 = vpop.f32.mrb[57].mxu0 }
0x3594   :  { %v6660_v11 = vmul.f32 0.999995, %v6649_v20 }
0x3595   :  { %11650 = vtanh.f32 %v6661_v8 }
0x3596   :  { %11652 = vtanh.f32 %v6660_v11 }
0x359f   :  { %v11651_v16 = vpop.eup %11650 }
0x35a0   :  { %v11653_v7 = vpop.eup %11652  ;;  %v6683_v35 = vcombine.high %v11651_v16, %v11651_v16  ;;  %v6690_v57 = vrot.slane %v11651_v16, %v13302_v27 }
0x35a1   :  { %v6666_v58 = vcombine.high %v11653_v7, %v11653_v7  ;;  %v6673_v1 = vrot.slane %v11653_v7, %v13302_v27 }
0x35a2   :  { %v6697_v62 = vrot.slane %v6683_v35, %v13302_v27  ;;  %v6698_v59 = vcombine.high %v6690_v57, %v6690_v57  ;;  %6713 = vst.msk [vmem:[#allocation3 + $0xc] sm:$0x3] %vm5979_vm8, %v6690_v57  ;;  %v6723_v35 = vld [vmem:[%s13801_s19 + $0x30] sm:$0xff]  ;;  %v6724_v57 = vld [vmem:[%s13801_s19 + $0x38] sm:$0xff] }
0x35a3   :  { %v6680_v48 = vrot.slane %v6666_v58, %v13302_v27  ;;  %v6681_v12 = vcombine.high %v6673_v1, %v6673_v1  ;;  %6709 = vst.msk [vmem:[#allocation3 + $0x4] sm:$0x3] %vm5979_vm8, %v6673_v1 }
0x35a4   :  { %v6699_v38 = vcombine.high %v6697_v62, %v6697_v62  ;;  %6714 = vst.msk [vmem:[#allocation3 + $0xe] sm:$0x3] %vm5979_vm8, %v6698_v59  ;;  %6715 = vst.msk [vmem:[#allocation3 + $0x10] sm:$0x3] %vm5979_vm8, %v6697_v62 }
0x35a5   :  { %v6682_v6 = vcombine.high %v6680_v48, %v6680_v48  ;;  %6710 = vst.msk [vmem:[#allocation3 + $0x6] sm:$0x3] %vm5979_vm8, %v6681_v12  ;;  %6711 = vst.msk [vmem:[#allocation3 + $0x8] sm:$0x3] %vm5979_vm8, %v6680_v48 }
0x35a6   :  { %6716 = vst.msk [vmem:[#allocation3 + $0x12] sm:$0x3] %vm5979_vm8, %v6699_v38  ;;  %v11329_v38 = vpack.c.bf16 %v6724_v57, %v6723_v35  ;;  %v7439_v35 = vld [vmem:[%s13802_s20 + $0x10] sm:$0xff]  ;;  %v7440_v57 = vld [vmem:[%s13802_s20 + $0x18] sm:$0xff] }
0x35a7   :  { %6712 = vst.msk [vmem:[#allocation3 + $0xa] sm:$0x3] %vm5979_vm8, %v6682_v6 }
0x35a9   :  { %v6741_v63 = vld [vmem:[#allocation3 + $0xc] sm:$0x3] }
0x35aa   :  { %v6737_v13 = vld [vmem:[#allocation3 + $0x4] sm:$0x3]  ;;  %v6733_v51 = vld [vmem:[#allocation3 + $0xc] sm:$0x3] }
0x35ab   :  { %v6752_v50 = vcombine.low %v6736_v2, %v6737_v13  ;;  %v6742_v37 = vld [vmem:[#allocation3 + $0xe] sm:$0x3]  ;;  %v6743_v61 = vld [vmem:[#allocation3 + $0x10] sm:$0x3]  ;;  %v6729_v25 = vld [vmem:[#allocation3 + $0x4] sm:$0x3] }
0x35ac   :  { %v6738_v19 = vld [vmem:[#allocation3 + $0x6] sm:$0x3]  ;;  %v6739_v17 = vld [vmem:[#allocation3 + $0x8] sm:$0x3]  ;;  %v6770_v3 = vcombine.low %v6742_v37, %v6743_v61  ;;  %v6734_v60 = vld [vmem:[#allocation3 + $0xe] sm:$0x3] }
0x35ad   :  { %v6730_v39 = vld [vmem:[#allocation3 + $0x6] sm:$0x3]  ;;  %v6753_v41 = vcombine.low %v6738_v19, %v6739_v17  ;;  %v6760_v18 = vrot.slane %v6752_v50, %v13302_v27  ;;  %v6731_v33 = vld [vmem:[#allocation3 + $0x8] sm:$0x3]  ;;  %v6891_v8 = vcombine.low %v6733_v51, %v6734_v60  ;;  %v6986_v20 = vld [vmem:[#allocation3 + $0x4] sm:$0x3] }
0x35ae   :  { %v6874_v49 = vcombine.low %v6729_v25, %v6730_v39  ;;  %v6740_v54 = vld [vmem:[#allocation3 + $0xa] sm:$0x3]  ;;  %v6784_v29 = vrot.slane %v6770_v3, %v13302_v27  ;;  %v6987_v24 = vld [vmem:[#allocation3 + $0x6] sm:$0x3]  ;;  %v6988_v53 = vld [vmem:[#allocation3 + $0x8] sm:$0x3] }
0x35af   :  { %v6767_v36 = vrot.slane %v6753_v41, %v13302_v27  ;;  %v6769_v21 = vcombine.low %v6740_v54, %v6741_v63  ;;  %v6732_v26 = vld [vmem:[#allocation3 + $0xa] sm:$0x3]  ;;  %v7002_v11 = vcombine.low %v6986_v20, %v6987_v24  ;;  %v6993_v58 = vld [vmem:[#allocation3 + $0x12] sm:$0x3]  ;;  %v6905_v1 = vrot.slane %v6891_v8, %v13302_v27  ;;  %v6991_v59 = vld [vmem:[#allocation3 + $0xe] sm:$0x3] }
0x35b0   :  { %v6888_v55 = vrot.slane %v6874_v49, %v13302_v27  ;;  %v6989_v15 = vld [vmem:[#allocation3 + $0xa] sm:$0x3]  ;;  %v6890_v42 = vcombine.low %v6731_v33, %v6732_v26  ;;  %v6992_v48 = vld [vmem:[#allocation3 + $0x10] sm:$0x3]  ;;  %v7118_v2 = vld [vmem:[#allocation3 + $0x6] sm:$0x3] }
0x35b1   :  { %v6768_v10 = vcombine.low %v6760_v18, %v6767_v36  ;;  %v6777_v31 = vrot.slane %v6769_v21, %v13302_v27  ;;  %v7003_v34 = vcombine.low %v6988_v53, %v6989_v15  ;;  %v7010_v62 = vrot.slane %v7002_v11, %v13302_v27  ;;  %v7119_v46 = vld [vmem:[#allocation3 + $0x8] sm:$0x3]  ;;  %v7121_v45 = vld [vmem:[#allocation3 + $0xc] sm:$0x3]  ;;  %v7125_v17 = vld [vmem:[#allocation3 + $0x14] sm:$0x3] }
0x35b2   :  { %v6889_v56 = vcombine.low %v6881_v9, %v6888_v55  ;;  %v6898_v16 = vrot.slane %v6890_v42, %v13302_v27  ;;  %v7020_v6 = vcombine.low %v6992_v48, %v6993_v58  ;;  %v6990_v50 = vld [vmem:[#allocation3 + $0xc] sm:$0x3]  ;;  %v7134_v25 = vcombine.low %v7118_v2, %v7119_v46  ;;  %v6726_v41 = vld [vmem:[%s13801_s19 + $0x48] sm:$0xff]  ;;  %v7251_v54 = vld [vmem:[#allocation3 + $0xa] sm:$0x3] }
0x35b3   :  { %10829 = vmatprep.mubr.msk.f32.mxu1 %vm374_vm3, %v6768_v10  ;;  %v6785_v14 = vcombine.low %v6777_v31, %v6784_v29  ;;  %v7017_v7 = vrot.slane %v7003_v34, %v13302_v27  ;;  %v7019_v61 = vcombine.low %v6990_v50, %v6991_v59  ;;  %v7124_v3 = vld [vmem:[#allocation3 + $0x12] sm:$0x3]  ;;  %v7122_v18 = vld [vmem:[#allocation3 + $0xe] sm:$0x3]  ;;  %v7123_v36 = vld [vmem:[#allocation3 + $0x10] sm:$0x3]  ;;  %v11333_v9 = vpack.c.bf16 %v6726_v41, %v6725_v47 }
0x35b4   :  { %v6906_v12 = vcombine.low %v6898_v16, %v6905_v1  ;;  %v7034_v19 = vrot.slane %v7020_v6, %v13302_v27  ;;  %v7142_v63 = vrot.slane %v7134_v25, %v13302_v27  ;;  %v7152_v55 = vcombine.low %v7124_v3, %v7125_v17  ;;  %v7250_v0 = vld [vmem:[#allocation3 + $0x8] sm:$0x3]  ;;  %v7253_v43 = vld [vmem:[#allocation3 + $0xe] sm:$0x3]  ;;  %v7252_v29 = vld [vmem:[#allocation3 + $0xc] sm:$0x3] }
0x35b5   :  { %10830 = vmatmul.mubr.msk.f32.vlgmr.msra.gmra.mrb[64].mxu1 %vm374_vm3, %v6785_v14  ;;  %v7018_v13 = vcombine.low %v7010_v62, %v7017_v7  ;;  %v7027_v49 = vrot.slane %v7019_v61, %v13302_v27  ;;  %v7266_v10 = vcombine.low %v7250_v0, %v7251_v54  ;;  %v7151_v31 = vcombine.low %v7122_v18, %v7123_v36  ;;  %v7255_v14 = vld [vmem:[#allocation3 + $0x12] sm:$0x3]  ;;  %v7257_v42 = vld [vmem:[#allocation3 + $0x16] sm:$0x3]  ;;  %v7437_v1 = vld [vmem:[%s13802_s20] sm:$0xff] }
0x35b6   :  { %11324 = vmatpush3.bf16.msra.mxu1 %v13440_v30  ;;  %10836 = vmatprep.mubr.msk.f32.mxu1 %vm374_vm3, %v6889_v56  ;;  %v7120_v30 = vld [vmem:[#allocation3 + $0xa] sm:$0x3]  ;;  %v7267_v15 = vcombine.low %v7252_v29, %v7253_v43  ;;  %v7166_v33 = vrot.slane %v7152_v55, %v13302_v27  ;;  %v7254_v56 = vld [vmem:[#allocation3 + $0x10] sm:$0x3]  ;;  %v11337_v58 = vpack.c.bf16 %v7440_v57, %v7439_v35  ;;  %v7455_v47 = vld [vmem:[#allocation3 + $0x2] sm:$0x3] }
0x35b7   :  { %11326 = vmatprep.subr.bf16.mxu1 %v11325_v22  ;;  %v7135_v37 = vcombine.low %v7120_v30, %v7121_v45  ;;  %v7035_v21 = vcombine.low %v7027_v49, %v7034_v19  ;;  %v7274_v60 = vrot.slane %v7266_v10, %v13302_v27  ;;  %v7159_v24 = vrot.slane %v7151_v31, %v13302_v27  ;;  %v7438_v30 = vld [vmem:[%s13802_s20 + $0x8] sm:$0xff]  ;;  %v7447_v41 = vld [vmem:[#allocation3] sm:$0x3]  ;;  %v7448_v3 = vld [vmem:[#allocation3 + $0x2] sm:$0x3] }
0x35b8   :  { %v7281_v53 = vrot.slane %v7267_v15, %v13302_v27  ;;  %v7283_v34 = vcombine.low %v7254_v56, %v7255_v14  ;;  %11338 = vmatprep.subr.bf16.mxu0 %v11337_v58  ;;  %v13516_v62 = vpack.c.bf16 %v7438_v30, %v7437_v1  ;;  %v7592_v0 = vcombine.low %v7447_v41, %v7448_v3 }
0x35b9   :  { %v7149_v39 = vrot.slane %v7135_v37, %v13302_v27  ;;  %v7167_v51 = vcombine.low %v7159_v24, %v7166_v33  ;;  %11340 = vmatpush3.bf16.msra.mxu0 %v11337_v58  ;;  %v7442_v24 = vld [vmem:[%s13802_s20 + $0x28] sm:$0xff] }
0x35ba   :  { %v7282_v20 = vcombine.low %v7274_v60, %v7281_v53  ;;  %v7291_v11 = vrot.slane %v7283_v34, %v13302_v27  ;;  %11342 = vmatprep.subr.bf16.mxu0 %v13516_v62  ;;  %v7600_v14 = vrot.slane %v7592_v0, %v13302_v27  ;;  %v7445_v0 = vld [vmem:[%s13802_s20 + $0x40] sm:$0xff] }
0x35bb   :  { %v7150_v26 = vcombine.low %v7142_v63, %v7149_v39 }
0x35bd   :  { %10837 = vmatmul.mubr.msk.f32.vlgmr.msra.gmra.mrb[64].mxu1 %vm374_vm3, %v6906_v12 }
0x35be   :  { %11328 = vmatpush3.bf16.msra.mxu1 %v11325_v22  ;;  %10843 = vmatprep.mubr.msk.f32.mxu1 %vm374_vm3, %v7018_v13  ;;  %v7256_v22 = vld [vmem:[#allocation3 + $0x14] sm:$0x3] }
0x35bf   :  { %11330 = vmatprep.subr.bf16.mxu1 %v11329_v38  ;;  %v7284_v8 = vcombine.low %v7256_v22, %v7257_v42  ;;  %v7441_v42 = vld [vmem:[%s13802_s20 + $0x20] sm:$0xff] }
0x35c1   :  { %v7298_v16 = vrot.slane %v7284_v8, %v13302_v27 }
0x35c3   :  { %v7299_v7 = vcombine.low %v7291_v11, %v7298_v16 }
0x35c5   :  { %10844 = vmatmul.mubr.msk.f32.vlgmr.msra.gmra.mrb[64].mxu1 %vm374_vm3, %v7035_v21 }
0x35c6   :  { %11332 = vmatpush3.bf16.msra.mxu1 %v11329_v38  ;;  %10850 = vmatprep.mubr.msk.f32.mxu1 %vm374_vm3, %v7150_v26 }
0x35c7   :  { %11334 = vmatprep.subr.bf16.mxu1 %v11333_v9 }
0x35cd   :  { %10851 = vmatmul.mubr.msk.f32.vlgmr.msra.gmra.mrb[64].mxu1 %vm374_vm3, %v7167_v51 }
0x35ce   :  { %11336 = vmatpush3.bf16.msra.mxu1 %v11333_v9  ;;  %10857 = vmatprep.mubr.msk.f32.mxu1 %vm374_vm3, %v7282_v20 }
0x35d5   :  { %10858 = vmatmul.mubr.msk.f32.vlgmr.msra.gmra.mrb[64].mxu1 %vm374_vm3, %v7299_v7  ;;  %v11345_v7 = vpack.c.bf16 %v7442_v24, %v7441_v42 }
0x36a8   :  { %v10859_v59 = vpop.f32.mrb[64].mxu1 }
0x36a9   :  { %v7382_v48 = vmul.f32 0.999995, %v10859_v59  ;;  %v7370_v12 = vpop.f32.mrb[65].mxu1 }
0x36aa   :  { %v7381_v38 = vmul.f32 0.999995, %v7370_v12 }
0x36ab   :  { %11654 = vtanh.f32 %v7382_v48 }
0x36ac   :  { %11656 = vtanh.f32 %v7381_v38 }
0x36b5   :  { %v11655_v6 = vpop.eup %11654 }
0x36b6   :  { %v11657_v2 = vpop.eup %11656  ;;  %v7404_v46 = vcombine.high %v11655_v6, %v11655_v6  ;;  %v7411_v45 = vrot.slane %v11655_v6, %v13302_v27 }
0x36b7   :  { %v7387_v13 = vcombine.high %v11657_v2, %v11657_v2  ;;  %v7394_v50 = vrot.slane %v11657_v2, %v13302_v27 }
0x36b8   :  { %v7418_v37 = vrot.slane %v7404_v46, %v13302_v27  ;;  %v7419_v61 = vcombine.high %v7411_v45, %v7411_v45  ;;  %7433 = vst.msk [vmem:[#allocation3 + $0xc] sm:$0x3] %vm5979_vm8, %v7411_v45  ;;  %v7443_v46 = vld [vmem:[%s13802_s20 + $0x30] sm:$0xff]  ;;  %v7444_v45 = vld [vmem:[%s13802_s20 + $0x38] sm:$0xff] }
0x36b9   :  { %v7401_v25 = vrot.slane %v7387_v13, %v13302_v27  ;;  %v7402_v19 = vcombine.high %v7394_v50, %v7394_v50  ;;  %7429 = vst.msk [vmem:[#allocation3 + $0x4] sm:$0x3] %vm5979_vm8, %v7394_v50 }
0x36ba   :  { %v7420_v17 = vcombine.high %v7418_v37, %v7418_v37  ;;  %7435 = vst.msk [vmem:[#allocation3 + $0x10] sm:$0x3] %vm5979_vm8, %v7418_v37  ;;  %7434 = vst.msk [vmem:[#allocation3 + $0xe] sm:$0x3] %vm5979_vm8, %v7419_v61 }
0x36bb   :  { %v7403_v39 = vcombine.high %v7401_v25, %v7401_v25  ;;  %7430 = vst.msk [vmem:[#allocation3 + $0x6] sm:$0x3] %vm5979_vm8, %v7402_v19  ;;  %7431 = vst.msk [vmem:[#allocation3 + $0x8] sm:$0x3] %vm5979_vm8, %v7401_v25 }
0x36bc   :  { %7436 = vst.msk [vmem:[#allocation3 + $0x12] sm:$0x3] %vm5979_vm8, %v7420_v17  ;;  %v11349_v17 = vpack.c.bf16 %v7444_v45, %v7443_v46  ;;  %v8156_v46 = vld [vmem:[%s13803_s21 + $0x10] sm:$0xff]  ;;  %v8157_v45 = vld [vmem:[%s13803_s21 + $0x18] sm:$0xff] }
0x36bd   :  { %7432 = vst.msk [vmem:[#allocation3 + $0xa] sm:$0x3] %vm5979_vm8, %v7403_v39 }
0x36bf   :  { %v7460_v29 = vld [vmem:[#allocation3 + $0xc] sm:$0x3] }
0x36c0   :  { %v7456_v49 = vld [vmem:[#allocation3 + $0x4] sm:$0x3]  ;;  %v7453_v30 = vld [vmem:[#allocation3 + $0xc] sm:$0x3] }
0x36c1   :  { %v7471_v54 = vcombine.low %v7455_v47, %v7456_v49  ;;  %v7461_v63 = vld [vmem:[#allocation3 + $0xe] sm:$0x3]  ;;  %v7462_v18 = vld [vmem:[#allocation3 + $0x10] sm:$0x3]  ;;  %v7449_v36 = vld [vmem:[#allocation3 + $0x4] sm:$0x3] }
0x36c2   :  { %v7457_v21 = vld [vmem:[#allocation3 + $0x6] sm:$0x3]  ;;  %v7458_v9 = vld [vmem:[#allocation3 + $0x8] sm:$0x3]  ;;  %v7489_v26 = vcombine.low %v7461_v63, %v7462_v18  ;;  %v7454_v11 = vld [vmem:[#allocation3 + $0xe] sm:$0x3] }
0x36c3   :  { %v7450_v55 = vld [vmem:[#allocation3 + $0x6] sm:$0x3]  ;;  %v7472_v43 = vcombine.low %v7457_v21, %v7458_v9  ;;  %v7479_v15 = vrot.slane %v7471_v54, %v13302_v27  ;;  %v7451_v20 = vld [vmem:[#allocation3 + $0x8] sm:$0x3]  ;;  %v7610_v48 = vcombine.low %v7453_v30, %v7454_v11  ;;  %v7705_v12 = vld [vmem:[#allocation3 + $0x4] sm:$0x3] }
0x36c4   :  { %v7593_v10 = vcombine.low %v7449_v36, %v7450_v55  ;;  %v7459_v31 = vld [vmem:[#allocation3 + $0xa] sm:$0x3]  ;;  %v7503_v34 = vrot.slane %v7489_v26, %v13302_v27  ;;  %v7706_v57 = vld [vmem:[#allocation3 + $0x6] sm:$0x3]  ;;  %v7707_v58 = vld [vmem:[#allocation3 + $0x8] sm:$0x3] }
0x36c5   :  { %v7486_v33 = vrot.slane %v7472_v43, %v13302_v27  ;;  %v7488_v60 = vcombine.low %v7459_v31, %v7460_v29  ;;  %v7452_v53 = vld [vmem:[#allocation3 + $0xa] sm:$0x3]  ;;  %v7721_v38 = vcombine.low %v7705_v12, %v7706_v57  ;;  %v7712_v13 = vld [vmem:[#allocation3 + $0x12] sm:$0x3]  ;;  %v7624_v50 = vrot.slane %v7610_v48, %v13302_v27  ;;  %v7710_v61 = vld [vmem:[#allocation3 + $0xe] sm:$0x3] }
0x36c6   :  { %v7607_v22 = vrot.slane %v7593_v10, %v13302_v27  ;;  %v7708_v8 = vld [vmem:[#allocation3 + $0xa] sm:$0x3]  ;;  %v7609_v35 = vcombine.low %v7451_v20, %v7452_v53  ;;  %v7711_v25 = vld [vmem:[#allocation3 + $0x10] sm:$0x3]  ;;  %v7836_v47 = vld [vmem:[#allocation3 + $0x6] sm:$0x3] }
0x36c7   :  { %v7487_v56 = vcombine.low %v7479_v15, %v7486_v33  ;;  %v7496_v51 = vrot.slane %v7488_v60, %v13302_v27  ;;  %v7722_v59 = vcombine.low %v7707_v58, %v7708_v8  ;;  %v7729_v37 = vrot.slane %v7721_v38, %v13302_v27  ;;  %v7837_v41 = vld [vmem:[#allocation3 + $0x8] sm:$0x3]  ;;  %v7839_v3 = vld [vmem:[#allocation3 + $0xc] sm:$0x3]  ;;  %v7843_v9 = vld [vmem:[#allocation3 + $0x14] sm:$0x3] }
0x36c8   :  { %v7608_v1 = vcombine.low %v7600_v14, %v7607_v22  ;;  %v7617_v6 = vrot.slane %v7609_v35, %v13302_v27  ;;  %v7739_v39 = vcombine.low %v7711_v25, %v7712_v13  ;;  %v7709_v54 = vld [vmem:[#allocation3 + $0xc] sm:$0x3]  ;;  %v7852_v36 = vcombine.low %v7836_v47, %v7837_v41  ;;  %v7446_v43 = vld [vmem:[%s13802_s20 + $0x48] sm:$0xff]  ;;  %v7968_v31 = vld [vmem:[#allocation3 + $0xa] sm:$0x3] }
0x36c9   :  { %10864 = vmatprep.mubr.msk.f32.mxu0 %vm374_vm3, %v7487_v56  ;;  %v7504_v16 = vcombine.low %v7496_v51, %v7503_v34  ;;  %v7736_v2 = vrot.slane %v7722_v59, %v13302_v27  ;;  %v7738_v18 = vcombine.low %v7709_v54, %v7710_v61  ;;  %v7842_v26 = vld [vmem:[#allocation3 + $0x12] sm:$0x3]  ;;  %v7840_v15 = vld [vmem:[#allocation3 + $0xe] sm:$0x3]  ;;  %v7841_v33 = vld [vmem:[#allocation3 + $0x10] sm:$0x3]  ;;  %v11353_v14 = vpack.c.bf16 %v7446_v43, %v7445_v0 }
0x36ca   :  { %v7625_v19 = vcombine.low %v7617_v6, %v7624_v50  ;;  %v7753_v21 = vrot.slane %v7739_v39, %v13302_v27  ;;  %v7860_v29 = vrot.slane %v7852_v36, %v13302_v27  ;;  %v7870_v22 = vcombine.low %v7842_v26, %v7843_v9  ;;  %v7967_v42 = vld [vmem:[#allocation3 + $0x8] sm:$0x3]  ;;  %v7970_v24 = vld [vmem:[#allocation3 + $0xe] sm:$0x3]  ;;  %v7969_v34 = vld [vmem:[#allocation3 + $0xc] sm:$0x3] }
0x36cb   :  { %10865 = vmatmul.mubr.msk.f32.vlgmr.msra.gmra.mrb[58].mxu0 %vm374_vm3, %v7504_v16  ;;  %v7737_v49 = vcombine.low %v7729_v37, %v7736_v2  ;;  %v7746_v10 = vrot.slane %v7738_v18, %v13302_v27  ;;  %v7983_v56 = vcombine.low %v7967_v42, %v7968_v31  ;;  %v7869_v51 = vcombine.low %v7840_v15, %v7841_v33  ;;  %v7972_v16 = vld [vmem:[#allocation3 + $0x12] sm:$0x3]  ;;  %v7974_v35 = vld [vmem:[#allocation3 + $0x16] sm:$0x3]  ;;  %v8154_v50 = vld [vmem:[%s13803_s21] sm:$0xff] }
0x36cc   :  { %11344 = vmatpush3.bf16.msra.mxu0 %v13516_v62  ;;  %10871 = vmatprep.mubr.msk.f32.mxu0 %vm374_vm3, %v7608_v1  ;;  %v7838_v62 = vld [vmem:[#allocation3 + $0xa] sm:$0x3]  ;;  %v7984_v8 = vcombine.low %v7969_v34, %v7970_v24  ;;  %v7884_v20 = vrot.slane %v7870_v22, %v13302_v27  ;;  %v7971_v1 = vld [vmem:[#allocation3 + $0x10] sm:$0x3]  ;;  %v11357_v13 = vpack.c.bf16 %v8157_v45, %v8156_v46  ;;  %v8172_v0 = vld [vmem:[#allocation3 + $0x2] sm:$0x3] }
0x36cd   :  { %11346 = vmatprep.subr.bf16.mxu0 %v11345_v7  ;;  %v7853_v63 = vcombine.low %v7838_v62, %v7839_v3  ;;  %v7754_v60 = vcombine.low %v7746_v10, %v7753_v21  ;;  %v7991_v11 = vrot.slane %v7983_v56, %v13302_v27  ;;  %v7877_v57 = vrot.slane %v7869_v51, %v13302_v27  ;;  %v8155_v62 = vld [vmem:[%s13803_s21 + $0x8] sm:$0xff]  ;;  %v8164_v43 = vld [vmem:[#allocation3] sm:$0x3]  ;;  %v8165_v26 = vld [vmem:[#allocation3 + $0x2] sm:$0x3] }
0x36ce   :  { %v7998_v58 = vrot.slane %v7984_v8, %v13302_v27  ;;  %v8000_v59 = vcombine.low %v7971_v1, %v7972_v16  ;;  %11358 = vmatprep.subr.bf16.mxu1 %v11357_v13  ;;  %v13592_v37 = vpack.c.bf16 %v8155_v62, %v8154_v50  ;;  %v8309_v42 = vcombine.low %v8164_v43, %v8165_v26 }
0x36cf   :  { %v7867_v55 = vrot.slane %v7853_v63, %v13302_v27  ;;  %v7885_v30 = vcombine.low %v7877_v57, %v7884_v20  ;;  %11360 = vmatpush3.bf16.msra.mxu1 %v11357_v13  ;;  %v8159_v57 = vld [vmem:[%s13803_s21 + $0x28] sm:$0xff] }
0x36d0   :  { %v7999_v12 = vcombine.low %v7991_v11, %v7998_v58  ;;  %v8008_v38 = vrot.slane %v8000_v59, %v13302_v27  ;;  %11362 = vmatprep.subr.bf16.mxu1 %v13592_v37  ;;  %v8317_v16 = vrot.slane %v8309_v42, %v13302_v27  ;;  %v8162_v42 = vld [vmem:[%s13803_s21 + $0x40] sm:$0xff] }
0x36d1   :  { %v7868_v53 = vcombine.low %v7860_v29, %v7867_v55 }
0x36d3   :  { %10872 = vmatmul.mubr.msk.f32.vlgmr.msra.gmra.mrb[58].mxu0 %vm374_vm3, %v7625_v19 }
0x36d4   :  { %11348 = vmatpush3.bf16.msra.mxu0 %v11345_v7  ;;  %10878 = vmatprep.mubr.msk.f32.mxu0 %vm374_vm3, %v7737_v49  ;;  %v7973_v7 = vld [vmem:[#allocation3 + $0x14] sm:$0x3] }
0x36d5   :  { %11350 = vmatprep.subr.bf16.mxu0 %v11349_v17  ;;  %v8001_v48 = vcombine.low %v7973_v7, %v7974_v35  ;;  %v8158_v35 = vld [vmem:[%s13803_s21 + $0x20] sm:$0xff] }
0x36d7   :  { %v8015_v6 = vrot.slane %v8001_v48, %v13302_v27 }
0x36d9   :  { %v8016_v2 = vcombine.low %v8008_v38, %v8015_v6 }
0x36db   :  { %10879 = vmatmul.mubr.msk.f32.vlgmr.msra.gmra.mrb[58].mxu0 %vm374_vm3, %v7754_v60 }
0x36dc   :  { %11352 = vmatpush3.bf16.msra.mxu0 %v11349_v17  ;;  %10885 = vmatprep.mubr.msk.f32.mxu0 %vm374_vm3, %v7868_v53 }
0x36dd   :  { %11354 = vmatprep.subr.bf16.mxu0 %v11353_v14 }
0x36e3   :  { %10886 = vmatmul.mubr.msk.f32.vlgmr.msra.gmra.mrb[58].mxu0 %vm374_vm3, %v7885_v30 }
0x36e4   :  { %11356 = vmatpush3.bf16.msra.mxu0 %v11353_v14  ;;  %10892 = vmatprep.mubr.msk.f32.mxu0 %vm374_vm3, %v7999_v12 }
0x36eb   :  { %10893 = vmatmul.mubr.msk.f32.vlgmr.msra.gmra.mrb[58].mxu0 %vm374_vm3, %v8016_v2  ;;  %v11365_v2 = vpack.c.bf16 %v8159_v57, %v8158_v35 }
0x37be   :  { %v10894_v61 = vpop.f32.mrb[58].mxu0 }
0x37bf   :  { %v8099_v25 = vmul.f32 0.999995, %v10894_v61  ;;  %v8087_v19 = vpop.f32.mrb[59].mxu0 }
0x37c0   :  { %v8098_v17 = vmul.f32 0.999995, %v8087_v19 }
0x37c1   :  { %11658 = vtanh.f32 %v8099_v25 }
0x37c2   :  { %11660 = vtanh.f32 %v8098_v17 }
0x37cb   :  { %v11659_v39 = vpop.eup %11658 }
0x37cc   :  { %v11661_v47 = vpop.eup %11660  ;;  %v8121_v41 = vcombine.high %v11659_v39, %v11659_v39  ;;  %v8128_v3 = vrot.slane %v11659_v39, %v13302_v27 }
0x37cd   :  { %v8104_v49 = vcombine.high %v11661_v47, %v11661_v47  ;;  %v8111_v54 = vrot.slane %v11661_v47, %v13302_v27 }
0x37ce   :  { %v8135_v63 = vrot.slane %v8121_v41, %v13302_v27  ;;  %v8136_v18 = vcombine.high %v8128_v3, %v8128_v3  ;;  %8150 = vst.msk [vmem:[#allocation3 + $0xc] sm:$0x3] %vm5979_vm8, %v8128_v3  ;;  %v8160_v41 = vld [vmem:[%s13803_s21 + $0x30] sm:$0xff]  ;;  %v8161_v3 = vld [vmem:[%s13803_s21 + $0x38] sm:$0xff] }
0x37cf   :  { %v8118_v36 = vrot.slane %v8104_v49, %v13302_v27  ;;  %v8119_v21 = vcombine.high %v8111_v54, %v8111_v54  ;;  %8146 = vst.msk [vmem:[#allocation3 + $0x4] sm:$0x3] %vm5979_vm8, %v8111_v54 }
0x37d0   :  { %v8137_v9 = vcombine.high %v8135_v63, %v8135_v63  ;;  %8151 = vst.msk [vmem:[#allocation3 + $0xe] sm:$0x3] %vm5979_vm8, %v8136_v18  ;;  %8152 = vst.msk [vmem:[#allocation3 + $0x10] sm:$0x3] %vm5979_vm8, %v8135_v63 }
0x37d1   :  { %v8120_v55 = vcombine.high %v8118_v36, %v8118_v36  ;;  %8147 = vst.msk [vmem:[#allocation3 + $0x6] sm:$0x3] %vm5979_vm8, %v8119_v21  ;;  %8148 = vst.msk [vmem:[#allocation3 + $0x8] sm:$0x3] %vm5979_vm8, %v8118_v36 }
0x37d2   :  { %8153 = vst.msk [vmem:[#allocation3 + $0x12] sm:$0x3] %vm5979_vm8, %v8137_v9  ;;  %v11369_v9 = vpack.c.bf16 %v8161_v3, %v8160_v41  ;;  %v8873_v41 = vld [vmem:[%s13804_s22 + $0x10] sm:$0xff]  ;;  %v8874_v3 = vld [vmem:[%s13804_s22 + $0x18] sm:$0xff] }
0x37d3   :  { %8149 = vst.msk [vmem:[#allocation3 + $0xa] sm:$0x3] %vm5979_vm8, %v8120_v55 }
0x37d5   :  { %v8177_v34 = vld [vmem:[#allocation3 + $0xc] sm:$0x3] }
0x37d6   :  { %v8173_v10 = vld [vmem:[#allocation3 + $0x4] sm:$0x3]  ;;  %v8170_v62 = vld [vmem:[#allocation3 + $0xc] sm:$0x3] }
0x37d7   :  { %v8188_v31 = vcombine.low %v8172_v0, %v8173_v10  ;;  %v8178_v29 = vld [vmem:[#allocation3 + $0xe] sm:$0x3]  ;;  %v8179_v15 = vld [vmem:[#allocation3 + $0x10] sm:$0x3]  ;;  %v8166_v33 = vld [vmem:[#allocation3 + $0x4] sm:$0x3] }
0x37d8   :  { %v8174_v60 = vld [vmem:[#allocation3 + $0x6] sm:$0x3]  ;;  %v8175_v14 = vld [vmem:[#allocation3 + $0x8] sm:$0x3]  ;;  %v8206_v53 = vcombine.low %v8178_v29, %v8179_v15  ;;  %v8171_v38 = vld [vmem:[#allocation3 + $0xe] sm:$0x3] }
0x37d9   :  { %v8167_v22 = vld [vmem:[#allocation3 + $0x6] sm:$0x3]  ;;  %v8189_v24 = vcombine.low %v8174_v60, %v8175_v14  ;;  %v8196_v8 = vrot.slane %v8188_v31, %v13302_v27  ;;  %v8168_v12 = vld [vmem:[#allocation3 + $0x8] sm:$0x3]  ;;  %v8327_v25 = vcombine.low %v8170_v62, %v8171_v38  ;;  %v8422_v19 = vld [vmem:[#allocation3 + $0x4] sm:$0x3] }
0x37da   :  { %v8310_v56 = vcombine.low %v8166_v33, %v8167_v22  ;;  %v8176_v51 = vld [vmem:[#allocation3 + $0xa] sm:$0x3]  ;;  %v8220_v59 = vrot.slane %v8206_v53, %v13302_v27  ;;  %v8423_v45 = vld [vmem:[#allocation3 + $0x6] sm:$0x3]  ;;  %v8424_v13 = vld [vmem:[#allocation3 + $0x8] sm:$0x3] }
0x37db   :  { %v8203_v20 = vrot.slane %v8189_v24, %v13302_v27  ;;  %v8205_v11 = vcombine.low %v8176_v51, %v8177_v34  ;;  %v8169_v58 = vld [vmem:[#allocation3 + $0xa] sm:$0x3]  ;;  %v8438_v17 = vcombine.low %v8422_v19, %v8423_v45  ;;  %v8429_v49 = vld [vmem:[#allocation3 + $0x12] sm:$0x3]  ;;  %v8341_v54 = vrot.slane %v8327_v25, %v13302_v27  ;;  %v8427_v18 = vld [vmem:[#allocation3 + $0xe] sm:$0x3] }
0x37dc   :  { %v8324_v7 = vrot.slane %v8310_v56, %v13302_v27  ;;  %v8425_v48 = vld [vmem:[#allocation3 + $0xa] sm:$0x3]  ;;  %v8326_v46 = vcombine.low %v8168_v12, %v8169_v58  ;;  %v8428_v36 = vld [vmem:[#allocation3 + $0x10] sm:$0x3]  ;;  %v8553_v0 = vld [vmem:[#allocation3 + $0x6] sm:$0x3] }
0x37dd   :  { %v8204_v1 = vcombine.low %v8196_v8, %v8203_v20  ;;  %v8213_v30 = vrot.slane %v8205_v11, %v13302_v27  ;;  %v8439_v61 = vcombine.low %v8424_v13, %v8425_v48  ;;  %v8446_v63 = vrot.slane %v8438_v17, %v13302_v27  ;;  %v8554_v43 = vld [vmem:[#allocation3 + $0x8] sm:$0x3]  ;;  %v8556_v26 = vld [vmem:[#allocation3 + $0xc] sm:$0x3]  ;;  %v8560_v14 = vld [vmem:[#allocation3 + $0x14] sm:$0x3] }
0x37de   :  { %v8325_v50 = vcombine.low %v8317_v16, %v8324_v7  ;;  %v8334_v39 = vrot.slane %v8326_v46, %v13302_v27  ;;  %v8456_v55 = vcombine.low %v8428_v36, %v8429_v49  ;;  %v8426_v31 = vld [vmem:[#allocation3 + $0xc] sm:$0x3]  ;;  %v8569_v33 = vcombine.low %v8553_v0, %v8554_v43  ;;  %v8163_v24 = vld [vmem:[%s13803_s21 + $0x48] sm:$0xff]  ;;  %v8685_v51 = vld [vmem:[#allocation3 + $0xa] sm:$0x3] }
0x37df   :  { %10899 = vmatprep.mubr.msk.f32.mxu1 %vm374_vm3, %v8204_v1  ;;  %v8221_v6 = vcombine.low %v8213_v30, %v8220_v59  ;;  %v8453_v47 = vrot.slane %v8439_v61, %v13302_v27  ;;  %v8455_v15 = vcombine.low %v8426_v31, %v8427_v18  ;;  %v8559_v53 = vld [vmem:[#allocation3 + $0x12] sm:$0x3]  ;;  %v8557_v8 = vld [vmem:[#allocation3 + $0xe] sm:$0x3]  ;;  %v8558_v20 = vld [vmem:[#allocation3 + $0x10] sm:$0x3]  ;;  %v11373_v16 = vpack.c.bf16 %v8163_v24, %v8162_v42 }
0x37e0   :  { %v8342_v21 = vcombine.low %v8334_v39, %v8341_v54  ;;  %v8470_v60 = vrot.slane %v8456_v55, %v13302_v27  ;;  %v8577_v34 = vrot.slane %v8569_v33, %v13302_v27  ;;  %v8587_v7 = vcombine.low %v8559_v53, %v8560_v14  ;;  %v8684_v35 = vld [vmem:[#allocation3 + $0x8] sm:$0x3]  ;;  %v8687_v57 = vld [vmem:[#allocation3 + $0xe] sm:$0x3]  ;;  %v8686_v59 = vld [vmem:[#allocation3 + $0xc] sm:$0x3] }
0x37e1   :  { %10900 = vmatmul.mubr.msk.f32.vlgmr.msra.gmra.mrb[66].mxu1 %vm374_vm3, %v8221_v6  ;;  %v8454_v10 = vcombine.low %v8446_v63, %v8453_v47  ;;  %v8463_v56 = vrot.slane %v8455_v15, %v13302_v27  ;;  %v8700_v1 = vcombine.low %v8684_v35, %v8685_v51  ;;  %v8586_v30 = vcombine.low %v8557_v8, %v8558_v20  ;;  %v8689_v6 = vld [vmem:[#allocation3 + $0x12] sm:$0x3]  ;;  %v8691_v46 = vld [vmem:[#allocation3 + $0x16] sm:$0x3]  ;;  %v8871_v54 = vld [vmem:[%s13804_s22] sm:$0xff] }
0x37e2   :  { %11364 = vmatpush3.bf16.msra.mxu1 %v13592_v37  ;;  %10906 = vmatprep.mubr.msk.f32.mxu1 %vm374_vm3, %v8325_v50  ;;  %v8555_v37 = vld [vmem:[#allocation3 + $0xa] sm:$0x3]  ;;  %v8701_v48 = vcombine.low %v8686_v59, %v8687_v57  ;;  %v8601_v12 = vrot.slane %v8587_v7, %v13302_v27  ;;  %v8688_v50 = vld [vmem:[#allocation3 + $0x10] sm:$0x3]  ;;  %v11377_v49 = vpack.c.bf16 %v8874_v3, %v8873_v41  ;;  %v8889_v42 = vld [vmem:[#allocation3 + $0x2] sm:$0x3] }
0x37e3   :  { %11366 = vmatprep.subr.bf16.mxu1 %v11365_v2  ;;  %v8570_v29 = vcombine.low %v8555_v37, %v8556_v26  ;;  %v8471_v11 = vcombine.low %v8463_v56, %v8470_v60  ;;  %v8708_v38 = vrot.slane %v8700_v1, %v13302_v27  ;;  %v8594_v45 = vrot.slane %v8586_v30, %v13302_v27  ;;  %v8872_v37 = vld [vmem:[%s13804_s22 + $0x8] sm:$0xff]  ;;  %v8881_v24 = vld [vmem:[#allocation3] sm:$0x3]  ;;  %v8882_v53 = vld [vmem:[#allocation3 + $0x2] sm:$0x3] }
0x37e4   :  { %v8715_v13 = vrot.slane %v8701_v48, %v13302_v27  ;;  %v8717_v61 = vcombine.low %v8688_v50, %v8689_v6  ;;  %11378 = vmatprep.subr.bf16.mxu0 %v11377_v49  ;;  %v13668_v63 = vpack.c.bf16 %v8872_v37, %v8871_v54  ;;  %v9026_v35 = vcombine.low %v8881_v24, %v8882_v53 }
0x37e5   :  { %v8584_v22 = vrot.slane %v8570_v29, %v13302_v27  ;;  %v8602_v62 = vcombine.low %v8594_v45, %v8601_v12  ;;  %11380 = vmatpush3.bf16.msra.mxu0 %v11377_v49  ;;  %v8876_v45 = vld [vmem:[%s13804_s22 + $0x28] sm:$0xff] }
0x37e6   :  { %v8716_v19 = vcombine.low %v8708_v38, %v8715_v13  ;;  %v8725_v17 = vrot.slane %v8717_v61, %v13302_v27  ;;  %11382 = vmatprep.subr.bf16.mxu0 %v13668_v63  ;;  %v9034_v6 = vrot.slane %v9026_v35, %v13302_v27  ;;  %v8879_v35 = vld [vmem:[%s13804_s22 + $0x40] sm:$0xff] }
0x37e7   :  { %v8585_v58 = vcombine.low %v8577_v34, %v8584_v22 }
0x37e9   :  { %10907 = vmatmul.mubr.msk.f32.vlgmr.msra.gmra.mrb[66].mxu1 %vm374_vm3, %v8342_v21 }
0x37ea   :  { %11368 = vmatpush3.bf16.msra.mxu1 %v11365_v2  ;;  %10913 = vmatprep.mubr.msk.f32.mxu1 %vm374_vm3, %v8454_v10  ;;  %v8690_v2 = vld [vmem:[#allocation3 + $0x14] sm:$0x3] }
0x37eb   :  { %11370 = vmatprep.subr.bf16.mxu1 %v11369_v9  ;;  %v8718_v25 = vcombine.low %v8690_v2, %v8691_v46  ;;  %v8875_v46 = vld [vmem:[%s13804_s22 + $0x20] sm:$0xff] }
0x37ed   :  { %v8732_v39 = vrot.slane %v8718_v25, %v13302_v27 }
0x37ef   :  { %v8733_v47 = vcombine.low %v8725_v17, %v8732_v39 }
0x37f1   :  { %10914 = vmatmul.mubr.msk.f32.vlgmr.msra.gmra.mrb[66].mxu1 %vm374_vm3, %v8471_v11 }
0x37f2   :  { %11372 = vmatpush3.bf16.msra.mxu1 %v11369_v9  ;;  %10920 = vmatprep.mubr.msk.f32.mxu1 %vm374_vm3, %v8585_v58 }
0x37f3   :  { %11374 = vmatprep.subr.bf16.mxu1 %v11373_v16 }
0x37f9   :  { %10921 = vmatmul.mubr.msk.f32.vlgmr.msra.gmra.mrb[66].mxu1 %vm374_vm3, %v8602_v62 }
0x37fa   :  { %11376 = vmatpush3.bf16.msra.mxu1 %v11373_v16  ;;  %10927 = vmatprep.mubr.msk.f32.mxu1 %vm374_vm3, %v8716_v19 }
0x3801   :  { %10928 = vmatmul.mubr.msk.f32.vlgmr.msra.gmra.mrb[66].mxu1 %vm374_vm3, %v8733_v47  ;;  %v11385_v47 = vpack.c.bf16 %v8876_v45, %v8875_v46 }
0x38d4   :  { %v10929_v18 = vpop.f32.mrb[66].mxu1 }
0x38d5   :  { %v8816_v36 = vmul.f32 0.999995, %v10929_v18  ;;  %v8804_v21 = vpop.f32.mrb[67].mxu1 }
0x38d6   :  { %v8815_v9 = vmul.f32 0.999995, %v8804_v21 }
0x38d7   :  { %11662 = vtanh.f32 %v8816_v36 }
0x38d8   :  { %11664 = vtanh.f32 %v8815_v9 }
0x38e1   :  { %v11663_v55 = vpop.eup %11662 }
0x38e2   :  { %v11665_v0 = vpop.eup %11664  ;;  %v8838_v43 = vcombine.high %v11663_v55, %v11663_v55  ;;  %v8845_v26 = vrot.slane %v11663_v55, %v13302_v27 }
0x38e3   :  { %v8821_v10 = vcombine.high %v11665_v0, %v11665_v0  ;;  %v8828_v31 = vrot.slane %v11665_v0, %v13302_v27 }
0x38e4   :  { %v8852_v29 = vrot.slane %v8838_v43, %v13302_v27  ;;  %v8853_v15 = vcombine.high %v8845_v26, %v8845_v26  ;;  %8867 = vst.msk [vmem:[#allocation3 + $0xc] sm:$0x3] %vm5979_vm8, %v8845_v26  ;;  %v8877_v43 = vld [vmem:[%s13804_s22 + $0x30] sm:$0xff]  ;;  %v8878_v26 = vld [vmem:[%s13804_s22 + $0x38] sm:$0xff] }
0x38e5   :  { %v8835_v33 = vrot.slane %v8821_v10, %v13302_v27  ;;  %v8836_v60 = vcombine.high %v8828_v31, %v8828_v31  ;;  %8863 = vst.msk [vmem:[#allocation3 + $0x4] sm:$0x3] %vm5979_vm8, %v8828_v31 }
0x38e6   :  { %v8854_v14 = vcombine.high %v8852_v29, %v8852_v29  ;;  %8868 = vst.msk [vmem:[#allocation3 + $0xe] sm:$0x3] %vm5979_vm8, %v8853_v15  ;;  %8869 = vst.msk [vmem:[#allocation3 + $0x10] sm:$0x3] %vm5979_vm8, %v8852_v29 }
0x38e7   :  { %v8837_v22 = vcombine.high %v8835_v33, %v8835_v33  ;;  %8864 = vst.msk [vmem:[#allocation3 + $0x6] sm:$0x3] %vm5979_vm8, %v8836_v60  ;;  %8865 = vst.msk [vmem:[#allocation3 + $0x8] sm:$0x3] %vm5979_vm8, %v8835_v33 }
0x38e8   :  { %8870 = vst.msk [vmem:[#allocation3 + $0x12] sm:$0x3] %vm5979_vm8, %v8854_v14  ;;  %v11389_v14 = vpack.c.bf16 %v8878_v26, %v8877_v43 }
0x38e9   :  { %8866 = vst.msk [vmem:[#allocation3 + $0xa] sm:$0x3] %vm5979_vm8, %v8837_v22 }
0x38eb   :  { %v8894_v59 = vld [vmem:[#allocation3 + $0xc] sm:$0x3] }
0x38ec   :  { %v8890_v56 = vld [vmem:[#allocation3 + $0x4] sm:$0x3]  ;;  %v8887_v37 = vld [vmem:[#allocation3 + $0xc] sm:$0x3] }
0x38ed   :  { %v8905_v51 = vcombine.low %v8889_v42, %v8890_v56  ;;  %v8895_v34 = vld [vmem:[#allocation3 + $0xe] sm:$0x3]  ;;  %v8896_v8 = vld [vmem:[#allocation3 + $0x10] sm:$0x3]  ;;  %v8883_v20 = vld [vmem:[#allocation3 + $0x4] sm:$0x3] }
0x38ee   :  { %v8891_v11 = vld [vmem:[#allocation3 + $0x6] sm:$0x3]  ;;  %v8892_v16 = vld [vmem:[#allocation3 + $0x8] sm:$0x3]  ;;  %v8923_v58 = vcombine.low %v8895_v34, %v8896_v8  ;;  %v8888_v17 = vld [vmem:[#allocation3 + $0xe] sm:$0x3] }
0x38ef   :  { %v8884_v7 = vld [vmem:[#allocation3 + $0x6] sm:$0x3]  ;;  %v8906_v57 = vcombine.low %v8891_v11, %v8892_v16  ;;  %v8913_v48 = vrot.slane %v8905_v51, %v13302_v27  ;;  %v8885_v19 = vld [vmem:[#allocation3 + $0x8] sm:$0x3]  ;;  %v9044_v36 = vcombine.low %v8887_v37, %v8888_v17  ;;  %v9139_v21 = vld [vmem:[#allocation3 + $0x4] sm:$0x3] }
0x38f0   :  { %v9027_v1 = vcombine.low %v8883_v20, %v8884_v7  ;;  %v8893_v30 = vld [vmem:[#allocation3 + $0xa] sm:$0x3]  ;;  %v8937_v61 = vrot.slane %v8923_v58, %v13302_v27  ;;  %v9140_v3 = vld [vmem:[#allocation3 + $0x6] sm:$0x3]  ;;  %v9141_v49 = vld [vmem:[#allocation3 + $0x8] sm:$0x3] }
0x38f1   :  { %v8920_v12 = vrot.slane %v8906_v57, %v13302_v27  ;;  %v8922_v38 = vcombine.low %v8893_v30, %v8894_v59  ;;  %v8886_v13 = vld [vmem:[#allocation3 + $0xa] sm:$0x3]  ;;  %v9155_v9 = vcombine.low %v9139_v21, %v9140_v3  ;;  %v9146_v10 = vld [vmem:[#allocation3 + $0x12] sm:$0x3]  ;;  %v9058_v31 = vrot.slane %v9044_v36, %v13302_v27  ;;  %v9144_v15 = vld [vmem:[#allocation3 + $0xe] sm:$0x3] }
0x38f2   :  { %v9041_v2 = vrot.slane %v9027_v1, %v13302_v27  ;;  %v9142_v25 = vld [vmem:[#allocation3 + $0xa] sm:$0x3]  ;;  %v9043_v41 = vcombine.low %v8885_v19, %v8886_v13  ;;  %v9145_v33 = vld [vmem:[#allocation3 + $0x10] sm:$0x3]  ;;  %v9270_v42 = vld [vmem:[#allocation3 + $0x6] sm:$0x3] }
0x38f3   :  { %v8921_v50 = vcombine.low %v8913_v48, %v8920_v12  ;;  %v8930_v62 = vrot.slane %v8922_v38, %v13302_v27  ;;  %v9156_v18 = vcombine.low %v9141_v49, %v9142_v25  ;;  %v9163_v29 = vrot.slane %v9155_v9, %v13302_v27  ;;  %v9271_v24 = vld [vmem:[#allocation3 + $0x8] sm:$0x3]  ;;  %v9273_v53 = vld [vmem:[#allocation3 + $0xc] sm:$0x3]  ;;  %v9277_v16 = vld [vmem:[#allocation3 + $0x14] sm:$0x3] }
0x38f4   :  { %v9042_v54 = vcombine.low %v9034_v6, %v9041_v2  ;;  %v9051_v55 = vrot.slane %v9043_v41, %v13302_v27  ;;  %v9173_v22 = vcombine.low %v9145_v33, %v9146_v10  ;;  %v9143_v51 = vld [vmem:[#allocation3 + $0xc] sm:$0x3]  ;;  %v9286_v20 = vcombine.low %v9270_v42, %v9271_v24  ;;  %v8880_v57 = vld [vmem:[%s13804_s22 + $0x48] sm:$0xff]  ;;  %v9402_v30 = vld [vmem:[#allocation3 + $0xa] sm:$0x3]  ;;  %s11950_s22 = smov [#allocation19]  }
0x38f5   :  { %10934 = vmatprep.mubr.msk.f32.mxu0 %vm374_vm3, %v8921_v50  ;;  %v8938_v39 = vcombine.low %v8930_v62, %v8937_v61  ;;  %v9170_v0 = vrot.slane %v9156_v18, %v13302_v27  ;;  %v9172_v8 = vcombine.low %v9143_v51, %v9144_v15  ;;  %v9276_v58 = vld [vmem:[#allocation3 + $0x12] sm:$0x3]  ;;  %v9274_v48 = vld [vmem:[#allocation3 + $0xe] sm:$0x3]  ;;  %v9275_v12 = vld [vmem:[#allocation3 + $0x10] sm:$0x3]  ;;  %v11393_v6 = vpack.c.bf16 %v8880_v57, %v8879_v35 }
0x38f6   :  { %v9059_v60 = vcombine.low %v9051_v55, %v9058_v31  ;;  %v9187_v11 = vrot.slane %v9173_v22, %v13302_v27  ;;  %v9294_v59 = vrot.slane %v9286_v20, %v13302_v27  ;;  %v9304_v2 = vcombine.low %v9276_v58, %v9277_v16  ;;  %v9401_v46 = vld [vmem:[#allocation3 + $0x8] sm:$0x3]  ;;  %v9404_v45 = vld [vmem:[#allocation3 + $0xe] sm:$0x3]  ;;  %v9403_v61 = vld [vmem:[#allocation3 + $0xc] sm:$0x3] }
0x38f7   :  { %10935 = vmatmul.mubr.msk.f32.vlgmr.msra.gmra.mrb[60].mxu0 %vm374_vm3, %v8938_v39  ;;  %v9171_v56 = vcombine.low %v9163_v29, %v9170_v0  ;;  %v9180_v1 = vrot.slane %v9172_v8, %v13302_v27  ;;  %v9417_v50 = vcombine.low %v9401_v46, %v9402_v30  ;;  %v9303_v62 = vcombine.low %v9274_v48, %v9275_v12  ;;  %v9406_v39 = vld [vmem:[#allocation3 + $0x12] sm:$0x3]  ;;  %v9408_v41 = vld [vmem:[#allocation3 + $0x16] sm:$0x3]  ;;  %s9599_s3 = sshll.u32 %s11950_s22, 4  ;;  %s9600_s3 = int_to_ptr.vmem [resolvable:$true] %s9599_s3 }
0x38f8   :  { %11384 = vmatpush3.bf16.msra.mxu0 %v13668_v63  ;;  %10941 = vmatprep.mubr.msk.f32.mxu0 %vm374_vm3, %v9042_v54  ;;  %v9272_v63 = vld [vmem:[#allocation3 + $0xa] sm:$0x3]  ;;  %v9418_v25 = vcombine.low %v9403_v61, %v9404_v45  ;;  %v9318_v19 = vrot.slane %v9304_v2, %v13302_v27  ;;  %v9405_v54 = vld [vmem:[#allocation3 + $0x10] sm:$0x3]  ;;  %s11874_s18 = scalar_lea.vmem %s9600_s3, 256  ;;  %p11879_p3 = scmp.lt.s32.totalorder %s9600_s3, %s9600_s3 }
0x38f9   :  { %11386 = vmatprep.subr.bf16.mxu0 %v11385_v47  ;;  %v9287_v34 = vcombine.low %v9272_v63, %v9273_v53  ;;  %v9188_v38 = vcombine.low %v9180_v1, %v9187_v11  ;;  %v9425_v17 = vrot.slane %v9417_v50, %v13302_v27  ;;  %v9311_v3 = vrot.slane %v9303_v62, %v13302_v27  ;;  %p11875_p2 = scmp.ne.s32.totalorder %s9600_s3, %s11874_s18  ;;  %p11880_p4 = scmp.lt.s32.totalorder %s11874_s18, %s11874_s18 }
0x38fa   :  { %v9432_v49 = vrot.slane %v9418_v25, %v13302_v27  ;;  %v9434_v18 = vcombine.low %v9405_v54, %v9406_v39 }
0x38fb   :  { %v9301_v7 = vrot.slane %v9287_v34, %v13302_v27  ;;  %v9319_v37 = vcombine.low %v9311_v3, %v9318_v19  ;;  %p11881_p5 = por %p11880_p4, %p11879_p3 }
0x38fc   :  { %v9433_v21 = vcombine.low %v9425_v17, %v9432_v49  ;;  %v9442_v9 = vrot.slane %v9434_v18, %v13302_v27 }
0x38fd   :  { %v9302_v13 = vcombine.low %v9294_v59, %v9301_v7  ;;  %p11882_p6 = pnand %p11881_p5, %p11875_p2 }
0x38ff   :  { %10942 = vmatmul.mubr.msk.f32.vlgmr.msra.gmra.mrb[60].mxu0 %vm374_vm3, %v9059_v60 }
0x3900   :  { %11388 = vmatpush3.bf16.msra.mxu0 %v11385_v47  ;;  %10948 = vmatprep.mubr.msk.f32.mxu0 %vm374_vm3, %v9171_v56  ;;  %v9407_v47 = vld [vmem:[#allocation3 + $0x14] sm:$0x3] }
0x3901   :  { %11390 = vmatprep.subr.bf16.mxu0 %v11389_v14  ;;  %v9435_v36 = vcombine.low %v9407_v47, %v9408_v41 }
0x3903   :  { %v9449_v55 = vrot.slane %v9435_v36, %v13302_v27 }
0x3905   :  { %v9450_v0 = vcombine.low %v9442_v9, %v9449_v55 }
0x3907   :  { %10949 = vmatmul.mubr.msk.f32.vlgmr.msra.gmra.mrb[60].mxu0 %vm374_vm3, %v9188_v38 }
0x3908   :  { %11392 = vmatpush3.bf16.msra.mxu0 %v11389_v14  ;;  %10955 = vmatprep.mubr.msk.f32.mxu0 %vm374_vm3, %v9302_v13 }
0x3909   :  { %11394 = vmatprep.subr.bf16.mxu0 %v11393_v6 }
0x390f   :  { %10956 = vmatmul.mubr.msk.f32.vlgmr.msra.gmra.mrb[60].mxu0 %vm374_vm3, %v9319_v37 }
0x3910   :  { %11396 = vmatpush3.bf16.msra.mxu0 %v11393_v6  ;;  %10962 = vmatprep.mubr.msk.f32.mxu0 %vm374_vm3, %v9433_v21 }
0x3917   :  { %10963 = vmatmul.mubr.msk.f32.vlgmr.msra.gmra.mrb[60].mxu0 %vm374_vm3, %v9450_v0 }
0x3918   :  { %11885 = shalt.err (!%p11882_p6)
}
0x3919   :  { %s11886_s4 = scalar_lea.hbm %s13805_s23, 256 }
0x391a   :  { %p11887_p7 = scmp.ne.s32.totalorder %s13805_s23, %s11886_s4  ;;  %p11890_p8 = scmp.lt.u32.totalorder %s11886_s4, %s13805_s23 }
0x391c   :  { %p11892_p9 = pnand %p11890_p8, %p11887_p7 }
0x391e   :  { %11895 = shalt.err (!%p11892_p9)
}
0x391f   :  { %s11951_s11 = smov 2  }
0x3920   :  { %9605 = dma.vmem_to_hbm [thread:$0]  %s9600_s3, 256, %s13805_s23, [#allocation6], %s11948_s16, %s11948_s16, %s11951_s11  }
0x3921   :  { %s11952_s23 = smov [#allocation20]  }
0x3922   :  { %s9611_s13 = sshll.u32 %s11952_s23, 4  ;;  %s9612_s13 = int_to_ptr.vmem [resolvable:$true] %s9611_s13 }
0x3923   :  { %s11896_s25 = scalar_lea.vmem %s9612_s13, 256  ;;  %p11901_p11 = scmp.lt.s32.totalorder %s9612_s13, %s9612_s13 }
0x3924   :  { %p11897_p10 = scmp.ne.s32.totalorder %s9612_s13, %s11896_s25  ;;  %p11902_p12 = scmp.lt.s32.totalorder %s11896_s25, %s11896_s25 }
0x3926   :  { %p11903_p13 = por %p11902_p12, %p11901_p11 }
0x3928   :  { %p11904_p0 = pnand %p11903_p13, %p11897_p10 }
0x39ea   :  { %v10964_v43 = vpop.f32.mrb[60].mxu0 }
0x39eb   :  { %v9533_v26 = vmul.f32 0.999995, %v10964_v43  ;;  %v9521_v10 = vpop.f32.mrb[61].mxu0 }
0x39ec   :  { %v9532_v31 = vmul.f32 0.999995, %v9521_v10 }
0x39ed   :  { %v9553_v63 = vcombine.high %v9533_v26, %v9533_v26  ;;  %v9560_v29 = vrot.slane %v9533_v26, %v13302_v27 }
0x39ee   :  { %v9536_v15 = vcombine.high %v9532_v31, %v9532_v31  ;;  %v9543_v33 = vrot.slane %v9532_v31, %v13302_v27 }
0x39ef   :  { %v9567_v60 = vrot.slane %v9553_v63, %v13302_v27  ;;  %v9568_v14 = vcombine.high %v9560_v29, %v9560_v29  ;;  %v9582_v22 = vadd.f32 %v9560_v29, %v13061_v40 }
0x39f0   :  { %v9550_v42 = vrot.slane %v9536_v15, %v13302_v27  ;;  %v9551_v24 = vcombine.high %v9543_v33, %v9543_v33  ;;  %v9578_v53 = vadd.f32 %v9543_v33, %v12556_v52 }
0x39f1   :  { %v9569_v56 = vcombine.high %v9567_v60, %v9567_v60  ;;  %v9583_v51 = vadd.f32 %v9568_v14, %v13192_v5  ;;  %v9584_v34 = vadd.f32 %v9567_v60, %v13329_v28  ;;  %9590 = vst.msk [vmem:[#allocation20 + $0x8] sm:$0x3] %vm718_vm4, %v9582_v22 }
0x39f2   :  { %v9552_v8 = vcombine.high %v9550_v42, %v9550_v42  ;;  %v9579_v20 = vadd.f32 %v9551_v24, %v12676_v44  ;;  %v9580_v11 = vadd.f32 %v9550_v42, %v12807_v4  ;;  %9586 = vst.msk [vmem:[#allocation20] sm:$0x3] %vm718_vm4, %v9578_v53 }
0x39f3   :  { %v9585_v40 = vadd.f32 %v9569_v56, %v13406_v23  ;;  %9591 = vst.msk [vmem:[#allocation20 + $0xa] sm:$0x3] %vm718_vm4, %v9583_v51  ;;  %9592 = vst.msk [vmem:[#allocation20 + $0xc] sm:$0x3] %vm718_vm4, %v9584_v34 }
0x39f4   :  { %v9581_v52 = vadd.f32 %v9552_v8, %v12939_v32  ;;  %9587 = vst.msk [vmem:[#allocation20 + $0x2] sm:$0x3] %vm718_vm4, %v9579_v20  ;;  %9588 = vst.msk [vmem:[#allocation20 + $0x4] sm:$0x3] %vm718_vm4, %v9580_v11 }
0x39f5   :  { %9593 = vst.msk [vmem:[#allocation20 + $0xe] sm:$0x3] %vm718_vm4, %v9585_v40 }
0x39f6   :  { %9589 = vst.msk [vmem:[#allocation20 + $0x6] sm:$0x3] %vm718_vm4, %v9581_v52 }
0x39f7   :  { %11907 = shalt.err (!%p11904_p0)
}
0x39f8   :  { %s13836_s20 = sld [smem:[#allocation38_spill]] }
0x39fe   :  { %s11908_s12 = scalar_lea.hbm %s13836_s20, 256 }
0x39ff   :  { %p11909_p1 = scmp.ne.s32.totalorder %s13836_s20, %s11908_s12  ;;  %p11912_p2 = scmp.lt.u32.totalorder %s11908_s12, %s13836_s20 }
0x3a01   :  { %p11914_p3 = pnand %p11912_p2, %p11909_p1 }
0x3a03   :  { %11917 = shalt.err (!%p11914_p3)
}
0x3a04   :  { %9617 = dma.vmem_to_hbm [thread:$0]  %s9612_s13, 256, %s13836_s20, [#allocation21], %s11948_s16, %s11948_s16, %s11951_s11  }
0x3a05   :  { %11928 = dma.done.wait [#allocation6], 256  }
0x3a06   :  { %11929 = vsyncadd [#allocation6], 4294967040 }
0x3a07   :  { %11930 = dma.done.wait [#allocation21], 256  }
0x3a08   :  { %11931 = vsyncadd [#allocation21], 4294967040 }
0x3a09   :  { %9624 = vsyncpa [#allocation5], 1 }
0x3a0a   :  { %9625 = vsyncpa [#allocation8], 1 }
0x3a0b   :  { %9626 = vsyncpa [#allocation11], 1 }
0x3a0c   :  { %9627 = vsyncpa [#allocation14], 1 }
0x3a0d   :  { %9628 = vsyncpa [#allocation17], 1 }
0x3a0e   :  { %9629 = vsyncpa [#allocation6], 1 }
0x3a0f   :  { %9630 = vsyncpa [#allocation21], 1 }

</bundles_post_ra>
